<compile_context>
chip_gen: v7x
topology: tpu7x:2x2x1
jax: 0.10.0
libtpu: 0.0.40
codegen_flags: <defaults>
</compile_context>

<pallas_src>
import functools

import jax
import jax.numpy as jnp
from jax import lax
from jax.experimental import pallas as pl
from jax.experimental.pallas import tpu as pltpu


# -----------------------------------------------------------------------------
# Fused kernel: conv1 + ReLU + conv2 + ReLU + flatten + FC, all VMEM-resident.
# -----------------------------------------------------------------------------
def fused_cnn_kernel(col1_ref, w1_ref, b1_ref, w2_ref, b2_ref, wf_ref, bf_ref,
                     out_ref, a1pad_ref, flat_ref):
    """
    col1_ref : (N*H*W, 9*C0)   conv1 im2col patches (rows ordered n,h,w)
    w1_ref   : (9*C0, C1)      conv1 weight, rows ordered (kh, kw, ci)
    b1_ref   : (1, C1)
    w2_ref   : (9*C1, C2)      conv2 weight, rows ordered (kh, kw, ci)
    b2_ref   : (1, C2)
    wf_ref   : (H*W*C2, Opad)  fc weight permuted to the (hw, c) flatten order
    bf_ref   : (1, Opad)
    out_ref  : (N, Opad)
    a1pad_ref: (N, H+2, W+2, C1) VMEM scratch (halo-padded conv1 activation)
    flat_ref : (N, H*W*C2)       VMEM scratch (flattened conv2 activation)
    """
    N, Hp, Wp, C1 = a1pad_ref.shape
    H, W = Hp - 2, Wp - 2
    HW = H * W
    NHW = N * HW
    C2 = w2_ref.shape[1]

    # ---- conv1 (3x3, pad=1) + bias + ReLU: one K = 9*Cin im2col matmul ----
    a1 = jnp.dot(col1_ref[...], w1_ref[...], preferred_element_type=jnp.float32)
    a1 = jnp.maximum(a1 + b1_ref[...], 0.0)                      # (N*H*W, C1)

    # ---- halo-pad the conv1 activation in a VMEM scratch ----
    a1pad_ref[...] = jnp.zeros_like(a1pad_ref)
    a1pad_ref[:, 1:H + 1, 1:W + 1, :] = a1.reshape(N, H, W, C1)

    # ---- conv2 (3x3, pad=1) + bias + ReLU: 9 shifted K=C1 matmuls,
    #      batch folded into the row dim (M = N*H*W) ----
    acc = jnp.zeros((NHW, C2), jnp.float32)
    for kh in range(3):
        for kw in range(3):
            patch = a1pad_ref[:, kh:kh + H, kw:kw + W, :].reshape(NHW, C1)
            wk = w2_ref[pl.ds((kh * 3 + kw) * C1, C1), :]        # (C1, C2)
            acc += jnp.dot(patch, wk, preferred_element_type=jnp.float32)
    a2 = jnp.maximum(acc + b2_ref[...], 0.0)                     # (N*H*W, C2)

    # ---- flatten to (N, H*W*C2) in (hw, c) order with static, 128-lane-
    #      aligned block stores (fc weight was pre-permuted to this order) ----
    for n in range(N):
        for hw in range(HW):
            r = n * HW + hw
            flat_ref[n:n + 1, hw * C2:(hw + 1) * C2] = a2[r:r + 1, :]

    # ---- fully connected ----
    out_ref[...] = (
        jnp.dot(flat_ref[...], wf_ref[...], preferred_element_type=jnp.float32)
        + bf_ref[...]
    )


# -----------------------------------------------------------------------------
# Parameter packing (done once): PyTorch layouts -> kernel layouts.
# -----------------------------------------------------------------------------
def pack_params(p, o_pad=16):
    C1, C0 = p["conv1_w"].shape[:2]
    C2 = p["conv2_w"].shape[0]
    O, F = p["fc_w"].shape
    HW = F // C2

    w1 = jnp.transpose(p["conv1_w"], (2, 3, 1, 0)).reshape(9 * C0, C1)
    w2 = jnp.transpose(p["conv2_w"], (2, 3, 1, 0)).reshape(9 * C1, C2)
    # PyTorch flattens NCHW as index c*HW + hw; the kernel flattens as
    # hw*C2 + c, so permute the fc weight once and pad the output dim.
    wf = p["fc_w"].reshape(O, C2, HW)                    # [o, c, hw]
    wf = jnp.transpose(wf, (2, 1, 0)).reshape(HW * C2, O)
    wf = jnp.pad(wf, ((0, 0), (0, o_pad - O)))
    bf = jnp.pad(p["fc_b"], (0, o_pad - O)).reshape(1, o_pad)
    return {
        "w1": w1, "b1": p["conv1_b"].reshape(1, C1),
        "w2": w2, "b2": p["conv2_b"].reshape(1, C2),
        "wf": wf, "bf": bf,
    }


# -----------------------------------------------------------------------------
# Forward wrapper: tiny im2col for conv1 + one fused pallas_call.
# -----------------------------------------------------------------------------
@functools.partial(jax.jit, static_argnames=("num_classes",))
def simple_cnn_forward(x_nchw, kp, num_classes=10):
    x = x_nchw.astype(jnp.float32)
    N, C0, H, W = x.shape
    C1 = kp["w1"].shape[1]
    C2 = kp["w2"].shape[1]
    Opad = kp["wf"].shape[1]
    NHW = N * H * W

    # conv1 im2col on the tiny input (folds NCHW->patch order + halo pad);
    # everything downstream runs inside the single fused Pallas kernel.
    xp = jnp.pad(x, ((0, 0), (0, 0), (1, 1), (1, 1)))
    taps = [xp[:, :, kh:kh + H, kw:kw + W]
            for kh in range(3) for kw in range(3)]               # 9 x (N,C0,H,W)
    col1 = jnp.stack(taps, axis=1)                               # (N,9,C0,H,W)
    col1 = jnp.transpose(col1, (0, 3, 4, 1, 2)).reshape(NHW, 9 * C0)

    out_pad = pl.pallas_call(
        fused_cnn_kernel,
        out_shape=jax.ShapeDtypeStruct((N, Opad), jnp.float32),
        in_specs=[
            pl.BlockSpec((NHW, 9 * C0), lambda: (0, 0)),
            pl.BlockSpec((9 * C0, C1), lambda: (0, 0)),
            pl.BlockSpec((1, C1), lambda: (0, 0)),
            pl.BlockSpec((9 * C1, C2), lambda: (0, 0)),
            pl.BlockSpec((1, C2), lambda: (0, 0)),
            pl.BlockSpec((H * W * C2, Opad), lambda: (0, 0)),
            pl.BlockSpec((1, Opad), lambda: (0, 0)),
        ],
        out_specs=pl.BlockSpec((N, Opad), lambda: (0, 0)),
        scratch_shapes=[
            pltpu.VMEM((N, H + 2, W + 2, C1), jnp.float32),
            pltpu.VMEM((N, H * W * C2), jnp.float32),
        ],
    )(col1, kp["w1"], kp["b1"], kp["w2"], kp["b2"], kp["wf"], kp["bf"])

    return out_pad[:, :num_classes]


# -----------------------------------------------------------------------------
# Torch-layout params + pure-JAX reference (same semantics as nn.Conv2d/Linear)
# -----------------------------------------------------------------------------
def init_params(key):
    ks = jax.random.split(key, 6)
    scale = 0.05
    return {
        "conv1_w": scale * jax.random.normal(ks[0], (64, 3, 3, 3), jnp.float32),
        "conv1_b": scale * jax.random.normal(ks[1], (64,), jnp.float32),
        "conv2_w": scale * jax.random.normal(ks[2], (128, 64, 3, 3), jnp.float32),
        "conv2_b": scale * jax.random.normal(ks[3], (128,), jnp.float32),
        "fc_w": scale * jax.random.normal(ks[4], (10, 128 * 8 * 8), jnp.float32),
        "fc_b": scale * jax.random.normal(ks[5], (10,), jnp.float32),
    }


def reference_forward(x, p):
    def conv(x, w, b):
        y = lax.conv_general_dilated(
            x, w, window_strides=(1, 1), padding=((1, 1), (1, 1)),
            dimension_numbers=("NCHW", "OIHW", "NCHW"))
        return jnp.maximum(y + b[None, :, None, None], 0.0)

    y = conv(x, p["conv1_w"], p["conv1_b"])
    y = conv(y, p["conv2_w"], p["conv2_b"])
    y = y.reshape(y.shape[0], -1)
    return y @ p["fc_w"].T + p["fc_b"]


if __name__ == "__main__":
    key = jax.random.PRNGKey(0)
    k_x, k_p = jax.random.split(key)

    # fc(128*8*8, 10) requires 8x8 spatial after the two padding=1 convs.
    x = jax.random.normal(k_x, (2, 3, 8, 8), jnp.float32)
    params = init_params(k_p)
    kparams = pack_params(params)

    out = simple_cnn_forward(x, kparams)
    out = jax.block_until_ready(out)

    ref = reference_forward(x, params)
    assert out.shape == (2, 10)
    assert jnp.allclose(out, ref, atol=1e-4, rtol=1e-4), "mismatch vs reference"

    print("KERNEL_OK")
</pallas_src>

<mosaic_0001>
module attributes {stable_mosaic.version = 11 : i64} {
  func.func @fused_cnn_kernel(%arg0: memref<128x27xf32, #tpu.memory_space<vmem>>, %arg1: memref<27x64xf32, #tpu.memory_space<vmem>>, %arg2: memref<1x64xf32, #tpu.memory_space<vmem>>, %arg3: memref<576x128xf32, #tpu.memory_space<vmem>>, %arg4: memref<1x128xf32, #tpu.memory_space<vmem>>, %arg5: memref<8192x16xf32, #tpu.memory_space<vmem>>, %arg6: memref<1x16xf32, #tpu.memory_space<vmem>>, %arg7: memref<2x16xf32, #tpu.memory_space<vmem>>, %arg8: memref<2x10x10x64xf32, #tpu.memory_space<vmem>>, %arg9: memref<2x8192xf32, #tpu.memory_space<vmem>>) attributes {dimension_semantics = [], scalar_prefetch = 0 : i64, scratch_operands = 2 : i64, tpu.core_type = #tpu.core_type<tc>} {
    %c0 = arith.constant 0 : index
    %c0_0 = arith.constant 0 : index
    %0 = vector.load %arg0[%c0, %c0_0] : memref<128x27xf32, #tpu.memory_space<vmem>>, vector<128x27xf32>
    %c0_1 = arith.constant 0 : index
    %c0_2 = arith.constant 0 : index
    %1 = vector.load %arg1[%c0_1, %c0_2] : memref<27x64xf32, #tpu.memory_space<vmem>>, vector<27x64xf32>
    %cst = arith.constant dense<0.000000e+00> : vector<128x64xf32>
    %2 = tpu.matmul %0, %1, %cst {dimension_numbers = #tpu.dot_dimension_numbers<[1], [0], [0], [1], [0, 0, 1, 1], [], []>} : vector<128x27xf32>, vector<27x64xf32>, vector<128x64xf32> -> vector<128x64xf32>
    %c0_3 = arith.constant 0 : index
    %c0_4 = arith.constant 0 : index
    %3 = vector.load %arg2[%c0_3, %c0_4] : memref<1x64xf32, #tpu.memory_space<vmem>>, vector<1x64xf32>
    %4 = vector.broadcast %3 : vector<1x64xf32> to vector<128x64xf32>
    %5 = arith.addf %2, %4 : vector<128x64xf32>
    %cst_5 = arith.constant 0.000000e+00 : f32
    %6 = vector.broadcast %cst_5 : f32 to vector<128x64xf32>
    %7 = arith.maximumf %5, %6 : vector<128x64xf32>
    %cst_6 = arith.constant 0.000000e+00 : f32
    %8 = vector.broadcast %cst_6 : f32 to vector<2x10x10x64xf32>
    %c0_7 = arith.constant 0 : index
    %c0_8 = arith.constant 0 : index
    %c0_9 = arith.constant 0 : index
    %c0_10 = arith.constant 0 : index
    %9 = vector.load %arg8[%c0_7, %c0_8, %c0_9, %c0_10] : memref<2x10x10x64xf32, #tpu.memory_space<vmem>>, vector<2x10x10x64xf32>
    tpu.vector_store %arg8[%c0_7, %c0_8, %c0_9, %c0_10], %8 {strides = array<i32>} : memref<2x10x10x64xf32, #tpu.memory_space<vmem>>, vector<2x10x10x64xf32>,
    %10 = vector.shape_cast %7 : vector<128x64xf32> to vector<2x8x8x64xf32>
    %c0_11 = arith.constant 0 : index
    %c1 = arith.constant 1 : index
    %c1_12 = arith.constant 1 : index
    %c0_13 = arith.constant 0 : index
    %11 = vector.load %arg8[%c0_11, %c1, %c1_12, %c0_13] : memref<2x10x10x64xf32, #tpu.memory_space<vmem>>, vector<2x8x8x64xf32>
    tpu.vector_store %arg8[%c0_11, %c1, %c1_12, %c0_13], %10 {strides = array<i32>} : memref<2x10x10x64xf32, #tpu.memory_space<vmem>>, vector<2x8x8x64xf32>,
    %cst_14 = arith.constant 0.000000e+00 : f32
    %12 = vector.broadcast %cst_14 : f32 to vector<128x128xf32>
    %c0_15 = arith.constant 0 : index
    %c0_16 = arith.constant 0 : index
    %c0_17 = arith.constant 0 : index
    %c0_18 = arith.constant 0 : index
    %13 = vector.load %arg8[%c0_15, %c0_16, %c0_17, %c0_18] : memref<2x10x10x64xf32, #tpu.memory_space<vmem>>, vector<2x8x8x64xf32>
    %14 = vector.shape_cast %13 : vector<2x8x8x64xf32> to vector<128x64xf32>
    %c0_19 = arith.constant 0 : index
    %c0_20 = arith.constant 0 : index
    %15 = vector.load %arg3[%c0_19, %c0_20] : memref<576x128xf32, #tpu.memory_space<vmem>>, vector<64x128xf32>
    %cst_21 = arith.constant dense<0.000000e+00> : vector<128x128xf32>
    %16 = tpu.matmul %14, %15, %cst_21 {dimension_numbers = #tpu.dot_dimension_numbers<[1], [0], [0], [1], [0, 0, 1, 1], [], []>} : vector<128x64xf32>, vector<64x128xf32>, vector<128x128xf32> -> vector<128x128xf32>
    %17 = arith.addf %12, %16 : vector<128x128xf32>
    %c0_22 = arith.constant 0 : index
    %c0_23 = arith.constant 0 : index
    %c1_24 = arith.constant 1 : index
    %c0_25 = arith.constant 0 : index
    %18 = vector.load %arg8[%c0_22, %c0_23, %c1_24, %c0_25] : memref<2x10x10x64xf32, #tpu.memory_space<vmem>>, vector<2x8x8x64xf32>
    %19 = vector.shape_cast %18 : vector<2x8x8x64xf32> to vector<128x64xf32>
    %c64 = arith.constant 64 : index
    %c0_26 = arith.constant 0 : index
    %20 = vector.load %arg3[%c64, %c0_26] : memref<576x128xf32, #tpu.memory_space<vmem>>, vector<64x128xf32>
    %cst_27 = arith.constant dense<0.000000e+00> : vector<128x128xf32>
    %21 = tpu.matmul %19, %20, %cst_27 {dimension_numbers = #tpu.dot_dimension_numbers<[1], [0], [0], [1], [0, 0, 1, 1], [], []>} : vector<128x64xf32>, vector<64x128xf32>, vector<128x128xf32> -> vector<128x128xf32>
    %22 = arith.addf %17, %21 : vector<128x128xf32>
    %c0_28 = arith.constant 0 : index
    %c0_29 = arith.constant 0 : index
    %c2 = arith.constant 2 : index
    %c0_30 = arith.constant 0 : index
    %23 = vector.load %arg8[%c0_28, %c0_29, %c2, %c0_30] : memref<2x10x10x64xf32, #tpu.memory_space<vmem>>, vector<2x8x8x64xf32>
    %24 = vector.shape_cast %23 : vector<2x8x8x64xf32> to vector<128x64xf32>
    %c128 = arith.constant 128 : index
    %c0_31 = arith.constant 0 : index
    %25 = vector.load %arg3[%c128, %c0_31] : memref<576x128xf32, #tpu.memory_space<vmem>>, vector<64x128xf32>
    %cst_32 = arith.constant dense<0.000000e+00> : vector<128x128xf32>
    %26 = tpu.matmul %24, %25, %cst_32 {dimension_numbers = #tpu.dot_dimension_numbers<[1], [0], [0], [1], [0, 0, 1, 1], [], []>} : vector<128x64xf32>, vector<64x128xf32>, vector<128x128xf32> -> vector<128x128xf32>
    %27 = arith.addf %22, %26 : vector<128x128xf32>
    %c0_33 = arith.constant 0 : index
    %c1_34 = arith.constant 1 : index
    %c0_35 = arith.constant 0 : index
    %c0_36 = arith.constant 0 : index
    %28 = vector.load %arg8[%c0_33, %c1_34, %c0_35, %c0_36] : memref<2x10x10x64xf32, #tpu.memory_space<vmem>>, vector<2x8x8x64xf32>
    %29 = vector.shape_cast %28 : vector<2x8x8x64xf32> to vector<128x64xf32>
    %c192 = arith.constant 192 : index
    %c0_37 = arith.constant 0 : index
    %30 = vector.load %arg3[%c192, %c0_37] : memref<576x128xf32, #tpu.memory_space<vmem>>, vector<64x128xf32>
    %cst_38 = arith.constant dense<0.000000e+00> : vector<128x128xf32>
    %31 = tpu.matmul %29, %30, %cst_38 {dimension_numbers = #tpu.dot_dimension_numbers<[1], [0], [0], [1], [0, 0, 1, 1], [], []>} : vector<128x64xf32>, vector<64x128xf32>, vector<128x128xf32> -> vector<128x128xf32>
    %32 = arith.addf %27, %31 : vector<128x128xf32>
    %c0_39 = arith.constant 0 : index
    %c1_40 = arith.constant 1 : index
    %c1_41 = arith.constant 1 : index
    %c0_42 = arith.constant 0 : index
    %33 = vector.load %arg8[%c0_39, %c1_40, %c1_41, %c0_42] : memref<2x10x10x64xf32, #tpu.memory_space<vmem>>, vector<2x8x8x64xf32>
    %34 = vector.shape_cast %33 : vector<2x8x8x64xf32> to vector<128x64xf32>
    %c256 = arith.constant 256 : index
    %c0_43 = arith.constant 0 : index
    %35 = vector.load %arg3[%c256, %c0_43] : memref<576x128xf32, #tpu.memory_space<vmem>>, vector<64x128xf32>
    %cst_44 = arith.constant dense<0.000000e+00> : vector<128x128xf32>
    %36 = tpu.matmul %34, %35, %cst_44 {dimension_numbers = #tpu.dot_dimension_numbers<[1], [0], [0], [1], [0, 0, 1, 1], [], []>} : vector<128x64xf32>, vector<64x128xf32>, vector<128x128xf32> -> vector<128x128xf32>
    %37 = arith.addf %32, %36 : vector<128x128xf32>
    %c0_45 = arith.constant 0 : index
    %c1_46 = arith.constant 1 : index
    %c2_47 = arith.constant 2 : index
    %c0_48 = arith.constant 0 : index
    %38 = vector.load %arg8[%c0_45, %c1_46, %c2_47, %c0_48] : memref<2x10x10x64xf32, #tpu.memory_space<vmem>>, vector<2x8x8x64xf32>
    %39 = vector.shape_cast %38 : vector<2x8x8x64xf32> to vector<128x64xf32>
    %c320 = arith.constant 320 : index
    %c0_49 = arith.constant 0 : index
    %40 = vector.load %arg3[%c320, %c0_49] : memref<576x128xf32, #tpu.memory_space<vmem>>, vector<64x128xf32>
    %cst_50 = arith.constant dense<0.000000e+00> : vector<128x128xf32>
    %41 = tpu.matmul %39, %40, %cst_50 {dimension_numbers = #tpu.dot_dimension_numbers<[1], [0], [0], [1], [0, 0, 1, 1], [], []>} : vector<128x64xf32>, vector<64x128xf32>, vector<128x128xf32> -> vector<128x128xf32>
    %42 = arith.addf %37, %41 : vector<128x128xf32>
    %c0_51 = arith.constant 0 : index
    %c2_52 = arith.constant 2 : index
    %c0_53 = arith.constant 0 : index
    %c0_54 = arith.constant 0 : index
    %43 = vector.load %arg8[%c0_51, %c2_52, %c0_53, %c0_54] : memref<2x10x10x64xf32, #tpu.memory_space<vmem>>, vector<2x8x8x64xf32>
    %44 = vector.shape_cast %43 : vector<2x8x8x64xf32> to vector<128x64xf32>
    %c384 = arith.constant 384 : index
    %c0_55 = arith.constant 0 : index
    %45 = vector.load %arg3[%c384, %c0_55] : memref<576x128xf32, #tpu.memory_space<vmem>>, vector<64x128xf32>
    %cst_56 = arith.constant dense<0.000000e+00> : vector<128x128xf32>
    %46 = tpu.matmul %44, %45, %cst_56 {dimension_numbers = #tpu.dot_dimension_numbers<[1], [0], [0], [1], [0, 0, 1, 1], [], []>} : vector<128x64xf32>, vector<64x128xf32>, vector<128x128xf32> -> vector<128x128xf32>
    %47 = arith.addf %42, %46 : vector<128x128xf32>
    %c0_57 = arith.constant 0 : index
    %c2_58 = arith.constant 2 : index
    %c1_59 = arith.constant 1 : index
    %c0_60 = arith.constant 0 : index
    %48 = vector.load %arg8[%c0_57, %c2_58, %c1_59, %c0_60] : memref<2x10x10x64xf32, #tpu.memory_space<vmem>>, vector<2x8x8x64xf32>
    %49 = vector.shape_cast %48 : vector<2x8x8x64xf32> to vector<128x64xf32>
    %c448 = arith.constant 448 : index
    %c0_61 = arith.constant 0 : index
    %50 = vector.load %arg3[%c448, %c0_61] : memref<576x128xf32, #tpu.memory_space<vmem>>, vector<64x128xf32>
    %cst_62 = arith.constant dense<0.000000e+00> : vector<128x128xf32>
    %51 = tpu.matmul %49, %50, %cst_62 {dimension_numbers = #tpu.dot_dimension_numbers<[1], [0], [0], [1], [0, 0, 1, 1], [], []>} : vector<128x64xf32>, vector<64x128xf32>, vector<128x128xf32> -> vector<128x128xf32>
    %52 = arith.addf %47, %51 : vector<128x128xf32>
    %c0_63 = arith.constant 0 : index
    %c2_64 = arith.constant 2 : index
    %c2_65 = arith.constant 2 : index
    %c0_66 = arith.constant 0 : index
    %53 = vector.load %arg8[%c0_63, %c2_64, %c2_65, %c0_66] : memref<2x10x10x64xf32, #tpu.memory_space<vmem>>, vector<2x8x8x64xf32>
    %54 = vector.shape_cast %53 : vector<2x8x8x64xf32> to vector<128x64xf32>
    %c512 = arith.constant 512 : index
    %c0_67 = arith.constant 0 : index
    %55 = vector.load %arg3[%c512, %c0_67] : memref<576x128xf32, #tpu.memory_space<vmem>>, vector<64x128xf32>
    %cst_68 = arith.constant dense<0.000000e+00> : vector<128x128xf32>
    %56 = tpu.matmul %54, %55, %cst_68 {dimension_numbers = #tpu.dot_dimension_numbers<[1], [0], [0], [1], [0, 0, 1, 1], [], []>} : vector<128x64xf32>, vector<64x128xf32>, vector<128x128xf32> -> vector<128x128xf32>
    %57 = arith.addf %52, %56 : vector<128x128xf32>
    %c0_69 = arith.constant 0 : index
    %c0_70 = arith.constant 0 : index
    %58 = vector.load %arg4[%c0_69, %c0_70] : memref<1x128xf32, #tpu.memory_space<vmem>>, vector<1x128xf32>
    %59 = vector.broadcast %58 : vector<1x128xf32> to vector<128x128xf32>
    %60 = arith.addf %57, %59 : vector<128x128xf32>
    %cst_71 = arith.constant 0.000000e+00 : f32
    %61 = vector.broadcast %cst_71 : f32 to vector<128x128xf32>
    %62 = arith.maximumf %60, %61 : vector<128x128xf32>
    %63 = vector.extract_strided_slice %62 {offsets = [0, 0], sizes = [1, 128], strides = [1, 1]} : vector<128x128xf32> to vector<1x128xf32>
    %c0_72 = arith.constant 0 : index
    %c0_73 = arith.constant 0 : index
    %64 = vector.load %arg9[%c0_72, %c0_73] : memref<2x8192xf32, #tpu.memory_space<vmem>>, vector<1x128xf32>
    tpu.vector_store %arg9[%c0_72, %c0_73], %63 {strides = array<i32>} : memref<2x8192xf32, #tpu.memory_space<vmem>>, vector<1x128xf32>,
    %65 = vector.extract_strided_slice %62 {offsets = [1, 0], sizes = [1, 128], strides = [1, 1]} : vector<128x128xf32> to vector<1x128xf32>
    %c0_74 = arith.constant 0 : index
    %c128_75 = arith.constant 128 : index
    %66 = vector.load %arg9[%c0_74, %c128_75] : memref<2x8192xf32, #tpu.memory_space<vmem>>, vector<1x128xf32>
    tpu.vector_store %arg9[%c0_74, %c128_75], %65 {strides = array<i32>} : memref<2x8192xf32, #tpu.memory_space<vmem>>, vector<1x128xf32>,
    %67 = vector.extract_strided_slice %62 {offsets = [2, 0], sizes = [1, 128], strides = [1, 1]} : vector<128x128xf32> to vector<1x128xf32>
    %c0_76 = arith.constant 0 : index
    %c256_77 = arith.constant 256 : index
    %68 = vector.load %arg9[%c0_76, %c256_77] : memref<2x8192xf32, #tpu.memory_space<vmem>>, vector<1x128xf32>
    tpu.vector_store %arg9[%c0_76, %c256_77], %67 {strides = array<i32>} : memref<2x8192xf32, #tpu.memory_space<vmem>>, vector<1x128xf32>,
    %69 = vector.extract_strided_slice %62 {offsets = [3, 0], sizes = [1, 128], strides = [1, 1]} : vector<128x128xf32> to vector<1x128xf32>
    %c0_78 = arith.constant 0 : index
    %c384_79 = arith.constant 384 : index
    %70 = vector.load %arg9[%c0_78, %c384_79] : memref<2x8192xf32, #tpu.memory_space<vmem>>, vector<1x128xf32>
    tpu.vector_store %arg9[%c0_78, %c384_79], %69 {strides = array<i32>} : memref<2x8192xf32, #tpu.memory_space<vmem>>, vector<1x128xf32>,
    %71 = vector.extract_strided_slice %62 {offsets = [4, 0], sizes = [1, 128], strides = [1, 1]} : vector<128x128xf32> to vector<1x128xf32>
    %c0_80 = arith.constant 0 : index
    %c512_81 = arith.constant 512 : index
    %72 = vector.load %arg9[%c0_80, %c512_81] : memref<2x8192xf32, #tpu.memory_space<vmem>>, vector<1x128xf32>
    tpu.vector_store %arg9[%c0_80, %c512_81], %71 {strides = array<i32>} : memref<2x8192xf32, #tpu.memory_space<vmem>>, vector<1x128xf32>,
    %73 = vector.extract_strided_slice %62 {offsets = [5, 0], sizes = [1, 128], strides = [1, 1]} : vector<128x128xf32> to vector<1x128xf32>
    %c0_82 = arith.constant 0 : index
    %c640 = arith.constant 640 : index
    %74 = vector.load %arg9[%c0_82, %c640] : memref<2x8192xf32, #tpu.memory_space<vmem>>, vector<1x128xf32>
    tpu.vector_store %arg9[%c0_82, %c640], %73 {strides = array<i32>} : memref<2x8192xf32, #tpu.memory_space<vmem>>, vector<1x128xf32>,
    %75 = vector.extract_strided_slice %62 {offsets = [6, 0], sizes = [1, 128], strides = [1, 1]} : vector<128x128xf32> to vector<1x128xf32>
    %c0_83 = arith.constant 0 : index
    %c768 = arith.constant 768 : index
    %76 = vector.load %arg9[%c0_83, %c768] : memref<2x8192xf32, #tpu.memory_space<vmem>>, vector<1x128xf32>
    tpu.vector_store %arg9[%c0_83, %c768], %75 {strides = array<i32>} : memref<2x8192xf32, #tpu.memory_space<vmem>>, vector<1x128xf32>,
    %77 = vector.extract_strided_slice %62 {offsets = [7, 0], sizes = [1, 128], strides = [1, 1]} : vector<128x128xf32> to vector<1x128xf32>
    %c0_84 = arith.constant 0 : index
    %c896 = arith.constant 896 : index
    %78 = vector.load %arg9[%c0_84, %c896] : memref<2x8192xf32, #tpu.memory_space<vmem>>, vector<1x128xf32>
    tpu.vector_store %arg9[%c0_84, %c896], %77 {strides = array<i32>} : memref<2x8192xf32, #tpu.memory_space<vmem>>, vector<1x128xf32>,
    %79 = vector.extract_strided_slice %62 {offsets = [8, 0], sizes = [1, 128], strides = [1, 1]} : vector<128x128xf32> to vector<1x128xf32>
    %c0_85 = arith.constant 0 : index
    %c1024 = arith.constant 1024 : index
    %80 = vector.load %arg9[%c0_85, %c1024] : memref<2x8192xf32, #tpu.memory_space<vmem>>, vector<1x128xf32>
    tpu.vector_store %arg9[%c0_85, %c1024], %79 {strides = array<i32>} : memref<2x8192xf32, #tpu.memory_space<vmem>>, vector<1x128xf32>,
    %81 = vector.extract_strided_slice %62 {offsets = [9, 0], sizes = [1, 128], strides = [1, 1]} : vector<128x128xf32> to vector<1x128xf32>
    %c0_86 = arith.constant 0 : index
    %c1152 = arith.constant 1152 : index
    %82 = vector.load %arg9[%c0_86, %c1152] : memref<2x8192xf32, #tpu.memory_space<vmem>>, vector<1x128xf32>
    tpu.vector_store %arg9[%c0_86, %c1152], %81 {strides = array<i32>} : memref<2x8192xf32, #tpu.memory_space<vmem>>, vector<1x128xf32>,
    %83 = vector.extract_strided_slice %62 {offsets = [10, 0], sizes = [1, 128], strides = [1, 1]} : vector<128x128xf32> to vector<1x128xf32>
    %c0_87 = arith.constant 0 : index
    %c1280 = arith.constant 1280 : index
    %84 = vector.load %arg9[%c0_87, %c1280] : memref<2x8192xf32, #tpu.memory_space<vmem>>, vector<1x128xf32>
    tpu.vector_store %arg9[%c0_87, %c1280], %83 {strides = array<i32>} : memref<2x8192xf32, #tpu.memory_space<vmem>>, vector<1x128xf32>,
    %85 = vector.extract_strided_slice %62 {offsets = [11, 0], sizes = [1, 128], strides = [1, 1]} : vector<128x128xf32> to vector<1x128xf32>
    %c0_88 = arith.constant 0 : index
    %c1408 = arith.constant 1408 : index
    %86 = vector.load %arg9[%c0_88, %c1408] : memref<2x8192xf32, #tpu.memory_space<vmem>>, vector<1x128xf32>
    tpu.vector_store %arg9[%c0_88, %c1408], %85 {strides = array<i32>} : memref<2x8192xf32, #tpu.memory_space<vmem>>, vector<1x128xf32>,
    %87 = vector.extract_strided_slice %62 {offsets = [12, 0], sizes = [1, 128], strides = [1, 1]} : vector<128x128xf32> to vector<1x128xf32>
    %c0_89 = arith.constant 0 : index
    %c1536 = arith.constant 1536 : index
    %88 = vector.load %arg9[%c0_89, %c1536] : memref<2x8192xf32, #tpu.memory_space<vmem>>, vector<1x128xf32>
    tpu.vector_store %arg9[%c0_89, %c1536], %87 {strides = array<i32>} : memref<2x8192xf32, #tpu.memory_space<vmem>>, vector<1x128xf32>,
    %89 = vector.extract_strided_slice %62 {offsets = [13, 0], sizes = [1, 128], strides = [1, 1]} : vector<128x128xf32> to vector<1x128xf32>
    %c0_90 = arith.constant 0 : index
    %c1664 = arith.constant 1664 : index
    %90 = vector.load %arg9[%c0_90, %c1664] : memref<2x8192xf32, #tpu.memory_space<vmem>>, vector<1x128xf32>
    tpu.vector_store %arg9[%c0_90, %c1664], %89 {strides = array<i32>} : memref<2x8192xf32, #tpu.memory_space<vmem>>, vector<1x128xf32>,
    %91 = vector.extract_strided_slice %62 {offsets = [14, 0], sizes = [1, 128], strides = [1, 1]} : vector<128x128xf32> to vector<1x128xf32>
    %c0_91 = arith.constant 0 : index
    %c1792 = arith.constant 1792 : index
    %92 = vector.load %arg9[%c0_91, %c1792] : memref<2x8192xf32, #tpu.memory_space<vmem>>, vector<1x128xf32>
    tpu.vector_store %arg9[%c0_91, %c1792], %91 {strides = array<i32>} : memref<2x8192xf32, #tpu.memory_space<vmem>>, vector<1x128xf32>,
    %93 = vector.extract_strided_slice %62 {offsets = [15, 0], sizes = [1, 128], strides = [1, 1]} : vector<128x128xf32> to vector<1x128xf32>
    %c0_92 = arith.constant 0 : index
    %c1920 = arith.constant 1920 : index
    %94 = vector.load %arg9[%c0_92, %c1920] : memref<2x8192xf32, #tpu.memory_space<vmem>>, vector<1x128xf32>
    tpu.vector_store %arg9[%c0_92, %c1920], %93 {strides = array<i32>} : memref<2x8192xf32, #tpu.memory_space<vmem>>, vector<1x128xf32>,
    %95 = vector.extract_strided_slice %62 {offsets = [16, 0], sizes = [1, 128], strides = [1, 1]} : vector<128x128xf32> to vector<1x128xf32>
    %c0_93 = arith.constant 0 : index
    %c2048 = arith.constant 2048 : index
    %96 = vector.load %arg9[%c0_93, %c2048] : memref<2x8192xf32, #tpu.memory_space<vmem>>, vector<1x128xf32>
    tpu.vector_store %arg9[%c0_93, %c2048], %95 {strides = array<i32>} : memref<2x8192xf32, #tpu.memory_space<vmem>>, vector<1x128xf32>,
    %97 = vector.extract_strided_slice %62 {offsets = [17, 0], sizes = [1, 128], strides = [1, 1]} : vector<128x128xf32> to vector<1x128xf32>
    %c0_94 = arith.constant 0 : index
    %c2176 = arith.constant 2176 : index
    %98 = vector.load %arg9[%c0_94, %c2176] : memref<2x8192xf32, #tpu.memory_space<vmem>>, vector<1x128xf32>
    tpu.vector_store %arg9[%c0_94, %c2176], %97 {strides = array<i32>} : memref<2x8192xf32, #tpu.memory_space<vmem>>, vector<1x128xf32>,
    %99 = vector.extract_strided_slice %62 {offsets = [18, 0], sizes = [1, 128], strides = [1, 1]} : vector<128x128xf32> to vector<1x128xf32>
    %c0_95 = arith.constant 0 : index
    %c2304 = arith.constant 2304 : index
    %100 = vector.load %arg9[%c0_95, %c2304] : memref<2x8192xf32, #tpu.memory_space<vmem>>, vector<1x128xf32>
    tpu.vector_store %arg9[%c0_95, %c2304], %99 {strides = array<i32>} : memref<2x8192xf32, #tpu.memory_space<vmem>>, vector<1x128xf32>,
    %101 = vector.extract_strided_slice %62 {offsets = [19, 0], sizes = [1, 128], strides = [1, 1]} : vector<128x128xf32> to vector<1x128xf32>
    %c0_96 = arith.constant 0 : index
    %c2432 = arith.constant 2432 : index
    %102 = vector.load %arg9[%c0_96, %c2432] : memref<2x8192xf32, #tpu.memory_space<vmem>>, vector<1x128xf32>
    tpu.vector_store %arg9[%c0_96, %c2432], %101 {strides = array<i32>} : memref<2x8192xf32, #tpu.memory_space<vmem>>, vector<1x128xf32>,
    %103 = vector.extract_strided_slice %62 {offsets = [20, 0], sizes = [1, 128], strides = [1, 1]} : vector<128x128xf32> to vector<1x128xf32>
    %c0_97 = arith.constant 0 : index
    %c2560 = arith.constant 2560 : index
    %104 = vector.load %arg9[%c0_97, %c2560] : memref<2x8192xf32, #tpu.memory_space<vmem>>, vector<1x128xf32>
    tpu.vector_store %arg9[%c0_97, %c2560], %103 {strides = array<i32>} : memref<2x8192xf32, #tpu.memory_space<vmem>>, vector<1x128xf32>,
    %105 = vector.extract_strided_slice %62 {offsets = [21, 0], sizes = [1, 128], strides = [1, 1]} : vector<128x128xf32> to vector<1x128xf32>
    %c0_98 = arith.constant 0 : index
    %c2688 = arith.constant 2688 : index
    %106 = vector.load %arg9[%c0_98, %c2688] : memref<2x8192xf32, #tpu.memory_space<vmem>>, vector<1x128xf32>
    tpu.vector_store %arg9[%c0_98, %c2688], %105 {strides = array<i32>} : memref<2x8192xf32, #tpu.memory_space<vmem>>, vector<1x128xf32>,
    %107 = vector.extract_strided_slice %62 {offsets = [22, 0], sizes = [1, 128], strides = [1, 1]} : vector<128x128xf32> to vector<1x128xf32>
    %c0_99 = arith.constant 0 : index
    %c2816 = arith.constant 2816 : index
    %108 = vector.load %arg9[%c0_99, %c2816] : memref<2x8192xf32, #tpu.memory_space<vmem>>, vector<1x128xf32>
    tpu.vector_store %arg9[%c0_99, %c2816], %107 {strides = array<i32>} : memref<2x8192xf32, #tpu.memory_space<vmem>>, vector<1x128xf32>,
    %109 = vector.extract_strided_slice %62 {offsets = [23, 0], sizes = [1, 128], strides = [1, 1]} : vector<128x128xf32> to vector<1x128xf32>
    %c0_100 = arith.constant 0 : index
    %c2944 = arith.constant 2944 : index
    %110 = vector.load %arg9[%c0_100, %c2944] : memref<2x8192xf32, #tpu.memory_space<vmem>>, vector<1x128xf32>
    tpu.vector_store %arg9[%c0_100, %c2944], %109 {strides = array<i32>} : memref<2x8192xf32, #tpu.memory_space<vmem>>, vector<1x128xf32>,
    %111 = vector.extract_strided_slice %62 {offsets = [24, 0], sizes = [1, 128], strides = [1, 1]} : vector<128x128xf32> to vector<1x128xf32>
    %c0_101 = arith.constant 0 : index
    %c3072 = arith.constant 3072 : index
    %112 = vector.load %arg9[%c0_101, %c3072] : memref<2x8192xf32, #tpu.memory_space<vmem>>, vector<1x128xf32>
    tpu.vector_store %arg9[%c0_101, %c3072], %111 {strides = array<i32>} : memref<2x8192xf32, #tpu.memory_space<vmem>>, vector<1x128xf32>,
    %113 = vector.extract_strided_slice %62 {offsets = [25, 0], sizes = [1, 128], strides = [1, 1]} : vector<128x128xf32> to vector<1x128xf32>
    %c0_102 = arith.constant 0 : index
    %c3200 = arith.constant 3200 : index
    %114 = vector.load %arg9[%c0_102, %c3200] : memref<2x8192xf32, #tpu.memory_space<vmem>>, vector<1x128xf32>
    tpu.vector_store %arg9[%c0_102, %c3200], %113 {strides = array<i32>} : memref<2x8192xf32, #tpu.memory_space<vmem>>, vector<1x128xf32>,
    %115 = vector.extract_strided_slice %62 {offsets = [26, 0], sizes = [1, 128], strides = [1, 1]} : vector<128x128xf32> to vector<1x128xf32>
    %c0_103 = arith.constant 0 : index
    %c3328 = arith.constant 3328 : index
    %116 = vector.load %arg9[%c0_103, %c3328] : memref<2x8192xf32, #tpu.memory_space<vmem>>, vector<1x128xf32>
    tpu.vector_store %arg9[%c0_103, %c3328], %115 {strides = array<i32>} : memref<2x8192xf32, #tpu.memory_space<vmem>>, vector<1x128xf32>,
    %117 = vector.extract_strided_slice %62 {offsets = [27, 0], sizes = [1, 128], strides = [1, 1]} : vector<128x128xf32> to vector<1x128xf32>
    %c0_104 = arith.constant 0 : index
    %c3456 = arith.constant 3456 : index
    %118 = vector.load %arg9[%c0_104, %c3456] : memref<2x8192xf32, #tpu.memory_space<vmem>>, vector<1x128xf32>
    tpu.vector_store %arg9[%c0_104, %c3456], %117 {strides = array<i32>} : memref<2x8192xf32, #tpu.memory_space<vmem>>, vector<1x128xf32>,
    %119 = vector.extract_strided_slice %62 {offsets = [28, 0], sizes = [1, 128], strides = [1, 1]} : vector<128x128xf32> to vector<1x128xf32>
    %c0_105 = arith.constant 0 : index
    %c3584 = arith.constant 3584 : index
    %120 = vector.load %arg9[%c0_105, %c3584] : memref<2x8192xf32, #tpu.memory_space<vmem>>, vector<1x128xf32>
    tpu.vector_store %arg9[%c0_105, %c3584], %119 {strides = array<i32>} : memref<2x8192xf32, #tpu.memory_space<vmem>>, vector<1x128xf32>,
    %121 = vector.extract_strided_slice %62 {offsets = [29, 0], sizes = [1, 128], strides = [1, 1]} : vector<128x128xf32> to vector<1x128xf32>
    %c0_106 = arith.constant 0 : index
    %c3712 = arith.constant 3712 : index
    %122 = vector.load %arg9[%c0_106, %c3712] : memref<2x8192xf32, #tpu.memory_space<vmem>>, vector<1x128xf32>
    tpu.vector_store %arg9[%c0_106, %c3712], %121 {strides = array<i32>} : memref<2x8192xf32, #tpu.memory_space<vmem>>, vector<1x128xf32>,
    %123 = vector.extract_strided_slice %62 {offsets = [30, 0], sizes = [1, 128], strides = [1, 1]} : vector<128x128xf32> to vector<1x128xf32>
    %c0_107 = arith.constant 0 : index
    %c3840 = arith.constant 3840 : index
    %124 = vector.load %arg9[%c0_107, %c3840] : memref<2x8192xf32, #tpu.memory_space<vmem>>, vector<1x128xf32>
    tpu.vector_store %arg9[%c0_107, %c3840], %123 {strides = array<i32>} : memref<2x8192xf32, #tpu.memory_space<vmem>>, vector<1x128xf32>,
    %125 = vector.extract_strided_slice %62 {offsets = [31, 0], sizes = [1, 128], strides = [1, 1]} : vector<128x128xf32> to vector<1x128xf32>
    %c0_108 = arith.constant 0 : index
    %c3968 = arith.constant 3968 : index
    %126 = vector.load %arg9[%c0_108, %c3968] : memref<2x8192xf32, #tpu.memory_space<vmem>>, vector<1x128xf32>
    tpu.vector_store %arg9[%c0_108, %c3968], %125 {strides = array<i32>} : memref<2x8192xf32, #tpu.memory_space<vmem>>, vector<1x128xf32>,
    %127 = vector.extract_strided_slice %62 {offsets = [32, 0], sizes = [1, 128], strides = [1, 1]} : vector<128x128xf32> to vector<1x128xf32>
    %c0_109 = arith.constant 0 : index
    %c4096 = arith.constant 4096 : index
    %128 = vector.load %arg9[%c0_109, %c4096] : memref<2x8192xf32, #tpu.memory_space<vmem>>, vector<1x128xf32>
    tpu.vector_store %arg9[%c0_109, %c4096], %127 {strides = array<i32>} : memref<2x8192xf32, #tpu.memory_space<vmem>>, vector<1x128xf32>,
    %129 = vector.extract_strided_slice %62 {offsets = [33, 0], sizes = [1, 128], strides = [1, 1]} : vector<128x128xf32> to vector<1x128xf32>
    %c0_110 = arith.constant 0 : index
    %c4224 = arith.constant 4224 : index
    %130 = vector.load %arg9[%c0_110, %c4224] : memref<2x8192xf32, #tpu.memory_space<vmem>>, vector<1x128xf32>
    tpu.vector_store %arg9[%c0_110, %c4224], %129 {strides = array<i32>} : memref<2x8192xf32, #tpu.memory_space<vmem>>, vector<1x128xf32>,
    %131 = vector.extract_strided_slice %62 {offsets = [34, 0], sizes = [1, 128], strides = [1, 1]} : vector<128x128xf32> to vector<1x128xf32>
    %c0_111 = arith.constant 0 : index
    %c4352 = arith.constant 4352 : index
    %132 = vector.load %arg9[%c0_111, %c4352] : memref<2x8192xf32, #tpu.memory_space<vmem>>, vector<1x128xf32>
    tpu.vector_store %arg9[%c0_111, %c4352], %131 {strides = array<i32>} : memref<2x8192xf32, #tpu.memory_space<vmem>>, vector<1x128xf32>,
    %133 = vector.extract_strided_slice %62 {offsets = [35, 0], sizes = [1, 128], strides = [1, 1]} : vector<128x128xf32> to vector<1x128xf32>
    %c0_112 = arith.constant 0 : index
    %c4480 = arith.constant 4480 : index
    %134 = vector.load %arg9[%c0_112, %c4480] : memref<2x8192xf32, #tpu.memory_space<vmem>>, vector<1x128xf32>
    tpu.vector_store %arg9[%c0_112, %c4480], %133 {strides = array<i32>} : memref<2x8192xf32, #tpu.memory_space<vmem>>, vector<1x128xf32>,
    %135 = vector.extract_strided_slice %62 {offsets = [36, 0], sizes = [1, 128], strides = [1, 1]} : vector<128x128xf32> to vector<1x128xf32>
    %c0_113 = arith.constant 0 : index
    %c4608 = arith.constant 4608 : index
    %136 = vector.load %arg9[%c0_113, %c4608] : memref<2x8192xf32, #tpu.memory_space<vmem>>, vector<1x128xf32>
    tpu.vector_store %arg9[%c0_113, %c4608], %135 {strides = array<i32>} : memref<2x8192xf32, #tpu.memory_space<vmem>>, vector<1x128xf32>,
    %137 = vector.extract_strided_slice %62 {offsets = [37, 0], sizes = [1, 128], strides = [1, 1]} : vector<128x128xf32> to vector<1x128xf32>
    %c0_114 = arith.constant 0 : index
    %c4736 = arith.constant 4736 : index
    %138 = vector.load %arg9[%c0_114, %c4736] : memref<2x8192xf32, #tpu.memory_space<vmem>>, vector<1x128xf32>
    tpu.vector_store %arg9[%c0_114, %c4736], %137 {strides = array<i32>} : memref<2x8192xf32, #tpu.memory_space<vmem>>, vector<1x128xf32>,
    %139 = vector.extract_strided_slice %62 {offsets = [38, 0], sizes = [1, 128], strides = [1, 1]} : vector<128x128xf32> to vector<1x128xf32>
    %c0_115 = arith.constant 0 : index
    %c4864 = arith.constant 4864 : index
    %140 = vector.load %arg9[%c0_115, %c4864] : memref<2x8192xf32, #tpu.memory_space<vmem>>, vector<1x128xf32>
    tpu.vector_store %arg9[%c0_115, %c4864], %139 {strides = array<i32>} : memref<2x8192xf32, #tpu.memory_space<vmem>>, vector<1x128xf32>,
    %141 = vector.extract_strided_slice %62 {offsets = [39, 0], sizes = [1, 128], strides = [1, 1]} : vector<128x128xf32> to vector<1x128xf32>
    %c0_116 = arith.constant 0 : index
    %c4992 = arith.constant 4992 : index
    %142 = vector.load %arg9[%c0_116, %c4992] : memref<2x8192xf32, #tpu.memory_space<vmem>>, vector<1x128xf32>
    tpu.vector_store %arg9[%c0_116, %c4992], %141 {strides = array<i32>} : memref<2x8192xf32, #tpu.memory_space<vmem>>, vector<1x128xf32>,
    %143 = vector.extract_strided_slice %62 {offsets = [40, 0], sizes = [1, 128], strides = [1, 1]} : vector<128x128xf32> to vector<1x128xf32>
    %c0_117 = arith.constant 0 : index
    %c5120 = arith.constant 5120 : index
    %144 = vector.load %arg9[%c0_117, %c5120] : memref<2x8192xf32, #tpu.memory_space<vmem>>, vector<1x128xf32>
    tpu.vector_store %arg9[%c0_117, %c5120], %143 {strides = array<i32>} : memref<2x8192xf32, #tpu.memory_space<vmem>>, vector<1x128xf32>,
    %145 = vector.extract_strided_slice %62 {offsets = [41, 0], sizes = [1, 128], strides = [1, 1]} : vector<128x128xf32> to vector<1x128xf32>
    %c0_118 = arith.constant 0 : index
    %c5248 = arith.constant 5248 : index
    %146 = vector.load %arg9[%c0_118, %c5248] : memref<2x8192xf32, #tpu.memory_space<vmem>>, vector<1x128xf32>
    tpu.vector_store %arg9[%c0_118, %c5248], %145 {strides = array<i32>} : memref<2x8192xf32, #tpu.memory_space<vmem>>, vector<1x128xf32>,
    %147 = vector.extract_strided_slice %62 {offsets = [42, 0], sizes = [1, 128], strides = [1, 1]} : vector<128x128xf32> to vector<1x128xf32>
    %c0_119 = arith.constant 0 : index
    %c5376 = arith.constant 5376 : index
    %148 = vector.load %arg9[%c0_119, %c5376] : memref<2x8192xf32, #tpu.memory_space<vmem>>, vector<1x128xf32>
    tpu.vector_store %arg9[%c0_119, %c5376], %147 {strides = array<i32>} : memref<2x8192xf32, #tpu.memory_space<vmem>>, vector<1x128xf32>,
    %149 = vector.extract_strided_slice %62 {offsets = [43, 0], sizes = [1, 128], strides = [1, 1]} : vector<128x128xf32> to vector<1x128xf32>
    %c0_120 = arith.constant 0 : index
    %c5504 = arith.constant 5504 : index
    %150 = vector.load %arg9[%c0_120, %c5504] : memref<2x8192xf32, #tpu.memory_space<vmem>>, vector<1x128xf32>
    tpu.vector_store %arg9[%c0_120, %c5504], %149 {strides = array<i32>} : memref<2x8192xf32, #tpu.memory_space<vmem>>, vector<1x128xf32>,
    %151 = vector.extract_strided_slice %62 {offsets = [44, 0], sizes = [1, 128], strides = [1, 1]} : vector<128x128xf32> to vector<1x128xf32>
    %c0_121 = arith.constant 0 : index
    %c5632 = arith.constant 5632 : index
    %152 = vector.load %arg9[%c0_121, %c5632] : memref<2x8192xf32, #tpu.memory_space<vmem>>, vector<1x128xf32>
    tpu.vector_store %arg9[%c0_121, %c5632], %151 {strides = array<i32>} : memref<2x8192xf32, #tpu.memory_space<vmem>>, vector<1x128xf32>,
    %153 = vector.extract_strided_slice %62 {offsets = [45, 0], sizes = [1, 128], strides = [1, 1]} : vector<128x128xf32> to vector<1x128xf32>
    %c0_122 = arith.constant 0 : index
    %c5760 = arith.constant 5760 : index
    %154 = vector.load %arg9[%c0_122, %c5760] : memref<2x8192xf32, #tpu.memory_space<vmem>>, vector<1x128xf32>
    tpu.vector_store %arg9[%c0_122, %c5760], %153 {strides = array<i32>} : memref<2x8192xf32, #tpu.memory_space<vmem>>, vector<1x128xf32>,
    %155 = vector.extract_strided_slice %62 {offsets = [46, 0], sizes = [1, 128], strides = [1, 1]} : vector<128x128xf32> to vector<1x128xf32>
    %c0_123 = arith.constant 0 : index
    %c5888 = arith.constant 5888 : index
    %156 = vector.load %arg9[%c0_123, %c5888] : memref<2x8192xf32, #tpu.memory_space<vmem>>, vector<1x128xf32>
    tpu.vector_store %arg9[%c0_123, %c5888], %155 {strides = array<i32>} : memref<2x8192xf32, #tpu.memory_space<vmem>>, vector<1x128xf32>,
    %157 = vector.extract_strided_slice %62 {offsets = [47, 0], sizes = [1, 128], strides = [1, 1]} : vector<128x128xf32> to vector<1x128xf32>
    %c0_124 = arith.constant 0 : index
    %c6016 = arith.constant 6016 : index
    %158 = vector.load %arg9[%c0_124, %c6016] : memref<2x8192xf32, #tpu.memory_space<vmem>>, vector<1x128xf32>
    tpu.vector_store %arg9[%c0_124, %c6016], %157 {strides = array<i32>} : memref<2x8192xf32, #tpu.memory_space<vmem>>, vector<1x128xf32>,
    %159 = vector.extract_strided_slice %62 {offsets = [48, 0], sizes = [1, 128], strides = [1, 1]} : vector<128x128xf32> to vector<1x128xf32>
    %c0_125 = arith.constant 0 : index
    %c6144 = arith.constant 6144 : index
    %160 = vector.load %arg9[%c0_125, %c6144] : memref<2x8192xf32, #tpu.memory_space<vmem>>, vector<1x128xf32>
    tpu.vector_store %arg9[%c0_125, %c6144], %159 {strides = array<i32>} : memref<2x8192xf32, #tpu.memory_space<vmem>>, vector<1x128xf32>,
    %161 = vector.extract_strided_slice %62 {offsets = [49, 0], sizes = [1, 128], strides = [1, 1]} : vector<128x128xf32> to vector<1x128xf32>
    %c0_126 = arith.constant 0 : index
    %c6272 = arith.constant 6272 : index
    %162 = vector.load %arg9[%c0_126, %c6272] : memref<2x8192xf32, #tpu.memory_space<vmem>>, vector<1x128xf32>
    tpu.vector_store %arg9[%c0_126, %c6272], %161 {strides = array<i32>} : memref<2x8192xf32, #tpu.memory_space<vmem>>, vector<1x128xf32>,
    %163 = vector.extract_strided_slice %62 {offsets = [50, 0], sizes = [1, 128], strides = [1, 1]} : vector<128x128xf32> to vector<1x128xf32>
    %c0_127 = arith.constant 0 : index
    %c6400 = arith.constant 6400 : index
    %164 = vector.load %arg9[%c0_127, %c6400] : memref<2x8192xf32, #tpu.memory_space<vmem>>, vector<1x128xf32>
    tpu.vector_store %arg9[%c0_127, %c6400], %163 {strides = array<i32>} : memref<2x8192xf32, #tpu.memory_space<vmem>>, vector<1x128xf32>,
    %165 = vector.extract_strided_slice %62 {offsets = [51, 0], sizes = [1, 128], strides = [1, 1]} : vector<128x128xf32> to vector<1x128xf32>
    %c0_128 = arith.constant 0 : index
    %c6528 = arith.constant 6528 : index
    %166 = vector.load %arg9[%c0_128, %c6528] : memref<2x8192xf32, #tpu.memory_space<vmem>>, vector<1x128xf32>
    tpu.vector_store %arg9[%c0_128, %c6528], %165 {strides = array<i32>} : memref<2x8192xf32, #tpu.memory_space<vmem>>, vector<1x128xf32>,
    %167 = vector.extract_strided_slice %62 {offsets = [52, 0], sizes = [1, 128], strides = [1, 1]} : vector<128x128xf32> to vector<1x128xf32>
    %c0_129 = arith.constant 0 : index
    %c6656 = arith.constant 6656 : index
    %168 = vector.load %arg9[%c0_129, %c6656] : memref<2x8192xf32, #tpu.memory_space<vmem>>, vector<1x128xf32>
    tpu.vector_store %arg9[%c0_129, %c6656], %167 {strides = array<i32>} : memref<2x8192xf32, #tpu.memory_space<vmem>>, vector<1x128xf32>,
    %169 = vector.extract_strided_slice %62 {offsets = [53, 0], sizes = [1, 128], strides = [1, 1]} : vector<128x128xf32> to vector<1x128xf32>
    %c0_130 = arith.constant 0 : index
    %c6784 = arith.constant 6784 : index
    %170 = vector.load %arg9[%c0_130, %c6784] : memref<2x8192xf32, #tpu.memory_space<vmem>>, vector<1x128xf32>
    tpu.vector_store %arg9[%c0_130, %c6784], %169 {strides = array<i32>} : memref<2x8192xf32, #tpu.memory_space<vmem>>, vector<1x128xf32>,
    %171 = vector.extract_strided_slice %62 {offsets = [54, 0], sizes = [1, 128], strides = [1, 1]} : vector<128x128xf32> to vector<1x128xf32>
    %c0_131 = arith.constant 0 : index
    %c6912 = arith.constant 6912 : index
    %172 = vector.load %arg9[%c0_131, %c6912] : memref<2x8192xf32, #tpu.memory_space<vmem>>, vector<1x128xf32>
    tpu.vector_store %arg9[%c0_131, %c6912], %171 {strides = array<i32>} : memref<2x8192xf32, #tpu.memory_space<vmem>>, vector<1x128xf32>,
    %173 = vector.extract_strided_slice %62 {offsets = [55, 0], sizes = [1, 128], strides = [1, 1]} : vector<128x128xf32> to vector<1x128xf32>
    %c0_132 = arith.constant 0 : index
    %c7040 = arith.constant 7040 : index
    %174 = vector.load %arg9[%c0_132, %c7040] : memref<2x8192xf32, #tpu.memory_space<vmem>>, vector<1x128xf32>
    tpu.vector_store %arg9[%c0_132, %c7040], %173 {strides = array<i32>} : memref<2x8192xf32, #tpu.memory_space<vmem>>, vector<1x128xf32>,
    %175 = vector.extract_strided_slice %62 {offsets = [56, 0], sizes = [1, 128], strides = [1, 1]} : vector<128x128xf32> to vector<1x128xf32>
    %c0_133 = arith.constant 0 : index
    %c7168 = arith.constant 7168 : index
    %176 = vector.load %arg9[%c0_133, %c7168] : memref<2x8192xf32, #tpu.memory_space<vmem>>, vector<1x128xf32>
    tpu.vector_store %arg9[%c0_133, %c7168], %175 {strides = array<i32>} : memref<2x8192xf32, #tpu.memory_space<vmem>>, vector<1x128xf32>,
    %177 = vector.extract_strided_slice %62 {offsets = [57, 0], sizes = [1, 128], strides = [1, 1]} : vector<128x128xf32> to vector<1x128xf32>
    %c0_134 = arith.constant 0 : index
    %c7296 = arith.constant 7296 : index
    %178 = vector.load %arg9[%c0_134, %c7296] : memref<2x8192xf32, #tpu.memory_space<vmem>>, vector<1x128xf32>
    tpu.vector_store %arg9[%c0_134, %c7296], %177 {strides = array<i32>} : memref<2x8192xf32, #tpu.memory_space<vmem>>, vector<1x128xf32>,
    %179 = vector.extract_strided_slice %62 {offsets = [58, 0], sizes = [1, 128], strides = [1, 1]} : vector<128x128xf32> to vector<1x128xf32>
    %c0_135 = arith.constant 0 : index
    %c7424 = arith.constant 7424 : index
    %180 = vector.load %arg9[%c0_135, %c7424] : memref<2x8192xf32, #tpu.memory_space<vmem>>, vector<1x128xf32>
    tpu.vector_store %arg9[%c0_135, %c7424], %179 {strides = array<i32>} : memref<2x8192xf32, #tpu.memory_space<vmem>>, vector<1x128xf32>,
    %181 = vector.extract_strided_slice %62 {offsets = [59, 0], sizes = [1, 128], strides = [1, 1]} : vector<128x128xf32> to vector<1x128xf32>
    %c0_136 = arith.constant 0 : index
    %c7552 = arith.constant 7552 : index
    %182 = vector.load %arg9[%c0_136, %c7552] : memref<2x8192xf32, #tpu.memory_space<vmem>>, vector<1x128xf32>
    tpu.vector_store %arg9[%c0_136, %c7552], %181 {strides = array<i32>} : memref<2x8192xf32, #tpu.memory_space<vmem>>, vector<1x128xf32>,
    %183 = vector.extract_strided_slice %62 {offsets = [60, 0], sizes = [1, 128], strides = [1, 1]} : vector<128x128xf32> to vector<1x128xf32>
    %c0_137 = arith.constant 0 : index
    %c7680 = arith.constant 7680 : index
    %184 = vector.load %arg9[%c0_137, %c7680] : memref<2x8192xf32, #tpu.memory_space<vmem>>, vector<1x128xf32>
    tpu.vector_store %arg9[%c0_137, %c7680], %183 {strides = array<i32>} : memref<2x8192xf32, #tpu.memory_space<vmem>>, vector<1x128xf32>,
    %185 = vector.extract_strided_slice %62 {offsets = [61, 0], sizes = [1, 128], strides = [1, 1]} : vector<128x128xf32> to vector<1x128xf32>
    %c0_138 = arith.constant 0 : index
    %c7808 = arith.constant 7808 : index
    %186 = vector.load %arg9[%c0_138, %c7808] : memref<2x8192xf32, #tpu.memory_space<vmem>>, vector<1x128xf32>
    tpu.vector_store %arg9[%c0_138, %c7808], %185 {strides = array<i32>} : memref<2x8192xf32, #tpu.memory_space<vmem>>, vector<1x128xf32>,
    %187 = vector.extract_strided_slice %62 {offsets = [62, 0], sizes = [1, 128], strides = [1, 1]} : vector<128x128xf32> to vector<1x128xf32>
    %c0_139 = arith.constant 0 : index
    %c7936 = arith.constant 7936 : index
    %188 = vector.load %arg9[%c0_139, %c7936] : memref<2x8192xf32, #tpu.memory_space<vmem>>, vector<1x128xf32>
    tpu.vector_store %arg9[%c0_139, %c7936], %187 {strides = array<i32>} : memref<2x8192xf32, #tpu.memory_space<vmem>>, vector<1x128xf32>,
    %189 = vector.extract_strided_slice %62 {offsets = [63, 0], sizes = [1, 128], strides = [1, 1]} : vector<128x128xf32> to vector<1x128xf32>
    %c0_140 = arith.constant 0 : index
    %c8064 = arith.constant 8064 : index
    %190 = vector.load %arg9[%c0_140, %c8064] : memref<2x8192xf32, #tpu.memory_space<vmem>>, vector<1x128xf32>
    tpu.vector_store %arg9[%c0_140, %c8064], %189 {strides = array<i32>} : memref<2x8192xf32, #tpu.memory_space<vmem>>, vector<1x128xf32>,
    %191 = vector.extract_strided_slice %62 {offsets = [64, 0], sizes = [1, 128], strides = [1, 1]} : vector<128x128xf32> to vector<1x128xf32>
    %c1_141 = arith.constant 1 : index
    %c0_142 = arith.constant 0 : index
    %192 = vector.load %arg9[%c1_141, %c0_142] : memref<2x8192xf32, #tpu.memory_space<vmem>>, vector<1x128xf32>
    tpu.vector_store %arg9[%c1_141, %c0_142], %191 {strides = array<i32>} : memref<2x8192xf32, #tpu.memory_space<vmem>>, vector<1x128xf32>,
    %193 = vector.extract_strided_slice %62 {offsets = [65, 0], sizes = [1, 128], strides = [1, 1]} : vector<128x128xf32> to vector<1x128xf32>
    %c1_143 = arith.constant 1 : index
    %c128_144 = arith.constant 128 : index
    %194 = vector.load %arg9[%c1_143, %c128_144] : memref<2x8192xf32, #tpu.memory_space<vmem>>, vector<1x128xf32>
    tpu.vector_store %arg9[%c1_143, %c128_144], %193 {strides = array<i32>} : memref<2x8192xf32, #tpu.memory_space<vmem>>, vector<1x128xf32>,
    %195 = vector.extract_strided_slice %62 {offsets = [66, 0], sizes = [1, 128], strides = [1, 1]} : vector<128x128xf32> to vector<1x128xf32>
    %c1_145 = arith.constant 1 : index
    %c256_146 = arith.constant 256 : index
    %196 = vector.load %arg9[%c1_145, %c256_146] : memref<2x8192xf32, #tpu.memory_space<vmem>>, vector<1x128xf32>
    tpu.vector_store %arg9[%c1_145, %c256_146], %195 {strides = array<i32>} : memref<2x8192xf32, #tpu.memory_space<vmem>>, vector<1x128xf32>,
    %197 = vector.extract_strided_slice %62 {offsets = [67, 0], sizes = [1, 128], strides = [1, 1]} : vector<128x128xf32> to vector<1x128xf32>
    %c1_147 = arith.constant 1 : index
    %c384_148 = arith.constant 384 : index
    %198 = vector.load %arg9[%c1_147, %c384_148] : memref<2x8192xf32, #tpu.memory_space<vmem>>, vector<1x128xf32>
    tpu.vector_store %arg9[%c1_147, %c384_148], %197 {strides = array<i32>} : memref<2x8192xf32, #tpu.memory_space<vmem>>, vector<1x128xf32>,
    %199 = vector.extract_strided_slice %62 {offsets = [68, 0], sizes = [1, 128], strides = [1, 1]} : vector<128x128xf32> to vector<1x128xf32>
    %c1_149 = arith.constant 1 : index
    %c512_150 = arith.constant 512 : index
    %200 = vector.load %arg9[%c1_149, %c512_150] : memref<2x8192xf32, #tpu.memory_space<vmem>>, vector<1x128xf32>
    tpu.vector_store %arg9[%c1_149, %c512_150], %199 {strides = array<i32>} : memref<2x8192xf32, #tpu.memory_space<vmem>>, vector<1x128xf32>,
    %201 = vector.extract_strided_slice %62 {offsets = [69, 0], sizes = [1, 128], strides = [1, 1]} : vector<128x128xf32> to vector<1x128xf32>
    %c1_151 = arith.constant 1 : index
    %c640_152 = arith.constant 640 : index
    %202 = vector.load %arg9[%c1_151, %c640_152] : memref<2x8192xf32, #tpu.memory_space<vmem>>, vector<1x128xf32>
    tpu.vector_store %arg9[%c1_151, %c640_152], %201 {strides = array<i32>} : memref<2x8192xf32, #tpu.memory_space<vmem>>, vector<1x128xf32>,
    %203 = vector.extract_strided_slice %62 {offsets = [70, 0], sizes = [1, 128], strides = [1, 1]} : vector<128x128xf32> to vector<1x128xf32>
    %c1_153 = arith.constant 1 : index
    %c768_154 = arith.constant 768 : index
    %204 = vector.load %arg9[%c1_153, %c768_154] : memref<2x8192xf32, #tpu.memory_space<vmem>>, vector<1x128xf32>
    tpu.vector_store %arg9[%c1_153, %c768_154], %203 {strides = array<i32>} : memref<2x8192xf32, #tpu.memory_space<vmem>>, vector<1x128xf32>,
    %205 = vector.extract_strided_slice %62 {offsets = [71, 0], sizes = [1, 128], strides = [1, 1]} : vector<128x128xf32> to vector<1x128xf32>
    %c1_155 = arith.constant 1 : index
    %c896_156 = arith.constant 896 : index
    %206 = vector.load %arg9[%c1_155, %c896_156] : memref<2x8192xf32, #tpu.memory_space<vmem>>, vector<1x128xf32>
    tpu.vector_store %arg9[%c1_155, %c896_156], %205 {strides = array<i32>} : memref<2x8192xf32, #tpu.memory_space<vmem>>, vector<1x128xf32>,
    %207 = vector.extract_strided_slice %62 {offsets = [72, 0], sizes = [1, 128], strides = [1, 1]} : vector<128x128xf32> to vector<1x128xf32>
    %c1_157 = arith.constant 1 : index
    %c1024_158 = arith.constant 1024 : index
    %208 = vector.load %arg9[%c1_157, %c1024_158] : memref<2x8192xf32, #tpu.memory_space<vmem>>, vector<1x128xf32>
    tpu.vector_store %arg9[%c1_157, %c1024_158], %207 {strides = array<i32>} : memref<2x8192xf32, #tpu.memory_space<vmem>>, vector<1x128xf32>,
    %209 = vector.extract_strided_slice %62 {offsets = [73, 0], sizes = [1, 128], strides = [1, 1]} : vector<128x128xf32> to vector<1x128xf32>
    %c1_159 = arith.constant 1 : index
    %c1152_160 = arith.constant 1152 : index
    %210 = vector.load %arg9[%c1_159, %c1152_160] : memref<2x8192xf32, #tpu.memory_space<vmem>>, vector<1x128xf32>
    tpu.vector_store %arg9[%c1_159, %c1152_160], %209 {strides = array<i32>} : memref<2x8192xf32, #tpu.memory_space<vmem>>, vector<1x128xf32>,
    %211 = vector.extract_strided_slice %62 {offsets = [74, 0], sizes = [1, 128], strides = [1, 1]} : vector<128x128xf32> to vector<1x128xf32>
    %c1_161 = arith.constant 1 : index
    %c1280_162 = arith.constant 1280 : index
    %212 = vector.load %arg9[%c1_161, %c1280_162] : memref<2x8192xf32, #tpu.memory_space<vmem>>, vector<1x128xf32>
    tpu.vector_store %arg9[%c1_161, %c1280_162], %211 {strides = array<i32>} : memref<2x8192xf32, #tpu.memory_space<vmem>>, vector<1x128xf32>,
    %213 = vector.extract_strided_slice %62 {offsets = [75, 0], sizes = [1, 128], strides = [1, 1]} : vector<128x128xf32> to vector<1x128xf32>
    %c1_163 = arith.constant 1 : index
    %c1408_164 = arith.constant 1408 : index
    %214 = vector.load %arg9[%c1_163, %c1408_164] : memref<2x8192xf32, #tpu.memory_space<vmem>>, vector<1x128xf32>
    tpu.vector_store %arg9[%c1_163, %c1408_164], %213 {strides = array<i32>} : memref<2x8192xf32, #tpu.memory_space<vmem>>, vector<1x128xf32>,
    %215 = vector.extract_strided_slice %62 {offsets = [76, 0], sizes = [1, 128], strides = [1, 1]} : vector<128x128xf32> to vector<1x128xf32>
    %c1_165 = arith.constant 1 : index
    %c1536_166 = arith.constant 1536 : index
    %216 = vector.load %arg9[%c1_165, %c1536_166] : memref<2x8192xf32, #tpu.memory_space<vmem>>, vector<1x128xf32>
    tpu.vector_store %arg9[%c1_165, %c1536_166], %215 {strides = array<i32>} : memref<2x8192xf32, #tpu.memory_space<vmem>>, vector<1x128xf32>,
    %217 = vector.extract_strided_slice %62 {offsets = [77, 0], sizes = [1, 128], strides = [1, 1]} : vector<128x128xf32> to vector<1x128xf32>
    %c1_167 = arith.constant 1 : index
    %c1664_168 = arith.constant 1664 : index
    %218 = vector.load %arg9[%c1_167, %c1664_168] : memref<2x8192xf32, #tpu.memory_space<vmem>>, vector<1x128xf32>
    tpu.vector_store %arg9[%c1_167, %c1664_168], %217 {strides = array<i32>} : memref<2x8192xf32, #tpu.memory_space<vmem>>, vector<1x128xf32>,
    %219 = vector.extract_strided_slice %62 {offsets = [78, 0], sizes = [1, 128], strides = [1, 1]} : vector<128x128xf32> to vector<1x128xf32>
    %c1_169 = arith.constant 1 : index
    %c1792_170 = arith.constant 1792 : index
    %220 = vector.load %arg9[%c1_169, %c1792_170] : memref<2x8192xf32, #tpu.memory_space<vmem>>, vector<1x128xf32>
    tpu.vector_store %arg9[%c1_169, %c1792_170], %219 {strides = array<i32>} : memref<2x8192xf32, #tpu.memory_space<vmem>>, vector<1x128xf32>,
    %221 = vector.extract_strided_slice %62 {offsets = [79, 0], sizes = [1, 128], strides = [1, 1]} : vector<128x128xf32> to vector<1x128xf32>
    %c1_171 = arith.constant 1 : index
    %c1920_172 = arith.constant 1920 : index
    %222 = vector.load %arg9[%c1_171, %c1920_172] : memref<2x8192xf32, #tpu.memory_space<vmem>>, vector<1x128xf32>
    tpu.vector_store %arg9[%c1_171, %c1920_172], %221 {strides = array<i32>} : memref<2x8192xf32, #tpu.memory_space<vmem>>, vector<1x128xf32>,
    %223 = vector.extract_strided_slice %62 {offsets = [80, 0], sizes = [1, 128], strides = [1, 1]} : vector<128x128xf32> to vector<1x128xf32>
    %c1_173 = arith.constant 1 : index
    %c2048_174 = arith.constant 2048 : index
    %224 = vector.load %arg9[%c1_173, %c2048_174] : memref<2x8192xf32, #tpu.memory_space<vmem>>, vector<1x128xf32>
    tpu.vector_store %arg9[%c1_173, %c2048_174], %223 {strides = array<i32>} : memref<2x8192xf32, #tpu.memory_space<vmem>>, vector<1x128xf32>,
    %225 = vector.extract_strided_slice %62 {offsets = [81, 0], sizes = [1, 128], strides = [1, 1]} : vector<128x128xf32> to vector<1x128xf32>
    %c1_175 = arith.constant 1 : index
    %c2176_176 = arith.constant 2176 : index
    %226 = vector.load %arg9[%c1_175, %c2176_176] : memref<2x8192xf32, #tpu.memory_space<vmem>>, vector<1x128xf32>
    tpu.vector_store %arg9[%c1_175, %c2176_176], %225 {strides = array<i32>} : memref<2x8192xf32, #tpu.memory_space<vmem>>, vector<1x128xf32>,
    %227 = vector.extract_strided_slice %62 {offsets = [82, 0], sizes = [1, 128], strides = [1, 1]} : vector<128x128xf32> to vector<1x128xf32>
    %c1_177 = arith.constant 1 : index
    %c2304_178 = arith.constant 2304 : index
    %228 = vector.load %arg9[%c1_177, %c2304_178] : memref<2x8192xf32, #tpu.memory_space<vmem>>, vector<1x128xf32>
    tpu.vector_store %arg9[%c1_177, %c2304_178], %227 {strides = array<i32>} : memref<2x8192xf32, #tpu.memory_space<vmem>>, vector<1x128xf32>,
    %229 = vector.extract_strided_slice %62 {offsets = [83, 0], sizes = [1, 128], strides = [1, 1]} : vector<128x128xf32> to vector<1x128xf32>
    %c1_179 = arith.constant 1 : index
    %c2432_180 = arith.constant 2432 : index
    %230 = vector.load %arg9[%c1_179, %c2432_180] : memref<2x8192xf32, #tpu.memory_space<vmem>>, vector<1x128xf32>
    tpu.vector_store %arg9[%c1_179, %c2432_180], %229 {strides = array<i32>} : memref<2x8192xf32, #tpu.memory_space<vmem>>, vector<1x128xf32>,
    %231 = vector.extract_strided_slice %62 {offsets = [84, 0], sizes = [1, 128], strides = [1, 1]} : vector<128x128xf32> to vector<1x128xf32>
    %c1_181 = arith.constant 1 : index
    %c2560_182 = arith.constant 2560 : index
    %232 = vector.load %arg9[%c1_181, %c2560_182] : memref<2x8192xf32, #tpu.memory_space<vmem>>, vector<1x128xf32>
    tpu.vector_store %arg9[%c1_181, %c2560_182], %231 {strides = array<i32>} : memref<2x8192xf32, #tpu.memory_space<vmem>>, vector<1x128xf32>,
    %233 = vector.extract_strided_slice %62 {offsets = [85, 0], sizes = [1, 128], strides = [1, 1]} : vector<128x128xf32> to vector<1x128xf32>
    %c1_183 = arith.constant 1 : index
    %c2688_184 = arith.constant 2688 : index
    %234 = vector.load %arg9[%c1_183, %c2688_184] : memref<2x8192xf32, #tpu.memory_space<vmem>>, vector<1x128xf32>
    tpu.vector_store %arg9[%c1_183, %c2688_184], %233 {strides = array<i32>} : memref<2x8192xf32, #tpu.memory_space<vmem>>, vector<1x128xf32>,
    %235 = vector.extract_strided_slice %62 {offsets = [86, 0], sizes = [1, 128], strides = [1, 1]} : vector<128x128xf32> to vector<1x128xf32>
    %c1_185 = arith.constant 1 : index
    %c2816_186 = arith.constant 2816 : index
    %236 = vector.load %arg9[%c1_185, %c2816_186] : memref<2x8192xf32, #tpu.memory_space<vmem>>, vector<1x128xf32>
    tpu.vector_store %arg9[%c1_185, %c2816_186], %235 {strides = array<i32>} : memref<2x8192xf32, #tpu.memory_space<vmem>>, vector<1x128xf32>,
    %237 = vector.extract_strided_slice %62 {offsets = [87, 0], sizes = [1, 128], strides = [1, 1]} : vector<128x128xf32> to vector<1x128xf32>
    %c1_187 = arith.constant 1 : index
    %c2944_188 = arith.constant 2944 : index
    %238 = vector.load %arg9[%c1_187, %c2944_188] : memref<2x8192xf32, #tpu.memory_space<vmem>>, vector<1x128xf32>
    tpu.vector_store %arg9[%c1_187, %c2944_188], %237 {strides = array<i32>} : memref<2x8192xf32, #tpu.memory_space<vmem>>, vector<1x128xf32>,
    %239 = vector.extract_strided_slice %62 {offsets = [88, 0], sizes = [1, 128], strides = [1, 1]} : vector<128x128xf32> to vector<1x128xf32>
    %c1_189 = arith.constant 1 : index
    %c3072_190 = arith.constant 3072 : index
    %240 = vector.load %arg9[%c1_189, %c3072_190] : memref<2x8192xf32, #tpu.memory_space<vmem>>, vector<1x128xf32>
    tpu.vector_store %arg9[%c1_189, %c3072_190], %239 {strides = array<i32>} : memref<2x8192xf32, #tpu.memory_space<vmem>>, vector<1x128xf32>,
    %241 = vector.extract_strided_slice %62 {offsets = [89, 0], sizes = [1, 128], strides = [1, 1]} : vector<128x128xf32> to vector<1x128xf32>
    %c1_191 = arith.constant 1 : index
    %c3200_192 = arith.constant 3200 : index
    %242 = vector.load %arg9[%c1_191, %c3200_192] : memref<2x8192xf32, #tpu.memory_space<vmem>>, vector<1x128xf32>
    tpu.vector_store %arg9[%c1_191, %c3200_192], %241 {strides = array<i32>} : memref<2x8192xf32, #tpu.memory_space<vmem>>, vector<1x128xf32>,
    %243 = vector.extract_strided_slice %62 {offsets = [90, 0], sizes = [1, 128], strides = [1, 1]} : vector<128x128xf32> to vector<1x128xf32>
    %c1_193 = arith.constant 1 : index
    %c3328_194 = arith.constant 3328 : index
    %244 = vector.load %arg9[%c1_193, %c3328_194] : memref<2x8192xf32, #tpu.memory_space<vmem>>, vector<1x128xf32>
    tpu.vector_store %arg9[%c1_193, %c3328_194], %243 {strides = array<i32>} : memref<2x8192xf32, #tpu.memory_space<vmem>>, vector<1x128xf32>,
    %245 = vector.extract_strided_slice %62 {offsets = [91, 0], sizes = [1, 128], strides = [1, 1]} : vector<128x128xf32> to vector<1x128xf32>
    %c1_195 = arith.constant 1 : index
    %c3456_196 = arith.constant 3456 : index
    %246 = vector.load %arg9[%c1_195, %c3456_196] : memref<2x8192xf32, #tpu.memory_space<vmem>>, vector<1x128xf32>
    tpu.vector_store %arg9[%c1_195, %c3456_196], %245 {strides = array<i32>} : memref<2x8192xf32, #tpu.memory_space<vmem>>, vector<1x128xf32>,
    %247 = vector.extract_strided_slice %62 {offsets = [92, 0], sizes = [1, 128], strides = [1, 1]} : vector<128x128xf32> to vector<1x128xf32>
    %c1_197 = arith.constant 1 : index
    %c3584_198 = arith.constant 3584 : index
    %248 = vector.load %arg9[%c1_197, %c3584_198] : memref<2x8192xf32, #tpu.memory_space<vmem>>, vector<1x128xf32>
    tpu.vector_store %arg9[%c1_197, %c3584_198], %247 {strides = array<i32>} : memref<2x8192xf32, #tpu.memory_space<vmem>>, vector<1x128xf32>,
    %249 = vector.extract_strided_slice %62 {offsets = [93, 0], sizes = [1, 128], strides = [1, 1]} : vector<128x128xf32> to vector<1x128xf32>
    %c1_199 = arith.constant 1 : index
    %c3712_200 = arith.constant 3712 : index
    %250 = vector.load %arg9[%c1_199, %c3712_200] : memref<2x8192xf32, #tpu.memory_space<vmem>>, vector<1x128xf32>
    tpu.vector_store %arg9[%c1_199, %c3712_200], %249 {strides = array<i32>} : memref<2x8192xf32, #tpu.memory_space<vmem>>, vector<1x128xf32>,
    %251 = vector.extract_strided_slice %62 {offsets = [94, 0], sizes = [1, 128], strides = [1, 1]} : vector<128x128xf32> to vector<1x128xf32>
    %c1_201 = arith.constant 1 : index
    %c3840_202 = arith.constant 3840 : index
    %252 = vector.load %arg9[%c1_201, %c3840_202] : memref<2x8192xf32, #tpu.memory_space<vmem>>, vector<1x128xf32>
    tpu.vector_store %arg9[%c1_201, %c3840_202], %251 {strides = array<i32>} : memref<2x8192xf32, #tpu.memory_space<vmem>>, vector<1x128xf32>,
    %253 = vector.extract_strided_slice %62 {offsets = [95, 0], sizes = [1, 128], strides = [1, 1]} : vector<128x128xf32> to vector<1x128xf32>
    %c1_203 = arith.constant 1 : index
    %c3968_204 = arith.constant 3968 : index
    %254 = vector.load %arg9[%c1_203, %c3968_204] : memref<2x8192xf32, #tpu.memory_space<vmem>>, vector<1x128xf32>
    tpu.vector_store %arg9[%c1_203, %c3968_204], %253 {strides = array<i32>} : memref<2x8192xf32, #tpu.memory_space<vmem>>, vector<1x128xf32>,
    %255 = vector.extract_strided_slice %62 {offsets = [96, 0], sizes = [1, 128], strides = [1, 1]} : vector<128x128xf32> to vector<1x128xf32>
    %c1_205 = arith.constant 1 : index
    %c4096_206 = arith.constant 4096 : index
    %256 = vector.load %arg9[%c1_205, %c4096_206] : memref<2x8192xf32, #tpu.memory_space<vmem>>, vector<1x128xf32>
    tpu.vector_store %arg9[%c1_205, %c4096_206], %255 {strides = array<i32>} : memref<2x8192xf32, #tpu.memory_space<vmem>>, vector<1x128xf32>,
    %257 = vector.extract_strided_slice %62 {offsets = [97, 0], sizes = [1, 128], strides = [1, 1]} : vector<128x128xf32> to vector<1x128xf32>
    %c1_207 = arith.constant 1 : index
    %c4224_208 = arith.constant 4224 : index
    %258 = vector.load %arg9[%c1_207, %c4224_208] : memref<2x8192xf32, #tpu.memory_space<vmem>>, vector<1x128xf32>
    tpu.vector_store %arg9[%c1_207, %c4224_208], %257 {strides = array<i32>} : memref<2x8192xf32, #tpu.memory_space<vmem>>, vector<1x128xf32>,
    %259 = vector.extract_strided_slice %62 {offsets = [98, 0], sizes = [1, 128], strides = [1, 1]} : vector<128x128xf32> to vector<1x128xf32>
    %c1_209 = arith.constant 1 : index
    %c4352_210 = arith.constant 4352 : index
    %260 = vector.load %arg9[%c1_209, %c4352_210] : memref<2x8192xf32, #tpu.memory_space<vmem>>, vector<1x128xf32>
    tpu.vector_store %arg9[%c1_209, %c4352_210], %259 {strides = array<i32>} : memref<2x8192xf32, #tpu.memory_space<vmem>>, vector<1x128xf32>,
    %261 = vector.extract_strided_slice %62 {offsets = [99, 0], sizes = [1, 128], strides = [1, 1]} : vector<128x128xf32> to vector<1x128xf32>
    %c1_211 = arith.constant 1 : index
    %c4480_212 = arith.constant 4480 : index
    %262 = vector.load %arg9[%c1_211, %c4480_212] : memref<2x8192xf32, #tpu.memory_space<vmem>>, vector<1x128xf32>
    tpu.vector_store %arg9[%c1_211, %c4480_212], %261 {strides = array<i32>} : memref<2x8192xf32, #tpu.memory_space<vmem>>, vector<1x128xf32>,
    %263 = vector.extract_strided_slice %62 {offsets = [100, 0], sizes = [1, 128], strides = [1, 1]} : vector<128x128xf32> to vector<1x128xf32>
    %c1_213 = arith.constant 1 : index
    %c4608_214 = arith.constant 4608 : index
    %264 = vector.load %arg9[%c1_213, %c4608_214] : memref<2x8192xf32, #tpu.memory_space<vmem>>, vector<1x128xf32>
    tpu.vector_store %arg9[%c1_213, %c4608_214], %263 {strides = array<i32>} : memref<2x8192xf32, #tpu.memory_space<vmem>>, vector<1x128xf32>,
    %265 = vector.extract_strided_slice %62 {offsets = [101, 0], sizes = [1, 128], strides = [1, 1]} : vector<128x128xf32> to vector<1x128xf32>
    %c1_215 = arith.constant 1 : index
    %c4736_216 = arith.constant 4736 : index
    %266 = vector.load %arg9[%c1_215, %c4736_216] : memref<2x8192xf32, #tpu.memory_space<vmem>>, vector<1x128xf32>
    tpu.vector_store %arg9[%c1_215, %c4736_216], %265 {strides = array<i32>} : memref<2x8192xf32, #tpu.memory_space<vmem>>, vector<1x128xf32>,
    %267 = vector.extract_strided_slice %62 {offsets = [102, 0], sizes = [1, 128], strides = [1, 1]} : vector<128x128xf32> to vector<1x128xf32>
    %c1_217 = arith.constant 1 : index
    %c4864_218 = arith.constant 4864 : index
    %268 = vector.load %arg9[%c1_217, %c4864_218] : memref<2x8192xf32, #tpu.memory_space<vmem>>, vector<1x128xf32>
    tpu.vector_store %arg9[%c1_217, %c4864_218], %267 {strides = array<i32>} : memref<2x8192xf32, #tpu.memory_space<vmem>>, vector<1x128xf32>,
    %269 = vector.extract_strided_slice %62 {offsets = [103, 0], sizes = [1, 128], strides = [1, 1]} : vector<128x128xf32> to vector<1x128xf32>
    %c1_219 = arith.constant 1 : index
    %c4992_220 = arith.constant 4992 : index
    %270 = vector.load %arg9[%c1_219, %c4992_220] : memref<2x8192xf32, #tpu.memory_space<vmem>>, vector<1x128xf32>
    tpu.vector_store %arg9[%c1_219, %c4992_220], %269 {strides = array<i32>} : memref<2x8192xf32, #tpu.memory_space<vmem>>, vector<1x128xf32>,
    %271 = vector.extract_strided_slice %62 {offsets = [104, 0], sizes = [1, 128], strides = [1, 1]} : vector<128x128xf32> to vector<1x128xf32>
    %c1_221 = arith.constant 1 : index
    %c5120_222 = arith.constant 5120 : index
    %272 = vector.load %arg9[%c1_221, %c5120_222] : memref<2x8192xf32, #tpu.memory_space<vmem>>, vector<1x128xf32>
    tpu.vector_store %arg9[%c1_221, %c5120_222], %271 {strides = array<i32>} : memref<2x8192xf32, #tpu.memory_space<vmem>>, vector<1x128xf32>,
    %273 = vector.extract_strided_slice %62 {offsets = [105, 0], sizes = [1, 128], strides = [1, 1]} : vector<128x128xf32> to vector<1x128xf32>
    %c1_223 = arith.constant 1 : index
    %c5248_224 = arith.constant 5248 : index
    %274 = vector.load %arg9[%c1_223, %c5248_224] : memref<2x8192xf32, #tpu.memory_space<vmem>>, vector<1x128xf32>
    tpu.vector_store %arg9[%c1_223, %c5248_224], %273 {strides = array<i32>} : memref<2x8192xf32, #tpu.memory_space<vmem>>, vector<1x128xf32>,
    %275 = vector.extract_strided_slice %62 {offsets = [106, 0], sizes = [1, 128], strides = [1, 1]} : vector<128x128xf32> to vector<1x128xf32>
    %c1_225 = arith.constant 1 : index
    %c5376_226 = arith.constant 5376 : index
    %276 = vector.load %arg9[%c1_225, %c5376_226] : memref<2x8192xf32, #tpu.memory_space<vmem>>, vector<1x128xf32>
    tpu.vector_store %arg9[%c1_225, %c5376_226], %275 {strides = array<i32>} : memref<2x8192xf32, #tpu.memory_space<vmem>>, vector<1x128xf32>,
    %277 = vector.extract_strided_slice %62 {offsets = [107, 0], sizes = [1, 128], strides = [1, 1]} : vector<128x128xf32> to vector<1x128xf32>
    %c1_227 = arith.constant 1 : index
    %c5504_228 = arith.constant 5504 : index
    %278 = vector.load %arg9[%c1_227, %c5504_228] : memref<2x8192xf32, #tpu.memory_space<vmem>>, vector<1x128xf32>
    tpu.vector_store %arg9[%c1_227, %c5504_228], %277 {strides = array<i32>} : memref<2x8192xf32, #tpu.memory_space<vmem>>, vector<1x128xf32>,
    %279 = vector.extract_strided_slice %62 {offsets = [108, 0], sizes = [1, 128], strides = [1, 1]} : vector<128x128xf32> to vector<1x128xf32>
    %c1_229 = arith.constant 1 : index
    %c5632_230 = arith.constant 5632 : index
    %280 = vector.load %arg9[%c1_229, %c5632_230] : memref<2x8192xf32, #tpu.memory_space<vmem>>, vector<1x128xf32>
    tpu.vector_store %arg9[%c1_229, %c5632_230], %279 {strides = array<i32>} : memref<2x8192xf32, #tpu.memory_space<vmem>>, vector<1x128xf32>,
    %281 = vector.extract_strided_slice %62 {offsets = [109, 0], sizes = [1, 128], strides = [1, 1]} : vector<128x128xf32> to vector<1x128xf32>
    %c1_231 = arith.constant 1 : index
    %c5760_232 = arith.constant 5760 : index
    %282 = vector.load %arg9[%c1_231, %c5760_232] : memref<2x8192xf32, #tpu.memory_space<vmem>>, vector<1x128xf32>
    tpu.vector_store %arg9[%c1_231, %c5760_232], %281 {strides = array<i32>} : memref<2x8192xf32, #tpu.memory_space<vmem>>, vector<1x128xf32>,
    %283 = vector.extract_strided_slice %62 {offsets = [110, 0], sizes = [1, 128], strides = [1, 1]} : vector<128x128xf32> to vector<1x128xf32>
    %c1_233 = arith.constant 1 : index
    %c5888_234 = arith.constant 5888 : index
    %284 = vector.load %arg9[%c1_233, %c5888_234] : memref<2x8192xf32, #tpu.memory_space<vmem>>, vector<1x128xf32>
    tpu.vector_store %arg9[%c1_233, %c5888_234], %283 {strides = array<i32>} : memref<2x8192xf32, #tpu.memory_space<vmem>>, vector<1x128xf32>,
    %285 = vector.extract_strided_slice %62 {offsets = [111, 0], sizes = [1, 128], strides = [1, 1]} : vector<128x128xf32> to vector<1x128xf32>
    %c1_235 = arith.constant 1 : index
    %c6016_236 = arith.constant 6016 : index
    %286 = vector.load %arg9[%c1_235, %c6016_236] : memref<2x8192xf32, #tpu.memory_space<vmem>>, vector<1x128xf32>
    tpu.vector_store %arg9[%c1_235, %c6016_236], %285 {strides = array<i32>} : memref<2x8192xf32, #tpu.memory_space<vmem>>, vector<1x128xf32>,
    %287 = vector.extract_strided_slice %62 {offsets = [112, 0], sizes = [1, 128], strides = [1, 1]} : vector<128x128xf32> to vector<1x128xf32>
    %c1_237 = arith.constant 1 : index
    %c6144_238 = arith.constant 6144 : index
    %288 = vector.load %arg9[%c1_237, %c6144_238] : memref<2x8192xf32, #tpu.memory_space<vmem>>, vector<1x128xf32>
    tpu.vector_store %arg9[%c1_237, %c6144_238], %287 {strides = array<i32>} : memref<2x8192xf32, #tpu.memory_space<vmem>>, vector<1x128xf32>,
    %289 = vector.extract_strided_slice %62 {offsets = [113, 0], sizes = [1, 128], strides = [1, 1]} : vector<128x128xf32> to vector<1x128xf32>
    %c1_239 = arith.constant 1 : index
    %c6272_240 = arith.constant 6272 : index
    %290 = vector.load %arg9[%c1_239, %c6272_240] : memref<2x8192xf32, #tpu.memory_space<vmem>>, vector<1x128xf32>
    tpu.vector_store %arg9[%c1_239, %c6272_240], %289 {strides = array<i32>} : memref<2x8192xf32, #tpu.memory_space<vmem>>, vector<1x128xf32>,
    %291 = vector.extract_strided_slice %62 {offsets = [114, 0], sizes = [1, 128], strides = [1, 1]} : vector<128x128xf32> to vector<1x128xf32>
    %c1_241 = arith.constant 1 : index
    %c6400_242 = arith.constant 6400 : index
    %292 = vector.load %arg9[%c1_241, %c6400_242] : memref<2x8192xf32, #tpu.memory_space<vmem>>, vector<1x128xf32>
    tpu.vector_store %arg9[%c1_241, %c6400_242], %291 {strides = array<i32>} : memref<2x8192xf32, #tpu.memory_space<vmem>>, vector<1x128xf32>,
    %293 = vector.extract_strided_slice %62 {offsets = [115, 0], sizes = [1, 128], strides = [1, 1]} : vector<128x128xf32> to vector<1x128xf32>
    %c1_243 = arith.constant 1 : index
    %c6528_244 = arith.constant 6528 : index
    %294 = vector.load %arg9[%c1_243, %c6528_244] : memref<2x8192xf32, #tpu.memory_space<vmem>>, vector<1x128xf32>
    tpu.vector_store %arg9[%c1_243, %c6528_244], %293 {strides = array<i32>} : memref<2x8192xf32, #tpu.memory_space<vmem>>, vector<1x128xf32>,
    %295 = vector.extract_strided_slice %62 {offsets = [116, 0], sizes = [1, 128], strides = [1, 1]} : vector<128x128xf32> to vector<1x128xf32>
    %c1_245 = arith.constant 1 : index
    %c6656_246 = arith.constant 6656 : index
    %296 = vector.load %arg9[%c1_245, %c6656_246] : memref<2x8192xf32, #tpu.memory_space<vmem>>, vector<1x128xf32>
    tpu.vector_store %arg9[%c1_245, %c6656_246], %295 {strides = array<i32>} : memref<2x8192xf32, #tpu.memory_space<vmem>>, vector<1x128xf32>,
    %297 = vector.extract_strided_slice %62 {offsets = [117, 0], sizes = [1, 128], strides = [1, 1]} : vector<128x128xf32> to vector<1x128xf32>
    %c1_247 = arith.constant 1 : index
    %c6784_248 = arith.constant 6784 : index
    %298 = vector.load %arg9[%c1_247, %c6784_248] : memref<2x8192xf32, #tpu.memory_space<vmem>>, vector<1x128xf32>
    tpu.vector_store %arg9[%c1_247, %c6784_248], %297 {strides = array<i32>} : memref<2x8192xf32, #tpu.memory_space<vmem>>, vector<1x128xf32>,
    %299 = vector.extract_strided_slice %62 {offsets = [118, 0], sizes = [1, 128], strides = [1, 1]} : vector<128x128xf32> to vector<1x128xf32>
    %c1_249 = arith.constant 1 : index
    %c6912_250 = arith.constant 6912 : index
    %300 = vector.load %arg9[%c1_249, %c6912_250] : memref<2x8192xf32, #tpu.memory_space<vmem>>, vector<1x128xf32>
    tpu.vector_store %arg9[%c1_249, %c6912_250], %299 {strides = array<i32>} : memref<2x8192xf32, #tpu.memory_space<vmem>>, vector<1x128xf32>,
    %301 = vector.extract_strided_slice %62 {offsets = [119, 0], sizes = [1, 128], strides = [1, 1]} : vector<128x128xf32> to vector<1x128xf32>
    %c1_251 = arith.constant 1 : index
    %c7040_252 = arith.constant 7040 : index
    %302 = vector.load %arg9[%c1_251, %c7040_252] : memref<2x8192xf32, #tpu.memory_space<vmem>>, vector<1x128xf32>
    tpu.vector_store %arg9[%c1_251, %c7040_252], %301 {strides = array<i32>} : memref<2x8192xf32, #tpu.memory_space<vmem>>, vector<1x128xf32>,
    %303 = vector.extract_strided_slice %62 {offsets = [120, 0], sizes = [1, 128], strides = [1, 1]} : vector<128x128xf32> to vector<1x128xf32>
    %c1_253 = arith.constant 1 : index
    %c7168_254 = arith.constant 7168 : index
    %304 = vector.load %arg9[%c1_253, %c7168_254] : memref<2x8192xf32, #tpu.memory_space<vmem>>, vector<1x128xf32>
    tpu.vector_store %arg9[%c1_253, %c7168_254], %303 {strides = array<i32>} : memref<2x8192xf32, #tpu.memory_space<vmem>>, vector<1x128xf32>,
    %305 = vector.extract_strided_slice %62 {offsets = [121, 0], sizes = [1, 128], strides = [1, 1]} : vector<128x128xf32> to vector<1x128xf32>
    %c1_255 = arith.constant 1 : index
    %c7296_256 = arith.constant 7296 : index
    %306 = vector.load %arg9[%c1_255, %c7296_256] : memref<2x8192xf32, #tpu.memory_space<vmem>>, vector<1x128xf32>
    tpu.vector_store %arg9[%c1_255, %c7296_256], %305 {strides = array<i32>} : memref<2x8192xf32, #tpu.memory_space<vmem>>, vector<1x128xf32>,
    %307 = vector.extract_strided_slice %62 {offsets = [122, 0], sizes = [1, 128], strides = [1, 1]} : vector<128x128xf32> to vector<1x128xf32>
    %c1_257 = arith.constant 1 : index
    %c7424_258 = arith.constant 7424 : index
    %308 = vector.load %arg9[%c1_257, %c7424_258] : memref<2x8192xf32, #tpu.memory_space<vmem>>, vector<1x128xf32>
    tpu.vector_store %arg9[%c1_257, %c7424_258], %307 {strides = array<i32>} : memref<2x8192xf32, #tpu.memory_space<vmem>>, vector<1x128xf32>,
    %309 = vector.extract_strided_slice %62 {offsets = [123, 0], sizes = [1, 128], strides = [1, 1]} : vector<128x128xf32> to vector<1x128xf32>
    %c1_259 = arith.constant 1 : index
    %c7552_260 = arith.constant 7552 : index
    %310 = vector.load %arg9[%c1_259, %c7552_260] : memref<2x8192xf32, #tpu.memory_space<vmem>>, vector<1x128xf32>
    tpu.vector_store %arg9[%c1_259, %c7552_260], %309 {strides = array<i32>} : memref<2x8192xf32, #tpu.memory_space<vmem>>, vector<1x128xf32>,
    %311 = vector.extract_strided_slice %62 {offsets = [124, 0], sizes = [1, 128], strides = [1, 1]} : vector<128x128xf32> to vector<1x128xf32>
    %c1_261 = arith.constant 1 : index
    %c7680_262 = arith.constant 7680 : index
    %312 = vector.load %arg9[%c1_261, %c7680_262] : memref<2x8192xf32, #tpu.memory_space<vmem>>, vector<1x128xf32>
    tpu.vector_store %arg9[%c1_261, %c7680_262], %311 {strides = array<i32>} : memref<2x8192xf32, #tpu.memory_space<vmem>>, vector<1x128xf32>,
    %313 = vector.extract_strided_slice %62 {offsets = [125, 0], sizes = [1, 128], strides = [1, 1]} : vector<128x128xf32> to vector<1x128xf32>
    %c1_263 = arith.constant 1 : index
    %c7808_264 = arith.constant 7808 : index
    %314 = vector.load %arg9[%c1_263, %c7808_264] : memref<2x8192xf32, #tpu.memory_space<vmem>>, vector<1x128xf32>
    tpu.vector_store %arg9[%c1_263, %c7808_264], %313 {strides = array<i32>} : memref<2x8192xf32, #tpu.memory_space<vmem>>, vector<1x128xf32>,
    %315 = vector.extract_strided_slice %62 {offsets = [126, 0], sizes = [1, 128], strides = [1, 1]} : vector<128x128xf32> to vector<1x128xf32>
    %c1_265 = arith.constant 1 : index
    %c7936_266 = arith.constant 7936 : index
    %316 = vector.load %arg9[%c1_265, %c7936_266] : memref<2x8192xf32, #tpu.memory_space<vmem>>, vector<1x128xf32>
    tpu.vector_store %arg9[%c1_265, %c7936_266], %315 {strides = array<i32>} : memref<2x8192xf32, #tpu.memory_space<vmem>>, vector<1x128xf32>,
    %317 = vector.extract_strided_slice %62 {offsets = [127, 0], sizes = [1, 128], strides = [1, 1]} : vector<128x128xf32> to vector<1x128xf32>
    %c1_267 = arith.constant 1 : index
    %c8064_268 = arith.constant 8064 : index
    %318 = vector.load %arg9[%c1_267, %c8064_268] : memref<2x8192xf32, #tpu.memory_space<vmem>>, vector<1x128xf32>
    tpu.vector_store %arg9[%c1_267, %c8064_268], %317 {strides = array<i32>} : memref<2x8192xf32, #tpu.memory_space<vmem>>, vector<1x128xf32>,
    %c0_269 = arith.constant 0 : index
    %c0_270 = arith.constant 0 : index
    %319 = vector.load %arg9[%c0_269, %c0_270] : memref<2x8192xf32, #tpu.memory_space<vmem>>, vector<2x8192xf32>
    %c0_271 = arith.constant 0 : index
    %c0_272 = arith.constant 0 : index
    %320 = vector.load %arg5[%c0_271, %c0_272] : memref<8192x16xf32, #tpu.memory_space<vmem>>, vector<8192x16xf32>
    %cst_273 = arith.constant dense<0.000000e+00> : vector<2x16xf32>
    %321 = tpu.matmul %319, %320, %cst_273 {dimension_numbers = #tpu.dot_dimension_numbers<[1], [0], [0], [1], [0, 0, 1, 1], [], []>} : vector<2x8192xf32>, vector<8192x16xf32>, vector<2x16xf32> -> vector<2x16xf32>
    %c0_274 = arith.constant 0 : index
    %c0_275 = arith.constant 0 : index
    %322 = vector.load %arg6[%c0_274, %c0_275] : memref<1x16xf32, #tpu.memory_space<vmem>>, vector<1x16xf32>
    %323 = vector.broadcast %322 : vector<1x16xf32> to vector<2x16xf32>
    %324 = arith.addf %321, %323 : vector<2x16xf32>
    %c0_276 = arith.constant 0 : index
    %c0_277 = arith.constant 0 : index
    %325 = vector.load %arg7[%c0_276, %c0_277] : memref<2x16xf32, #tpu.memory_space<vmem>>, vector<2x16xf32>
    tpu.vector_store %arg7[%c0_276, %c0_277], %324 {strides = array<i32>} : memref<2x16xf32, #tpu.memory_space<vmem>>, vector<2x16xf32>,
    return
  }
}

</mosaic_0001>

<bundles_post_ra>
// kernel: simple_cnn_forward.1
= control target key start
LH: loop header
LB: loop body
LE: loop exit
PB: predicated region body
PF: predicated region fallthrough
CT: control target
= control target key end

     0   :  { %vm103_vm0 = vcmask 1042432   ;;  %vm54_vm1 = vcmask 220160   ;;  %vm10109_vm2 = vmmov 1   ;;  %s14317_s0 = inlined_call_operand.vmem [shape: f32[128,27], index: 0, kind: input, shape index: {}]   ;;  %s14318_s1 = inlined_call_operand.vmem [shape: f32[27,64], index: 1, kind: input, shape index: {}]   ;;  %s14319_s2 = inlined_call_operand.vmem [shape: f32[1,64], index: 2, kind: input, shape index: {}]   ;;  %s14320_s3 = inlined_call_operand.vmem [shape: f32[576,128], index: 3, kind: input, shape index: {}]   ;;  %s14321_s4 = inlined_call_operand.vmem [shape: f32[1,128], index: 4, kind: input, shape index: {}]   ;;  %s14322_s5 = inlined_call_operand.vmem [shape: f32[8192,16], index: 5, kind: input, shape index: {}]   ;;  %s14323_s6 = inlined_call_operand.vmem [shape: f32[1,16], index: 6, kind: input, shape index: {}]   ;;  %s14324_s7 = inlined_call_operand.hbm [shape: f32[2,16], index: 7, kind: output, shape index: {}]  }
   0x1   :  { %v43_v0 = vld [vmem:[%s14318_s1] sm:$0xff]  ;;  %v44_v1 = vld [vmem:[%s14318_s1 + $0x8] sm:$0xff]  ;;  %v45_v2 = vld [vmem:[%s14318_s1 + $0x10] sm:$0xff] }
   0x2   :  { %v8735_v3 = vpack.c.bf16 %v44_v1, %v43_v0  ;;  %v46_v4 = vld [vmem:[%s14318_s1 + $0x18] sm:$0x7]  ;;  %v27_v5 = vld [vmem:[%s14317_s0] sm:$0xff]  ;;  %vm8740_vm3 = vmpackc.low %vm103_vm0, %vm10109_vm2 }
   0x3   :  { %v8739_v6 = vpack.c.bf16 %v46_v4, %v45_v2  ;;  %8351 = vmatprep.mubr.msk.f32.mxu0 %vm54_vm1, %v27_v5  ;;  %v367_v7 = vld [vmem:[%s14320_s3 + $0x40] sm:$0xff]  ;;  %v368_v8 = vld [vmem:[%s14320_s3 + $0x48] sm:$0xff] }
   0x4   :  { %8736 = vmatprep.subr.bf16.mxu0 %v8735_v3 }
   0x5   :  { %8738 = vmatpush3.bf16.msra.mxu0 %v8735_v3 }
   0x6   :  { %8741 = vmatprep.subr.msk.bf16.mxu0 %vm8740_vm3, %v8739_v6 }
   0x7   :  { %12 = vsyncpa [#allocation5], 0  ;;  %v28_v9 = vld [vmem:[%s14317_s0 + $0x8] sm:$0xff]  ;;  %v8745_v10 = vpack.c.bf16 %v368_v8, %v367_v7  ;;  %v29_v11 = vld [vmem:[%s14317_s0 + $0x10] sm:$0xff]  ;;  %vm268_vm4 = vcmask 523264   ;;  %vm270_vm5 = vcmask 517120  }
   0x8   :  { %v30_v12 = vld [vmem:[%s14317_s0 + $0x18] sm:$0xff]  ;;  %v31_v13 = vld [vmem:[%s14317_s0 + $0x20] sm:$0xff]  ;;  %v32_v14 = vld [vmem:[%s14317_s0 + $0x28] sm:$0xff]  ;;  %v10110_v30 = vmov 0.0   ;;  %vm6727_vm6 = vcmask 123904  }
   0x9   :  { %8744 = vmatpush3.bf16.msk.msra.mxu0 %vm8740_vm3, %v8739_v6  ;;  %8746 = vmatprep.subr.bf16.mxu1 %v8745_v10  ;;  %v33_v15 = vld [vmem:[%s14317_s0 + $0x30] sm:$0xff]  ;;  %v34_v16 = vld [vmem:[%s14317_s0 + $0x38] sm:$0xff]  ;;  %v35_v17 = vld [vmem:[%s14317_s0 + $0x40] sm:$0xff]  ;;  %274 = vst.msk [vmem:[#allocation2 + $0x20] sm:$0xff] %vm268_vm4, %v10110_v30 }
   0xa   :  { %8748 = vmatpush3.bf16.msra.mxu1 %v8745_v10  ;;  %v36_v18 = vld [vmem:[%s14317_s0 + $0x48] sm:$0xff]  ;;  %v37_v19 = vld [vmem:[%s14317_s0 + $0x50] sm:$0xff]  ;;  %v38_v20 = vld [vmem:[%s14317_s0 + $0x58] sm:$0xff]  ;;  %275 = vst.msk [vmem:[#allocation2 + $0x28] sm:$0x3] %vm270_vm5, %v10110_v30 }
   0xb   :  { %v39_v21 = vld [vmem:[%s14317_s0 + $0x60] sm:$0xff]  ;;  %v40_v22 = vld [vmem:[%s14317_s0 + $0x68] sm:$0xff]  ;;  %v41_v23 = vld [vmem:[%s14317_s0 + $0x70] sm:$0xff]  ;;  %269 = vst.msk [vmem:[#allocation2] sm:$0xff] %vm268_vm4, %v10110_v30 }
   0xc   :  { %8352 = vmatmul.mubr.msk.f32.vlgmr.msra.gmra.mrb[0].mxu0 %vm54_vm1, %v28_v9  ;;  %v42_v24 = vld [vmem:[%s14317_s0 + $0x78] sm:$0xff]  ;;  %v369_v25 = vld [vmem:[%s14320_s3 + $0x50] sm:$0xff]  ;;  %v371_v28 = vld [vmem:[%s14320_s3 + $0x60] sm:$0xff]  ;;  %271 = vst.msk [vmem:[#allocation2 + $0x8] sm:$0x3] %vm270_vm5, %v10110_v30 }
   0xd   :  { %8354 = vmatprep.mubr.msk.f32.mxu0 %vm54_vm1, %v29_v11  ;;  %v370_v26 = vld [vmem:[%s14320_s3 + $0x58] sm:$0xff]  ;;  %v372_v29 = vld [vmem:[%s14320_s3 + $0x68] sm:$0xff]  ;;  %272 = vst.msk [vmem:[#allocation2 + $0x10] sm:$0xff] %vm268_vm4, %v10110_v30  ;;  %276 = vst.msk [vmem:[#allocation2 + $0x30] sm:$0xff] %vm268_vm4, %v10110_v30 }
   0xe   :  { %v8749_v27 = vpack.c.bf16 %v370_v26, %v369_v25  ;;  %273 = vst.msk [vmem:[#allocation2 + $0x18] sm:$0x3] %vm270_vm5, %v10110_v30  ;;  %277 = vst.msk [vmem:[#allocation2 + $0x38] sm:$0x3] %vm270_vm5, %v10110_v30  ;;  %v8753_v31 = vpack.c.bf16 %v372_v29, %v371_v28  ;;  %v373_v32 = vld [vmem:[%s14320_s3 + $0x70] sm:$0xff]  ;;  %v374_v33 = vld [vmem:[%s14320_s3 + $0x78] sm:$0xff] }
   0xf   :  { %278 = vst.msk [vmem:[#allocation2 + $0x40] sm:$0xff] %vm268_vm4, %v10110_v30  ;;  %280 = vst.msk [vmem:[#allocation2 + $0x50] sm:$0xff] %vm268_vm4, %v10110_v30  ;;  %v8757_v34 = vpack.c.bf16 %v374_v33, %v373_v32  ;;  %v343_v36 = vld [vmem:[%s14320_s3] sm:$0xff]  ;;  %v344_v37 = vld [vmem:[%s14320_s3 + $0x8] sm:$0xff] }
  0x10   :  { %8355 = vmatmul.mubr.msk.f32.gmra.mrb[2].mxu0 %vm54_vm1, %v30_v12  ;;  %8750 = vmatprep.subr.bf16.mxu1 %v8749_v27  ;;  %279 = vst.msk [vmem:[#allocation2 + $0x48] sm:$0x3] %vm270_vm5, %v10110_v30  ;;  %281 = vst.msk [vmem:[#allocation2 + $0x58] sm:$0x3] %vm270_vm5, %v10110_v30  ;;  %v8761_v38 = vpack.c.bf16 %v344_v37, %v343_v36  ;;  %v10303_v39 = vld [vmem:[%s14319_s2] ss:$0 sm:$0xff] }
  0x11   :  { %8357 = vmatprep.mubr.msk.f32.mxu0 %vm54_vm1, %v31_v13  ;;  %8752 = vmatpush3.bf16.msra.mxu1 %v8749_v27  ;;  %282 = vst.msk [vmem:[#allocation2 + $0x60] sm:$0xff] %vm268_vm4, %v10110_v30  ;;  %284 = vst.msk [vmem:[#allocation2 + $0x70] sm:$0xff] %vm268_vm4, %v10110_v30  ;;  %v345_v55 = vld [vmem:[%s14320_s3 + $0x10] sm:$0xff]  ;;  %v346_v56 = vld [vmem:[%s14320_s3 + $0x18] sm:$0xff] }
  0x12   :  { %283 = vst.msk [vmem:[#allocation2 + $0x68] sm:$0x3] %vm270_vm5, %v10110_v30  ;;  %285 = vst.msk [vmem:[#allocation2 + $0x78] sm:$0x3] %vm270_vm5, %v10110_v30  ;;  %8754 = vmatprep.subr.bf16.mxu1 %v8753_v31  ;;  %v8765_v61 = vpack.c.bf16 %v346_v56, %v345_v55  ;;  %v347_v1 = vld [vmem:[%s14320_s3 + $0x20] sm:$0xff]  ;;  %v348_v2 = vld [vmem:[%s14320_s3 + $0x28] sm:$0xff] }
  0x13   :  { %286 = vst.msk [vmem:[#allocation2 + $0x80] sm:$0xff] %vm268_vm4, %v10110_v30  ;;  %288 = vst.msk [vmem:[#allocation2 + $0x90] sm:$0xff] %vm268_vm4, %v10110_v30  ;;  %v351_v35 = vld [vmem:[#allocation2 + $0x1] sm:$0xff]  ;;  %v8769_v8 = vpack.c.bf16 %v348_v2, %v347_v1  ;;  %v349_v12 = vld [vmem:[%s14320_s3 + $0x30] sm:$0xff] }
  0x14   :  { %8358 = vmatmul.mubr.msk.f32.gmra.mrb[4].mxu0 %vm54_vm1, %v32_v14  ;;  %287 = vst.msk [vmem:[#allocation2 + $0x88] sm:$0x3] %vm270_vm5, %v10110_v30  ;;  %289 = vst.msk [vmem:[#allocation2 + $0x98] sm:$0x3] %vm270_vm5, %v10110_v30  ;;  %8391 = vmatprep.mubr.msk.f32.mxu1 %vm268_vm4, %v351_v35  ;;  %v350_v13 = vld [vmem:[%s14320_s3 + $0x38] sm:$0xff]  ;;  %v781_v56 = vld [vmem:[%s14320_s3 + $0xa0] sm:$0xff] }
  0x15   :  { %8360 = vmatprep.mubr.msk.f32.mxu0 %vm54_vm1, %v33_v15  ;;  %290 = vst.msk [vmem:[#allocation2 + $0xa0] sm:$0xff] %vm268_vm4, %v10110_v30  ;;  %292 = vst.msk [vmem:[#allocation2 + $0xb0] sm:$0xff] %vm268_vm4, %v10110_v30  ;;  %8756 = vmatpush3.bf16.msra.mxu1 %v8753_v31 }
  0x16   :  { %291 = vst.msk [vmem:[#allocation2 + $0xa8] sm:$0x3] %vm270_vm5, %v10110_v30  ;;  %293 = vst.msk [vmem:[#allocation2 + $0xb8] sm:$0x3] %vm270_vm5, %v10110_v30  ;;  %8758 = vmatprep.subr.bf16.mxu1 %v8757_v34 }
  0x17   :  { %294 = vst.msk [vmem:[#allocation2 + $0xc0] sm:$0xff] %vm268_vm4, %v10110_v30  ;;  %296 = vst.msk [vmem:[#allocation2 + $0xd0] sm:$0xff] %vm268_vm4, %v10110_v30 }
  0x18   :  { %8361 = vmatmul.mubr.msk.f32.gmra.mrb[6].mxu0 %vm54_vm1, %v34_v16  ;;  %295 = vst.msk [vmem:[#allocation2 + $0xc8] sm:$0x3] %vm270_vm5, %v10110_v30  ;;  %297 = vst.msk [vmem:[#allocation2 + $0xd8] sm:$0x3] %vm270_vm5, %v10110_v30 }
  0x19   :  { %8363 = vmatprep.mubr.msk.f32.mxu0 %vm54_vm1, %v35_v17  ;;  %298 = vst.msk [vmem:[#allocation2 + $0xe0] sm:$0xff] %vm268_vm4, %v10110_v30  ;;  %300 = vst.msk [vmem:[#allocation2 + $0xf0] sm:$0xff] %vm268_vm4, %v10110_v30  ;;  %8760 = vmatpush3.bf16.msra.mxu1 %v8757_v34 }
  0x1a   :  { %299 = vst.msk [vmem:[#allocation2 + $0xe8] sm:$0x3] %vm270_vm5, %v10110_v30  ;;  %301 = vst.msk [vmem:[#allocation2 + $0xf8] sm:$0x3] %vm270_vm5, %v10110_v30  ;;  %8762 = vmatprep.subr.bf16.mxu1 %v8761_v38 }
  0x1b   :  { %302 = vst.msk [vmem:[#allocation2 + $0x100] sm:$0xff] %vm268_vm4, %v10110_v30  ;;  %304 = vst.msk [vmem:[#allocation2 + $0x110] sm:$0xff] %vm268_vm4, %v10110_v30 }
  0x1c   :  { %8364 = vmatmul.mubr.msk.f32.gmra.mrb[8].mxu0 %vm54_vm1, %v36_v18  ;;  %303 = vst.msk [vmem:[#allocation2 + $0x108] sm:$0x3] %vm270_vm5, %v10110_v30  ;;  %305 = vst.msk [vmem:[#allocation2 + $0x118] sm:$0x3] %vm270_vm5, %v10110_v30 }
  0x1d   :  { %8366 = vmatprep.mubr.msk.f32.mxu0 %vm54_vm1, %v37_v19  ;;  %306 = vst.msk [vmem:[#allocation2 + $0x120] sm:$0xff] %vm268_vm4, %v10110_v30  ;;  %308 = vst.msk [vmem:[#allocation2 + $0x130] sm:$0xff] %vm268_vm4, %v10110_v30  ;;  %v8773_v19 = vpack.c.bf16 %v350_v13, %v349_v12 }
  0x1e   :  { %307 = vst.msk [vmem:[#allocation2 + $0x128] sm:$0x3] %vm270_vm5, %v10110_v30  ;;  %309 = vst.msk [vmem:[#allocation2 + $0x138] sm:$0x3] %vm270_vm5, %v10110_v30  ;;  %v359_v30 = vld [vmem:[#allocation2 + $0xa1] sm:$0xff] }
  0x20   :  { %8367 = vmatmul.mubr.msk.f32.gmra.mrb[10].mxu0 %vm54_vm1, %v38_v20 }
  0x21   :  { %8369 = vmatprep.mubr.msk.f32.mxu0 %vm54_vm1, %v39_v21 }
  0x24   :  { %8370 = vmatmul.mubr.msk.f32.gmra.mrb[12].mxu0 %vm54_vm1, %v40_v22 }
  0x25   :  { %8372 = vmatprep.mubr.msk.f32.mxu0 %vm54_vm1, %v41_v23  ;;  %v777_v23 = vld [vmem:[%s14320_s3 + $0x80] sm:$0xff] }
  0x28   :  { %8373 = vmatmul.mubr.msk.f32.gmra.mrb[14].mxu0 %vm54_vm1, %v42_v24  ;;  %v778_v24 = vld [vmem:[%s14320_s3 + $0x88] sm:$0xff] }
  0x29   :  { %v8777_v31 = vpack.c.bf16 %v778_v24, %v777_v23 }
  0xdf   :  { %v8353_v40 = vpop.f32.mrb[0].mxu0 }
  0xe0   :  { %v179_v41 = vadd.f32 %v8353_v40, %v10303_v39  ;;  %v173_v42 = vpop.f32.mrb[1].mxu0 }
  0xe1   :  { %v174_v43 = vadd.f32 %v10303_v39, %v173_v42 }
  0xe2   :  { %v253_v44 = vmax.f32 %v179_v41, 0.0 }
  0xe3   :  { %v252_v45 = vmax.f32 %v174_v43, 0.0  ;;  %v8356_v46 = vpop.f32.mrb[2].mxu0 }
  0xe4   :  { %312 = vst.msk [vmem:[#allocation2 + $0x21] sm:$0xff] %vm268_vm4, %v253_v44  ;;  %v189_v47 = vadd.f32 %v8356_v46, %v10303_v39  ;;  %v183_v48 = vpop.f32.mrb[3].mxu0 }
  0xe5   :  { %311 = vst.msk [vmem:[#allocation2 + $0x11] sm:$0xff] %vm268_vm4, %v252_v45  ;;  %v184_v49 = vadd.f32 %v10303_v39, %v183_v48 }
  0xe6   :  { %v255_v50 = vmax.f32 %v189_v47, 0.0 }
  0xe7   :  { %v254_v51 = vmax.f32 %v184_v49, 0.0  ;;  %v8359_v52 = vpop.f32.mrb[4].mxu0 }
  0xe8   :  { %314 = vst.msk [vmem:[#allocation2 + $0x41] sm:$0xff] %vm268_vm4, %v255_v50  ;;  %v199_v53 = vadd.f32 %v8359_v52, %v10303_v39  ;;  %v193_v54 = vpop.f32.mrb[5].mxu0  ;;  %v327_v50 = vld [vmem:[#allocation2] sm:$0xff]  ;;  %v779_v52 = vld [vmem:[%s14320_s3 + $0x90] sm:$0xff] }
  0xe9   :  { %313 = vst.msk [vmem:[#allocation2 + $0x31] sm:$0xff] %vm268_vm4, %v254_v51  ;;  %v194_v57 = vadd.f32 %v10303_v39, %v193_v54 }
  0xea   :  { %v257_v58 = vmax.f32 %v199_v53, 0.0  ;;  %v780_v53 = vld [vmem:[%s14320_s3 + $0x98] sm:$0xff] }
  0xeb   :  { %v256_v59 = vmax.f32 %v194_v57, 0.0  ;;  %v8362_v60 = vpop.f32.mrb[6].mxu0  ;;  %v10335_v4 = vld [vmem:[#allocation2 + $0x21] sm:$0xff]  ;;  %v8781_v54 = vpack.c.bf16 %v780_v53, %v779_v52 }
  0xec   :  { %316 = vst.msk [vmem:[#allocation2 + $0x61] sm:$0xff] %vm268_vm4, %v257_v58  ;;  %v209_v62 = vadd.f32 %v8362_v60, %v10303_v39  ;;  %v203_v63 = vpop.f32.mrb[7].mxu0  ;;  %v10323_v0 = vld [vmem:[#allocation2 + $0x11] sm:$0xff]  ;;  %v782_v57 = vld [vmem:[%s14320_s3 + $0xa8] sm:$0xff]  ;;  %v10435_v58 = vld [vmem:[#allocation2 + $0x20] sm:$0xff] }
  0xed   :  { %315 = vst.msk [vmem:[#allocation2 + $0x51] sm:$0xff] %vm268_vm4, %v256_v59  ;;  %v204_v3 = vadd.f32 %v10303_v39, %v203_v63  ;;  %8392 = vmatmul.mubr.msk.f32.vlgmr.msra.gmra.mrb[0].mxu1 %vm268_vm4, %v10323_v0  ;;  %v10425_v55 = vld [vmem:[#allocation2 + $0x10] sm:$0xff]  ;;  %v8785_v59 = vpack.c.bf16 %v782_v57, %v781_v56 }
  0xee   :  { %v259_v5 = vmax.f32 %v209_v62, 0.0  ;;  %8764 = vmatpush3.bf16.msra.mxu1 %v8761_v38  ;;  %8394 = vmatprep.mubr.msk.f32.mxu1 %vm268_vm4, %v10335_v4  ;;  %v784_v62 = vld [vmem:[%s14320_s3 + $0xb8] sm:$0xff] }
  0xef   :  { %v258_v6 = vmax.f32 %v204_v3, 0.0  ;;  %v8365_v7 = vpop.f32.mrb[8].mxu0  ;;  %8766 = vmatprep.subr.bf16.mxu1 %v8765_v61  ;;  %v10353_v15 = vld [vmem:[#allocation2 + $0x41] sm:$0xff]  ;;  %v10507_v24 = vld [vmem:[#allocation2 + $0x12] sm:$0xff] }
  0xf0   :  { %318 = vst.msk [vmem:[#allocation2 + $0x81] sm:$0xff] %vm268_vm4, %v259_v5  ;;  %v219_v9 = vadd.f32 %v8365_v7, %v10303_v39  ;;  %v213_v10 = vpop.f32.mrb[9].mxu0  ;;  %v10341_v11 = vld [vmem:[#allocation2 + $0x31] sm:$0xff]  ;;  %v10449_v63 = vld [vmem:[#allocation2 + $0x40] sm:$0xff]  ;;  %v1011_v5 = vld [vmem:[%s14320_s3 + $0xc8] sm:$0xff] }
  0xf1   :  { %317 = vst.msk [vmem:[#allocation2 + $0x71] sm:$0xff] %vm268_vm4, %v258_v6  ;;  %v214_v14 = vadd.f32 %v10303_v39, %v213_v10  ;;  %8395 = vmatmul.mubr.msk.f32.gmra.mrb[2].mxu1 %vm268_vm4, %v10341_v11  ;;  %v10439_v60 = vld [vmem:[#allocation2 + $0x30] sm:$0xff]  ;;  %v1010_v3 = vld [vmem:[%s14320_s3 + $0xc0] sm:$0xff] }
  0xf2   :  { %v261_v16 = vmax.f32 %v219_v9, 0.0  ;;  %8397 = vmatprep.mubr.msk.f32.mxu1 %vm268_vm4, %v10353_v15  ;;  %8768 = vmatpush3.bf16.msra.mxu1 %v8765_v61  ;;  %v783_v61 = vld [vmem:[%s14320_s3 + $0xb0] sm:$0xff]  ;;  %v335_v7 = vld [vmem:[#allocation2 + $0xa0] sm:$0xff] }
  0xf3   :  { %v260_v17 = vmax.f32 %v214_v14, 0.0  ;;  %v8368_v18 = vpop.f32.mrb[10].mxu0  ;;  %8770 = vmatprep.subr.bf16.mxu1 %v8769_v8  ;;  %v10371_v26 = vld [vmem:[#allocation2 + $0x61] sm:$0xff]  ;;  %v8789_v1 = vpack.c.bf16 %v784_v62, %v783_v61  ;;  %v1246_v61 = vld [vmem:[%s14320_s3 + $0x118] sm:$0xff] }
  0xf4   :  { %320 = vst.msk [vmem:[#allocation2 + $0xc1] sm:$0xff] %vm268_vm4, %v261_v16  ;;  %v229_v20 = vadd.f32 %v8368_v18, %v10303_v39  ;;  %v223_v21 = vpop.f32.mrb[11].mxu0  ;;  %v10359_v22 = vld [vmem:[#allocation2 + $0x51] sm:$0xff]  ;;  %v10463_v6 = vld [vmem:[#allocation2 + $0x60] sm:$0xff] }
  0xf5   :  { %319 = vst.msk [vmem:[#allocation2 + $0xb1] sm:$0xff] %vm268_vm4, %v260_v17  ;;  %v224_v25 = vadd.f32 %v10303_v39, %v223_v21  ;;  %8398 = vmatmul.mubr.msk.f32.gmra.mrb[4].mxu1 %vm268_vm4, %v10359_v22  ;;  %v10453_v2 = vld [vmem:[#allocation2 + $0x50] sm:$0xff]  ;;  %v761_v18 = vld [vmem:[#allocation2 + $0x2] sm:$0xff]  ;;  %v1013_v21 = vld [vmem:[%s14320_s3 + $0xd8] sm:$0xff] }
  0xf6   :  { %v263_v27 = vmax.f32 %v229_v20, 0.0  ;;  %8400 = vmatprep.mubr.msk.f32.mxu1 %vm268_vm4, %v10371_v26  ;;  %8772 = vmatpush3.bf16.msra.mxu1 %v8769_v8  ;;  %v8793_v8 = vpack.c.bf16 %v1011_v5, %v1010_v3  ;;  %v1012_v20 = vld [vmem:[%s14320_s3 + $0xd0] sm:$0xff]  ;;  %v1248_v3 = vld [vmem:[%s14320_s3 + $0x128] sm:$0xff] }
  0xf7   :  { %v262_v28 = vmax.f32 %v224_v25, 0.0  ;;  %v8371_v29 = vpop.f32.mrb[12].mxu0  ;;  %8774 = vmatprep.subr.bf16.mxu1 %v8773_v19  ;;  %v8797_v23 = vpack.c.bf16 %v1013_v21, %v1012_v20  ;;  %v1014_v25 = vld [vmem:[%s14320_s3 + $0xe0] sm:$0xff]  ;;  %v1477_v20 = vld [vmem:[%s14320_s3 + $0x148] sm:$0xff] }
  0xf8   :  { %322 = vst.msk [vmem:[#allocation2 + $0xe1] sm:$0xff] %vm268_vm4, %v263_v27  ;;  %v239_v32 = vadd.f32 %v8371_v29, %v10303_v39  ;;  %v233_v33 = vpop.f32.mrb[13].mxu0  ;;  %v10377_v34 = vld [vmem:[#allocation2 + $0x71] sm:$0xff]  ;;  %v1015_v27 = vld [vmem:[%s14320_s3 + $0xe8] sm:$0xff] }
  0xf9   :  { %321 = vst.msk [vmem:[#allocation2 + $0xd1] sm:$0xff] %vm268_vm4, %v262_v28  ;;  %v234_v35 = vadd.f32 %v10303_v39, %v233_v33  ;;  %8401 = vmatmul.mubr.msk.f32.gmra.mrb[6].mxu1 %vm268_vm4, %v10377_v34  ;;  %v10467_v9 = vld [vmem:[#allocation2 + $0x70] sm:$0xff]  ;;  %v10517_v28 = vld [vmem:[#allocation2 + $0x22] sm:$0xff]  ;;  %v8801_v29 = vpack.c.bf16 %v1015_v27, %v1014_v25  ;;  %v1479_v27 = vld [vmem:[%s14320_s3 + $0x158] sm:$0xff] }
  0xfa   :  { %v265_v36 = vmax.f32 %v239_v32, 0.0  ;;  %8403 = vmatprep.mubr.msk.f32.mxu1 %vm268_vm4, %v359_v30  ;;  %8776 = vmatpush3.bf16.msra.mxu1 %v8773_v19  ;;  %v10521_v30 = vld [vmem:[#allocation2 + $0x32] sm:$0xff]  ;;  %v10531_v33 = vld [vmem:[#allocation2 + $0x42] sm:$0xff] }
  0xfb   :  { %v264_v37 = vmax.f32 %v234_v35, 0.0  ;;  %v8374_v38 = vpop.f32.mrb[14].mxu0  ;;  %8778 = vmatprep.subr.bf16.mxu1 %v8777_v31  ;;  %v10392_v44 = vld [vmem:[#allocation2 + $0xc1] sm:$0xff]  ;;  %v1017_v32 = vld [vmem:[%s14320_s3 + $0xf8] sm:$0xff]  ;;  %v1478_v25 = vld [vmem:[%s14320_s3 + $0x150] sm:$0xff] }
  0xfc   :  { %324 = vst.msk [vmem:[#allocation2 + $0x101] sm:$0xff] %vm268_vm4, %v265_v36  ;;  %v249_v40 = vadd.f32 %v8374_v38, %v10303_v39  ;;  %v243_v41 = vpop.f32.mrb[15].mxu0  ;;  %v10386_v42 = vld [vmem:[#allocation2 + $0xb1] sm:$0xff]  ;;  %v10476_v12 = vld [vmem:[#allocation2 + $0xc0] sm:$0xff]  ;;  %v1244_v38 = vld [vmem:[%s14320_s3 + $0x108] sm:$0xff] }
  0xfd   :  { %323 = vst.msk [vmem:[#allocation2 + $0xf1] sm:$0xff] %vm268_vm4, %v264_v37  ;;  %v244_v43 = vadd.f32 %v10303_v39, %v243_v41  ;;  %8404 = vmatmul.mubr.msk.f32.gmra.mrb[8].mxu1 %vm268_vm4, %v10386_v42  ;;  %v10472_v10 = vld [vmem:[#allocation2 + $0xb0] sm:$0xff]  ;;  %v1243_v37 = vld [vmem:[%s14320_s3 + $0x100] sm:$0xff] }
  0xfe   :  { %v267_v45 = vmax.f32 %v249_v40, 0.0  ;;  %8406 = vmatprep.mubr.msk.f32.mxu1 %vm268_vm4, %v10392_v44  ;;  %v10535_v36 = vld [vmem:[#allocation2 + $0x52] sm:$0xff]  ;;  %v10545_v40 = vld [vmem:[#allocation2 + $0x62] sm:$0xff] }
  0xff   :  { %v266_v46 = vmax.f32 %v244_v43, 0.0  ;;  %v10402_v39 = vld [vmem:[#allocation2 + $0xe1] sm:$0xff]  ;;  %v8809_v43 = vpack.c.bf16 %v1244_v38, %v1243_v37  ;;  %v1483_v37 = vld [vmem:[%s14320_s3 + $0x178] sm:$0xff] }
 0x100   :  { %326 = vst.msk [vmem:[#allocation2 + $0x121] sm:$0xff] %vm268_vm4, %v267_v45  ;;  %v10397_v47 = vld [vmem:[#allocation2 + $0xd1] sm:$0xff]  ;;  %v10484_v14 = vld [vmem:[#allocation2 + $0xe0] sm:$0xff] }
 0x101   :  { %325 = vst.msk [vmem:[#allocation2 + $0x111] sm:$0xff] %vm268_vm4, %v266_v46  ;;  %8407 = vmatmul.mubr.msk.f32.gmra.mrb[10].mxu1 %vm268_vm4, %v10397_v47  ;;  %v10480_v13 = vld [vmem:[#allocation2 + $0xd0] sm:$0xff]  ;;  %v769_v41 = vld [vmem:[#allocation2 + $0xa2] sm:$0xff] }
 0x102   :  { %8409 = vmatprep.mubr.msk.f32.mxu1 %vm268_vm4, %v10402_v39  ;;  %v10549_v45 = vld [vmem:[#allocation2 + $0x72] sm:$0xff]  ;;  %v10566_v53 = vld [vmem:[#allocation2 + $0xe2] sm:$0xff] }
 0x103   :  { %v10410_v49 = vld [vmem:[#allocation2 + $0x101] sm:$0xff]  ;;  %v10554_v46 = vld [vmem:[#allocation2 + $0xb2] sm:$0xff] }
 0x104   :  { %v10406_v48 = vld [vmem:[#allocation2 + $0xf1] sm:$0xff]  ;;  %v10492_v17 = vld [vmem:[#allocation2 + $0x100] sm:$0xff] }
 0x105   :  { %8410 = vmatmul.mubr.msk.f32.gmra.mrb[12].mxu1 %vm268_vm4, %v10406_v48  ;;  %v10488_v16 = vld [vmem:[#allocation2 + $0xf0] sm:$0xff]  ;;  %v10574_v56 = vld [vmem:[#allocation2 + $0x102] sm:$0xff] }
 0x106   :  { %8412 = vmatprep.mubr.msk.f32.mxu1 %vm268_vm4, %v10410_v49  ;;  %v10562_v52 = vld [vmem:[#allocation2 + $0xd2] sm:$0xff] }
 0x108   :  { %v10414_v51 = vld [vmem:[#allocation2 + $0x111] sm:$0xff] }
 0x109   :  { %8413 = vmatmul.mubr.msk.f32.gmra.mrb[14].mxu1 %vm268_vm4, %v10414_v51  ;;  %v10496_v19 = vld [vmem:[#allocation2 + $0x110] sm:$0xff] }
 0x10a   :  { %8431 = vmatprep.mubr.msk.f32.mxu1 %vm268_vm4, %v327_v50  ;;  %v10558_v50 = vld [vmem:[#allocation2 + $0xc2] sm:$0xff]  ;;  %v10578_v57 = vld [vmem:[#allocation2 + $0x112] sm:$0xff] }
 0x10d   :  { %8432 = vmatmul.mubr.msk.f32.vlgmr.msra.gmra.mrb[0].mxu1 %vm268_vm4, %v10425_v55 }
 0x10e   :  { %8780 = vmatpush3.bf16.msra.mxu1 %v8777_v31  ;;  %8434 = vmatprep.mubr.msk.f32.mxu1 %vm268_vm4, %v10435_v58  ;;  %v1016_v31 = vld [vmem:[%s14320_s3 + $0xf0] sm:$0xff] }
 0x10f   :  { %8782 = vmatprep.subr.bf16.mxu1 %v8781_v54  ;;  %v8805_v35 = vpack.c.bf16 %v1017_v32, %v1016_v31  ;;  %v1480_v31 = vld [vmem:[%s14320_s3 + $0x160] sm:$0xff]  ;;  %v1481_v32 = vld [vmem:[%s14320_s3 + $0x168] sm:$0xff] }
 0x111   :  { %8435 = vmatmul.mubr.msk.f32.gmra.mrb[2].mxu1 %vm268_vm4, %v10439_v60 }
 0x112   :  { %8437 = vmatprep.mubr.msk.f32.mxu1 %vm268_vm4, %v10449_v63  ;;  %8784 = vmatpush3.bf16.msra.mxu1 %v8781_v54  ;;  %v10570_v54 = vld [vmem:[#allocation2 + $0xf2] sm:$0xff] }
 0x113   :  { %8786 = vmatprep.subr.bf16.mxu1 %v8785_v59 }
 0x115   :  { %8438 = vmatmul.mubr.msk.f32.gmra.mrb[4].mxu1 %vm268_vm4, %v10453_v2 }
 0x116   :  { %8440 = vmatprep.mubr.msk.f32.mxu1 %vm268_vm4, %v10463_v6  ;;  %8788 = vmatpush3.bf16.msra.mxu1 %v8785_v59  ;;  %v1245_v59 = vld [vmem:[%s14320_s3 + $0x110] sm:$0xff] }
 0x117   :  { %8790 = vmatprep.subr.bf16.mxu1 %v8789_v1  ;;  %v8813_v62 = vpack.c.bf16 %v1246_v61, %v1245_v59  ;;  %v10680_v61 = vld [vmem:[#allocation2 + $0x81] sm:$0xff] }
 0x119   :  { %8441 = vmatmul.mubr.msk.f32.gmra.mrb[6].mxu1 %vm268_vm4, %v10467_v9 }
 0x11a   :  { %8443 = vmatprep.mubr.msk.f32.mxu1 %vm268_vm4, %v335_v7  ;;  %8792 = vmatpush3.bf16.msra.mxu1 %v8789_v1  ;;  %v1247_v1 = vld [vmem:[%s14320_s3 + $0x120] sm:$0xff]  ;;  %v1250_v7 = vld [vmem:[%s14320_s3 + $0x138] sm:$0xff] }
 0x11b   :  { %8794 = vmatprep.subr.bf16.mxu1 %v8793_v8  ;;  %v8817_v5 = vpack.c.bf16 %v1248_v3, %v1247_v1  ;;  %v1713_v1 = vld [vmem:[%s14320_s3 + $0x198] sm:$0xff] }
 0x11d   :  { %8444 = vmatmul.mubr.msk.f32.gmra.mrb[8].mxu1 %vm268_vm4, %v10472_v10 }
 0x11e   :  { %8446 = vmatprep.mubr.msk.f32.mxu1 %vm268_vm4, %v10476_v12 }
 0x121   :  { %8447 = vmatmul.mubr.msk.f32.gmra.mrb[10].mxu1 %vm268_vm4, %v10480_v13 }
 0x122   :  { %8449 = vmatprep.mubr.msk.f32.mxu1 %vm268_vm4, %v10484_v14 }
 0x125   :  { %8450 = vmatmul.mubr.msk.f32.gmra.mrb[12].mxu1 %vm268_vm4, %v10488_v16 }
 0x126   :  { %8452 = vmatprep.mubr.msk.f32.mxu1 %vm268_vm4, %v10492_v17 }
 0x129   :  { %8453 = vmatmul.mubr.msk.f32.gmra.mrb[14].mxu1 %vm268_vm4, %v10496_v19 }
 0x12a   :  { %8471 = vmatprep.mubr.msk.f32.mxu1 %vm268_vm4, %v761_v18  ;;  %v1476_v18 = vld [vmem:[%s14320_s3 + $0x140] sm:$0xff] }
 0x12b   :  { %v8825_v21 = vpack.c.bf16 %v1477_v20, %v1476_v18  ;;  %v1943_v20 = vld [vmem:[%s14320_s3 + $0x1c0] sm:$0xff] }
 0x12d   :  { %8472 = vmatmul.mubr.msk.f32.vlgmr.msra.gmra.mrb[0].mxu1 %vm268_vm4, %v10507_v24 }
 0x12e   :  { %8796 = vmatpush3.bf16.msra.mxu1 %v8793_v8  ;;  %8474 = vmatprep.mubr.msk.f32.mxu1 %vm268_vm4, %v10517_v28 }
 0x12f   :  { %8798 = vmatprep.subr.bf16.mxu1 %v8797_v23 }
 0x131   :  { %8475 = vmatmul.mubr.msk.f32.gmra.mrb[2].mxu1 %vm268_vm4, %v10521_v30 }
 0x132   :  { %8477 = vmatprep.mubr.msk.f32.mxu1 %vm268_vm4, %v10531_v33  ;;  %8800 = vmatpush3.bf16.msra.mxu1 %v8797_v23  ;;  %v10620_v23 = vld [vmem:[#allocation2 + $0x80] sm:$0xff] }
 0x133   :  { %8802 = vmatprep.subr.bf16.mxu1 %v8801_v29 }
 0x135   :  { %8478 = vmatmul.mubr.msk.f32.gmra.mrb[4].mxu1 %vm268_vm4, %v10535_v36 }
 0x136   :  { %8480 = vmatprep.mubr.msk.f32.mxu1 %vm268_vm4, %v10545_v40  ;;  %8804 = vmatpush3.bf16.msra.mxu1 %v8801_v29  ;;  %v8829_v29 = vpack.c.bf16 %v1479_v27, %v1478_v25  ;;  %v10740_v27 = vld [vmem:[#allocation2 + $0x82] sm:$0xff] }
 0x137   :  { %8806 = vmatprep.subr.bf16.mxu1 %v8805_v35 }
 0x139   :  { %8481 = vmatmul.mubr.msk.f32.gmra.mrb[6].mxu1 %vm268_vm4, %v10549_v45 }
 0x13a   :  { %8483 = vmatprep.mubr.msk.f32.mxu1 %vm268_vm4, %v769_v41  ;;  %8808 = vmatpush3.bf16.msra.mxu1 %v8805_v35  ;;  %v8833_v35 = vpack.c.bf16 %v1481_v32, %v1480_v31  ;;  %v1710_v41 = vld [vmem:[%s14320_s3 + $0x180] sm:$0xff]  ;;  %v1946_v31 = vld [vmem:[%s14320_s3 + $0x1d8] sm:$0xff] }
 0x13b   :  { %8810 = vmatprep.subr.bf16.mxu1 %v8809_v43 }
 0x13d   :  { %8484 = vmatmul.mubr.msk.f32.gmra.mrb[8].mxu1 %vm268_vm4, %v10554_v46 }
 0x13e   :  { %8486 = vmatprep.mubr.msk.f32.mxu1 %vm268_vm4, %v10558_v50 }
 0x141   :  { %8487 = vmatmul.mubr.msk.f32.gmra.mrb[10].mxu1 %vm268_vm4, %v10562_v52 }
 0x142   :  { %8489 = vmatprep.mubr.msk.f32.mxu1 %vm268_vm4, %v10566_v53 }
 0x145   :  { %8490 = vmatmul.mubr.msk.f32.gmra.mrb[12].mxu1 %vm268_vm4, %v10570_v54 }
 0x146   :  { %8492 = vmatprep.mubr.msk.f32.mxu1 %vm268_vm4, %v10574_v56 }
 0x149   :  { %8493 = vmatmul.mubr.msk.f32.gmra.mrb[14].mxu1 %vm268_vm4, %v10578_v57 }
 0x14a   :  { %8511 = vmatprep.mubr.msk.f32.mxu1 %vm268_vm4, %v10425_v55  ;;  %v1249_v55 = vld [vmem:[%s14320_s3 + $0x130] sm:$0xff] }
 0x14b   :  { %v8821_v8 = vpack.c.bf16 %v1250_v7, %v1249_v55  ;;  %v1715_v55 = vld [vmem:[%s14320_s3 + $0x1a8] sm:$0xff] }
 0x14d   :  { %8512 = vmatmul.mubr.msk.f32.vlgmr.msra.gmra.mrb[0].mxu1 %vm268_vm4, %v10435_v58 }
 0x14e   :  { %8812 = vmatpush3.bf16.msra.mxu1 %v8809_v43  ;;  %8514 = vmatprep.mubr.msk.f32.mxu1 %vm268_vm4, %v10439_v60  ;;  %v1711_v43 = vld [vmem:[%s14320_s3 + $0x188] sm:$0xff] }
 0x14f   :  { %8814 = vmatprep.subr.bf16.mxu1 %v8813_v62  ;;  %v8841_v59 = vpack.c.bf16 %v1711_v43, %v1710_v41  ;;  %v2177_v41 = vld [vmem:[%s14320_s3 + $0x208] sm:$0xff] }
 0x150   :  { %v3125_v43 = vld [vmem:[%s14322_s5 + $0xa8] sm:$0xff] }
 0x151   :  { %8515 = vmatmul.mubr.msk.f32.gmra.mrb[2].mxu1 %vm268_vm4, %v10449_v63 }
 0x152   :  { %8517 = vmatprep.mubr.msk.f32.mxu1 %vm268_vm4, %v10453_v2  ;;  %8816 = vmatpush3.bf16.msra.mxu1 %v8813_v62  ;;  %v1712_v62 = vld [vmem:[%s14320_s3 + $0x190] sm:$0xff] }
 0x153   :  { %8818 = vmatprep.subr.bf16.mxu1 %v8817_v5  ;;  %v8845_v3 = vpack.c.bf16 %v1713_v1, %v1712_v62  ;;  %v3410_v1 = vld [vmem:[%s14322_s5 + $0x990] sm:$0xff] }
 0x155   :  { %8518 = vmatmul.mubr.msk.f32.gmra.mrb[4].mxu1 %vm268_vm4, %v10463_v6 }
 0x156   :  { %8520 = vmatprep.mubr.msk.f32.mxu1 %vm268_vm4, %v10467_v9  ;;  %8820 = vmatpush3.bf16.msra.mxu1 %v8817_v5  ;;  %v1714_v5 = vld [vmem:[%s14320_s3 + $0x1a0] sm:$0xff] }
 0x157   :  { %8822 = vmatprep.subr.bf16.mxu1 %v8821_v8  ;;  %v8849_v7 = vpack.c.bf16 %v1715_v55, %v1714_v5  ;;  %v3394_v55 = vld [vmem:[%s14322_s5 + $0x910] sm:$0xff] }
 0x159   :  { %8521 = vmatmul.mubr.msk.f32.gmra.mrb[6].mxu1 %vm268_vm4, %v10620_v23 }
 0x15a   :  { %8523 = vmatprep.mubr.msk.f32.mxu1 %vm268_vm4, %v10472_v10  ;;  %8824 = vmatpush3.bf16.msra.mxu1 %v8821_v8  ;;  %v10638_v10 = vld [vmem:[#allocation2 + $0x120] sm:$0xff]  ;;  %v1717_v8 = vld [vmem:[%s14320_s3 + $0x1b8] sm:$0xff] }
 0x15b   :  { %8826 = vmatprep.subr.bf16.mxu1 %v8825_v21 }
 0x15d   :  { %8524 = vmatmul.mubr.msk.f32.gmra.mrb[8].mxu1 %vm268_vm4, %v10476_v12 }
 0x15e   :  { %8526 = vmatprep.mubr.msk.f32.mxu1 %vm268_vm4, %v10480_v13 }
 0x161   :  { %8527 = vmatmul.mubr.msk.f32.gmra.mrb[10].mxu1 %vm268_vm4, %v10484_v14 }
 0x162   :  { %8529 = vmatprep.mubr.msk.f32.mxu1 %vm268_vm4, %v10488_v16 }
 0x165   :  { %8530 = vmatmul.mubr.msk.f32.gmra.mrb[12].mxu1 %vm268_vm4, %v10492_v17 }
 0x166   :  { %8532 = vmatprep.mubr.msk.f32.mxu1 %vm268_vm4, %v10496_v19 }
 0x169   :  { %8533 = vmatmul.mubr.msk.f32.gmra.mrb[14].mxu1 %vm268_vm4, %v10638_v10 }
 0x16a   :  { %8551 = vmatprep.mubr.msk.f32.mxu1 %vm268_vm4, %v10323_v0  ;;  %v1482_v0 = vld [vmem:[%s14320_s3 + $0x170] sm:$0xff] }
 0x16b   :  { %v8837_v38 = vpack.c.bf16 %v1483_v37, %v1482_v0  ;;  %v1948_v0 = vld [vmem:[%s14320_s3 + $0x1e8] sm:$0xff] }
 0x16d   :  { %8552 = vmatmul.mubr.msk.f32.vlgmr.msra.gmra.mrb[0].mxu1 %vm268_vm4, %v10335_v4 }
 0x16e   :  { %8828 = vmatpush3.bf16.msra.mxu1 %v8825_v21  ;;  %8554 = vmatprep.mubr.msk.f32.mxu1 %vm268_vm4, %v10341_v11  ;;  %v1944_v21 = vld [vmem:[%s14320_s3 + $0x1c8] sm:$0xff] }
 0x16f   :  { %8830 = vmatprep.subr.bf16.mxu1 %v8829_v29  ;;  %v8857_v25 = vpack.c.bf16 %v1944_v21, %v1943_v20  ;;  %v3110_v21 = vld [vmem:[%s14322_s5 + $0x30] sm:$0xff] }
 0x171   :  { %8555 = vmatmul.mubr.msk.f32.gmra.mrb[2].mxu1 %vm268_vm4, %v10353_v15 }
 0x172   :  { %8557 = vmatprep.mubr.msk.f32.mxu1 %vm268_vm4, %v10359_v22  ;;  %8832 = vmatpush3.bf16.msra.mxu1 %v8829_v29  ;;  %v1945_v29 = vld [vmem:[%s14320_s3 + $0x1d0] sm:$0xff] }
 0x173   :  { %8834 = vmatprep.subr.bf16.mxu1 %v8833_v35  ;;  %v8861_v32 = vpack.c.bf16 %v1946_v31, %v1945_v29  ;;  %v3413_v29 = vld [vmem:[%s14322_s5 + $0x9a8] sm:$0xff] }
 0x175   :  { %8558 = vmatmul.mubr.msk.f32.gmra.mrb[4].mxu1 %vm268_vm4, %v10371_v26 }
 0x176   :  { %8560 = vmatprep.mubr.msk.f32.mxu1 %vm268_vm4, %v10377_v34  ;;  %8836 = vmatpush3.bf16.msra.mxu1 %v8833_v35  ;;  %v1947_v35 = vld [vmem:[%s14320_s3 + $0x1e0] sm:$0xff] }
 0x177   :  { %8838 = vmatprep.subr.bf16.mxu1 %v8837_v38  ;;  %v8865_v37 = vpack.c.bf16 %v1948_v0, %v1947_v35  ;;  %v3397_v35 = vld [vmem:[%s14322_s5 + $0x928] sm:$0xff] }
 0x179   :  { %8561 = vmatmul.mubr.msk.f32.gmra.mrb[6].mxu1 %vm268_vm4, %v10680_v61 }
 0x17a   :  { %8563 = vmatprep.mubr.msk.f32.mxu1 %vm268_vm4, %v10386_v42  ;;  %8840 = vmatpush3.bf16.msra.mxu1 %v8837_v38  ;;  %v10698_v42 = vld [vmem:[#allocation2 + $0x121] sm:$0xff]  ;;  %v1950_v38 = vld [vmem:[%s14320_s3 + $0x1f8] sm:$0xff] }
 0x17b   :  { %8842 = vmatprep.subr.bf16.mxu1 %v8841_v59 }
 0x17d   :  { %8564 = vmatmul.mubr.msk.f32.gmra.mrb[8].mxu1 %vm268_vm4, %v10392_v44 }
 0x17e   :  { %8566 = vmatprep.mubr.msk.f32.mxu1 %vm268_vm4, %v10397_v47 }
 0x181   :  { %8567 = vmatmul.mubr.msk.f32.gmra.mrb[10].mxu1 %vm268_vm4, %v10402_v39 }
 0x182   :  { %8569 = vmatprep.mubr.msk.f32.mxu1 %vm268_vm4, %v10406_v48 }
 0x185   :  { %8570 = vmatmul.mubr.msk.f32.gmra.mrb[12].mxu1 %vm268_vm4, %v10410_v49 }
 0x186   :  { %8572 = vmatprep.mubr.msk.f32.mxu1 %vm268_vm4, %v10414_v51 }
 0x189   :  { %8573 = vmatmul.mubr.msk.f32.gmra.mrb[14].mxu1 %vm268_vm4, %v10698_v42 }
 0x18a   :  { %8591 = vmatprep.mubr.msk.f32.mxu1 %vm268_vm4, %v10507_v24  ;;  %v1716_v24 = vld [vmem:[%s14320_s3 + $0x1b0] sm:$0xff] }
 0x18b   :  { %v8853_v18 = vpack.c.bf16 %v1717_v8, %v1716_v24  ;;  %v3126_v8 = vld [vmem:[%s14322_s5 + $0xb0] sm:$0xff] }
 0x18d   :  { %8592 = vmatmul.mubr.msk.f32.vlgmr.msra.gmra.mrb[0].mxu1 %vm268_vm4, %v10517_v28 }
 0x18e   :  { %8844 = vmatpush3.bf16.msra.mxu1 %v8841_v59  ;;  %8594 = vmatprep.mubr.msk.f32.mxu1 %vm268_vm4, %v10521_v30 }
 0x18f   :  { %8846 = vmatprep.subr.bf16.mxu1 %v8845_v3 }
 0x191   :  { %8595 = vmatmul.mubr.msk.f32.gmra.mrb[2].mxu1 %vm268_vm4, %v10531_v33 }
 0x192   :  { %8597 = vmatprep.mubr.msk.f32.mxu1 %vm268_vm4, %v10535_v36  ;;  %8848 = vmatpush3.bf16.msra.mxu1 %v8845_v3  ;;  %v3411_v3 = vld [vmem:[%s14322_s5 + $0x998] sm:$0xff] }
 0x193   :  { %8850 = vmatprep.subr.bf16.mxu1 %v8849_v7  ;;  %v9181_v5 = vpack.c.bf16 %v3411_v3, %v3410_v1  ;;  %v3405_v1 = vld [vmem:[%s14322_s5 + $0x968] sm:$0xff] }
 0x195   :  { %8598 = vmatmul.mubr.msk.f32.gmra.mrb[4].mxu1 %vm268_vm4, %v10545_v40 }
 0x196   :  { %8600 = vmatprep.mubr.msk.f32.mxu1 %vm268_vm4, %v10549_v45  ;;  %8852 = vmatpush3.bf16.msra.mxu1 %v8849_v7  ;;  %v3395_v7 = vld [vmem:[%s14322_s5 + $0x918] sm:$0xff] }
 0x197   :  { %8854 = vmatprep.subr.bf16.mxu1 %v8853_v18  ;;  %v9183_v24 = vpack.c.bf16 %v3395_v7, %v3394_v55  ;;  %v3153_v55 = vld [vmem:[%s14322_s5 + $0x188] sm:$0xff] }
 0x199   :  { %8601 = vmatmul.mubr.msk.f32.gmra.mrb[6].mxu1 %vm268_vm4, %v10740_v27 }
 0x19a   :  { %8603 = vmatprep.mubr.msk.f32.mxu1 %vm268_vm4, %v10554_v46  ;;  %8856 = vmatpush3.bf16.msra.mxu1 %v8853_v18  ;;  %v10758_v46 = vld [vmem:[#allocation2 + $0x122] sm:$0xff]  ;;  %v3127_v18 = vld [vmem:[%s14322_s5 + $0xb8] sm:$0xff] }
 0x19b   :  { %8858 = vmatprep.subr.bf16.mxu1 %v8857_v25  ;;  %v8901_v20 = vpack.c.bf16 %v3127_v18, %v3126_v8  ;;  %v3423_v8 = vld [vmem:[%s14322_s5 + $0x9f8] sm:$0xff] }
 0x19d   :  { %8604 = vmatmul.mubr.msk.f32.gmra.mrb[8].mxu1 %vm268_vm4, %v10558_v50 }
 0x19e   :  { %8606 = vmatprep.mubr.msk.f32.mxu1 %vm268_vm4, %v10562_v52 }
 0x1a1   :  { %8607 = vmatmul.mubr.msk.f32.gmra.mrb[10].mxu1 %vm268_vm4, %v10566_v53 }
 0x1a2   :  { %8609 = vmatprep.mubr.msk.f32.mxu1 %vm268_vm4, %v10570_v54 }
 0x1a5   :  { %8610 = vmatmul.mubr.msk.f32.gmra.mrb[12].mxu1 %vm268_vm4, %v10574_v56 }
 0x1a6   :  { %8612 = vmatprep.mubr.msk.f32.mxu1 %vm268_vm4, %v10578_v57 }
 0x1a9   :  { %8613 = vmatmul.mubr.msk.f32.gmra.mrb[14].mxu1 %vm268_vm4, %v10758_v46 }
 0x1aa   :  { %8631 = vmatprep.mubr.msk.f32.mxu1 %vm268_vm4, %v10435_v58  ;;  %v1949_v58 = vld [vmem:[%s14320_s3 + $0x1f0] sm:$0xff] }
 0x1ad   :  { %8632 = vmatmul.mubr.msk.f32.vlgmr.msra.gmra.mrb[0].mxu1 %vm268_vm4, %v10439_v60  ;;  %v8869_v60 = vpack.c.bf16 %v1950_v38, %v1949_v58  ;;  %v3129_v58 = vld [vmem:[%s14322_s5 + $0xc8] sm:$0xff] }
 0x1ae   :  { %8860 = vmatpush3.bf16.msra.mxu1 %v8857_v25  ;;  %8634 = vmatprep.mubr.msk.f32.mxu1 %vm268_vm4, %v10449_v63  ;;  %v2176_v63 = vld [vmem:[%s14320_s3 + $0x200] sm:$0xff]  ;;  %v3111_v25 = vld [vmem:[%s14322_s5 + $0x38] sm:$0xff] }
 0x1af   :  { %8862 = vmatprep.subr.bf16.mxu1 %v8861_v32 }
 0x1b1   :  { %8635 = vmatmul.mubr.msk.f32.gmra.mrb[2].mxu1 %vm268_vm4, %v10453_v2  ;;  %v1701_v2 = vld [vmem:[#allocation2 + $0x90] sm:$0xff] }
 0x1b2   :  { %8637 = vmatprep.mubr.msk.f32.mxu1 %vm268_vm4, %v10463_v6  ;;  %8864 = vmatpush3.bf16.msra.mxu1 %v8861_v32  ;;  %v8873_v6 = vpack.c.bf16 %v2177_v41, %v2176_v63  ;;  %v3396_v32 = vld [vmem:[%s14322_s5 + $0x920] sm:$0xff]  ;;  %v3113_v63 = vld [vmem:[%s14322_s5 + $0x48] sm:$0xff] }
 0x1b3   :  { %8866 = vmatprep.subr.bf16.mxu1 %v8865_v37  ;;  %v9187_v0 = vpack.c.bf16 %v3397_v35, %v3396_v32  ;;  %v2437_v35 = vlaneseq }
 0x1b5   :  { %8638 = vmatmul.mubr.msk.f32.gmra.mrb[4].mxu1 %vm268_vm4, %v10467_v9  ;;  %v1709_v9 = vld [vmem:[#allocation2 + $0x130] sm:$0xff] }
 0x1b6   :  { %8640 = vmatprep.mubr.msk.f32.mxu1 %vm268_vm4, %v10620_v23  ;;  %8868 = vmatpush3.bf16.msra.mxu1 %v8865_v37  ;;  %v2183_v23 = vld [vmem:[%s14320_s3 + $0x238] sm:$0xff]  ;;  %v3128_v37 = vld [vmem:[%s14322_s5 + $0xc0] sm:$0xff] }
 0x1b7   :  { %8870 = vmatprep.subr.bf16.mxu1 %v8869_v60  ;;  %v8905_v38 = vpack.c.bf16 %v3129_v58, %v3128_v37  ;;  %v2438_v37 = vshrl.u32 %v2437_v35, 7  ;;  %v11101_v58 = vld [vmem:[%s14321_s4] ss:$0 sm:$0xff] }
 0x1b9   :  { %8641 = vmatmul.mubr.msk.f32.gmra.mrb[6].mxu1 %vm268_vm4, %v1701_v2  ;;  %v3414_v2 = vld [vmem:[%s14322_s5 + $0x9b0] sm:$0xff] }
 0x1ba   :  { %8643 = vmatprep.mubr.msk.f32.mxu1 %vm268_vm4, %v10476_v12  ;;  %8872 = vmatpush3.bf16.msra.mxu1 %v8869_v60  ;;  %v2178_v12 = vld [vmem:[%s14320_s3 + $0x210] sm:$0xff]  ;;  %v3112_v60 = vld [vmem:[%s14322_s5 + $0x40] sm:$0xff] }
 0x1bb   :  { %8874 = vmatprep.subr.bf16.mxu1 %v8873_v6  ;;  %v8907_v41 = vpack.c.bf16 %v3113_v63, %v3112_v60 }
 0x1bd   :  { %8644 = vmatmul.mubr.msk.f32.gmra.mrb[8].mxu1 %vm268_vm4, %v10480_v13  ;;  %v2179_v13 = vld [vmem:[%s14320_s3 + $0x218] sm:$0xff] }
 0x1be   :  { %8646 = vmatprep.mubr.msk.f32.mxu1 %vm268_vm4, %v10484_v14  ;;  %v8877_v14 = vpack.c.bf16 %v2179_v13, %v2178_v12  ;;  %v3398_v12 = vld [vmem:[%s14322_s5 + $0x930] sm:$0xff]  ;;  %v3399_v13 = vld [vmem:[%s14322_s5 + $0x938] sm:$0xff] }
 0x1c1   :  { %8647 = vmatmul.mubr.msk.f32.gmra.mrb[10].mxu1 %vm268_vm4, %v10488_v16  ;;  %v2180_v16 = vld [vmem:[%s14320_s3 + $0x220] sm:$0xff] }
 0x1c2   :  { %8649 = vmatprep.mubr.msk.f32.mxu1 %vm268_vm4, %v10492_v17  ;;  %v2181_v17 = vld [vmem:[%s14320_s3 + $0x228] sm:$0xff] }
 0x1c5   :  { %8650 = vmatmul.mubr.msk.f32.gmra.mrb[12].mxu1 %vm268_vm4, %v10496_v19  ;;  %v8881_v19 = vpack.c.bf16 %v2181_v17, %v2180_v16  ;;  %v3130_v16 = vld [vmem:[%s14322_s5 + $0xd0] sm:$0xff]  ;;  %v3131_v17 = vld [vmem:[%s14322_s5 + $0xd8] sm:$0xff] }
 0x1c6   :  { %8652 = vmatprep.mubr.msk.f32.mxu1 %vm268_vm4, %v10638_v10  ;;  %v3124_v10 = vld [vmem:[%s14322_s5 + $0xa0] sm:$0xff] }
 0x1c7   :  { %v8897_v59 = vpack.c.bf16 %v3125_v43, %v3124_v10  ;;  %v3119_v10 = vld [vmem:[%s14322_s5 + $0x78] sm:$0xff] }
 0x1c9   :  { %8653 = vmatmul.mubr.msk.f32.gmra.mrb[14].mxu1 %vm268_vm4, %v1709_v9 }
 0x1ca   :  { %8671 = vmatprep.mubr.msk.f32.mxu1 %vm268_vm4, %v10335_v4  ;;  %v2182_v4 = vld [vmem:[%s14320_s3 + $0x230] sm:$0xff] }
 0x1cd   :  { %8672 = vmatmul.mubr.msk.f32.vlgmr.msra.gmra.mrb[0].mxu1 %vm268_vm4, %v10341_v11  ;;  %v8885_v11 = vpack.c.bf16 %v2183_v23, %v2182_v4  ;;  %v3114_v4 = vld [vmem:[%s14322_s5 + $0x50] sm:$0xff]  ;;  %v3115_v23 = vld [vmem:[%s14322_s5 + $0x58] sm:$0xff] }
 0x1ce   :  { %8876 = vmatpush3.bf16.msra.mxu1 %v8873_v6  ;;  %8674 = vmatprep.mubr.msk.f32.mxu1 %vm268_vm4, %v10353_v15  ;;  %v1934_v15 = vld [vmem:[#allocation2 + $0x91] sm:$0xff] }
 0x1cf   :  { %8878 = vmatprep.subr.bf16.mxu1 %v8877_v14  ;;  %v3415_v6 = vld [vmem:[%s14322_s5 + $0x9b8] sm:$0xff] }
 0x1d0   :  { %v9189_v9 = vpack.c.bf16 %v3415_v6, %v3414_v2 }
 0x1d1   :  { %8675 = vmatmul.mubr.msk.f32.gmra.mrb[2].mxu1 %vm268_vm4, %v10359_v22  ;;  %v1942_v22 = vld [vmem:[#allocation2 + $0x131] sm:$0xff] }
 0x1d2   :  { %8677 = vmatprep.mubr.msk.f32.mxu1 %vm268_vm4, %v10371_v26  ;;  %8880 = vmatpush3.bf16.msra.mxu1 %v8877_v14  ;;  %v2167_v26 = vld [vmem:[#allocation2 + $0x92] sm:$0xff]  ;;  %v9191_v14 = vpack.c.bf16 %v3399_v13, %v3398_v12 }
 0x1d3   :  { %8882 = vmatprep.subr.bf16.mxu1 %v8881_v19 }
 0x1d5   :  { %8678 = vmatmul.mubr.msk.f32.gmra.mrb[4].mxu1 %vm268_vm4, %v10377_v34  ;;  %v2175_v34 = vld [vmem:[#allocation2 + $0x132] sm:$0xff] }
 0x1d6   :  { %8680 = vmatprep.mubr.msk.f32.mxu1 %vm268_vm4, %v10680_v61  ;;  %8884 = vmatpush3.bf16.msra.mxu1 %v8881_v19  ;;  %v3108_v61 = vld [vmem:[%s14322_s5 + $0x20] sm:$0xff]  ;;  %v8909_v19 = vpack.c.bf16 %v3131_v17, %v3130_v16 }
 0x1d7   :  { %8886 = vmatprep.subr.bf16.mxu1 %v8885_v11 }
 0x1d9   :  { %8681 = vmatmul.mubr.msk.f32.gmra.mrb[6].mxu1 %vm268_vm4, %v1934_v15  ;;  %v3416_v15 = vld [vmem:[%s14322_s5 + $0x9c0] sm:$0xff] }
 0x1da   :  { %8683 = vmatprep.mubr.msk.f32.mxu1 %vm268_vm4, %v10392_v44  ;;  %8888 = vmatpush3.bf16.msra.mxu1 %v8885_v11  ;;  %v3120_v44 = vld [vmem:[%s14322_s5 + $0x80] sm:$0xff]  ;;  %v8911_v11 = vpack.c.bf16 %v3115_v23, %v3114_v4 }
 0x1dd   :  { %8684 = vmatmul.mubr.msk.f32.gmra.mrb[8].mxu1 %vm268_vm4, %v10397_v47  ;;  %v3121_v47 = vld [vmem:[%s14322_s5 + $0x88] sm:$0xff] }
 0x1de   :  { %8686 = vmatprep.mubr.msk.f32.mxu1 %vm268_vm4, %v10402_v39  ;;  %v8889_v39 = vpack.c.bf16 %v3121_v47, %v3120_v44  ;;  %v3401_v44 = vld [vmem:[%s14322_s5 + $0x948] sm:$0xff] }
 0x1e0   :  { %8890 = vmatprep.subr.bf16.mxu0 %v8889_v39  ;;  %v3132_v39 = vld [vmem:[%s14322_s5 + $0xe0] sm:$0xff] }
 0x1e1   :  { %8687 = vmatmul.mubr.msk.f32.gmra.mrb[10].mxu1 %vm268_vm4, %v10406_v48  ;;  %v3104_v48 = vld [vmem:[%s14322_s5] sm:$0xff] }
 0x1e2   :  { %8689 = vmatprep.mubr.msk.f32.mxu1 %vm268_vm4, %v10410_v49  ;;  %v3105_v49 = vld [vmem:[%s14322_s5 + $0x8] sm:$0xff] }
 0x1e5   :  { %8690 = vmatmul.mubr.msk.f32.gmra.mrb[12].mxu1 %vm268_vm4, %v10414_v51  ;;  %v8891_v51 = vpack.c.bf16 %v3105_v49, %v3104_v48  ;;  %v3133_v48 = vld [vmem:[%s14322_s5 + $0xe8] sm:$0xff] }
 0x1e6   :  { %8692 = vmatprep.mubr.msk.f32.mxu1 %vm268_vm4, %v10698_v42  ;;  %v3109_v42 = vld [vmem:[%s14322_s5 + $0x28] sm:$0xff]  ;;  %v8913_v49 = vpack.c.bf16 %v3133_v48, %v3132_v39 }
 0x1e7   :  { %8892 = vmatpush3.bf16.msra.mxu0 %v8891_v51  ;;  %v8899_v62 = vpack.c.bf16 %v3109_v42, %v3108_v61  ;;  %v3116_v51 = vld [vmem:[%s14322_s5 + $0x60] sm:$0xff]  ;;  %v3421_v61 = vld [vmem:[%s14322_s5 + $0x9e8] sm:$0xff] }
 0x1e9   :  { %8693 = vmatmul.mubr.msk.f32.gmra.mrb[14].mxu1 %vm268_vm4, %v1942_v22  ;;  %v3417_v22 = vld [vmem:[%s14322_s5 + $0x9c8] sm:$0xff] }
 0x1ea   :  { %8711 = vmatprep.mubr.msk.f32.mxu1 %vm268_vm4, %v10517_v28  ;;  %v3122_v28 = vld [vmem:[%s14322_s5 + $0x90] sm:$0xff] }
 0x1ed   :  { %8712 = vmatmul.mubr.msk.f32.vlgmr.msra.gmra.mrb[0].mxu1 %vm268_vm4, %v10521_v30  ;;  %v3123_v30 = vld [vmem:[%s14322_s5 + $0x98] sm:$0xff] }
 0x1ee   :  { %8714 = vmatprep.mubr.msk.f32.mxu1 %vm268_vm4, %v10531_v33  ;;  %v8893_v33 = vpack.c.bf16 %v3123_v30, %v3122_v28  ;;  %v3117_v28 = vld [vmem:[%s14322_s5 + $0x68] sm:$0xff] }
 0x1ef   :  { %v8915_v30 = vpack.c.bf16 %v3117_v28, %v3116_v51 }
 0x1f0   :  { %8894 = vmatprep.subr.bf16.mxu0 %v8893_v33  ;;  %v3418_v33 = vld [vmem:[%s14322_s5 + $0x9d0] sm:$0xff] }
 0x1f1   :  { %8715 = vmatmul.mubr.msk.f32.gmra.mrb[2].mxu1 %vm268_vm4, %v10535_v36  ;;  %v3106_v36 = vld [vmem:[%s14322_s5 + $0x10] sm:$0xff] }
 0x1f2   :  { %8717 = vmatprep.mubr.msk.f32.mxu1 %vm268_vm4, %v10545_v40  ;;  %v3107_v40 = vld [vmem:[%s14322_s5 + $0x18] sm:$0xff] }
 0x1f5   :  { %8718 = vmatmul.mubr.msk.f32.gmra.mrb[4].mxu1 %vm268_vm4, %v10549_v45  ;;  %v8895_v45 = vpack.c.bf16 %v3107_v40, %v3106_v36  ;;  %v3419_v36 = vld [vmem:[%s14322_s5 + $0x9d8] sm:$0xff] }
 0x1f6   :  { %8720 = vmatprep.mubr.msk.f32.mxu1 %vm268_vm4, %v10740_v27  ;;  %v8903_v27 = vpack.c.bf16 %v3111_v25, %v3110_v21  ;;  %v9197_v40 = vpack.c.bf16 %v3419_v36, %v3418_v33  ;;  %v3407_v21 = vld [vmem:[%s14322_s5 + $0x978] sm:$0xff] }
 0x1f7   :  { %8896 = vmatpush3.bf16.msra.mxu0 %v8895_v45  ;;  %v3402_v45 = vld [vmem:[%s14322_s5 + $0x950] sm:$0xff] }
 0x1f8   :  { %8898 = vmatprep.subr.bf16.mxu0 %v8897_v59  ;;  %v3420_v59 = vld [vmem:[%s14322_s5 + $0x9e0] sm:$0xff] }
 0x1f9   :  { %8721 = vmatmul.mubr.msk.f32.gmra.mrb[6].mxu1 %vm268_vm4, %v2167_v26  ;;  %v9193_v26 = vpack.c.bf16 %v3417_v22, %v3416_v15  ;;  %v9201_v42 = vpack.c.bf16 %v3421_v61, %v3420_v59 }
 0x1fa   :  { %8723 = vmatprep.mubr.msk.f32.mxu1 %vm268_vm4, %v10558_v50  ;;  %v3408_v50 = vld [vmem:[%s14322_s5 + $0x980] sm:$0xff] }
 0x1fb   :  { %8900 = vmatpush3.bf16.msra.mxu0 %v8899_v62  ;;  %v3404_v62 = vld [vmem:[%s14322_s5 + $0x960] sm:$0xff] }
 0x1fc   :  { %8902 = vmatprep.subr.bf16.mxu0 %v8901_v20  ;;  %v9203_v3 = vpack.c.bf16 %v3405_v1, %v3404_v62  ;;  %v3406_v20 = vld [vmem:[%s14322_s5 + $0x970] sm:$0xff] }
 0x1fd   :  { %8724 = vmatmul.mubr.msk.f32.gmra.mrb[8].mxu1 %vm268_vm4, %v10562_v52  ;;  %v3409_v52 = vld [vmem:[%s14322_s5 + $0x988] sm:$0xff]  ;;  %v9207_v25 = vpack.c.bf16 %v3407_v21, %v3406_v20 }
 0x1fe   :  { %8726 = vmatprep.mubr.msk.f32.mxu1 %vm268_vm4, %v10566_v53  ;;  %v9177_v53 = vpack.c.bf16 %v3409_v52, %v3408_v50  ;;  %v3403_v50 = vld [vmem:[%s14322_s5 + $0x958] sm:$0xff] }
 0x1ff   :  { %8904 = vmatpush3.bf16.msra.mxu0 %v8903_v27  ;;  %v9199_v52 = vpack.c.bf16 %v3403_v50, %v3402_v45  ;;  %v3472_v27 = vld [vmem:[%s14322_s5 + $0xb80] sm:$0xff] }
 0x200   :  { %9178 = vmatprep.subr.bf16.mxu1 %v9177_v53  ;;  %8906 = vmatprep.subr.bf16.mxu0 %v8905_v38  ;;  %v3134_v53 = vld [vmem:[%s14322_s5 + $0xf0] sm:$0xff] }
 0x201   :  { %8727 = vmatmul.mubr.msk.f32.gmra.mrb[10].mxu1 %vm268_vm4, %v10570_v54  ;;  %v3392_v54 = vld [vmem:[%s14322_s5 + $0x900] sm:$0xff] }
 0x202   :  { %8729 = vmatprep.mubr.msk.f32.mxu1 %vm268_vm4, %v10574_v56  ;;  %v3393_v56 = vld [vmem:[%s14322_s5 + $0x908] sm:$0xff] }
 0x203   :  { %8908 = vmatpush3.bf16.msra.mxu0 %v8907_v41 }
 0x204   :  { %8910 = vmatprep.subr.bf16.mxu0 %v8909_v19 }
 0x205   :  { %8730 = vmatmul.mubr.msk.f32.gmra.mrb[12].mxu1 %vm268_vm4, %v10578_v57  ;;  %v9179_v57 = vpack.c.bf16 %v3393_v56, %v3392_v54  ;;  %v3135_v54 = vld [vmem:[%s14322_s5 + $0xf8] sm:$0xff] }
 0x206   :  { %8732 = vmatprep.mubr.msk.f32.mxu1 %vm268_vm4, %v10758_v46  ;;  %v3412_v46 = vld [vmem:[%s14322_s5 + $0x9a0] sm:$0xff]  ;;  %v8917_v56 = vpack.c.bf16 %v3135_v54, %v3134_v53 }
 0x207   :  { %9180 = vmatpush3.bf16.msra.mxu1 %v9179_v57  ;;  %v9185_v31 = vpack.c.bf16 %v3413_v29, %v3412_v46  ;;  %8912 = vmatpush3.bf16.msra.mxu0 %v8911_v11  ;;  %v3118_v57 = vld [vmem:[%s14322_s5 + $0x70] sm:$0xff]  ;;  %v3473_v46 = vld [vmem:[%s14322_s5 + $0xb88] sm:$0xff] }
 0x208   :  { %9182 = vmatprep.subr.bf16.mxu1 %v9181_v5  ;;  %8914 = vmatprep.subr.bf16.mxu0 %v8913_v49  ;;  %v8919_v43 = vpack.c.bf16 %v3119_v10, %v3118_v57  ;;  %v3152_v5 = vld [vmem:[%s14322_s5 + $0x180] sm:$0xff]  ;;  %v9241_v29 = vpack.c.bf16 %v3473_v46, %v3472_v27 }
 0x209   :  { %8733 = vmatmul.mubr.msk.f32.gmra.mrb[14].mxu1 %vm268_vm4, %v2175_v34  ;;  %v3400_v34 = vld [vmem:[%s14322_s5 + $0x940] sm:$0xff]  ;;  %v8921_v7 = vpack.c.bf16 %v3153_v55, %v3152_v5 }
 0x20a   :  { %v9195_v47 = vpack.c.bf16 %v3401_v44, %v3400_v34 }
 0x20b   :  { %9184 = vmatpush3.bf16.msra.mxu1 %v9183_v24  ;;  %8916 = vmatpush3.bf16.msra.mxu0 %v8915_v30  ;;  %v3422_v24 = vld [vmem:[%s14322_s5 + $0x9f0] sm:$0xff] }
 0x20c   :  { %9186 = vmatprep.subr.bf16.mxu1 %v9185_v31  ;;  %8918 = vmatprep.subr.bf16.mxu0 %v8917_v56  ;;  %v9205_v18 = vpack.c.bf16 %v3423_v8, %v3422_v24  ;;  %v10111_v31 = vmov 1983009808  }
 0x20d   :  { %v2435_v32 = vunpack.c.l.s4 %v10111_v31 }
 0x20f   :  { %9188 = vmatpush3.bf16.msra.mxu1 %v9187_v0  ;;  %8920 = vmatpush3.bf16.msra.mxu0 %v8919_v43  ;;  %v2436_v0 = vunpack.c.0.s8 %v2435_v32 }
 0x210   :  { %9190 = vmatprep.subr.bf16.mxu1 %v9189_v9  ;;  %8922 = vmatprep.subr.bf16.mxu0 %v8921_v7 }
 0x211   :  { %v11104_v63 = vsub.s32 %v2436_v0, %v2438_v37 }
 0x213   :  { %9192 = vmatpush3.bf16.msra.mxu1 %v9191_v14 }
 0x214   :  { %9194 = vmatprep.subr.bf16.mxu1 %v9193_v26 }
 0x217   :  { %9196 = vmatpush3.bf16.msra.mxu1 %v9195_v47 }
 0x218   :  { %9198 = vmatprep.subr.bf16.mxu1 %v9197_v40 }
 0x21b   :  { %9200 = vmatpush3.bf16.msra.mxu1 %v9199_v52 }
 0x21c   :  { %9202 = vmatprep.subr.bf16.mxu1 %v9201_v42 }
 0x21f   :  { %9204 = vmatpush3.bf16.msra.mxu1 %v9203_v3 }
 0x220   :  { %9206 = vmatprep.subr.bf16.mxu1 %v9205_v18 }
 0x223   :  { %9208 = vmatpush3.bf16.msra.mxu1 %v9207_v25 }
 0x224   :  { %9242 = vmatprep.subr.bf16.mxu1 %v9241_v29 }
 0x2c0   :  { %v8713_v38 = vpop.f32.mrb[0].mxu1 }
 0x2c1   :  { %v2401_v60 = vadd.f32 %v8713_v38, %v11101_v58  ;;  %v2298_v41 = vpop.f32.mrb[1].mxu1 }
 0x2c2   :  { %v2400_v2 = vadd.f32 %v11101_v58, %v2298_v41 }
 0x2c3   :  { %v2417_v6 = vmax.f32 %v2401_v60, 0.0 }
 0x2c4   :  { %v2416_v9 = vmax.f32 %v2400_v2, 0.0  ;;  %v8716_v12 = vpop.f32.mrb[2].mxu1 }
 0x2c5   :  { %2473 = vst [vmem:[#allocation3 + $0x10] sm:$0x1] %v2417_v6  ;;  %v2481_v13 = vrot.slane %v2417_v6, %v11104_v63  ;;  %v2493_v14 = vcombine.high %v2417_v6, %v2417_v6  ;;  %v2403_v16 = vadd.f32 %v8716_v12, %v11101_v58  ;;  %v2308_v17 = vpop.f32.mrb[3].mxu1 }
 0x2c6   :  { %2432 = vst [vmem:[#allocation3] sm:$0x1] %v2416_v9  ;;  %v2440_v19 = vrot.slane %v2416_v9, %v11104_v63  ;;  %v2452_v4 = vcombine.high %v2416_v9, %v2416_v9  ;;  %v2402_v23 = vadd.f32 %v11101_v58, %v2308_v17 }
 0x2c7   :  { %v6911_v11 = vrot.slane %v2481_v13, 9  ;;  %v2486_v15 = vcombine.high %v2481_v13, %v2481_v13  ;;  %v2500_v22 = vrot.slane %v2493_v14, %v11104_v63  ;;  %6913 = vst.sshfl [vmem:[#allocation3 + $0x18] sm:$0x1 pattern:$0x76325410] %v2493_v14  ;;  %v2419_v26 = vmax.f32 %v2403_v16, 0.0 }
 0x2c8   :  { %v6906_v34 = vrot.slane %v2440_v19, 9  ;;  %v2445_v44 = vcombine.high %v2440_v19, %v2440_v19  ;;  %v2459_v47 = vrot.slane %v2452_v4, %v11104_v63  ;;  %6908 = vst.sshfl [vmem:[#allocation3 + $0x8] sm:$0x1 pattern:$0x76325410] %v2452_v4  ;;  %v2418_v39 = vmax.f32 %v2402_v23, 0.0 }
 0x2c9   :  { %v8719_v48 = vpop.f32.mrb[4].mxu1  ;;  %2485 = vst [vmem:[#allocation3 + $0x12] sm:$0x1] %v6911_v11  ;;  %2488 = vst [vmem:[#allocation3 + $0x14] sm:$0x1] %v2486_v15  ;;  %v6912_v49 = vrot.slane %v2486_v15, 9  ;;  %v2507_v28 = vcombine.high %v2500_v22, %v2500_v22  ;;  %v2563_v30 = vrot.slane %v2419_v26, %v11104_v63  ;;  %v2575_v50 = vcombine.high %v2419_v26, %v2419_v26 }
 0x2ca   :  { %v6914_v51 = vrot.slane %v2500_v22, 9  ;;  %2555 = vst [vmem:[#allocation3 + $0x30] sm:$0x1] %v2419_v26  ;;  %v2318_v33 = vpop.f32.mrb[5].mxu1  ;;  %2444 = vst [vmem:[#allocation3 + $0x2] sm:$0x1] %v6906_v34  ;;  %v2466_v45 = vcombine.high %v2459_v47, %v2459_v47  ;;  %v2522_v56 = vrot.slane %v2418_v39, %v11104_v63  ;;  %v2534_v43 = vcombine.high %v2418_v39, %v2418_v39 }
 0x2cb   :  { %2447 = vst [vmem:[#allocation3 + $0x4] sm:$0x1] %v2445_v44  ;;  %v6907_v36 = vrot.slane %v2445_v44, 9  ;;  %v6909_v40 = vrot.slane %v2459_v47, 9  ;;  %2514 = vst [vmem:[#allocation3 + $0x20] sm:$0x1] %v2418_v39  ;;  %v2568_v54 = vcombine.high %v2563_v30, %v2563_v30  ;;  %v2582_v10 = vrot.slane %v2575_v50, %v11104_v63 }
 0x2cc   :  { %2492 = vst [vmem:[#allocation3 + $0x16] sm:$0x1] %v6912_v49  ;;  %2506 = vst [vmem:[#allocation3 + $0x1a] sm:$0x1] %v6914_v51  ;;  %v6915_v52 = vrot.slane %v2507_v28, 9  ;;  %v6921_v53 = vrot.slane %v2563_v30, 9  ;;  %v2405_v59 = vadd.f32 %v8719_v48, %v11101_v58  ;;  %v2527_v1 = vcombine.high %v2522_v56, %v2522_v56 }
 0x2cd   :  { %2509 = vst [vmem:[#allocation3 + $0x1c] sm:$0x1] %v2507_v28  ;;  %2451 = vst [vmem:[#allocation3 + $0x6] sm:$0x1] %v6907_v36  ;;  %v6910_v57 = vrot.slane %v2466_v45, 9  ;;  %v8722_v61 = vpop.f32.mrb[6].mxu1  ;;  %v2404_v3 = vadd.f32 %v11101_v58, %v2318_v33  ;;  %v2589_v7 = vcombine.high %v2582_v10, %v2582_v10  ;;  %v2541_v24 = vrot.slane %v2534_v43, %v11104_v63 }
 0x2ce   :  { %2465 = vst [vmem:[#allocation3 + $0xa] sm:$0x1] %v6909_v40  ;;  %2468 = vst [vmem:[#allocation3 + $0xc] sm:$0x1] %v2466_v45  ;;  %v6922_v42 = vrot.slane %v2568_v54, 9  ;;  %v6916_v62 = vrot.slane %v2522_v56, 9  ;;  %v2407_v21 = vadd.f32 %v8722_v61, %v11101_v58 }
 0x2cf   :  { %6923 = vst.sshfl [vmem:[#allocation3 + $0x38] sm:$0x1 pattern:$0x76325410] %v2575_v50  ;;  %2513 = vst [vmem:[#allocation3 + $0x1e] sm:$0x1] %v6915_v52  ;;  %v2548_v29 = vcombine.high %v2541_v24, %v2541_v24 }
 0x2d0   :  { %2567 = vst [vmem:[#allocation3 + $0x32] sm:$0x1] %v6921_v53  ;;  %2570 = vst [vmem:[#allocation3 + $0x34] sm:$0x1] %v2568_v54  ;;  %v2328_v5 = vpop.f32.mrb[7].mxu1  ;;  %v6924_v55 = vrot.slane %v2582_v10, 9 }
 0x2d1   :  { %2472 = vst [vmem:[#allocation3 + $0xe] sm:$0x1] %v6910_v57  ;;  %6918 = vst.sshfl [vmem:[#allocation3 + $0x28] sm:$0x1 pattern:$0x76325410] %v2534_v43  ;;  %v2406_v25 = vadd.f32 %v11101_v58, %v2328_v5 }
 0x2d2   :  { %v2421_v8 = vmax.f32 %v2405_v59, 0.0  ;;  %2574 = vst [vmem:[#allocation3 + $0x36] sm:$0x1] %v6922_v42  ;;  %2526 = vst [vmem:[#allocation3 + $0x22] sm:$0x1] %v6916_v62  ;;  %v6917_v18 = vrot.slane %v2527_v1, 9 }
 0x2d3   :  { %2529 = vst [vmem:[#allocation3 + $0x24] sm:$0x1] %v2527_v1  ;;  %v2420_v20 = vmax.f32 %v2404_v3, 0.0  ;;  %2588 = vst [vmem:[#allocation3 + $0x3a] sm:$0x1] %v6924_v55  ;;  %v6925_v27 = vrot.slane %v2589_v7, 9 }
 0x2d4   :  { %2591 = vst [vmem:[#allocation3 + $0x3c] sm:$0x1] %v2589_v7  ;;  %v6919_v46 = vrot.slane %v2541_v24, 9  ;;  %2637 = vst [vmem:[#allocation3 + $0x50] sm:$0x1] %v2421_v8  ;;  %v2645_v31 = vrot.slane %v2421_v8, %v11104_v63  ;;  %v11122_v32 = vpop.f32.mrb[8].mxu1  ;;  %v2657_v35 = vcombine.high %v2421_v8, %v2421_v8 }
 0x2d5   :  { %2533 = vst [vmem:[#allocation3 + $0x26] sm:$0x1] %v6917_v18  ;;  %2596 = vst [vmem:[#allocation3 + $0x40] sm:$0x1] %v2420_v20  ;;  %v2604_v0 = vrot.slane %v2420_v20, %v11104_v63  ;;  %v2616_v37 = vcombine.high %v2420_v20, %v2420_v20  ;;  %v2423_v38 = vmax.f32 %v2407_v21, 0.0  ;;  %v2338_v60 = vpop.f32.mrb[9].mxu1  ;;  %v2409_v56 = vadd.f32 %v11122_v32, %v11101_v58 }
 0x2d6   :  { %2595 = vst [vmem:[#allocation3 + $0x3e] sm:$0x1] %v6925_v27  ;;  %2547 = vst [vmem:[#allocation3 + $0x2a] sm:$0x1] %v6919_v46  ;;  %v6920_v41 = vrot.slane %v2548_v29, 9  ;;  %v6931_v2 = vrot.slane %v2645_v31, 9  ;;  %v2650_v6 = vcombine.high %v2645_v31, %v2645_v31  ;;  %v2664_v12 = vrot.slane %v2657_v35, %v11104_v63 }
 0x2d7   :  { %2550 = vst [vmem:[#allocation3 + $0x2c] sm:$0x1] %v2548_v29  ;;  %v2422_v9 = vmax.f32 %v2406_v25, 0.0  ;;  %v6926_v13 = vrot.slane %v2604_v0, 9  ;;  %v2609_v14 = vcombine.high %v2604_v0, %v2604_v0  ;;  %v2623_v16 = vrot.slane %v2616_v37, %v11104_v63  ;;  %2719 = vst [vmem:[#allocation3 + $0x70] sm:$0x1] %v2423_v38 }
 0x2d8   :  { %6933 = vst.sshfl [vmem:[#allocation3 + $0x58] sm:$0x1 pattern:$0x76325410] %v2657_v35  ;;  %2554 = vst [vmem:[#allocation3 + $0x2e] sm:$0x1] %v6920_v41  ;;  %v2727_v19 = vrot.slane %v2423_v38, %v11104_v63  ;;  %v2739_v4 = vcombine.high %v2423_v38, %v2423_v38  ;;  %v2671_v22 = vcombine.high %v2664_v12, %v2664_v12 }
 0x2d9   :  { %6928 = vst.sshfl [vmem:[#allocation3 + $0x48] sm:$0x1 pattern:$0x76325410] %v2616_v37  ;;  %2649 = vst [vmem:[#allocation3 + $0x52] sm:$0x1] %v6931_v2  ;;  %v2686_v23 = vrot.slane %v2422_v9, %v11104_v63  ;;  %v2630_v47 = vcombine.high %v2623_v16, %v2623_v16  ;;  %v2698_v33 = vcombine.high %v2422_v9, %v2422_v9 }
 0x2da   :  { %2652 = vst [vmem:[#allocation3 + $0x54] sm:$0x1] %v2650_v6  ;;  %v6932_v17 = vrot.slane %v2650_v6, 9  ;;  %2678 = vst [vmem:[#allocation3 + $0x60] sm:$0x1] %v2422_v9  ;;  %v8728_v11 = vpop.f32.mrb[10].mxu1  ;;  %v2732_v48 = vcombine.high %v2727_v19, %v2727_v19  ;;  %v2746_v49 = vrot.slane %v2739_v4, %v11104_v63  ;;  %v2408_v57 = vadd.f32 %v11101_v58, %v2338_v60 }
 0x2db   :  { %v6934_v15 = vrot.slane %v2664_v12, 9  ;;  %2608 = vst [vmem:[#allocation3 + $0x42] sm:$0x1] %v6926_v13  ;;  %2611 = vst [vmem:[#allocation3 + $0x44] sm:$0x1] %v2609_v14  ;;  %v6927_v26 = vrot.slane %v2609_v14, 9  ;;  %v2691_v30 = vcombine.high %v2686_v23, %v2686_v23  ;;  %v2705_v54 = vrot.slane %v2698_v33, %v11104_v63 }
 0x2dc   :  { %v6929_v34 = vrot.slane %v2623_v16, 9  ;;  %v2348_v44 = vpop.f32.mrb[11].mxu1  ;;  %2656 = vst [vmem:[#allocation3 + $0x56] sm:$0x1] %v6932_v17  ;;  %v6941_v39 = vrot.slane %v2727_v19, 9  ;;  %v6935_v51 = vrot.slane %v2671_v22, 9  ;;  %v2753_v50 = vcombine.high %v2746_v49, %v2746_v49 }
 0x2dd   :  { %6943 = vst.sshfl [vmem:[#allocation3 + $0x78] sm:$0x1 pattern:$0x76325410] %v2739_v4  ;;  %2670 = vst [vmem:[#allocation3 + $0x5a] sm:$0x1] %v6934_v15  ;;  %v2411_v59 = vadd.f32 %v8728_v11, %v11101_v58  ;;  %v2410_v61 = vadd.f32 %v11101_v58, %v2348_v44  ;;  %v2712_v1 = vcombine.high %v2705_v54, %v2705_v54 }
 0x2de   :  { %2673 = vst [vmem:[#allocation3 + $0x5c] sm:$0x1] %v2671_v22  ;;  %2615 = vst [vmem:[#allocation3 + $0x46] sm:$0x1] %v6927_v26  ;;  %v6936_v28 = vrot.slane %v2686_v23, 9  ;;  %v6930_v36 = vrot.slane %v2630_v47, 9 }
 0x2df   :  { %2629 = vst [vmem:[#allocation3 + $0x4a] sm:$0x1] %v6929_v34  ;;  %2632 = vst [vmem:[#allocation3 + $0x4c] sm:$0x1] %v2630_v47  ;;  %v6942_v40 = vrot.slane %v2732_v48, 9  ;;  %v6944_v45 = vrot.slane %v2746_v49, 9 }
 0x2e0   :  { %2731 = vst [vmem:[#allocation3 + $0x72] sm:$0x1] %v6941_v39  ;;  %2734 = vst [vmem:[#allocation3 + $0x74] sm:$0x1] %v2732_v48  ;;  %v8731_v52 = vpop.f32.mrb[12].mxu1  ;;  %v6937_v53 = vrot.slane %v2691_v30, 9 }
 0x2e1   :  { %2677 = vst [vmem:[#allocation3 + $0x5e] sm:$0x1] %v6935_v51  ;;  %2690 = vst [vmem:[#allocation3 + $0x62] sm:$0x1] %v6936_v28  ;;  %v2358_v10 = vpop.f32.mrb[13].mxu1  ;;  %v6945_v43 = vrot.slane %v2753_v50, 9  ;;  %v2413_v42 = vadd.f32 %v8731_v52, %v11101_v58 }
 0x2e2   :  { %2693 = vst [vmem:[#allocation3 + $0x64] sm:$0x1] %v2691_v30  ;;  %6938 = vst.sshfl [vmem:[#allocation3 + $0x68] sm:$0x1 pattern:$0x76325410] %v2698_v33  ;;  %v11140_v8 = vadd.f32 %v11101_v58, %v2358_v10 }
 0x2e3   :  { %2636 = vst [vmem:[#allocation3 + $0x4e] sm:$0x1] %v6930_v36  ;;  %2738 = vst [vmem:[#allocation3 + $0x76] sm:$0x1] %v6942_v40  ;;  %v6939_v62 = vrot.slane %v2705_v54, 9  ;;  %v2425_v3 = vmax.f32 %v2409_v56, 0.0 }
 0x2e4   :  { %2752 = vst [vmem:[#allocation3 + $0x7a] sm:$0x1] %v6944_v45  ;;  %2755 = vst [vmem:[#allocation3 + $0x7c] sm:$0x1] %v2753_v50  ;;  %v2424_v5 = vmax.f32 %v2408_v57, 0.0  ;;  %v2427_v55 = vmax.f32 %v2411_v59, 0.0 }
 0x2e5   :  { %2697 = vst [vmem:[#allocation3 + $0x66] sm:$0x1] %v6937_v53  ;;  %2759 = vst [vmem:[#allocation3 + $0x7e] sm:$0x1] %v6945_v43  ;;  %v2426_v7 = vmax.f32 %v2410_v61, 0.0  ;;  %v11137_v24 = vmax.f32 %v2413_v42, 0.0  ;;  %v2809_v21 = vrot.slane %v2425_v3, %v11104_v63  ;;  %v2821_v25 = vcombine.high %v2425_v3, %v2425_v3 }
 0x2e6   :  { %v11142_v18 = vpop.f32.mrb[14].mxu1  ;;  %2711 = vst [vmem:[#allocation3 + $0x6a] sm:$0x1] %v6939_v62  ;;  %2714 = vst [vmem:[#allocation3 + $0x6c] sm:$0x1] %v2712_v1  ;;  %v6940_v20 = vrot.slane %v2712_v1, 9  ;;  %v2768_v27 = vrot.slane %v2424_v5, %v11104_v63  ;;  %v2780_v29 = vcombine.high %v2424_v5, %v2424_v5  ;;  %v2891_v31 = vrot.slane %v2427_v55, %v11104_v63 }
 0x2e7   :  { %2801 = vst [vmem:[#allocation3 + $0x11] sm:$0x1] %v2425_v3  ;;  %2760 = vst [vmem:[#allocation3 + $0x1] sm:$0x1] %v2424_v5  ;;  %v11146_v46 = vpop.f32.mrb[15].mxu1  ;;  %v2903_v32 = vcombine.high %v2427_v55, %v2427_v55  ;;  %v2850_v35 = vrot.slane %v2426_v7, %v11104_v63  ;;  %v6951_v0 = vrot.slane %v2809_v21, 9  ;;  %v2814_v37 = vcombine.high %v2809_v21, %v2809_v21 }
 0x2e8   :  { %2883 = vst [vmem:[#allocation3 + $0x31] sm:$0x1] %v2427_v55  ;;  %2842 = vst [vmem:[#allocation3 + $0x21] sm:$0x1] %v2426_v7  ;;  %v2828_v38 = vrot.slane %v2821_v25, %v11104_v63  ;;  %v6946_v60 = vrot.slane %v2768_v27, 9  ;;  %v2773_v41 = vcombine.high %v2768_v27, %v2768_v27  ;;  %v2787_v2 = vrot.slane %v2780_v29, %v11104_v63 }
 0x2e9   :  { %2965 = vst [vmem:[#allocation3 + $0x51] sm:$0x1] %v11137_v24  ;;  %2718 = vst [vmem:[#allocation3 + $0x6e] sm:$0x1] %v6940_v20  ;;  %v6961_v6 = vrot.slane %v2891_v31, 9  ;;  %v2896_v9 = vcombine.high %v2891_v31, %v2891_v31  ;;  %v6952_v12 = vrot.slane %v2814_v37, 9  ;;  %v2910_v16 = vrot.slane %v2903_v32, %v11104_v63 }
 0x2ea   :  { %6953 = vst.sshfl [vmem:[#allocation3 + $0x19] sm:$0x1 pattern:$0x76325410] %v2821_v25  ;;  %2813 = vst [vmem:[#allocation3 + $0x13] sm:$0x1] %v6951_v0  ;;  %v2835_v14 = vcombine.high %v2828_v38, %v2828_v38  ;;  %v2794_v4 = vcombine.high %v2787_v2, %v2787_v2  ;;  %v2855_v44 = vcombine.high %v2850_v35, %v2850_v35 }
 0x2eb   :  { %6948 = vst.sshfl [vmem:[#allocation3 + $0x9] sm:$0x1 pattern:$0x76325410] %v2780_v29  ;;  %2816 = vst [vmem:[#allocation3 + $0x15] sm:$0x1] %v2814_v37  ;;  %v2917_v22 = vcombine.high %v2910_v16, %v2910_v16  ;;  %v2862_v47 = vcombine.high %v2426_v7, %v2426_v7  ;;  %v2973_v39 = vrot.slane %v11137_v24, %v11104_v63 }
 0x2ec   :  { %6963 = vst.sshfl [vmem:[#allocation3 + $0x39] sm:$0x1 pattern:$0x76325410] %v2903_v32  ;;  %v6954_v13 = vrot.slane %v2828_v38, 9  ;;  %v6947_v17 = vrot.slane %v2773_v41, 9  ;;  %v2985_v49 = vcombine.high %v11137_v24, %v11137_v24  ;;  %v2415_v28 = vadd.f32 %v11142_v18, %v11101_v58 }
 0x2ed   :  { %2772 = vst [vmem:[#allocation3 + $0x3] sm:$0x1] %v6946_v60  ;;  %2775 = vst [vmem:[#allocation3 + $0x5] sm:$0x1] %v2773_v41  ;;  %v6949_v19 = vrot.slane %v2787_v2, 9  ;;  %v6962_v23 = vrot.slane %v2896_v9, 9  ;;  %v2869_v33 = vrot.slane %v2862_v47, %v11104_v63  ;;  %v2978_v40 = vcombine.high %v2973_v39, %v2973_v39 }
 0x2ee   :  { %2895 = vst [vmem:[#allocation3 + $0x33] sm:$0x1] %v6961_v6  ;;  %2898 = vst [vmem:[#allocation3 + $0x35] sm:$0x1] %v2896_v9  ;;  %v6955_v11 = vrot.slane %v2835_v14, 9  ;;  %v6964_v15 = vrot.slane %v2910_v16, 9  ;;  %v2992_v45 = vrot.slane %v2985_v49, %v11104_v63  ;;  %v2414_v10 = vadd.f32 %v11101_v58, %v11146_v46 }
 0x2ef   :  { %2820 = vst [vmem:[#allocation3 + $0x17] sm:$0x1] %v6952_v12  ;;  %2834 = vst [vmem:[#allocation3 + $0x1b] sm:$0x1] %v6954_v13  ;;  %v6956_v26 = vrot.slane %v2850_v35, 9  ;;  %v6950_v34 = vrot.slane %v2794_v4, 9  ;;  %v2876_v56 = vcombine.high %v2869_v33, %v2869_v33 }
 0x2f0   :  { %2837 = vst [vmem:[#allocation3 + $0x1d] sm:$0x1] %v2835_v14  ;;  %2779 = vst [vmem:[#allocation3 + $0x7] sm:$0x1] %v6947_v17  ;;  %v6965_v48 = vrot.slane %v2917_v22, 9  ;;  %v2428_v51 = vmax.f32 %v11140_v8, 0.0  ;;  %v2999_v59 = vcombine.high %v2992_v45, %v2992_v45 }
 0x2f1   :  { %2793 = vst [vmem:[#allocation3 + $0xb] sm:$0x1] %v6949_v19  ;;  %2796 = vst [vmem:[#allocation3 + $0xd] sm:$0x1] %v2794_v4  ;;  %v6957_v30 = vrot.slane %v2855_v44, 9  ;;  %v6971_v36 = vrot.slane %v2973_v39, 9 }
 0x2f2   :  { %2902 = vst [vmem:[#allocation3 + $0x37] sm:$0x1] %v6962_v23  ;;  %2841 = vst [vmem:[#allocation3 + $0x1f] sm:$0x1] %v6955_v11  ;;  %v2932_v50 = vrot.slane %v2428_v51, %v11104_v63  ;;  %v2944_v52 = vcombine.high %v2428_v51, %v2428_v51  ;;  %v2431_v53 = vmax.f32 %v2415_v28, 0.0  ;;  %v6959_v54 = vrot.slane %v2869_v33, 9 }
 0x2f3   :  { %2916 = vst [vmem:[#allocation3 + $0x3b] sm:$0x1] %v6964_v15  ;;  %2919 = vst [vmem:[#allocation3 + $0x3d] sm:$0x1] %v2917_v22  ;;  %v6972_v57 = vrot.slane %v2978_v40, 9  ;;  %v6974_v43 = vrot.slane %v2992_v45, 9 }
 0x2f4   :  { %2854 = vst [vmem:[#allocation3 + $0x23] sm:$0x1] %v6956_v26  ;;  %2800 = vst [vmem:[#allocation3 + $0xf] sm:$0x1] %v6950_v34  ;;  %v6966_v61 = vrot.slane %v2932_v50, 9  ;;  %v2937_v42 = vcombine.high %v2932_v50, %v2932_v50  ;;  %v6960_v62 = vrot.slane %v2876_v56, 9  ;;  %v2951_v1 = vrot.slane %v2944_v52, %v11104_v63 }
 0x2f5   :  { %2857 = vst [vmem:[#allocation3 + $0x25] sm:$0x1] %v2855_v44  ;;  %6958 = vst.sshfl [vmem:[#allocation3 + $0x29] sm:$0x1 pattern:$0x76325410] %v2862_v47  ;;  %v3055_v3 = vrot.slane %v2431_v53, %v11104_v63  ;;  %v3067_v5 = vcombine.high %v2431_v53, %v2431_v53 }
 0x2f6   :  { %2923 = vst [vmem:[#allocation3 + $0x3f] sm:$0x1] %v6965_v48  ;;  %6973 = vst.sshfl [vmem:[#allocation3 + $0x59] sm:$0x1 pattern:$0x76325410] %v2985_v49  ;;  %v2958_v21 = vcombine.high %v2951_v1, %v2951_v1 }
 0x2f7   :  { %2924 = vst [vmem:[#allocation3 + $0x41] sm:$0x1] %v2428_v51  ;;  %2861 = vst [vmem:[#allocation3 + $0x27] sm:$0x1] %v6957_v30  ;;  %v6975_v55 = vrot.slane %v2999_v59, 9  ;;  %v6967_v58 = vrot.slane %v2937_v42, 9  ;;  %v3060_v27 = vcombine.high %v3055_v3, %v3055_v3  ;;  %v3074_v46 = vrot.slane %v3067_v5, %v11104_v63 }
 0x2f8   :  { %2977 = vst [vmem:[#allocation3 + $0x53] sm:$0x1] %v6971_v36  ;;  %2980 = vst [vmem:[#allocation3 + $0x55] sm:$0x1] %v2978_v40  ;;  %v2430_v7 = vmax.f32 %v2414_v10, 0.0  ;;  %v3088_v24 = vld [vmem:[#allocation3] sm:$0xff] }
 0x2f9   :  { %6968 = vst.sshfl [vmem:[#allocation3 + $0x49] sm:$0x1 pattern:$0x76325410] %v2944_v52  ;;  %3047 = vst [vmem:[#allocation3 + $0x71] sm:$0x1] %v2431_v53  ;;  %v4158_v32 = vrot.slane %v3088_v24, %v11104_v63  ;;  %v4151_v38 = vcombine.high %v3088_v24, %v3088_v24  ;;  %v3081_v6 = vcombine.high %v3074_v46, %v3074_v46 }
 0x2fa   :  { %2875 = vst [vmem:[#allocation3 + $0x2b] sm:$0x1] %v6959_v54  ;;  %2878 = vst [vmem:[#allocation3 + $0x2d] sm:$0x1] %v2876_v56  ;;  %v11171_v8 = vld [vmem:[%s14322_s5 + $0x100] sm:$0xff]  ;;  %v11176_v18 = vld [vmem:[%s14322_s5 + $0x108] sm:$0xff]  ;;  %v3014_v29 = vrot.slane %v2430_v7, %v11104_v63  ;;  %v3026_v31 = vcombine.high %v2430_v7, %v2430_v7 }
 0x2fb   :  { %2984 = vst [vmem:[#allocation3 + $0x57] sm:$0x1] %v6972_v57  ;;  %2998 = vst [vmem:[#allocation3 + $0x5b] sm:$0x1] %v6974_v43  ;;  %v6969_v20 = vrot.slane %v2951_v1, 9  ;;  %v6981_v25 = vrot.slane %v3055_v3, 9  ;;  %v8923_v37 = vpack.c.bf16 %v11176_v18, %v11171_v8  ;;  %v4166_v16 = vcombine.high %v4158_v32, %v4158_v32 }
 0x2fc   :  { %3001 = vst [vmem:[#allocation3 + $0x5d] sm:$0x1] %v2999_v59  ;;  %2936 = vst [vmem:[#allocation3 + $0x43] sm:$0x1] %v6966_v61  ;;  %v6970_v35 = vrot.slane %v2958_v21, 9  ;;  %v6982_v0 = vrot.slane %v3060_v27, 9  ;;  %v3019_v12 = vcombine.high %v3014_v29, %v3014_v29  ;;  %v3033_v14 = vrot.slane %v3026_v31, %v11104_v63 }
 0x2fd   :  { %2939 = vst [vmem:[#allocation3 + $0x45] sm:$0x1] %v2937_v42  ;;  %2882 = vst [vmem:[#allocation3 + $0x2f] sm:$0x1] %v6960_v62  ;;  %v3154_v60 = vld [vmem:[%s14322_s5 + $0x190] sm:$0xff]  ;;  %v3155_v41 = vld [vmem:[%s14322_s5 + $0x198] sm:$0xff]  ;;  %v11191_v17 = vrot.slane %v4151_v38, %v11104_v63  ;;  %4551 = vmatprep.mubr.f32.mxu0 %v4166_v16 }
 0x2fe   :  { %6983 = vst.sshfl [vmem:[#allocation3 + $0x79] sm:$0x1 pattern:$0x76325410] %v3067_v5  ;;  %3005 = vst [vmem:[#allocation3 + $0x5f] sm:$0x1] %v6975_v55  ;;  %v8925_v22 = vpack.c.bf16 %v3155_v41, %v3154_v60  ;;  %v3040_v39 = vcombine.high %v3033_v14, %v3033_v14  ;;  %4552 = vmatmul.mubr.f32.vlgmr.msra.gmra.mrb[16].mxu0 %v4158_v32 }
 0x2ff   :  { %2943 = vst [vmem:[#allocation3 + $0x47] sm:$0x1] %v6967_v58  ;;  %3006 = vst [vmem:[#allocation3 + $0x61] sm:$0x1] %v2430_v7  ;;  %v6984_v2 = vrot.slane %v3074_v46, 9  ;;  %v6976_v9 = vrot.slane %v3014_v29, 9  ;;  %v4167_v48 = vcombine.high %v11191_v17, %v11191_v17  ;;  %8924 = vmatpush3.bf16.msra.mxu0 %v8923_v37 }
 0x300   :  { %2957 = vst [vmem:[#allocation3 + $0x4b] sm:$0x1] %v6969_v20  ;;  %2960 = vst [vmem:[#allocation3 + $0x4d] sm:$0x1] %v2958_v21  ;;  %v3092_v13 = vld [vmem:[#allocation3 + $0x20] sm:$0xff]  ;;  %v3138_v19 = vld [vmem:[%s14322_s5 + $0x110] sm:$0xff]  ;;  %8926 = vmatprep.subr.bf16.mxu0 %v8925_v22 }
 0x301   :  { %3059 = vst [vmem:[#allocation3 + $0x73] sm:$0x1] %v6981_v25  ;;  %3062 = vst [vmem:[#allocation3 + $0x75] sm:$0x1] %v3060_v27  ;;  %v3139_v4 = vld [vmem:[%s14322_s5 + $0x118] sm:$0xff]  ;;  %v4219_v23 = vcombine.high %v3092_v13, %v3092_v13  ;;  %v6985_v11 = vrot.slane %v3081_v6, 9  ;;  %4621 = vmatprep.mubr.f32.mxu0 %v4167_v48 }
 0x302   :  { %6978 = vst.sshfl [vmem:[#allocation3 + $0x69] sm:$0x1 pattern:$0x76325410] %v3026_v31  ;;  %2964 = vst [vmem:[#allocation3 + $0x4f] sm:$0x1] %v6970_v35  ;;  %v8927_v33 = vpack.c.bf16 %v3139_v4, %v3138_v19 }
 0x303   :  { %3066 = vst [vmem:[#allocation3 + $0x77] sm:$0x1] %v6982_v0  ;;  %3080 = vst [vmem:[#allocation3 + $0x7b] sm:$0x1] %v6984_v2  ;;  %v6977_v15 = vrot.slane %v3019_v12, 9  ;;  %v3456_v26 = vld [vmem:[%s14322_s5 + $0xb00] sm:$0xff]  ;;  %v4233_v49 = vrot.slane %v4219_v23, %v11104_v63 }
 0x304   :  { %3083 = vst [vmem:[#allocation3 + $0x7d] sm:$0x1] %v3081_v6  ;;  %3018 = vst [vmem:[#allocation3 + $0x63] sm:$0x1] %v6976_v9  ;;  %v3457_v34 = vld [vmem:[%s14322_s5 + $0xb08] sm:$0xff]  ;;  %v3156_v44 = vld [vmem:[%s14322_s5 + $0x1a0] sm:$0xff]  ;;  %8928 = vmatpush3.bf16.msra.mxu0 %v8927_v33 }
 0x305   :  { %3021 = vst [vmem:[#allocation3 + $0x65] sm:$0x1] %v3019_v12  ;;  %v6979_v47 = vrot.slane %v3033_v14, 9  ;;  %v3157_v51 = vld [vmem:[%s14322_s5 + $0x1a8] sm:$0xff]  ;;  %v3474_v28 = vld [vmem:[%s14322_s5 + $0xb90] sm:$0xff]  ;;  %v3475_v30 = vld [vmem:[%s14322_s5 + $0xb98] sm:$0xff]  ;;  %v4235_v45 = vcombine.high %v4233_v49, %v4233_v49  ;;  %v9243_v50 = vpack.c.bf16 %v3457_v34, %v3456_v26 }
 0x306   :  { %3087 = vst [vmem:[#allocation3 + $0x7f] sm:$0x1] %v6985_v11  ;;  %3025 = vst [vmem:[#allocation3 + $0x67] sm:$0x1] %v6977_v15  ;;  %v3093_v36 = vld [vmem:[#allocation3 + $0x28] sm:$0xff]  ;;  %v6980_v40 = vrot.slane %v3040_v39, 9  ;;  %v8929_v56 = vpack.c.bf16 %v3157_v51, %v3156_v44  ;;  %v9245_v57 = vpack.c.bf16 %v3475_v30, %v3474_v28 }
 0x307   :  { %3039 = vst [vmem:[#allocation3 + $0x6b] sm:$0x1] %v6979_v47  ;;  %3042 = vst [vmem:[#allocation3 + $0x6d] sm:$0x1] %v3040_v39  ;;  %v4236_v52 = vcombine.high %v3093_v36, %v3093_v36  ;;  %v3140_v53 = vld [vmem:[%s14322_s5 + $0x120] sm:$0xff]  ;;  %v3141_v54 = vld [vmem:[%s14322_s5 + $0x128] sm:$0xff]  ;;  %5181 = vmatprep.mubr.f32.mxu1 %v4235_v45 }
 0x308   :  { %v3458_v10 = vld [vmem:[%s14322_s5 + $0xb10] sm:$0xff]  ;;  %v3459_v43 = vld [vmem:[%s14322_s5 + $0xb18] sm:$0xff]  ;;  %3046 = vst [vmem:[#allocation3 + $0x6f] sm:$0x1] %v6980_v40  ;;  %v3476_v62 = vld [vmem:[%s14322_s5 + $0xba0] sm:$0xff]  ;;  %5182 = vmatmul.mubr.f32.vlgmr.msra.gmra.mrb[16].mxu1 %v4233_v49  ;;  %v8931_v5 = vpack.c.bf16 %v3141_v54, %v3140_v53  ;;  %8930 = vmatprep.subr.bf16.mxu0 %v8929_v56 }
 0x309   :  { %v3158_v59 = vld [vmem:[%s14322_s5 + $0x1b0] sm:$0xff]  ;;  %v11236_v61 = vrot.slane %v4236_v52, %v11104_v63  ;;  %v3159_v42 = vld [vmem:[%s14322_s5 + $0x1b8] sm:$0xff]  ;;  %v3477_v1 = vld [vmem:[%s14322_s5 + $0xba8] sm:$0xff]  ;;  %9244 = vmatpush3.bf16.msra.mxu1 %v9243_v50  ;;  %v9247_v55 = vpack.c.bf16 %v3459_v43, %v3458_v10 }
 0x30a   :  { %v3142_v58 = vld [vmem:[%s14322_s5 + $0x130] sm:$0xff]  ;;  %v3143_v7 = vld [vmem:[%s14322_s5 + $0x138] sm:$0xff]  ;;  %9246 = vmatprep.subr.bf16.mxu1 %v9245_v57  ;;  %v8933_v24 = vpack.c.bf16 %v3159_v42, %v3158_v59  ;;  %v9249_v8 = vpack.c.bf16 %v3477_v1, %v3476_v62  ;;  %v3460_v18 = vld [vmem:[%s14322_s5 + $0xb20] sm:$0xff]  ;;  %8932 = vmatpush3.bf16.msra.mxu0 %v8931_v5 }
 0x30b   :  { %v4252_v3 = vcombine.high %v11236_v61, %v11236_v61  ;;  %v3461_v20 = vld [vmem:[%s14322_s5 + $0xb28] sm:$0xff]  ;;  %v3160_v21 = vld [vmem:[%s14322_s5 + $0x1c0] sm:$0xff]  ;;  %v3478_v27 = vld [vmem:[%s14322_s5 + $0xbb0] sm:$0xff]  ;;  %v8935_v29 = vpack.c.bf16 %v3143_v7, %v3142_v58 }
 0x30c   :  { %v3161_v25 = vld [vmem:[%s14322_s5 + $0x1c8] sm:$0xff]  ;;  %v3479_v46 = vld [vmem:[%s14322_s5 + $0xbb8] sm:$0xff]  ;;  %v9251_v31 = vpack.c.bf16 %v3461_v20, %v3460_v18  ;;  %v3144_v32 = vld [vmem:[%s14322_s5 + $0x140] sm:$0xff]  ;;  %8934 = vmatprep.subr.bf16.mxu0 %v8933_v24 }
 0x30d   :  { %5321 = vmatprep.mubr.f32.mxu1 %v4252_v3  ;;  %9248 = vmatpush3.bf16.msra.mxu1 %v9247_v55  ;;  %v3145_v35 = vld [vmem:[%s14322_s5 + $0x148] sm:$0xff]  ;;  %v8937_v0 = vpack.c.bf16 %v3161_v25, %v3160_v21  ;;  %v9253_v37 = vpack.c.bf16 %v3479_v46, %v3478_v27  ;;  %v3462_v38 = vld [vmem:[%s14322_s5 + $0xb30] sm:$0xff]  ;;  %v3463_v60 = vld [vmem:[%s14322_s5 + $0xb38] sm:$0xff] }
 0x30e   :  { %9250 = vmatprep.subr.bf16.mxu1 %v9249_v8  ;;  %v3162_v41 = vld [vmem:[%s14322_s5 + $0x1d0] sm:$0xff]  ;;  %v3163_v2 = vld [vmem:[%s14322_s5 + $0x1d8] sm:$0xff]  ;;  %v3480_v6 = vld [vmem:[%s14322_s5 + $0xbc0] sm:$0xff]  ;;  %8936 = vmatpush3.bf16.msra.mxu0 %v8935_v29  ;;  %v8939_v12 = vpack.c.bf16 %v3145_v35, %v3144_v32  ;;  %v9255_v13 = vpack.c.bf16 %v3463_v60, %v3462_v38 }
 0x30f   :  { %v3481_v9 = vld [vmem:[%s14322_s5 + $0xbc8] sm:$0xff]  ;;  %v3146_v14 = vld [vmem:[%s14322_s5 + $0x150] sm:$0xff]  ;;  %v3147_v16 = vld [vmem:[%s14322_s5 + $0x158] sm:$0xff]  ;;  %8938 = vmatprep.subr.bf16.mxu0 %v8937_v0  ;;  %v8941_v19 = vpack.c.bf16 %v3163_v2, %v3162_v41 }
 0x310   :  { %v9257_v4 = vpack.c.bf16 %v3481_v9, %v3480_v6  ;;  %v3464_v23 = vld [vmem:[%s14322_s5 + $0xb40] sm:$0xff]  ;;  %v3465_v11 = vld [vmem:[%s14322_s5 + $0xb48] sm:$0xff]  ;;  %v3482_v26 = vld [vmem:[%s14322_s5 + $0xbd0] sm:$0xff]  ;;  %v8943_v44 = vpack.c.bf16 %v3147_v16, %v3146_v14 }
 0x311   :  { %9252 = vmatpush3.bf16.msra.mxu1 %v9251_v31  ;;  %v3164_v15 = vld [vmem:[%s14322_s5 + $0x1e0] sm:$0xff]  ;;  %v3165_v22 = vld [vmem:[%s14322_s5 + $0x1e8] sm:$0xff]  ;;  %v3483_v34 = vld [vmem:[%s14322_s5 + $0xbd8] sm:$0xff]  ;;  %v9259_v47 = vpack.c.bf16 %v3465_v11, %v3464_v23 }
 0x312   :  { %9254 = vmatprep.subr.bf16.mxu1 %v9253_v37  ;;  %8940 = vmatpush3.bf16.msra.mxu0 %v8939_v12  ;;  %v3148_v39 = vld [vmem:[%s14322_s5 + $0x160] sm:$0xff]  ;;  %v3149_v48 = vld [vmem:[%s14322_s5 + $0x168] sm:$0xff]  ;;  %v8945_v49 = vpack.c.bf16 %v3165_v22, %v3164_v15  ;;  %v9261_v51 = vpack.c.bf16 %v3483_v34, %v3482_v26  ;;  %v3466_v28 = vld [vmem:[%s14322_s5 + $0xb50] sm:$0xff] }
 0x313   :  { %8942 = vmatprep.subr.bf16.mxu0 %v8941_v19  ;;  %v3467_v30 = vld [vmem:[%s14322_s5 + $0xb58] sm:$0xff]  ;;  %v3166_v33 = vld [vmem:[%s14322_s5 + $0x1f0] sm:$0xff]  ;;  %v3484_v40 = vld [vmem:[%s14322_s5 + $0xbe0] sm:$0xff]  ;;  %v8947_v50 = vpack.c.bf16 %v3149_v48, %v3148_v39 }
 0x314   :  { %v3167_v36 = vld [vmem:[%s14322_s5 + $0x1f8] sm:$0xff]  ;;  %v3485_v45 = vld [vmem:[%s14322_s5 + $0xbe8] sm:$0xff]  ;;  %v9263_v52 = vpack.c.bf16 %v3467_v30, %v3466_v28  ;;  %v3150_v53 = vld [vmem:[%s14322_s5 + $0x170] sm:$0xff] }
 0x315   :  { %9256 = vmatpush3.bf16.msra.mxu1 %v9255_v13  ;;  %v3151_v54 = vld [vmem:[%s14322_s5 + $0x178] sm:$0xff]  ;;  %v8949_v56 = vpack.c.bf16 %v3167_v36, %v3166_v33  ;;  %v9265_v57 = vpack.c.bf16 %v3485_v45, %v3484_v40  ;;  %v3468_v10 = vld [vmem:[%s14322_s5 + $0xb60] sm:$0xff]  ;;  %v3469_v43 = vld [vmem:[%s14322_s5 + $0xb68] sm:$0xff] }
 0x316   :  { %9258 = vmatprep.subr.bf16.mxu1 %v9257_v4  ;;  %8944 = vmatpush3.bf16.msra.mxu0 %v8943_v44  ;;  %v3184_v59 = vld [vmem:[%s14322_s5 + $0x280] sm:$0xff]  ;;  %v3185_v42 = vld [vmem:[%s14322_s5 + $0x288] sm:$0xff]  ;;  %v3486_v62 = vld [vmem:[%s14322_s5 + $0xbf0] sm:$0xff]  ;;  %v8951_v5 = vpack.c.bf16 %v3151_v54, %v3150_v53  ;;  %v9267_v55 = vpack.c.bf16 %v3469_v43, %v3468_v10 }
 0x317   :  { %8946 = vmatprep.subr.bf16.mxu0 %v8945_v49  ;;  %v3487_v1 = vld [vmem:[%s14322_s5 + $0xbf8] sm:$0xff]  ;;  %v11369_v3 = vld [vmem:[#allocation3 + $0x8] sm:$0xff]  ;;  %v3094_v58 = vld [vmem:[#allocation3 + $0x30] sm:$0xff]  ;;  %v8953_v7 = vpack.c.bf16 %v3185_v42, %v3184_v59 }
 0x318   :  { %v3168_v24 = vld [vmem:[%s14322_s5 + $0x200] sm:$0xff]  ;;  %v3169_v8 = vld [vmem:[%s14322_s5 + $0x208] sm:$0xff]  ;;  %v9269_v18 = vpack.c.bf16 %v3487_v1, %v3486_v62  ;;  %v3470_v20 = vld [vmem:[%s14322_s5 + $0xb70] sm:$0xff]  ;;  %v11382_v21 = vrot.slane %v11369_v3, %v11104_v63  ;;  %v4253_v32 = vcombine.high %v3094_v58, %v3094_v58 }
 0x319   :  { %9260 = vmatpush3.bf16.msra.mxu1 %v9259_v47  ;;  %v3471_v25 = vld [vmem:[%s14322_s5 + $0xb78] sm:$0xff]  ;;  %v3186_v27 = vld [vmem:[%s14322_s5 + $0x290] sm:$0xff]  ;;  %v3536_v29 = vld [vmem:[%s14322_s5 + $0xd80] sm:$0xff]  ;;  %v8955_v35 = vpack.c.bf16 %v3169_v8, %v3168_v24 }
 0x31a   :  { %9262 = vmatprep.subr.bf16.mxu1 %v9261_v51  ;;  %8948 = vmatpush3.bf16.msra.mxu0 %v8947_v50  ;;  %v3187_v46 = vld [vmem:[%s14322_s5 + $0x298] sm:$0xff]  ;;  %v3537_v31 = vld [vmem:[%s14322_s5 + $0xd88] sm:$0xff]  ;;  %v9271_v0 = vpack.c.bf16 %v3471_v25, %v3470_v20  ;;  %v3170_v38 = vld [vmem:[%s14322_s5 + $0x210] sm:$0xff]  ;;  %v4183_v41 = vcombine.high %v11382_v21, %v11382_v21  ;;  %v11418_v13 = vrot.slane %v4253_v32, %v11104_v63 }
 0x31b   :  { %8950 = vmatprep.subr.bf16.mxu0 %v8949_v56  ;;  %v8957_v37 = vpack.c.bf16 %v3187_v46, %v3186_v27  ;;  %v3171_v60 = vld [vmem:[%s14322_s5 + $0x218] sm:$0xff]  ;;  %v9305_v2 = vpack.c.bf16 %v3537_v31, %v3536_v29  ;;  %v3520_v6 = vld [vmem:[%s14322_s5 + $0xd00] sm:$0xff]  ;;  %v3521_v9 = vld [vmem:[%s14322_s5 + $0xd08] sm:$0xff] }
 0x31c   :  { %v3188_v12 = vld [vmem:[%s14322_s5 + $0x2a0] sm:$0xff]  ;;  %v3189_v14 = vld [vmem:[%s14322_s5 + $0x2a8] sm:$0xff]  ;;  %v3538_v16 = vld [vmem:[%s14322_s5 + $0xd90] sm:$0xff]  ;;  %v8959_v4 = vpack.c.bf16 %v3171_v60, %v3170_v38  ;;  %v4269_v39 = vcombine.high %v11418_v13, %v11418_v13 }
 0x31d   :  { %9264 = vmatpush3.bf16.msra.mxu1 %v9263_v52  ;;  %v3539_v19 = vld [vmem:[%s14322_s5 + $0xd98] sm:$0xff]  ;;  %v3172_v23 = vld [vmem:[%s14322_s5 + $0x220] sm:$0xff]  ;;  %v3173_v11 = vld [vmem:[%s14322_s5 + $0x228] sm:$0xff]  ;;  %v8961_v22 = vpack.c.bf16 %v3189_v14, %v3188_v12 }
 0x31e   :  { %9266 = vmatprep.subr.bf16.mxu1 %v9265_v57  ;;  %8952 = vmatpush3.bf16.msra.mxu0 %v8951_v5  ;;  %v3522_v15 = vld [vmem:[%s14322_s5 + $0xd10] sm:$0xff]  ;;  %v9309_v26 = vpack.c.bf16 %v3539_v19, %v3538_v16  ;;  %v3523_v34 = vld [vmem:[%s14322_s5 + $0xd18] sm:$0xff]  ;;  %v3540_v48 = vld [vmem:[%s14322_s5 + $0xda0] sm:$0xff]  ;;  %v8963_v51 = vpack.c.bf16 %v3173_v11, %v3172_v23 }
 0x31f   :  { %8954 = vmatprep.subr.bf16.mxu0 %v8953_v7  ;;  %v3190_v44 = vld [vmem:[%s14322_s5 + $0x2b0] sm:$0xff]  ;;  %v3191_v47 = vld [vmem:[%s14322_s5 + $0x2b8] sm:$0xff]  ;;  %v3541_v49 = vld [vmem:[%s14322_s5 + $0xda8] sm:$0xff]  ;;  %v9311_v28 = vpack.c.bf16 %v3523_v34, %v3522_v15 }
 0x320   :  { %v8965_v30 = vpack.c.bf16 %v3191_v47, %v3190_v44  ;;  %v3174_v33 = vld [vmem:[%s14322_s5 + $0x230] sm:$0xff]  ;;  %v3175_v36 = vld [vmem:[%s14322_s5 + $0x238] sm:$0xff]  ;;  %v3524_v40 = vld [vmem:[%s14322_s5 + $0xd20] sm:$0xff] }
 0x321   :  { %9268 = vmatpush3.bf16.msra.mxu1 %v9267_v55  ;;  %4622 = vmatmul.mubr.f32.vlgmr.msra.gmra.mrb[18].mxu0 %v11191_v17  ;;  %v9307_v17 = vpack.c.bf16 %v3521_v9, %v3520_v6  ;;  %v3525_v45 = vld [vmem:[%s14322_s5 + $0xd28] sm:$0xff]  ;;  %v3192_v50 = vld [vmem:[%s14322_s5 + $0x2c0] sm:$0xff]  ;;  %v3542_v53 = vld [vmem:[%s14322_s5 + $0xdb0] sm:$0xff]  ;;  %v8967_v56 = vpack.c.bf16 %v3175_v36, %v3174_v33 }
 0x322   :  { %9270 = vmatprep.subr.bf16.mxu1 %v9269_v18  ;;  %8956 = vmatpush3.bf16.msra.mxu0 %v8955_v35  ;;  %v3193_v52 = vld [vmem:[%s14322_s5 + $0x2c8] sm:$0xff]  ;;  %v3543_v54 = vld [vmem:[%s14322_s5 + $0xdb8] sm:$0xff]  ;;  %v9315_v57 = vpack.c.bf16 %v3525_v45, %v3524_v40  ;;  %v3176_v43 = vld [vmem:[%s14322_s5 + $0x240] sm:$0xff] }
 0x323   :  { %4691 = vmatprep.mubr.f32.mxu0 %v4183_v41  ;;  %8958 = vmatprep.subr.bf16.mxu0 %v8957_v37  ;;  %v8969_v10 = vpack.c.bf16 %v3193_v52, %v3192_v50  ;;  %v3177_v59 = vld [vmem:[%s14322_s5 + $0x248] sm:$0xff]  ;;  %v3526_v42 = vld [vmem:[%s14322_s5 + $0xd30] sm:$0xff]  ;;  %v9317_v62 = vpack.c.bf16 %v3543_v54, %v3542_v53  ;;  %v3527_v1 = vld [vmem:[%s14322_s5 + $0xd38] sm:$0xff] }
 0x324   :  { %v3194_v5 = vld [vmem:[%s14322_s5 + $0x2d0] sm:$0xff]  ;;  %v3195_v55 = vld [vmem:[%s14322_s5 + $0x2d8] sm:$0xff]  ;;  %v3544_v58 = vld [vmem:[%s14322_s5 + $0xdc0] sm:$0xff]  ;;  %v8971_v24 = vpack.c.bf16 %v3177_v59, %v3176_v43  ;;  %v9319_v8 = vpack.c.bf16 %v3527_v1, %v3526_v42 }
 0x325   :  { %9272 = vmatpush3.bf16.msra.mxu1 %v9271_v0  ;;  %v3545_v7 = vld [vmem:[%s14322_s5 + $0xdc8] sm:$0xff]  ;;  %v8973_v18 = vpack.c.bf16 %v3195_v55, %v3194_v5  ;;  %v3178_v20 = vld [vmem:[%s14322_s5 + $0x250] sm:$0xff]  ;;  %v3179_v25 = vld [vmem:[%s14322_s5 + $0x258] sm:$0xff] }
 0x326   :  { %9306 = vmatprep.subr.bf16.mxu1 %v9305_v2  ;;  %8960 = vmatpush3.bf16.msra.mxu0 %v8959_v4  ;;  %v3528_v27 = vld [vmem:[%s14322_s5 + $0xd40] sm:$0xff]  ;;  %v9321_v46 = vpack.c.bf16 %v3545_v7, %v3544_v58  ;;  %v3529_v29 = vld [vmem:[%s14322_s5 + $0xd48] sm:$0xff]  ;;  %v3546_v35 = vld [vmem:[%s14322_s5 + $0xdd0] sm:$0xff]  ;;  %v8975_v37 = vpack.c.bf16 %v3179_v25, %v3178_v20 }
 0x327   :  { %8962 = vmatprep.subr.bf16.mxu0 %v8961_v22  ;;  %v3196_v31 = vld [vmem:[%s14322_s5 + $0x2e0] sm:$0xff]  ;;  %v3197_v32 = vld [vmem:[%s14322_s5 + $0x2e8] sm:$0xff]  ;;  %v3547_v0 = vld [vmem:[%s14322_s5 + $0xdd8] sm:$0xff]  ;;  %v9323_v38 = vpack.c.bf16 %v3529_v29, %v3528_v27 }
 0x328   :  { %5322 = vmatmul.mubr.f32.vlgmr.msra.gmra.mrb[18].mxu1 %v11236_v61  ;;  %v9313_v61 = vpack.c.bf16 %v3541_v49, %v3540_v48  ;;  %v8977_v60 = vpack.c.bf16 %v3197_v32, %v3196_v31  ;;  %v3180_v41 = vld [vmem:[%s14322_s5 + $0x260] sm:$0xff]  ;;  %v3181_v2 = vld [vmem:[%s14322_s5 + $0x268] sm:$0xff]  ;;  %v3530_v6 = vld [vmem:[%s14322_s5 + $0xd50] sm:$0xff]  ;;  %v9325_v9 = vpack.c.bf16 %v3547_v0, %v3546_v35  ;;  %v4168_v48 = vcombine.high %v11369_v3, %v11369_v3 }
 0x329   :  { %9308 = vmatpush3.bf16.msra.mxu1 %v9307_v17  ;;  %5461 = vmatprep.mubr.f32.mxu1 %v4269_v39  ;;  %v3531_v12 = vld [vmem:[%s14322_s5 + $0xd58] sm:$0xff]  ;;  %v3198_v14 = vld [vmem:[%s14322_s5 + $0x2f0] sm:$0xff]  ;;  %v3548_v19 = vld [vmem:[%s14322_s5 + $0xde0] sm:$0xff]  ;;  %v8979_v17 = vpack.c.bf16 %v3181_v2, %v3180_v41 }
 0x32a   :  { %9310 = vmatprep.subr.bf16.mxu1 %v9309_v26  ;;  %8964 = vmatpush3.bf16.msra.mxu0 %v8963_v51  ;;  %v3199_v16 = vld [vmem:[%s14322_s5 + $0x2f8] sm:$0xff]  ;;  %v3549_v4 = vld [vmem:[%s14322_s5 + $0xde8] sm:$0xff]  ;;  %v9327_v23 = vpack.c.bf16 %v3531_v12, %v3530_v6  ;;  %v3182_v15 = vld [vmem:[%s14322_s5 + $0x270] sm:$0xff]  ;;  %v11588_v45 = vrot.slane %v4168_v48, %v11104_v63 }
 0x32b   :  { %8966 = vmatprep.subr.bf16.mxu0 %v8965_v30  ;;  %v8981_v11 = vpack.c.bf16 %v3199_v16, %v3198_v14  ;;  %v3183_v22 = vld [vmem:[%s14322_s5 + $0x278] sm:$0xff]  ;;  %v3532_v26 = vld [vmem:[%s14322_s5 + $0xd60] sm:$0xff]  ;;  %v9329_v34 = vpack.c.bf16 %v3549_v4, %v3548_v19  ;;  %v3533_v44 = vld [vmem:[%s14322_s5 + $0xd68] sm:$0xff] }
 0x32c   :  { %v3216_v47 = vld [vmem:[%s14322_s5 + $0x380] sm:$0xff]  ;;  %v3217_v39 = vld [vmem:[%s14322_s5 + $0x388] sm:$0xff]  ;;  %v3550_v49 = vld [vmem:[%s14322_s5 + $0xdf0] sm:$0xff]  ;;  %v9331_v33 = vpack.c.bf16 %v3533_v44, %v3532_v26  ;;  %v4184_v5 = vcombine.high %v11588_v45, %v11588_v45 }
 0x32d   :  { %9312 = vmatpush3.bf16.msra.mxu1 %v9311_v28  ;;  %v3551_v51 = vld [vmem:[%s14322_s5 + $0xdf8] sm:$0xff]  ;;  %v8983_v28 = vpack.c.bf16 %v3183_v22, %v3182_v15  ;;  %v8985_v36 = vpack.c.bf16 %v3217_v39, %v3216_v47  ;;  %v3200_v40 = vld [vmem:[%s14322_s5 + $0x300] sm:$0xff]  ;;  %v3201_v3 = vld [vmem:[%s14322_s5 + $0x308] sm:$0xff] }
 0x32e   :  { %9314 = vmatprep.subr.bf16.mxu1 %v9313_v61  ;;  %8968 = vmatpush3.bf16.msra.mxu0 %v8967_v56  ;;  %v3095_v30 = vld [vmem:[#allocation3 + $0x38] sm:$0xff]  ;;  %v3534_v61 = vld [vmem:[%s14322_s5 + $0xd70] sm:$0xff]  ;;  %v9333_v50 = vpack.c.bf16 %v3551_v51, %v3550_v49  ;;  %v3600_v56 = vld [vmem:[%s14322_s5 + $0xf80] sm:$0xff]  ;;  %v8987_v43 = vpack.c.bf16 %v3201_v3, %v3200_v40 }
 0x32f   :  { %8970 = vmatprep.subr.bf16.mxu0 %v8969_v10  ;;  %v3535_v52 = vld [vmem:[%s14322_s5 + $0xd78] sm:$0xff]  ;;  %v3218_v53 = vld [vmem:[%s14322_s5 + $0x390] sm:$0xff]  ;;  %v4270_v10 = vcombine.high %v3095_v30, %v3095_v30  ;;  %v3584_v58 = vld [vmem:[%s14322_s5 + $0xf00] sm:$0xff] }
 0x330   :  { %v3219_v54 = vld [vmem:[%s14322_s5 + $0x398] sm:$0xff]  ;;  %v9335_v59 = vpack.c.bf16 %v3535_v52, %v3534_v61  ;;  %v3585_v7 = vld [vmem:[%s14322_s5 + $0xf08] sm:$0xff]  ;;  %v3602_v20 = vld [vmem:[%s14322_s5 + $0xf90] sm:$0xff] }
 0x331   :  { %9316 = vmatpush3.bf16.msra.mxu1 %v9315_v57  ;;  %v3601_v57 = vld [vmem:[%s14322_s5 + $0xf88] sm:$0xff]  ;;  %v8989_v42 = vpack.c.bf16 %v3219_v54, %v3218_v53  ;;  %v3203_v1 = vld [vmem:[%s14322_s5 + $0x318] sm:$0xff]  ;;  %v3586_v31 = vld [vmem:[%s14322_s5 + $0xf10] sm:$0xff] }
 0x332   :  { %9318 = vmatprep.subr.bf16.mxu1 %v9317_v62  ;;  %8972 = vmatpush3.bf16.msra.mxu0 %v8971_v24  ;;  %v3202_v62 = vld [vmem:[%s14322_s5 + $0x310] sm:$0xff]  ;;  %v9369_v55 = vpack.c.bf16 %v3601_v57, %v3600_v56  ;;  %v3220_v24 = vld [vmem:[%s14322_s5 + $0x3a0] sm:$0xff]  ;;  %v3603_v25 = vld [vmem:[%s14322_s5 + $0xf98] sm:$0xff] }
 0x333   :  { %8974 = vmatprep.subr.bf16.mxu0 %v8973_v18  ;;  %v3221_v18 = vld [vmem:[%s14322_s5 + $0x3a8] sm:$0xff]  ;;  %v8991_v27 = vpack.c.bf16 %v3203_v1, %v3202_v62  ;;  %v9373_v35 = vpack.c.bf16 %v3603_v25, %v3602_v20  ;;  %v3587_v0 = vld [vmem:[%s14322_s5 + $0xf18] sm:$0xff]  ;;  %v3604_v41 = vld [vmem:[%s14322_s5 + $0xfa0] sm:$0xff] }
 0x334   :  { %v3205_v29 = vld [vmem:[%s14322_s5 + $0x328] sm:$0xff]  ;;  %v8993_v32 = vpack.c.bf16 %v3221_v18, %v3220_v24  ;;  %v3206_v14 = vld [vmem:[%s14322_s5 + $0x330] sm:$0xff]  ;;  %v3207_v16 = vld [vmem:[%s14322_s5 + $0x338] sm:$0xff] }
 0x335   :  { %9320 = vmatpush3.bf16.msra.mxu1 %v9319_v8  ;;  %v11624_v8 = vrot.slane %v4270_v10, %v11104_v63  ;;  %v3605_v2 = vld [vmem:[%s14322_s5 + $0xfa8] sm:$0xff]  ;;  %v3588_v19 = vld [vmem:[%s14322_s5 + $0xf20] sm:$0xff]  ;;  %v3607_v15 = vld [vmem:[%s14322_s5 + $0xfb8] sm:$0xff]  ;;  %v8999_v22 = vpack.c.bf16 %v3207_v16, %v3206_v14 }
 0x336   :  { %9322 = vmatprep.subr.bf16.mxu1 %v9321_v46  ;;  %8976 = vmatpush3.bf16.msra.mxu0 %v8975_v37  ;;  %v3204_v46 = vld [vmem:[%s14322_s5 + $0x320] sm:$0xff]  ;;  %v3222_v37 = vld [vmem:[%s14322_s5 + $0x3b0] sm:$0xff]  ;;  %v3589_v4 = vld [vmem:[%s14322_s5 + $0xf28] sm:$0xff] }
 0x337   :  { %8978 = vmatprep.subr.bf16.mxu0 %v8977_v60  ;;  %v4286_v60 = vcombine.high %v11624_v8, %v11624_v8  ;;  %v8995_v6 = vpack.c.bf16 %v3205_v29, %v3204_v46  ;;  %v9379_v26 = vpack.c.bf16 %v3589_v4, %v3588_v19  ;;  %v3208_v44 = vld [vmem:[%s14322_s5 + $0x340] sm:$0xff]  ;;  %v3209_v47 = vld [vmem:[%s14322_s5 + $0x348] sm:$0xff]  ;;  %v3590_v39 = vld [vmem:[%s14322_s5 + $0xf30] sm:$0xff] }
 0x338   :  { %v3591_v49 = vld [vmem:[%s14322_s5 + $0xf38] sm:$0xff]  ;;  %v3226_v51 = vld [vmem:[%s14322_s5 + $0x3d0] sm:$0xff]  ;;  %v3608_v30 = vld [vmem:[%s14322_s5 + $0xfc0] sm:$0xff] }
 0x339   :  { %9324 = vmatpush3.bf16.msra.mxu1 %v9323_v38  ;;  %v3223_v38 = vld [vmem:[%s14322_s5 + $0x3b8] sm:$0xff]  ;;  %v9383_v40 = vpack.c.bf16 %v3591_v49, %v3590_v39  ;;  %v3210_v61 = vld [vmem:[%s14322_s5 + $0x350] sm:$0xff]  ;;  %v3592_v52 = vld [vmem:[%s14322_s5 + $0xf40] sm:$0xff] }
 0x33a   :  { %9326 = vmatprep.subr.bf16.mxu1 %v9325_v9  ;;  %8980 = vmatpush3.bf16.msra.mxu0 %v8979_v17  ;;  %v9375_v9 = vpack.c.bf16 %v3587_v0, %v3586_v31  ;;  %v8997_v12 = vpack.c.bf16 %v3223_v38, %v3222_v37  ;;  %v3224_v17 = vld [vmem:[%s14322_s5 + $0x3c0] sm:$0xff]  ;;  %v3593_v54 = vld [vmem:[%s14322_s5 + $0xf48] sm:$0xff]  ;;  %v3610_v10 = vld [vmem:[%s14322_s5 + $0xfd0] sm:$0xff] }
 0x33b   :  { %8982 = vmatprep.subr.bf16.mxu0 %v8981_v11  ;;  %v3606_v11 = vld [vmem:[%s14322_s5 + $0xfb0] sm:$0xff]  ;;  %v3228_v56 = vld [vmem:[%s14322_s5 + $0x3e0] sm:$0xff]  ;;  %v3229_v57 = vld [vmem:[%s14322_s5 + $0x3e8] sm:$0xff] }
 0x33c   :  { %v9381_v48 = vpack.c.bf16 %v3607_v15, %v3606_v11  ;;  %v9009_v62 = vpack.c.bf16 %v3229_v57, %v3228_v56  ;;  %v3212_v1 = vld [vmem:[%s14322_s5 + $0x360] sm:$0xff]  ;;  %v3230_v24 = vld [vmem:[%s14322_s5 + $0x3f0] sm:$0xff]  ;;  %v3231_v18 = vld [vmem:[%s14322_s5 + $0x3f8] sm:$0xff] }
 0x33d   :  { %9328 = vmatpush3.bf16.msra.mxu1 %v9327_v23  ;;  %v3225_v23 = vld [vmem:[%s14322_s5 + $0x3c8] sm:$0xff]  ;;  %v3612_v20 = vld [vmem:[%s14322_s5 + $0xfe0] sm:$0xff]  ;;  %v9013_v46 = vpack.c.bf16 %v3231_v18, %v3230_v24  ;;  %v3214_v29 = vld [vmem:[%s14322_s5 + $0x370] sm:$0xff] }
 0x33e   :  { %9330 = vmatprep.subr.bf16.mxu1 %v9329_v34  ;;  %8984 = vmatpush3.bf16.msra.mxu0 %v8983_v28  ;;  %v9001_v34 = vpack.c.bf16 %v3225_v23, %v3224_v17  ;;  %v3227_v28 = vld [vmem:[%s14322_s5 + $0x3d8] sm:$0xff]  ;;  %v3613_v25 = vld [vmem:[%s14322_s5 + $0xfe8] sm:$0xff]  ;;  %v3248_v37 = vld [vmem:[%s14322_s5 + $0x480] sm:$0xff] }
 0x33f   :  { %8986 = vmatprep.subr.bf16.mxu0 %v8985_v36  ;;  %v9003_v36 = vpack.c.bf16 %v3209_v47, %v3208_v44  ;;  %v9005_v3 = vpack.c.bf16 %v3227_v28, %v3226_v51  ;;  %v3215_v31 = vld [vmem:[%s14322_s5 + $0x378] sm:$0xff]  ;;  %v3597_v0 = vld [vmem:[%s14322_s5 + $0xf68] sm:$0xff]  ;;  %v3232_v16 = vld [vmem:[%s14322_s5 + $0x400] sm:$0xff] }
 0x340   :  { %v3249_v38 = vld [vmem:[%s14322_s5 + $0x488] sm:$0xff]  ;;  %v3599_v23 = vld [vmem:[%s14322_s5 + $0xf78] sm:$0xff]  ;;  %v3250_v11 = vld [vmem:[%s14322_s5 + $0x490] sm:$0xff] }
 0x341   :  { %9332 = vmatpush3.bf16.msra.mxu1 %v9331_v33  ;;  %4692 = vmatmul.mubr.f32.vlgmr.msra.gmra.mrb[20].mxu0 %v11382_v21  ;;  %v9371_v21 = vpack.c.bf16 %v3585_v7, %v3584_v58  ;;  %v3609_v33 = vld [vmem:[%s14322_s5 + $0xfc8] sm:$0xff]  ;;  %v3595_v7 = vld [vmem:[%s14322_s5 + $0xf58] sm:$0xff]  ;;  %v9017_v14 = vpack.c.bf16 %v3249_v38, %v3248_v37  ;;  %v3650_v56 = vld [vmem:[%s14322_s5 + $0x1110] sm:$0xff] }
 0x342   :  { %9334 = vmatprep.subr.bf16.mxu1 %v9333_v50  ;;  %8988 = vmatpush3.bf16.msra.mxu0 %v8987_v43  ;;  %v3211_v50 = vld [vmem:[%s14322_s5 + $0x358] sm:$0xff]  ;;  %v9385_v53 = vpack.c.bf16 %v3609_v33, %v3608_v30  ;;  %v3233_v19 = vld [vmem:[%s14322_s5 + $0x408] sm:$0xff]  ;;  %v3648_v30 = vld [vmem:[%s14322_s5 + $0x1100] sm:$0xff] }
 0x343   :  { %4761 = vmatprep.mubr.f32.mxu0 %v4184_v5  ;;  %8990 = vmatprep.subr.bf16.mxu0 %v8989_v42  ;;  %v3611_v43 = vld [vmem:[%s14322_s5 + $0xfd8] sm:$0xff]  ;;  %v9387_v42 = vpack.c.bf16 %v3593_v54, %v3592_v52  ;;  %v3213_v5 = vld [vmem:[%s14322_s5 + $0x368] sm:$0xff]  ;;  %v9019_v44 = vpack.c.bf16 %v3233_v19, %v3232_v16  ;;  %v3238_v24 = vld [vmem:[%s14322_s5 + $0x430] sm:$0xff] }
 0x344   :  { %v9389_v58 = vpack.c.bf16 %v3611_v43, %v3610_v10  ;;  %v3251_v15 = vld [vmem:[%s14322_s5 + $0x498] sm:$0xff]  ;;  %v3649_v33 = vld [vmem:[%s14322_s5 + $0x1108] sm:$0xff]  ;;  %v3654_v38 = vld [vmem:[%s14322_s5 + $0x1130] sm:$0xff] }
 0x345   :  { %9336 = vmatpush3.bf16.msra.mxu1 %v9335_v59  ;;  %v9007_v59 = vpack.c.bf16 %v3211_v50, %v3210_v61  ;;  %v9021_v39 = vpack.c.bf16 %v3251_v15, %v3250_v11  ;;  %v3235_v49 = vld [vmem:[%s14322_s5 + $0x418] sm:$0xff]  ;;  %v3666_v61 = vld [vmem:[%s14322_s5 + $0x1190] sm:$0xff]  ;;  %v3237_v54 = vld [vmem:[%s14322_s5 + $0x428] sm:$0xff] }
 0x346   :  { %9370 = vmatprep.subr.bf16.mxu1 %v9369_v55  ;;  %8992 = vmatpush3.bf16.msra.mxu0 %v8991_v27  ;;  %v3594_v55 = vld [vmem:[%s14322_s5 + $0xf50] sm:$0xff]  ;;  %v9011_v27 = vpack.c.bf16 %v3213_v5, %v3212_v1  ;;  %v3667_v50 = vld [vmem:[%s14322_s5 + $0x1198] sm:$0xff]  ;;  %v3668_v1 = vld [vmem:[%s14322_s5 + $0x11a0] sm:$0xff] }
 0x347   :  { %8994 = vmatprep.subr.bf16.mxu0 %v8993_v32  ;;  %v3596_v32 = vld [vmem:[%s14322_s5 + $0xf60] sm:$0xff]  ;;  %v9437_v10 = vpack.c.bf16 %v3667_v50, %v3666_v61  ;;  %v3651_v43 = vld [vmem:[%s14322_s5 + $0x1118] sm:$0xff]  ;;  %v3669_v5 = vld [vmem:[%s14322_s5 + $0x11a8] sm:$0xff] }
 0x348   :  { %5462 = vmatmul.mubr.f32.vlgmr.msra.gmra.mrb[20].mxu1 %v11418_v13  ;;  %v9377_v13 = vpack.c.bf16 %v3605_v2, %v3604_v41  ;;  %v3614_v41 = vld [vmem:[%s14322_s5 + $0xff0] sm:$0xff]  ;;  %v3615_v2 = vld [vmem:[%s14322_s5 + $0xff8] sm:$0xff]  ;;  %v3241_v37 = vld [vmem:[%s14322_s5 + $0x448] sm:$0xff] }
 0x349   :  { %9372 = vmatpush3.bf16.msra.mxu1 %v9371_v21  ;;  %5601 = vmatprep.mubr.f32.mxu1 %v4286_v60  ;;  %v9391_v21 = vpack.c.bf16 %v3595_v7, %v3594_v55  ;;  %v11776_v60 = vld [vmem:[#allocation3 + $0x10] sm:$0xff]  ;;  %v9397_v17 = vpack.c.bf16 %v3615_v2, %v3614_v41  ;;  %v3239_v18 = vld [vmem:[%s14322_s5 + $0x438] sm:$0xff]  ;;  %v3656_v11 = vld [vmem:[%s14322_s5 + $0x1140] sm:$0xff] }
 0x34a   :  { %9374 = vmatprep.subr.bf16.mxu1 %v9373_v35  ;;  %8996 = vmatpush3.bf16.msra.mxu0 %v8995_v6  ;;  %v9393_v35 = vpack.c.bf16 %v3613_v25, %v3612_v20  ;;  %v9015_v6 = vpack.c.bf16 %v3215_v31, %v3214_v29  ;;  %v11795_v4 = vrot.slane %v11776_v60, %v11104_v63  ;;  %v3652_v20 = vld [vmem:[%s14322_s5 + $0x1120] sm:$0xff]  ;;  %v3653_v25 = vld [vmem:[%s14322_s5 + $0x1128] sm:$0xff]  ;;  %v3671_v29 = vld [vmem:[%s14322_s5 + $0x11b8] sm:$0xff] }
 0x34b   :  { %8998 = vmatprep.subr.bf16.mxu0 %v8997_v12  ;;  %v9395_v12 = vpack.c.bf16 %v3597_v0, %v3596_v32  ;;  %v9031_v31 = vpack.c.bf16 %v3239_v18, %v3238_v24  ;;  %v9443_v32 = vpack.c.bf16 %v3653_v25, %v3652_v20  ;;  %v3240_v0 = vld [vmem:[%s14322_s5 + $0x440] sm:$0xff]  ;;  %v3655_v2 = vld [vmem:[%s14322_s5 + $0x1138] sm:$0xff] }
 0x34c   :  { %v4200_v51 = vcombine.high %v11795_v4, %v11795_v4  ;;  %v9035_v16 = vpack.c.bf16 %v3241_v37, %v3240_v0  ;;  %v9447_v19 = vpack.c.bf16 %v3655_v2, %v3654_v38  ;;  %v3263_v61 = vld [vmem:[%s14322_s5 + $0x4f8] sm:$0xff]  ;;  %v3676_v50 = vld [vmem:[%s14322_s5 + $0x11e0] sm:$0xff] }
 0x34d   :  { %9376 = vmatpush3.bf16.msra.mxu1 %v9375_v9  ;;  %v3096_v9 = vld [vmem:[#allocation3 + $0x40] sm:$0xff]  ;;  %v3267_v2 = vld [vmem:[%s14322_s5 + $0x518] sm:$0xff] }
 0x34e   :  { %9378 = vmatprep.subr.bf16.mxu1 %v9377_v13  ;;  %9000 = vmatpush3.bf16.msra.mxu0 %v8999_v22  ;;  %v3598_v13 = vld [vmem:[%s14322_s5 + $0xf70] sm:$0xff]  ;;  %v3664_v22 = vld [vmem:[%s14322_s5 + $0x1180] sm:$0xff] }
 0x34f   :  { %9002 = vmatprep.subr.bf16.mxu0 %v9001_v34  ;;  %v4287_v34 = vcombine.high %v3096_v9, %v3096_v9  ;;  %v9399_v47 = vpack.c.bf16 %v3599_v23, %v3598_v13  ;;  %v3259_v9 = vld [vmem:[%s14322_s5 + $0x4d8] sm:$0xff]  ;;  %v3264_v20 = vld [vmem:[%s14322_s5 + $0x500] sm:$0xff] }
 0x350   :  { %v3243_v23 = vld [vmem:[%s14322_s5 + $0x458] sm:$0xff] }
 0x351   :  { %9380 = vmatpush3.bf16.msra.mxu1 %v9379_v26  ;;  %v3665_v26 = vld [vmem:[%s14322_s5 + $0x1188] sm:$0xff] }
 0x352   :  { %9382 = vmatprep.subr.bf16.mxu1 %v9381_v48  ;;  %9004 = vmatpush3.bf16.msra.mxu0 %v9003_v36  ;;  %v3234_v48 = vld [vmem:[%s14322_s5 + $0x410] sm:$0xff]  ;;  %v9433_v28 = vpack.c.bf16 %v3665_v26, %v3664_v22  ;;  %v3252_v36 = vld [vmem:[%s14322_s5 + $0x4a0] sm:$0xff]  ;;  %v3657_v22 = vld [vmem:[%s14322_s5 + $0x1148] sm:$0xff] }
 0x353   :  { %9006 = vmatprep.subr.bf16.mxu0 %v9005_v3  ;;  %v3253_v3 = vld [vmem:[%s14322_s5 + $0x4a8] sm:$0xff]  ;;  %v9023_v52 = vpack.c.bf16 %v3235_v49, %v3234_v48  ;;  %v3260_v26 = vld [vmem:[%s14322_s5 + $0x4e0] sm:$0xff]  ;;  %v9451_v48 = vpack.c.bf16 %v3657_v22, %v3656_v11 }
 0x354   :  { %v9025_v57 = vpack.c.bf16 %v3253_v3, %v3252_v36  ;;  %v3659_v36 = vld [vmem:[%s14322_s5 + $0x1158] sm:$0xff]  ;;  %v3262_v3 = vld [vmem:[%s14322_s5 + $0x4f0] sm:$0xff]  ;;  %v3269_v22 = vld [vmem:[%s14322_s5 + $0x528] sm:$0xff] }
 0x355   :  { %9384 = vmatpush3.bf16.msra.mxu1 %v9383_v40  ;;  %v11831_v40 = vrot.slane %v4287_v34, %v11104_v63  ;;  %v3261_v34 = vld [vmem:[%s14322_s5 + $0x4e8] sm:$0xff] }
 0x356   :  { %9386 = vmatprep.subr.bf16.mxu1 %v9385_v53  ;;  %9008 = vmatpush3.bf16.msra.mxu0 %v9007_v59  ;;  %v3236_v53 = vld [vmem:[%s14322_s5 + $0x420] sm:$0xff]  ;;  %v3254_v59 = vld [vmem:[%s14322_s5 + $0x4b0] sm:$0xff]  ;;  %v9041_v49 = vpack.c.bf16 %v3261_v34, %v3260_v26 }
 0x357   :  { %9010 = vmatprep.subr.bf16.mxu0 %v9009_v62  ;;  %v4303_v62 = vcombine.high %v11831_v40, %v11831_v40  ;;  %v9027_v55 = vpack.c.bf16 %v3237_v54, %v3236_v53  ;;  %v9045_v54 = vpack.c.bf16 %v3263_v61, %v3262_v3  ;;  %v3714_v26 = vld [vmem:[%s14322_s5 + $0x1310] sm:$0xff]  ;;  %v3271_v61 = vld [vmem:[%s14322_s5 + $0x538] sm:$0xff] }
 0x358   :  { %v3270_v3 = vld [vmem:[%s14322_s5 + $0x530] sm:$0xff] }
 0x359   :  { %9388 = vmatpush3.bf16.msra.mxu1 %v9387_v42  ;;  %v3255_v42 = vld [vmem:[%s14322_s5 + $0x4b8] sm:$0xff] }
 0x35a   :  { %9390 = vmatprep.subr.bf16.mxu1 %v9389_v58  ;;  %9012 = vmatpush3.bf16.msra.mxu0 %v9011_v27  ;;  %v9439_v58 = vpack.c.bf16 %v3651_v43, %v3650_v56  ;;  %v9029_v7 = vpack.c.bf16 %v3255_v42, %v3254_v59  ;;  %v3256_v27 = vld [vmem:[%s14322_s5 + $0x4c0] sm:$0xff]  ;;  %v3246_v56 = vld [vmem:[%s14322_s5 + $0x470] sm:$0xff]  ;;  %v3661_v59 = vld [vmem:[%s14322_s5 + $0x1168] sm:$0xff] }
 0x35b   :  { %9014 = vmatprep.subr.bf16.mxu0 %v9013_v46  ;;  %v3670_v46 = vld [vmem:[%s14322_s5 + $0x11b0] sm:$0xff]  ;;  %v3280_v42 = vld [vmem:[%s14322_s5 + $0x580] sm:$0xff] }
 0x35c   :  { %v9445_v41 = vpack.c.bf16 %v3671_v29, %v3670_v46  ;;  %v3282_v46 = vld [vmem:[%s14322_s5 + $0x590] sm:$0xff]  ;;  %v3283_v29 = vld [vmem:[%s14322_s5 + $0x598] sm:$0xff] }
 0x35d   :  { %9392 = vmatpush3.bf16.msra.mxu1 %v9391_v21  ;;  %v3257_v21 = vld [vmem:[%s14322_s5 + $0x4c8] sm:$0xff]  ;;  %v9053_v38 = vpack.c.bf16 %v3283_v29, %v3282_v46 }
 0x35e   :  { %9394 = vmatprep.subr.bf16.mxu1 %v9393_v35  ;;  %9016 = vmatpush3.bf16.msra.mxu0 %v9015_v6  ;;  %v9033_v35 = vpack.c.bf16 %v3257_v21, %v3256_v27  ;;  %v3258_v6 = vld [vmem:[%s14322_s5 + $0x4d0] sm:$0xff]  ;;  %v3663_v21 = vld [vmem:[%s14322_s5 + $0x1178] sm:$0xff]  ;;  %v3721_v29 = vld [vmem:[%s14322_s5 + $0x1348] sm:$0xff] }
 0x35f   :  { %9018 = vmatprep.subr.bf16.mxu0 %v9017_v14  ;;  %v3673_v14 = vld [vmem:[%s14322_s5 + $0x11c8] sm:$0xff]  ;;  %v9037_v13 = vpack.c.bf16 %v3259_v9, %v3258_v6 }
 0x361   :  { %9396 = vmatpush3.bf16.msra.mxu1 %v9395_v12  ;;  %4762 = vmatmul.mubr.f32.vlgmr.msra.gmra.mrb[22].mxu0 %v11588_v45  ;;  %v9435_v45 = vpack.c.bf16 %v3649_v33, %v3648_v30  ;;  %v3672_v12 = vld [vmem:[%s14322_s5 + $0x11c0] sm:$0xff]  ;;  %v3658_v30 = vld [vmem:[%s14322_s5 + $0x1150] sm:$0xff] }
 0x362   :  { %9398 = vmatprep.subr.bf16.mxu1 %v9397_v17  ;;  %9020 = vmatpush3.bf16.msra.mxu0 %v9019_v44  ;;  %v3242_v17 = vld [vmem:[%s14322_s5 + $0x450] sm:$0xff]  ;;  %v9449_v15 = vpack.c.bf16 %v3673_v14, %v3672_v12  ;;  %v9455_v53 = vpack.c.bf16 %v3659_v36, %v3658_v30  ;;  %v3712_v12 = vld [vmem:[%s14322_s5 + $0x1300] sm:$0xff]  ;;  %v3713_v14 = vld [vmem:[%s14322_s5 + $0x1308] sm:$0xff] }
 0x363   :  { %4831 = vmatprep.mubr.f32.mxu0 %v4200_v51  ;;  %9022 = vmatprep.subr.bf16.mxu0 %v9021_v39  ;;  %v3674_v44 = vld [vmem:[%s14322_s5 + $0x11d0] sm:$0xff]  ;;  %v9039_v39 = vpack.c.bf16 %v3243_v23, %v3242_v17  ;;  %v3244_v51 = vld [vmem:[%s14322_s5 + $0x460] sm:$0xff]  ;;  %v3731_v23 = vld [vmem:[%s14322_s5 + $0x1398] sm:$0xff] }
 0x364   :  { %v3730_v17 = vld [vmem:[%s14322_s5 + $0x1390] sm:$0xff] }
 0x365   :  { %9400 = vmatpush3.bf16.msra.mxu1 %v9399_v47  ;;  %v3675_v47 = vld [vmem:[%s14322_s5 + $0x11d8] sm:$0xff] }
 0x366   :  { %9434 = vmatprep.subr.bf16.mxu1 %v9433_v28  ;;  %9024 = vmatpush3.bf16.msra.mxu0 %v9023_v52  ;;  %v3245_v28 = vld [vmem:[%s14322_s5 + $0x468] sm:$0xff]  ;;  %v9453_v33 = vpack.c.bf16 %v3675_v47, %v3674_v44  ;;  %v9501_v44 = vpack.c.bf16 %v3731_v23, %v3730_v17  ;;  %v3715_v47 = vld [vmem:[%s14322_s5 + $0x1318] sm:$0xff]  ;;  %v3740_v17 = vld [vmem:[%s14322_s5 + $0x13e0] sm:$0xff] }
 0x367   :  { %9026 = vmatprep.subr.bf16.mxu0 %v9025_v57  ;;  %v3677_v52 = vld [vmem:[%s14322_s5 + $0x11e8] sm:$0xff]  ;;  %v3247_v57 = vld [vmem:[%s14322_s5 + $0x478] sm:$0xff] }
 0x368   :  { %5602 = vmatmul.mubr.f32.vlgmr.msra.gmra.mrb[22].mxu1 %v11624_v8  ;;  %v9441_v8 = vpack.c.bf16 %v3669_v5, %v3668_v1  ;;  %v9457_v43 = vpack.c.bf16 %v3677_v52, %v3676_v50  ;;  %v4185_v1 = vcombine.high %v11776_v60, %v11776_v60  ;;  %v3678_v5 = vld [vmem:[%s14322_s5 + $0x11f0] sm:$0xff]  ;;  %v3265_v60 = vld [vmem:[%s14322_s5 + $0x508] sm:$0xff]  ;;  %v3716_v50 = vld [vmem:[%s14322_s5 + $0x1320] sm:$0xff] }
 0x369   :  { %9436 = vmatpush3.bf16.msra.mxu1 %v9435_v45  ;;  %5741 = vmatprep.mubr.f32.mxu1 %v4303_v62  ;;  %v9043_v45 = vpack.c.bf16 %v3245_v28, %v3244_v51  ;;  %v3281_v62 = vld [vmem:[%s14322_s5 + $0x588] sm:$0xff]  ;;  %v9051_v0 = vpack.c.bf16 %v3265_v60, %v3264_v20  ;;  %v3732_v51 = vld [vmem:[%s14322_s5 + $0x13a0] sm:$0xff] }
 0x36a   :  { %9438 = vmatprep.subr.bf16.mxu1 %v9437_v10  ;;  %9028 = vmatpush3.bf16.msra.mxu0 %v9027_v55  ;;  %v3660_v10 = vld [vmem:[%s14322_s5 + $0x1160] sm:$0xff]  ;;  %v3679_v55 = vld [vmem:[%s14322_s5 + $0x11f8] sm:$0xff]  ;;  %v9049_v18 = vpack.c.bf16 %v3281_v62, %v3280_v42  ;;  %v12001_v25 = vrot.slane %v4185_v1, %v11104_v63  ;;  %v3733_v28 = vld [vmem:[%s14322_s5 + $0x13a8] sm:$0xff] }
 0x36b   :  { %9030 = vmatprep.subr.bf16.mxu0 %v9029_v7  ;;  %v3097_v7 = vld [vmem:[#allocation3 + $0x48] sm:$0xff]  ;;  %v9459_v24 = vpack.c.bf16 %v3661_v59, %v3660_v10  ;;  %v9461_v27 = vpack.c.bf16 %v3679_v55, %v3678_v5  ;;  %v3272_v59 = vld [vmem:[%s14322_s5 + $0x540] sm:$0xff]  ;;  %v3718_v62 = vld [vmem:[%s14322_s5 + $0x1330] sm:$0xff] }
 0x36c   :  { %v4201_v6 = vcombine.high %v12001_v25, %v12001_v25  ;;  %v3717_v52 = vld [vmem:[%s14322_s5 + $0x1328] sm:$0xff]  ;;  %v3719_v5 = vld [vmem:[%s14322_s5 + $0x1338] sm:$0xff]  ;;  %v3290_v55 = vld [vmem:[%s14322_s5 + $0x5d0] sm:$0xff] }
 0x36d   :  { %9440 = vmatpush3.bf16.msra.mxu1 %v9439_v58  ;;  %v9047_v58 = vpack.c.bf16 %v3247_v57, %v3246_v56  ;;  %v3735_v56 = vld [vmem:[%s14322_s5 + $0x13b8] sm:$0xff]  ;;  %v9063_v57 = vpack.c.bf16 %v3271_v61, %v3270_v3  ;;  %v9507_v10 = vpack.c.bf16 %v3717_v52, %v3716_v50  ;;  %v3273_v42 = vld [vmem:[%s14322_s5 + $0x548] sm:$0xff]  ;;  %v9511_v20 = vpack.c.bf16 %v3719_v5, %v3718_v62  ;;  %v3296_v61 = vld [vmem:[%s14322_s5 + $0x600] sm:$0xff] }
 0x36e   :  { %9442 = vmatprep.subr.bf16.mxu1 %v9441_v8  ;;  %9032 = vmatpush3.bf16.msra.mxu0 %v9031_v31  ;;  %v3662_v8 = vld [vmem:[%s14322_s5 + $0x1170] sm:$0xff]  ;;  %v3728_v31 = vld [vmem:[%s14322_s5 + $0x1380] sm:$0xff]  ;;  %v3741_v23 = vld [vmem:[%s14322_s5 + $0x13e8] sm:$0xff] }
 0x36f   :  { %9034 = vmatprep.subr.bf16.mxu0 %v9033_v35  ;;  %v4304_v35 = vcombine.high %v3097_v7, %v3097_v7  ;;  %v9463_v37 = vpack.c.bf16 %v3663_v21, %v3662_v8  ;;  %v3736_v7 = vld [vmem:[%s14322_s5 + $0x13c0] sm:$0xff]  ;;  %v3274_v8 = vld [vmem:[%s14322_s5 + $0x550] sm:$0xff]  ;;  %v3297_v50 = vld [vmem:[%s14322_s5 + $0x608] sm:$0xff] }
 0x370   :  { %v3720_v21 = vld [vmem:[%s14322_s5 + $0x1340] sm:$0xff]  ;;  %v3299_v5 = vld [vmem:[%s14322_s5 + $0x618] sm:$0xff] }
 0x371   :  { %9444 = vmatpush3.bf16.msra.mxu1 %v9443_v32  ;;  %v3729_v32 = vld [vmem:[%s14322_s5 + $0x1388] sm:$0xff] }
 0x372   :  { %9446 = vmatprep.subr.bf16.mxu1 %v9445_v41  ;;  %9036 = vmatpush3.bf16.msra.mxu0 %v9035_v16  ;;  %v3266_v41 = vld [vmem:[%s14322_s5 + $0x510] sm:$0xff]  ;;  %v9497_v9 = vpack.c.bf16 %v3729_v32, %v3728_v31  ;;  %v3284_v16 = vld [vmem:[%s14322_s5 + $0x5a0] sm:$0xff]  ;;  %v3293_v32 = vld [vmem:[%s14322_s5 + $0x5e8] sm:$0xff] }
 0x373   :  { %9038 = vmatprep.subr.bf16.mxu0 %v9037_v13  ;;  %v3285_v13 = vld [vmem:[%s14322_s5 + $0x5a8] sm:$0xff]  ;;  %v9055_v11 = vpack.c.bf16 %v3267_v2, %v3266_v41  ;;  %v3292_v31 = vld [vmem:[%s14322_s5 + $0x5e0] sm:$0xff] }
 0x374   :  { %v9057_v34 = vpack.c.bf16 %v3285_v13, %v3284_v16  ;;  %v9073_v41 = vpack.c.bf16 %v3293_v32, %v3292_v31  ;;  %v3276_v2 = vld [vmem:[%s14322_s5 + $0x560] sm:$0xff]  ;;  %v3294_v16 = vld [vmem:[%s14322_s5 + $0x5f0] sm:$0xff]  ;;  %v3295_v13 = vld [vmem:[%s14322_s5 + $0x5f8] sm:$0xff] }
 0x375   :  { %9448 = vmatpush3.bf16.msra.mxu1 %v9447_v19  ;;  %v12037_v19 = vrot.slane %v4304_v35, %v11104_v63  ;;  %v3738_v35 = vld [vmem:[%s14322_s5 + $0x13d0] sm:$0xff] }
 0x376   :  { %9450 = vmatprep.subr.bf16.mxu1 %v9449_v15  ;;  %9040 = vmatpush3.bf16.msra.mxu0 %v9039_v39  ;;  %v3268_v15 = vld [vmem:[%s14322_s5 + $0x520] sm:$0xff]  ;;  %v3286_v39 = vld [vmem:[%s14322_s5 + $0x5b0] sm:$0xff] }
 0x377   :  { %9042 = vmatprep.subr.bf16.mxu0 %v9041_v49  ;;  %v4320_v49 = vcombine.high %v12037_v19, %v12037_v19  ;;  %v9059_v30 = vpack.c.bf16 %v3269_v22, %v3268_v15  ;;  %v9077_v15 = vpack.c.bf16 %v3295_v13, %v3294_v16  ;;  %v3278_v22 = vld [vmem:[%s14322_s5 + $0x570] sm:$0xff]  ;;  %v3303_v13 = vld [vmem:[%s14322_s5 + $0x638] sm:$0xff] }
 0x378   :  { %v3778_v31 = vld [vmem:[%s14322_s5 + $0x1510] sm:$0xff] }
 0x379   :  { %9452 = vmatpush3.bf16.msra.mxu1 %v9451_v48  ;;  %v3287_v48 = vld [vmem:[%s14322_s5 + $0x5b8] sm:$0xff]  ;;  %v3302_v16 = vld [vmem:[%s14322_s5 + $0x630] sm:$0xff] }
 0x37a   :  { %9454 = vmatprep.subr.bf16.mxu1 %v9453_v33  ;;  %9044 = vmatpush3.bf16.msra.mxu0 %v9043_v45  ;;  %v9503_v33 = vpack.c.bf16 %v3715_v47, %v3714_v26  ;;  %v9061_v36 = vpack.c.bf16 %v3287_v48, %v3286_v39  ;;  %v3288_v45 = vld [vmem:[%s14322_s5 + $0x5c0] sm:$0xff]  ;;  %v3279_v26 = vld [vmem:[%s14322_s5 + $0x578] sm:$0xff]  ;;  %v3725_v47 = vld [vmem:[%s14322_s5 + $0x1368] sm:$0xff] }
 0x37b   :  { %9046 = vmatprep.subr.bf16.mxu0 %v9045_v54  ;;  %v3734_v54 = vld [vmem:[%s14322_s5 + $0x13b0] sm:$0xff]  ;;  %v3312_v39 = vld [vmem:[%s14322_s5 + $0x680] sm:$0xff]  ;;  %v3313_v48 = vld [vmem:[%s14322_s5 + $0x688] sm:$0xff] }
 0x37c   :  { %v9509_v1 = vpack.c.bf16 %v3735_v56, %v3734_v54  ;;  %v9081_v3 = vpack.c.bf16 %v3313_v48, %v3312_v39  ;;  %v3314_v54 = vld [vmem:[%s14322_s5 + $0x690] sm:$0xff]  ;;  %v3315_v56 = vld [vmem:[%s14322_s5 + $0x698] sm:$0xff]  ;;  %v3305_v39 = vld [vmem:[%s14322_s5 + $0x648] sm:$0xff] }
 0x37d   :  { %9456 = vmatpush3.bf16.msra.mxu1 %v9455_v53  ;;  %v3289_v53 = vld [vmem:[%s14322_s5 + $0x5c8] sm:$0xff]  ;;  %v9085_v62 = vpack.c.bf16 %v3315_v56, %v3314_v54  ;;  %v3782_v48 = vld [vmem:[%s14322_s5 + $0x1530] sm:$0xff]  ;;  %v3784_v54 = vld [vmem:[%s14322_s5 + $0x1540] sm:$0xff] }
 0x37e   :  { %9458 = vmatprep.subr.bf16.mxu1 %v9457_v43  ;;  %9048 = vmatpush3.bf16.msra.mxu0 %v9047_v58  ;;  %v9065_v43 = vpack.c.bf16 %v3289_v53, %v3288_v45  ;;  %v3291_v58 = vld [vmem:[%s14322_s5 + $0x5d8] sm:$0xff] }
 0x37f   :  { %9050 = vmatprep.subr.bf16.mxu0 %v9049_v18  ;;  %v9067_v18 = vpack.c.bf16 %v3273_v42, %v3272_v59  ;;  %v9069_v60 = vpack.c.bf16 %v3291_v58, %v3290_v55  ;;  %v3727_v53 = vld [vmem:[%s14322_s5 + $0x1378] sm:$0xff]  ;;  %v9083_v59 = vpack.c.bf16 %v3297_v50, %v3296_v61 }
 0x381   :  { %9460 = vmatpush3.bf16.msra.mxu1 %v9459_v24  ;;  %4832 = vmatmul.mubr.f32.vlgmr.msra.gmra.mrb[24].mxu0 %v11795_v4  ;;  %v9499_v4 = vpack.c.bf16 %v3713_v14, %v3712_v12  ;;  %v3737_v24 = vld [vmem:[%s14322_s5 + $0x13c8] sm:$0xff]  ;;  %v3723_v14 = vld [vmem:[%s14322_s5 + $0x1358] sm:$0xff] }
 0x382   :  { %9462 = vmatprep.subr.bf16.mxu1 %v9461_v27  ;;  %9052 = vmatpush3.bf16.msra.mxu0 %v9051_v0  ;;  %v3275_v27 = vld [vmem:[%s14322_s5 + $0x558] sm:$0xff]  ;;  %v9513_v46 = vpack.c.bf16 %v3737_v24, %v3736_v7  ;;  %v3776_v7 = vld [vmem:[%s14322_s5 + $0x1500] sm:$0xff]  ;;  %v3777_v24 = vld [vmem:[%s14322_s5 + $0x1508] sm:$0xff] }
 0x383   :  { %4901 = vmatprep.mubr.f32.mxu0 %v4201_v6  ;;  %9054 = vmatprep.subr.bf16.mxu0 %v9053_v38  ;;  %v3739_v0 = vld [vmem:[%s14322_s5 + $0x13d8] sm:$0xff]  ;;  %v9515_v38 = vpack.c.bf16 %v3721_v29, %v3720_v21  ;;  %v3277_v6 = vld [vmem:[%s14322_s5 + $0x568] sm:$0xff] }
 0x384   :  { %v9517_v12 = vpack.c.bf16 %v3739_v0, %v3738_v35  ;;  %v3301_v29 = vld [vmem:[%s14322_s5 + $0x628] sm:$0xff]  ;;  %v3779_v0 = vld [vmem:[%s14322_s5 + $0x1518] sm:$0xff] }
 0x385   :  { %9464 = vmatpush3.bf16.msra.mxu1 %v9463_v37  ;;  %v9071_v37 = vpack.c.bf16 %v3275_v27, %v3274_v8  ;;  %v3794_v8 = vld [vmem:[%s14322_s5 + $0x1590] sm:$0xff]  ;;  %v3795_v27 = vld [vmem:[%s14322_s5 + $0x1598] sm:$0xff] }
 0x386   :  { %9498 = vmatprep.subr.bf16.mxu1 %v9497_v9  ;;  %9056 = vmatpush3.bf16.msra.mxu0 %v9055_v11  ;;  %v3722_v9 = vld [vmem:[%s14322_s5 + $0x1350] sm:$0xff]  ;;  %v9075_v11 = vpack.c.bf16 %v3277_v6, %v3276_v2  ;;  %v9565_v35 = vpack.c.bf16 %v3795_v27, %v3794_v8  ;;  %v3796_v2 = vld [vmem:[%s14322_s5 + $0x15a0] sm:$0xff]  ;;  %v3797_v6 = vld [vmem:[%s14322_s5 + $0x15a8] sm:$0xff] }
 0x387   :  { %9058 = vmatprep.subr.bf16.mxu0 %v9057_v34  ;;  %v3724_v34 = vld [vmem:[%s14322_s5 + $0x1360] sm:$0xff]  ;;  %v3327_v8 = vld [vmem:[%s14322_s5 + $0x6f8] sm:$0xff] }
 0x388   :  { %5742 = vmatmul.mubr.f32.vlgmr.msra.gmra.mrb[24].mxu1 %v11831_v40  ;;  %v9505_v40 = vpack.c.bf16 %v3733_v28, %v3732_v51  ;;  %v3742_v51 = vld [vmem:[%s14322_s5 + $0x13f0] sm:$0xff]  ;;  %v3743_v28 = vld [vmem:[%s14322_s5 + $0x13f8] sm:$0xff]  ;;  %v3804_v27 = vld [vmem:[%s14322_s5 + $0x15e0] sm:$0xff] }
 0x389   :  { %9500 = vmatpush3.bf16.msra.mxu1 %v9499_v4  ;;  %5881 = vmatprep.mubr.f32.mxu1 %v4320_v49  ;;  %v9519_v4 = vpack.c.bf16 %v3723_v14, %v3722_v9  ;;  %v12189_v49 = vld [vmem:[#allocation3 + $0x18] sm:$0xff]  ;;  %v9525_v45 = vpack.c.bf16 %v3743_v28, %v3742_v51 }
 0x38a   :  { %9502 = vmatprep.subr.bf16.mxu1 %v9501_v44  ;;  %9060 = vmatpush3.bf16.msra.mxu0 %v9059_v30  ;;  %v9521_v44 = vpack.c.bf16 %v3741_v23, %v3740_v17  ;;  %v9079_v30 = vpack.c.bf16 %v3279_v26, %v3278_v22  ;;  %v12208_v52 = vrot.slane %v12189_v49, %v11104_v63  ;;  %v3780_v17 = vld [vmem:[%s14322_s5 + $0x1520] sm:$0xff]  ;;  %v3781_v23 = vld [vmem:[%s14322_s5 + $0x1528] sm:$0xff]  ;;  %v3799_v22 = vld [vmem:[%s14322_s5 + $0x15b8] sm:$0xff] }
 0x38b   :  { %9062 = vmatprep.subr.bf16.mxu0 %v9061_v36  ;;  %v9523_v36 = vpack.c.bf16 %v3725_v47, %v3724_v34  ;;  %v9095_v26 = vpack.c.bf16 %v3303_v13, %v3302_v16  ;;  %v9571_v34 = vpack.c.bf16 %v3781_v23, %v3780_v17  ;;  %v3304_v47 = vld [vmem:[%s14322_s5 + $0x640] sm:$0xff]  ;;  %v3783_v28 = vld [vmem:[%s14322_s5 + $0x1538] sm:$0xff] }
 0x38c   :  { %v4217_v55 = vcombine.high %v12208_v52, %v12208_v52  ;;  %v9099_v61 = vpack.c.bf16 %v3305_v39, %v3304_v47  ;;  %v9575_v50 = vpack.c.bf16 %v3783_v28, %v3782_v48  ;;  %v3328_v17 = vld [vmem:[%s14322_s5 + $0x700] sm:$0xff]  ;;  %v3331_v28 = vld [vmem:[%s14322_s5 + $0x718] sm:$0xff] }
 0x38d   :  { %9504 = vmatpush3.bf16.msra.mxu1 %v9503_v33  ;;  %v3098_v33 = vld [vmem:[#allocation3 + $0x50] sm:$0xff] }
 0x38e   :  { %9506 = vmatprep.subr.bf16.mxu1 %v9505_v40  ;;  %9064 = vmatpush3.bf16.msra.mxu0 %v9063_v57  ;;  %v3726_v40 = vld [vmem:[%s14322_s5 + $0x1370] sm:$0xff]  ;;  %v3792_v57 = vld [vmem:[%s14322_s5 + $0x1580] sm:$0xff] }
 0x38f   :  { %9066 = vmatprep.subr.bf16.mxu0 %v9065_v43  ;;  %v4321_v43 = vcombine.high %v3098_v33, %v3098_v33  ;;  %v9527_v42 = vpack.c.bf16 %v3727_v53, %v3726_v40  ;;  %v3323_v33 = vld [vmem:[%s14322_s5 + $0x6d8] sm:$0xff] }
 0x390   :  { %v3307_v53 = vld [vmem:[%s14322_s5 + $0x658] sm:$0xff] }
 0x391   :  { %9508 = vmatpush3.bf16.msra.mxu1 %v9507_v10  ;;  %v3793_v10 = vld [vmem:[%s14322_s5 + $0x1588] sm:$0xff] }
 0x392   :  { %9510 = vmatprep.subr.bf16.mxu1 %v9509_v1  ;;  %9068 = vmatpush3.bf16.msra.mxu0 %v9067_v18  ;;  %v3298_v1 = vld [vmem:[%s14322_s5 + $0x610] sm:$0xff]  ;;  %v9561_v58 = vpack.c.bf16 %v3793_v10, %v3792_v57  ;;  %v3316_v18 = vld [vmem:[%s14322_s5 + $0x6a0] sm:$0xff]  ;;  %v3785_v57 = vld [vmem:[%s14322_s5 + $0x1548] sm:$0xff] }
 0x393   :  { %9070 = vmatprep.subr.bf16.mxu0 %v9069_v60  ;;  %v3317_v60 = vld [vmem:[%s14322_s5 + $0x6a8] sm:$0xff]  ;;  %v9087_v21 = vpack.c.bf16 %v3299_v5, %v3298_v1  ;;  %v3324_v10 = vld [vmem:[%s14322_s5 + $0x6e0] sm:$0xff]  ;;  %v9579_v1 = vpack.c.bf16 %v3785_v57, %v3784_v54 }
 0x394   :  { %v9089_v32 = vpack.c.bf16 %v3317_v60, %v3316_v18  ;;  %v3787_v18 = vld [vmem:[%s14322_s5 + $0x1558] sm:$0xff]  ;;  %v3326_v60 = vld [vmem:[%s14322_s5 + $0x6f0] sm:$0xff]  ;;  %v3333_v57 = vld [vmem:[%s14322_s5 + $0x728] sm:$0xff] }
 0x395   :  { %9512 = vmatpush3.bf16.msra.mxu1 %v9511_v20  ;;  %v12244_v20 = vrot.slane %v4321_v43, %v11104_v63  ;;  %v3325_v43 = vld [vmem:[%s14322_s5 + $0x6e8] sm:$0xff] }
 0x396   :  { %9514 = vmatprep.subr.bf16.mxu1 %v9513_v46  ;;  %9072 = vmatpush3.bf16.msra.mxu0 %v9071_v37  ;;  %v3300_v46 = vld [vmem:[%s14322_s5 + $0x620] sm:$0xff]  ;;  %v3318_v37 = vld [vmem:[%s14322_s5 + $0x6b0] sm:$0xff]  ;;  %v9105_v5 = vpack.c.bf16 %v3325_v43, %v3324_v10 }
 0x397   :  { %9074 = vmatprep.subr.bf16.mxu0 %v9073_v41  ;;  %v4337_v41 = vcombine.high %v12244_v20, %v12244_v20  ;;  %v9091_v9 = vpack.c.bf16 %v3301_v29, %v3300_v46  ;;  %v9109_v29 = vpack.c.bf16 %v3327_v8, %v3326_v60  ;;  %v3842_v10 = vld [vmem:[%s14322_s5 + $0x1710] sm:$0xff]  ;;  %v3335_v8 = vld [vmem:[%s14322_s5 + $0x738] sm:$0xff] }
 0x398   :  { %v3334_v60 = vld [vmem:[%s14322_s5 + $0x730] sm:$0xff] }
 0x399   :  { %9516 = vmatpush3.bf16.msra.mxu1 %v9515_v38  ;;  %v3319_v38 = vld [vmem:[%s14322_s5 + $0x6b8] sm:$0xff] }
 0x39a   :  { %9518 = vmatprep.subr.bf16.mxu1 %v9517_v12  ;;  %9076 = vmatpush3.bf16.msra.mxu0 %v9075_v11  ;;  %v9567_v12 = vpack.c.bf16 %v3779_v0, %v3778_v31  ;;  %v9093_v14 = vpack.c.bf16 %v3319_v38, %v3318_v37  ;;  %v3320_v11 = vld [vmem:[%s14322_s5 + $0x6c0] sm:$0xff]  ;;  %v3310_v31 = vld [vmem:[%s14322_s5 + $0x670] sm:$0xff]  ;;  %v3789_v37 = vld [vmem:[%s14322_s5 + $0x1568] sm:$0xff] }
 0x39b   :  { %9078 = vmatprep.subr.bf16.mxu0 %v9077_v15  ;;  %v3798_v15 = vld [vmem:[%s14322_s5 + $0x15b0] sm:$0xff]  ;;  %v3344_v38 = vld [vmem:[%s14322_s5 + $0x780] sm:$0xff] }
 0x39c   :  { %v9573_v51 = vpack.c.bf16 %v3799_v22, %v3798_v15  ;;  %v3346_v15 = vld [vmem:[%s14322_s5 + $0x790] sm:$0xff]  ;;  %v3347_v22 = vld [vmem:[%s14322_s5 + $0x798] sm:$0xff] }
 0x39d   :  { %9520 = vmatpush3.bf16.msra.mxu1 %v9519_v4  ;;  %v3321_v4 = vld [vmem:[%s14322_s5 + $0x6c8] sm:$0xff]  ;;  %v9117_v48 = vpack.c.bf16 %v3347_v22, %v3346_v15 }
 0x39e   :  { %9522 = vmatprep.subr.bf16.mxu1 %v9521_v44  ;;  %9080 = vmatpush3.bf16.msra.mxu0 %v9079_v30  ;;  %v9097_v44 = vpack.c.bf16 %v3321_v4, %v3320_v11  ;;  %v3322_v30 = vld [vmem:[%s14322_s5 + $0x6d0] sm:$0xff]  ;;  %v3791_v4 = vld [vmem:[%s14322_s5 + $0x1578] sm:$0xff]  ;;  %v3849_v22 = vld [vmem:[%s14322_s5 + $0x1748] sm:$0xff] }
 0x39f   :  { %9082 = vmatprep.subr.bf16.mxu0 %v9081_v3  ;;  %v3801_v3 = vld [vmem:[%s14322_s5 + $0x15c8] sm:$0xff]  ;;  %v9101_v40 = vpack.c.bf16 %v3323_v33, %v3322_v30 }
 0x3a1   :  { %9524 = vmatpush3.bf16.msra.mxu1 %v9523_v36  ;;  %4902 = vmatmul.mubr.f32.vlgmr.msra.gmra.mrb[26].mxu0 %v12001_v25  ;;  %v9563_v25 = vpack.c.bf16 %v3777_v24, %v3776_v7  ;;  %v3800_v36 = vld [vmem:[%s14322_s5 + $0x15c0] sm:$0xff]  ;;  %v3786_v7 = vld [vmem:[%s14322_s5 + $0x1550] sm:$0xff] }
 0x3a2   :  { %9526 = vmatprep.subr.bf16.mxu1 %v9525_v45  ;;  %9084 = vmatpush3.bf16.msra.mxu0 %v9083_v59  ;;  %v3306_v45 = vld [vmem:[%s14322_s5 + $0x650] sm:$0xff]  ;;  %v9577_v56 = vpack.c.bf16 %v3801_v3, %v3800_v36  ;;  %v9583_v46 = vpack.c.bf16 %v3787_v18, %v3786_v7  ;;  %v3840_v36 = vld [vmem:[%s14322_s5 + $0x1700] sm:$0xff]  ;;  %v3841_v3 = vld [vmem:[%s14322_s5 + $0x1708] sm:$0xff] }
 0x3a3   :  { %4971 = vmatprep.mubr.f32.mxu0 %v4217_v55  ;;  %9086 = vmatprep.subr.bf16.mxu0 %v9085_v62  ;;  %v3802_v59 = vld [vmem:[%s14322_s5 + $0x15d0] sm:$0xff]  ;;  %v9103_v62 = vpack.c.bf16 %v3307_v53, %v3306_v45  ;;  %v3308_v55 = vld [vmem:[%s14322_s5 + $0x660] sm:$0xff]  ;;  %v3859_v53 = vld [vmem:[%s14322_s5 + $0x1798] sm:$0xff] }
 0x3a4   :  { %v3858_v45 = vld [vmem:[%s14322_s5 + $0x1790] sm:$0xff] }
 0x3a5   :  { %9528 = vmatpush3.bf16.msra.mxu1 %v9527_v42  ;;  %v3803_v42 = vld [vmem:[%s14322_s5 + $0x15d8] sm:$0xff] }
 0x3a6   :  { %9562 = vmatprep.subr.bf16.mxu1 %v9561_v58  ;;  %9088 = vmatpush3.bf16.msra.mxu0 %v9087_v21  ;;  %v3309_v58 = vld [vmem:[%s14322_s5 + $0x668] sm:$0xff]  ;;  %v9581_v24 = vpack.c.bf16 %v3803_v42, %v3802_v59  ;;  %v9629_v59 = vpack.c.bf16 %v3859_v53, %v3858_v45  ;;  %v3843_v42 = vld [vmem:[%s14322_s5 + $0x1718] sm:$0xff] }
 0x3a7   :  { %9090 = vmatprep.subr.bf16.mxu0 %v9089_v32  ;;  %v3805_v21 = vld [vmem:[%s14322_s5 + $0x15e8] sm:$0xff]  ;;  %v3311_v32 = vld [vmem:[%s14322_s5 + $0x678] sm:$0xff] }
 0x3a8   :  { %5882 = vmatmul.mubr.f32.vlgmr.msra.gmra.mrb[26].mxu1 %v12037_v19  ;;  %v9569_v19 = vpack.c.bf16 %v3797_v6, %v3796_v2  ;;  %v9585_v0 = vpack.c.bf16 %v3805_v21, %v3804_v27  ;;  %v4202_v2 = vcombine.high %v12189_v49, %v12189_v49  ;;  %v3806_v6 = vld [vmem:[%s14322_s5 + $0x15f0] sm:$0xff]  ;;  %v3329_v49 = vld [vmem:[%s14322_s5 + $0x708] sm:$0xff]  ;;  %v3844_v27 = vld [vmem:[%s14322_s5 + $0x1720] sm:$0xff] }
 0x3a9   :  { %9564 = vmatpush3.bf16.msra.mxu1 %v9563_v25  ;;  %6021 = vmatprep.mubr.f32.mxu1 %v4337_v41  ;;  %v9107_v25 = vpack.c.bf16 %v3309_v58, %v3308_v55  ;;  %v3345_v41 = vld [vmem:[%s14322_s5 + $0x788] sm:$0xff]  ;;  %v9115_v47 = vpack.c.bf16 %v3329_v49, %v3328_v17  ;;  %v3860_v55 = vld [vmem:[%s14322_s5 + $0x17a0] sm:$0xff]  ;;  %v3359_v45 = vld [vmem:[%s14322_s5 + $0x7f8] sm:$0xff] }
 0x3aa   :  { %9566 = vmatprep.subr.bf16.mxu1 %v9565_v35  ;;  %9092 = vmatpush3.bf16.msra.mxu0 %v9091_v9  ;;  %v3788_v35 = vld [vmem:[%s14322_s5 + $0x1560] sm:$0xff]  ;;  %v3807_v9 = vld [vmem:[%s14322_s5 + $0x15f8] sm:$0xff]  ;;  %v9113_v13 = vpack.c.bf16 %v3345_v41, %v3344_v38  ;;  %v12414_v23 = vrot.slane %v4202_v2, %v11104_v63  ;;  %v3861_v58 = vld [vmem:[%s14322_s5 + $0x17a8] sm:$0xff] }
 0x3ab   :  { %9094 = vmatprep.subr.bf16.mxu0 %v9093_v14  ;;  %v3099_v14 = vld [vmem:[#allocation3 + $0x58] sm:$0xff]  ;;  %v9587_v16 = vpack.c.bf16 %v3789_v37, %v3788_v35  ;;  %v9589_v11 = vpack.c.bf16 %v3807_v9, %v3806_v6  ;;  %v3845_v21 = vld [vmem:[%s14322_s5 + $0x1728] sm:$0xff]  ;;  %v3336_v37 = vld [vmem:[%s14322_s5 + $0x740] sm:$0xff] }
 0x3ac   :  { %v4218_v30 = vcombine.high %v12414_v23, %v12414_v23  ;;  %v9635_v35 = vpack.c.bf16 %v3845_v21, %v3844_v27  ;;  %v3337_v38 = vld [vmem:[%s14322_s5 + $0x748] sm:$0xff]  ;;  %v3846_v41 = vld [vmem:[%s14322_s5 + $0x1730] sm:$0xff]  ;;  %v3847_v6 = vld [vmem:[%s14322_s5 + $0x1738] sm:$0xff] }
 0x3ad   :  { %9568 = vmatpush3.bf16.msra.mxu1 %v9567_v12  ;;  %v9111_v12 = vpack.c.bf16 %v3311_v32, %v3310_v31  ;;  %v3863_v31 = vld [vmem:[%s14322_s5 + $0x17b8] sm:$0xff]  ;;  %v9127_v32 = vpack.c.bf16 %v3335_v8, %v3334_v60  ;;  %v3354_v9 = vld [vmem:[%s14322_s5 + $0x7d0] sm:$0xff]  ;;  %v9639_v17 = vpack.c.bf16 %v3847_v6, %v3846_v41  ;;  %v3920_v41 = vld [vmem:[%s14322_s5 + $0x1980] sm:$0xff] }
 0x3ae   :  { %9570 = vmatprep.subr.bf16.mxu1 %v9569_v19  ;;  %9096 = vmatpush3.bf16.msra.mxu0 %v9095_v26  ;;  %v3790_v19 = vld [vmem:[%s14322_s5 + $0x1570] sm:$0xff]  ;;  %v3856_v26 = vld [vmem:[%s14322_s5 + $0x1780] sm:$0xff]  ;;  %v3871_v60 = vld [vmem:[%s14322_s5 + $0x17f8] sm:$0xff] }
 0x3af   :  { %9098 = vmatprep.subr.bf16.mxu0 %v9097_v44  ;;  %v4338_v44 = vcombine.high %v3099_v14, %v3099_v14  ;;  %v9591_v39 = vpack.c.bf16 %v3791_v4, %v3790_v19  ;;  %v3864_v14 = vld [vmem:[%s14322_s5 + $0x17c0] sm:$0xff]  ;;  %v3338_v19 = vld [vmem:[%s14322_s5 + $0x750] sm:$0xff] }
 0x3b0   :  { %v3848_v4 = vld [vmem:[%s14322_s5 + $0x1740] sm:$0xff] }
 0x3b1   :  { %9572 = vmatpush3.bf16.msra.mxu1 %v9571_v34  ;;  %v3857_v34 = vld [vmem:[%s14322_s5 + $0x1788] sm:$0xff] }
 0x3b2   :  { %9574 = vmatprep.subr.bf16.mxu1 %v9573_v51  ;;  %9100 = vmatpush3.bf16.msra.mxu0 %v9099_v61  ;;  %v3330_v51 = vld [vmem:[%s14322_s5 + $0x710] sm:$0xff]  ;;  %v9625_v33 = vpack.c.bf16 %v3857_v34, %v3856_v26  ;;  %v3348_v61 = vld [vmem:[%s14322_s5 + $0x7a0] sm:$0xff]  ;;  %v3357_v34 = vld [vmem:[%s14322_s5 + $0x7e8] sm:$0xff] }
 0x3b3   :  { %9102 = vmatprep.subr.bf16.mxu0 %v9101_v40  ;;  %v3349_v40 = vld [vmem:[%s14322_s5 + $0x7a8] sm:$0xff]  ;;  %v9119_v54 = vpack.c.bf16 %v3331_v28, %v3330_v51  ;;  %v3356_v26 = vld [vmem:[%s14322_s5 + $0x7e0] sm:$0xff] }
 0x3b4   :  { %v9121_v43 = vpack.c.bf16 %v3349_v40, %v3348_v61  ;;  %v9137_v51 = vpack.c.bf16 %v3357_v34, %v3356_v26  ;;  %v3340_v28 = vld [vmem:[%s14322_s5 + $0x760] sm:$0xff]  ;;  %v3851_v61 = vld [vmem:[%s14322_s5 + $0x1758] sm:$0xff]  ;;  %v3358_v40 = vld [vmem:[%s14322_s5 + $0x7f0] sm:$0xff] }
 0x3b5   :  { %9576 = vmatpush3.bf16.msra.mxu1 %v9575_v50  ;;  %v12450_v50 = vrot.slane %v4338_v44, %v11104_v63  ;;  %v3866_v44 = vld [vmem:[%s14322_s5 + $0x17d0] sm:$0xff]  ;;  %v3923_v34 = vld [vmem:[%s14322_s5 + $0x1998] sm:$0xff] }
 0x3b6   :  { %9578 = vmatprep.subr.bf16.mxu1 %v9577_v56  ;;  %9104 = vmatpush3.bf16.msra.mxu0 %v9103_v62  ;;  %v3332_v56 = vld [vmem:[%s14322_s5 + $0x720] sm:$0xff]  ;;  %v3350_v62 = vld [vmem:[%s14322_s5 + $0x7b0] sm:$0xff] }
 0x3b7   :  { %9106 = vmatprep.subr.bf16.mxu0 %v9105_v5  ;;  %v4354_v5 = vcombine.high %v12450_v50, %v12450_v50  ;;  %v9123_v7 = vpack.c.bf16 %v3333_v57, %v3332_v56  ;;  %v3922_v26 = vld [vmem:[%s14322_s5 + $0x1990] sm:$0xff] }
 0x3b9   :  { %9580 = vmatpush3.bf16.msra.mxu1 %v9579_v1  ;;  %v3351_v1 = vld [vmem:[%s14322_s5 + $0x7b8] sm:$0xff] }
 0x3ba   :  { %9582 = vmatprep.subr.bf16.mxu1 %v9581_v24  ;;  %9108 = vmatpush3.bf16.msra.mxu0 %v9107_v25  ;;  %v9631_v24 = vpack.c.bf16 %v3843_v42, %v3842_v10  ;;  %v9125_v18 = vpack.c.bf16 %v3351_v1, %v3350_v62  ;;  %v3352_v25 = vld [vmem:[%s14322_s5 + $0x7c0] sm:$0xff]  ;;  %v3343_v42 = vld [vmem:[%s14322_s5 + $0x778] sm:$0xff] }
 0x3bb   :  { %9110 = vmatprep.subr.bf16.mxu0 %v9109_v29  ;;  %v3862_v29 = vld [vmem:[%s14322_s5 + $0x17b0] sm:$0xff]  ;;  %v3852_v62 = vld [vmem:[%s14322_s5 + $0x1760] sm:$0xff] }
 0x3bc   :  { %v9637_v2 = vpack.c.bf16 %v3863_v31, %v3862_v29  ;;  %v3361_v29 = vld [vmem:[%s14322_s5 + $0x808] sm:$0xff]  ;;  %v3854_v31 = vld [vmem:[%s14322_s5 + $0x1770] sm:$0xff] }
 0x3bd   :  { %9584 = vmatpush3.bf16.msra.mxu1 %v9583_v46  ;;  %v3353_v46 = vld [vmem:[%s14322_s5 + $0x7c8] sm:$0xff] }
 0x3be   :  { %9586 = vmatprep.subr.bf16.mxu1 %v9585_v0  ;;  %9112 = vmatpush3.bf16.msra.mxu0 %v9111_v12  ;;  %v9129_v0 = vpack.c.bf16 %v3353_v46, %v3352_v25  ;;  %v3355_v12 = vld [vmem:[%s14322_s5 + $0x7d8] sm:$0xff]  ;;  %v3360_v46 = vld [vmem:[%s14322_s5 + $0x800] sm:$0xff] }
 0x3bf   :  { %9114 = vmatprep.subr.bf16.mxu0 %v9113_v13  ;;  %v9131_v13 = vpack.c.bf16 %v3337_v38, %v3336_v37  ;;  %v9133_v49 = vpack.c.bf16 %v3355_v12, %v3354_v9  ;;  %v3378_v37 = vld [vmem:[%s14322_s5 + $0x890] sm:$0xff]  ;;  %v3379_v38 = vld [vmem:[%s14322_s5 + $0x898] sm:$0xff]  ;;  %v9147_v9 = vpack.c.bf16 %v3361_v29, %v3360_v46  ;;  %v3929_v46 = vld [vmem:[%s14322_s5 + $0x19c8] sm:$0xff] }
 0x3c1   :  { %9588 = vmatpush3.bf16.msra.mxu1 %v9587_v16  ;;  %4972 = vmatmul.mubr.f32.vlgmr.msra.gmra.mrb[28].mxu0 %v12208_v52  ;;  %v9627_v52 = vpack.c.bf16 %v3841_v3, %v3840_v36  ;;  %v3865_v16 = vld [vmem:[%s14322_s5 + $0x17c8] sm:$0xff] }
 0x3c2   :  { %9590 = vmatprep.subr.bf16.mxu1 %v9589_v11  ;;  %9116 = vmatpush3.bf16.msra.mxu0 %v9115_v47  ;;  %v3339_v11 = vld [vmem:[%s14322_s5 + $0x758] sm:$0xff]  ;;  %v9641_v15 = vpack.c.bf16 %v3865_v16, %v3864_v14  ;;  %v9149_v14 = vpack.c.bf16 %v3379_v38, %v3378_v37  ;;  %v3362_v16 = vld [vmem:[%s14322_s5 + $0x810] sm:$0xff]  ;;  %v3912_v38 = vld [vmem:[%s14322_s5 + $0x1940] sm:$0xff] }
 0x3c3   :  { %5041 = vmatprep.mubr.f32.mxu0 %v4218_v30  ;;  %9118 = vmatprep.subr.bf16.mxu0 %v9117_v48  ;;  %v3867_v47 = vld [vmem:[%s14322_s5 + $0x17d8] sm:$0xff]  ;;  %v9643_v48 = vpack.c.bf16 %v3849_v22, %v3848_v4  ;;  %v3341_v30 = vld [vmem:[%s14322_s5 + $0x768] sm:$0xff]  ;;  %v3380_v4 = vld [vmem:[%s14322_s5 + $0x8a0] sm:$0xff] }
 0x3c4   :  { %v9645_v3 = vpack.c.bf16 %v3867_v47, %v3866_v44  ;;  %v9139_v57 = vpack.c.bf16 %v3341_v30, %v3340_v28  ;;  %v3381_v22 = vld [vmem:[%s14322_s5 + $0x8a8] sm:$0xff]  ;;  %v3364_v47 = vld [vmem:[%s14322_s5 + $0x820] sm:$0xff]  ;;  %v9693_v28 = vpack.c.bf16 %v3923_v34, %v3922_v26  ;;  %v3907_v30 = vld [vmem:[%s14322_s5 + $0x1918] sm:$0xff] }
 0x3c5   :  { %9592 = vmatpush3.bf16.msra.mxu1 %v9591_v39  ;;  %v9135_v39 = vpack.c.bf16 %v3339_v11, %v3338_v19  ;;  %v3904_v19 = vld [vmem:[%s14322_s5 + $0x1900] sm:$0xff]  ;;  %v3905_v11 = vld [vmem:[%s14322_s5 + $0x1908] sm:$0xff]  ;;  %v3371_v37 = vld [vmem:[%s14322_s5 + $0x858] sm:$0xff] }
 0x3c6   :  { %9626 = vmatprep.subr.bf16.mxu1 %v9625_v33  ;;  %9120 = vmatpush3.bf16.msra.mxu0 %v9119_v54  ;;  %v3850_v33 = vld [vmem:[%s14322_s5 + $0x1750] sm:$0xff]  ;;  %v3868_v54 = vld [vmem:[%s14322_s5 + $0x17e0] sm:$0xff]  ;;  %v3915_v34 = vld [vmem:[%s14322_s5 + $0x1958] sm:$0xff] }
 0x3c7   :  { %9122 = vmatprep.subr.bf16.mxu0 %v9121_v43  ;;  %v9647_v10 = vpack.c.bf16 %v3851_v61, %v3850_v33  ;;  %v9141_v43 = vpack.c.bf16 %v3359_v45, %v3358_v40  ;;  %v3382_v33 = vld [vmem:[%s14322_s5 + $0x8b0] sm:$0xff]  ;;  %v3924_v61 = vld [vmem:[%s14322_s5 + $0x19a0] sm:$0xff]  ;;  %v3925_v40 = vld [vmem:[%s14322_s5 + $0x19a8] sm:$0xff] }
 0x3c8   :  { %6022 = vmatmul.mubr.f32.vlgmr.msra.gmra.mrb[28].mxu1 %v12244_v20  ;;  %v9633_v20 = vpack.c.bf16 %v3861_v58, %v3860_v55  ;;  %v3853_v55 = vld [vmem:[%s14322_s5 + $0x1768] sm:$0xff]  ;;  %v3376_v58 = vld [vmem:[%s14322_s5 + $0x880] sm:$0xff] }
 0x3c9   :  { %9628 = vmatpush3.bf16.msra.mxu1 %v9627_v52  ;;  %6161 = vmatprep.mubr.f32.mxu1 %v4354_v5  ;;  %v3869_v52 = vld [vmem:[%s14322_s5 + $0x17e8] sm:$0xff]  ;;  %v9651_v21 = vpack.c.bf16 %v3853_v55, %v3852_v62  ;;  %v3926_v62 = vld [vmem:[%s14322_s5 + $0x19b0] sm:$0xff] }
 0x3ca   :  { %9630 = vmatprep.subr.bf16.mxu1 %v9629_v59  ;;  %9124 = vmatpush3.bf16.msra.mxu0 %v9123_v7  ;;  %v3342_v59 = vld [vmem:[%s14322_s5 + $0x770] sm:$0xff]  ;;  %v9649_v5 = vpack.c.bf16 %v3869_v52, %v3868_v54  ;;  %v3377_v7 = vld [vmem:[%s14322_s5 + $0x888] sm:$0xff] }
 0x3cb   :  { %9126 = vmatprep.subr.bf16.mxu0 %v9125_v18  ;;  %v3870_v18 = vld [vmem:[%s14322_s5 + $0x17f0] sm:$0xff]  ;;  %v9143_v27 = vpack.c.bf16 %v3343_v42, %v3342_v59  ;;  %v9145_v25 = vpack.c.bf16 %v3377_v7, %v3376_v58  ;;  %v3384_v59 = vld [vmem:[%s14322_s5 + $0x8c0] sm:$0xff]  ;;  %v3385_v42 = vld [vmem:[%s14322_s5 + $0x8c8] sm:$0xff] }
 0x3cc   :  { %v3366_v52 = vld [vmem:[%s14322_s5 + $0x830] sm:$0xff]  ;;  %v9161_v58 = vpack.c.bf16 %v3385_v42, %v3384_v59  ;;  %v3368_v7 = vld [vmem:[%s14322_s5 + $0x840] sm:$0xff]  ;;  %v3101_v42 = vld [vmem:[#allocation3 + $0x68] sm:$0xff] }
 0x3cd   :  { %9632 = vmatpush3.bf16.msra.mxu1 %v9631_v24 }
 0x3ce   :  { %9634 = vmatprep.subr.bf16.mxu1 %v9633_v20  ;;  %9128 = vmatpush3.bf16.msra.mxu0 %v9127_v32  ;;  %v3100_v20 = vld [vmem:[#allocation3 + $0x60] sm:$0xff] }
 0x3cf   :  { %9130 = vmatprep.subr.bf16.mxu0 %v9129_v0  ;;  %v12621_v32 = vld.sshfl [vmem:[#allocation3 + $0x20] sm:$0xff pattern:$0x76325410]  ;;  %v3855_v0 = vld [vmem:[%s14322_s5 + $0x1778] sm:$0xff]  ;;  %v4355_v6 = vcombine.high %v3100_v20, %v3100_v20  ;;  %v3386_v20 = vld [vmem:[%s14322_s5 + $0x8d0] sm:$0xff] }
 0x3d0   :  { %v9655_v12 = vpack.c.bf16 %v3855_v0, %v3854_v31  ;;  %v3370_v0 = vld [vmem:[%s14322_s5 + $0x850] sm:$0xff] }
 0x3d1   :  { %9636 = vmatpush3.bf16.msra.mxu1 %v9635_v35  ;;  %v7255_v36 = vpop.f32.mrb[16].mxu0  ;;  %v9653_v35 = vpack.c.bf16 %v3871_v60, %v3870_v18  ;;  %v3910_v18 = vld [vmem:[%s14322_s5 + $0x1930] sm:$0xff] }
 0x3d2   :  { %9638 = vmatprep.subr.bf16.mxu1 %v9637_v2  ;;  %9132 = vmatpush3.bf16.msra.mxu0 %v9131_v13  ;;  %v7256_v53 = vpop.f32.mrb[17].mxu0  ;;  %v3921_v2 = vld [vmem:[%s14322_s5 + $0x1988] sm:$0xff]  ;;  %v3363_v13 = vld [vmem:[%s14322_s5 + $0x818] sm:$0xff] }
 0x3d3   :  { %9134 = vmatprep.subr.bf16.mxu0 %v9133_v49  ;;  %v12584_v56 = vadd.f32 %v7256_v53, %v7255_v36  ;;  %v9689_v49 = vpack.c.bf16 %v3921_v2, %v3920_v41  ;;  %v9151_v44 = vpack.c.bf16 %v3363_v13, %v3362_v16  ;;  %v3383_v36 = vld [vmem:[%s14322_s5 + $0x8b8] sm:$0xff]  ;;  %v3913_v2 = vld [vmem:[%s14322_s5 + $0x1948] sm:$0xff]  ;;  %v6986_v16 = vld [vmem:[%s14323_s6] ss:$0 sm:$0xff]  ;;  %v9167_v13 = vpack.c.bf16 %v3371_v37, %v3370_v0 }
 0x3d4   :  { %v9157_v54 = vpack.c.bf16 %v3383_v36, %v3382_v33  ;;  %v3426_v0 = vld [vmem:[%s14322_s5 + $0xa10] sm:$0xff]  ;;  %v3427_v37 = vld [vmem:[%s14322_s5 + $0xa18] sm:$0xff] }
 0x3d5   :  { %9640 = vmatpush3.bf16.msra.mxu1 %v9639_v17  ;;  %v4234_v17 = vcombine.high %v12621_v32, %v12621_v32 }
 0x3d6   :  { %9642 = vmatprep.subr.bf16.mxu1 %v9641_v15  ;;  %9136 = vmatpush3.bf16.msra.mxu0 %v9135_v39  ;;  %v12657_v15 = vrot.slane %v4355_v6, %v11104_v63  ;;  %v3365_v39 = vld [vmem:[%s14322_s5 + $0x828] sm:$0xff]  ;;  %v3388_v6 = vld [vmem:[%s14322_s5 + $0x8e0] sm:$0xff] }
 0x3d7   :  { %9138 = vmatprep.subr.bf16.mxu0 %v9137_v51  ;;  %v9153_v51 = vpack.c.bf16 %v3381_v22, %v3380_v4  ;;  %v9155_v45 = vpack.c.bf16 %v3365_v39, %v3364_v47  ;;  %v3914_v4 = vld [vmem:[%s14322_s5 + $0x1950] sm:$0xff]  ;;  %v3932_v39 = vld [vmem:[%s14322_s5 + $0x19e0] sm:$0xff] }
 0x3d8   :  { %v9711_v33 = vpack.c.bf16 %v3915_v34, %v3914_v4  ;;  %v3446_v34 = vld [vmem:[%s14322_s5 + $0xab0] sm:$0xff] }
 0x3d9   :  { %9644 = vmatpush3.bf16.msra.mxu1 %v9643_v48  ;;  %v3906_v48 = vld [vmem:[%s14322_s5 + $0x1910] sm:$0xff] }
 0x3da   :  { %9646 = vmatprep.subr.bf16.mxu1 %v9645_v3  ;;  %9140 = vmatpush3.bf16.msra.mxu0 %v9139_v57  ;;  %v4371_v3 = vcombine.high %v12657_v15, %v12657_v15  ;;  %v9695_v53 = vpack.c.bf16 %v3907_v30, %v3906_v48  ;;  %v3367_v57 = vld [vmem:[%s14322_s5 + $0x838] sm:$0xff]  ;;  %v3933_v48 = vld [vmem:[%s14322_s5 + $0x19e8] sm:$0xff] }
 0x3db   :  { %v7570_v1 = vpop.f32.mrb[16].mxu1  ;;  %9142 = vmatprep.subr.bf16.mxu0 %v9141_v43  ;;  %v3909_v43 = vld [vmem:[%s14322_s5 + $0x1928] sm:$0xff] }
 0x3dc   :  { %v7571_v24 = vpop.f32.mrb[17].mxu1 }
 0x3dd   :  { %v12610_v8 = vadd.f32 %v7571_v24, %v7570_v1  ;;  %9648 = vmatpush3.bf16.msra.mxu1 %v9647_v10  ;;  %v3908_v10 = vld [vmem:[%s14322_s5 + $0x1920] sm:$0xff]  ;;  %v3927_v1 = vld [vmem:[%s14322_s5 + $0x19b8] sm:$0xff]  ;;  %v3369_v24 = vld [vmem:[%s14322_s5 + $0x848] sm:$0xff] }
 0x3de   :  { %9650 = vmatprep.subr.bf16.mxu1 %v9649_v5  ;;  %9144 = vmatpush3.bf16.msra.mxu0 %v9143_v27  ;;  %v9159_v5 = vpack.c.bf16 %v3367_v57, %v3366_v52  ;;  %v9699_v55 = vpack.c.bf16 %v3909_v43, %v3908_v10  ;;  %v9701_v60 = vpack.c.bf16 %v3927_v1, %v3926_v62  ;;  %v3911_v27 = vld [vmem:[%s14322_s5 + $0x1938] sm:$0xff]  ;;  %v3441_v52 = vld [vmem:[%s14322_s5 + $0xa88] sm:$0xff]  ;;  %v3934_v10 = vld [vmem:[%s14322_s5 + $0x19f0] sm:$0xff] }
 0x3df   :  { %9146 = vmatprep.subr.bf16.mxu0 %v9145_v25  ;;  %v3928_v25 = vld [vmem:[%s14322_s5 + $0x19c0] sm:$0xff]  ;;  %v9163_v29 = vpack.c.bf16 %v3369_v24, %v3368_v7  ;;  %v9703_v31 = vpack.c.bf16 %v3911_v27, %v3910_v18  ;;  %v3918_v7 = vld [vmem:[%s14322_s5 + $0x1970] sm:$0xff]  ;;  %v12832_v24 = vld.sshfl [vmem:[#allocation3 + $0x28] sm:$0xff pattern:$0x76325410] }
 0x3e0   :  { %v9705_v41 = vpack.c.bf16 %v3929_v46, %v3928_v25  ;;  %v3442_v27 = vld [vmem:[%s14322_s5 + $0xa90] sm:$0xff]  ;;  %v3985_v25 = vld [vmem:[%s14322_s5 + $0x1b88] sm:$0xff]  ;;  %v4372_v46 = vcombine.high %v3101_v42, %v3101_v42  ;;  %v3975_v42 = vld [vmem:[%s14322_s5 + $0x1b38] sm:$0xff] }
 0x3e1   :  { %9652 = vmatpush3.bf16.msra.mxu1 %v9651_v21  ;;  %5042 = vmatmul.mubr.f32.vlgmr.msra.gmra.mrb[30].mxu0 %v12414_v23  ;;  %v9691_v23 = vpack.c.bf16 %v3905_v11, %v3904_v19  ;;  %v3387_v21 = vld [vmem:[%s14322_s5 + $0x8d8] sm:$0xff]  ;;  %v3372_v19 = vld [vmem:[%s14322_s5 + $0x860] sm:$0xff]  ;;  %v3373_v11 = vld [vmem:[%s14322_s5 + $0x868] sm:$0xff] }
 0x3e2   :  { %9654 = vmatprep.subr.bf16.mxu1 %v9653_v35  ;;  %9148 = vmatpush3.bf16.msra.mxu0 %v9147_v9  ;;  %v9165_v35 = vpack.c.bf16 %v3387_v21, %v3386_v20  ;;  %v3389_v9 = vld [vmem:[%s14322_s5 + $0x8e8] sm:$0xff]  ;;  %v9171_v30 = vpack.c.bf16 %v3373_v11, %v3372_v19  ;;  %v3443_v20 = vld [vmem:[%s14322_s5 + $0xa98] sm:$0xff]  ;;  %v3984_v21 = vld [vmem:[%s14322_s5 + $0x1b80] sm:$0xff] }
 0x3e3   :  { %5111 = vmatprep.mubr.f32.mxu0 %v4234_v17  ;;  %9150 = vmatprep.subr.bf16.mxu0 %v9149_v14  ;;  %v3931_v14 = vld [vmem:[%s14322_s5 + $0x19d8] sm:$0xff]  ;;  %v9707_v17 = vpack.c.bf16 %v3913_v2, %v3912_v38  ;;  %v4251_v38 = vcombine.high %v12832_v24, %v12832_v24  ;;  %v3968_v2 = vld [vmem:[%s14322_s5 + $0x1b00] sm:$0xff]  ;;  %v3429_v19 = vld [vmem:[%s14322_s5 + $0xa28] sm:$0xff] }
 0x3e4   :  { %v3970_v11 = vld [vmem:[%s14322_s5 + $0x1b10] sm:$0xff] }
 0x3e5   :  { %9656 = vmatpush3.bf16.msra.mxu1 %v9655_v12  ;;  %v3930_v12 = vld [vmem:[%s14322_s5 + $0x19d0] sm:$0xff] }
 0x3e6   :  { %9690 = vmatprep.subr.bf16.mxu1 %v9689_v49  ;;  %9152 = vmatpush3.bf16.msra.mxu0 %v9151_v44  ;;  %v9169_v49 = vpack.c.bf16 %v3389_v9, %v3388_v6  ;;  %v9709_v26 = vpack.c.bf16 %v3931_v14, %v3930_v12  ;;  %v3390_v44 = vld [vmem:[%s14322_s5 + $0x8f0] sm:$0xff]  ;;  %v3969_v6 = vld [vmem:[%s14322_s5 + $0x1b08] sm:$0xff]  ;;  %v3444_v9 = vld [vmem:[%s14322_s5 + $0xaa0] sm:$0xff]  ;;  %v12868_v12 = vrot.slane %v4372_v46, %v11104_v63 }
 0x3e7   :  { %9154 = vmatprep.subr.bf16.mxu0 %v9153_v51  ;;  %v4554_v51 = vadd.f32 %v12584_v56, %v6986_v16  ;;  %v3445_v14 = vld [vmem:[%s14322_s5 + $0xaa8] sm:$0xff]  ;;  %v3986_v16 = vld [vmem:[%s14322_s5 + $0x1b90] sm:$0xff] }
 0x3e8   :  { %6162 = vmatmul.mubr.f32.vlgmr.msra.gmra.mrb[30].mxu1 %v12450_v50  ;;  %v9697_v50 = vpack.c.bf16 %v3925_v40, %v3924_v61  ;;  %v3375_v61 = vld [vmem:[%s14322_s5 + $0x878] sm:$0xff]  ;;  %v3916_v40 = vld [vmem:[%s14322_s5 + $0x1960] sm:$0xff]  ;;  %v9217_v4 = vpack.c.bf16 %v3445_v14, %v3444_v9  ;;  %v3977_v46 = vld [vmem:[%s14322_s5 + $0x1b48] sm:$0xff] }
 0x3e9   :  { %9692 = vmatpush3.bf16.msra.mxu1 %v9691_v23  ;;  %6301 = vmatprep.mubr.f32.mxu1 %v4371_v3  ;;  %v3391_v23 = vld [vmem:[%s14322_s5 + $0x8f8] sm:$0xff]  ;;  %v3374_v3 = vld [vmem:[%s14322_s5 + $0x870] sm:$0xff] }
 0x3ea   :  { %9694 = vmatprep.subr.bf16.mxu1 %v9693_v28  ;;  %9156 = vmatpush3.bf16.msra.mxu0 %v9155_v45  ;;  %v9173_v36 = vpack.c.bf16 %v3391_v23, %v3390_v44  ;;  %v9713_v45 = vpack.c.bf16 %v3933_v48, %v3932_v39  ;;  %v9175_v59 = vpack.c.bf16 %v3375_v61, %v3374_v3  ;;  %v3447_v44 = vld [vmem:[%s14322_s5 + $0xab8] sm:$0xff]  ;;  %v3989_v39 = vld [vmem:[%s14322_s5 + $0x1ba8] sm:$0xff]  ;;  %v3448_v61 = vld [vmem:[%s14322_s5 + $0xac0] sm:$0xff] }
 0x3eb   :  { %9158 = vmatprep.subr.bf16.mxu0 %v9157_v54  ;;  %v3440_v54 = vld [vmem:[%s14322_s5 + $0xa80] sm:$0xff]  ;;  %v4388_v23 = vcombine.high %v12868_v12, %v12868_v12  ;;  %v3973_v3 = vld [vmem:[%s14322_s5 + $0x1b28] sm:$0xff]  ;;  %v3978_v9 = vld [vmem:[%s14322_s5 + $0x1b50] sm:$0xff] }
 0x3ed   :  { %9696 = vmatpush3.bf16.msra.mxu1 %v9695_v53  ;;  %v3917_v53 = vld [vmem:[%s14322_s5 + $0x1968] sm:$0xff] }
 0x3ee   :  { %9698 = vmatprep.subr.bf16.mxu1 %v9697_v50  ;;  %9160 = vmatpush3.bf16.msra.mxu0 %v9159_v5  ;;  %v3935_v50 = vld [vmem:[%s14322_s5 + $0x19f8] sm:$0xff]  ;;  %v9715_v1 = vpack.c.bf16 %v3917_v53, %v3916_v40  ;;  %v9209_v5 = vpack.c.bf16 %v3441_v52, %v3440_v54  ;;  %v3449_v40 = vld [vmem:[%s14322_s5 + $0xac8] sm:$0xff] }
 0x3ef   :  { %9162 = vmatprep.subr.bf16.mxu0 %v9161_v58  ;;  %v3425_v58 = vld [vmem:[%s14322_s5 + $0xa08] sm:$0xff]  ;;  %v9717_v18 = vpack.c.bf16 %v3935_v50, %v3934_v10  ;;  %v3991_v53 = vld [vmem:[%s14322_s5 + $0x1bb8] sm:$0xff]  ;;  %v3432_v10 = vld [vmem:[%s14322_s5 + $0xa40] sm:$0xff] }
 0x3f0   :  { %v3433_v50 = vld [vmem:[%s14322_s5 + $0xa48] sm:$0xff] }
 0x3f1   :  { %9700 = vmatpush3.bf16.msra.mxu1 %v9699_v55  ;;  %v3424_v55 = vld [vmem:[%s14322_s5 + $0xa00] sm:$0xff] }
 0x3f2   :  { %9702 = vmatprep.subr.bf16.mxu1 %v9701_v60  ;;  %9164 = vmatpush3.bf16.msra.mxu0 %v9163_v29  ;;  %v3919_v60 = vld [vmem:[%s14322_s5 + $0x1978] sm:$0xff]  ;;  %v9211_v29 = vpack.c.bf16 %v3425_v58, %v3424_v55  ;;  %v3992_v55 = vld [vmem:[%s14322_s5 + $0x1bc0] sm:$0xff]  ;;  %v3993_v58 = vld [vmem:[%s14322_s5 + $0x1bc8] sm:$0xff] }
 0x3f3   :  { %9166 = vmatprep.subr.bf16.mxu0 %v9165_v35  ;;  %v9213_v35 = vpack.c.bf16 %v3443_v20, %v3442_v27  ;;  %v3434_v27 = vld [vmem:[%s14322_s5 + $0xa50] sm:$0xff]  ;;  %v3435_v20 = vld [vmem:[%s14322_s5 + $0xa58] sm:$0xff] }
 0x3f4   :  { %v7290_v22 = vpop.f32.mrb[18].mxu0 }
 0x3f5   :  { %9704 = vmatpush3.bf16.msra.mxu1 %v9703_v31  ;;  %v7291_v47 = vpop.f32.mrb[19].mxu0  ;;  %v9719_v31 = vpack.c.bf16 %v3919_v60, %v3918_v7  ;;  %v9227_v7 = vpack.c.bf16 %v3433_v50, %v3432_v10  ;;  %v13040_v10 = vld.sshfl [vmem:[#allocation3 + $0x30] sm:$0xff pattern:$0x76325410] }
 0x3f6   :  { %9706 = vmatprep.subr.bf16.mxu1 %v9705_v41  ;;  %v7292_v28 = vadd.f32 %v7291_v47, %v7290_v22  ;;  %9168 = vmatpush3.bf16.msra.mxu0 %v9167_v13  ;;  %v9753_v41 = vpack.c.bf16 %v3985_v25, %v3984_v21  ;;  %v3987_v13 = vld [vmem:[%s14322_s5 + $0x1b98] sm:$0xff]  ;;  %v3988_v47 = vld [vmem:[%s14322_s5 + $0x1ba0] sm:$0xff]  ;;  %v9769_v25 = vpack.c.bf16 %v3993_v58, %v3992_v55 }
 0x3f7   :  { %9170 = vmatprep.subr.bf16.mxu0 %v9169_v49  ;;  %v3428_v49 = vld [vmem:[%s14322_s5 + $0xa20] sm:$0xff]  ;;  %v9757_v22 = vpack.c.bf16 %v3987_v13, %v3986_v16  ;;  %v3979_v13 = vld [vmem:[%s14322_s5 + $0x1b58] sm:$0xff] }
 0x3f8   :  { %v12804_v56 = vadd.f32 %v7292_v28, %v4554_v51  ;;  %v9219_v48 = vpack.c.bf16 %v3429_v19, %v3428_v49  ;;  %v9221_v28 = vpack.c.bf16 %v3447_v44, %v3446_v34  ;;  %v3976_v21 = vld [vmem:[%s14322_s5 + $0x1b40] sm:$0xff]  ;;  %v3438_v44 = vld [vmem:[%s14322_s5 + $0xa70] sm:$0xff] }
 0x3f9   :  { %9708 = vmatpush3.bf16.msra.mxu1 %v9707_v17  ;;  %v9215_v17 = vpack.c.bf16 %v3427_v37, %v3426_v0  ;;  %v3995_v0 = vld [vmem:[%s14322_s5 + $0x1bd8] sm:$0xff]  ;;  %v9231_v37 = vpack.c.bf16 %v3435_v20, %v3434_v27  ;;  %v3996_v19 = vld [vmem:[%s14322_s5 + $0x1be0] sm:$0xff]  ;;  %v4268_v20 = vcombine.high %v13040_v10, %v13040_v10 }
 0x3fa   :  { %9710 = vmatprep.subr.bf16.mxu1 %v9709_v26  ;;  %9172 = vmatpush3.bf16.msra.mxu0 %v9171_v30  ;;  %v3971_v26 = vld [vmem:[%s14322_s5 + $0x1b18] sm:$0xff]  ;;  %v3430_v30 = vld [vmem:[%s14322_s5 + $0xa30] sm:$0xff] }
 0x3fb   :  { %v7640_v57 = vpop.f32.mrb[18].mxu1  ;;  %9174 = vmatprep.subr.bf16.mxu0 %v9173_v36  ;;  %v9759_v51 = vpack.c.bf16 %v3971_v26, %v3970_v11  ;;  %v3972_v36 = vld [vmem:[%s14322_s5 + $0x1b20] sm:$0xff]  ;;  %v3997_v11 = vld [vmem:[%s14322_s5 + $0x1be8] sm:$0xff]  ;;  %v9775_v26 = vpack.c.bf16 %v3979_v13, %v3978_v9  ;;  %v3491_v27 = vld [vmem:[%s14322_s5 + $0xc18] sm:$0xff] }
 0x3fc   :  { %v7641_v43 = vpop.f32.mrb[19].mxu1  ;;  %v9763_v52 = vpack.c.bf16 %v3973_v3, %v3972_v36  ;;  %v3999_v36 = vld [vmem:[%s14322_s5 + $0x1bf8] sm:$0xff]  ;;  %v3510_v13 = vld [vmem:[%s14322_s5 + $0xcb0] sm:$0xff] }
 0x3fd   :  { %v12821_v62 = vadd.f32 %v7641_v43, %v7640_v57  ;;  %9712 = vmatpush3.bf16.msra.mxu1 %v9711_v33  ;;  %v3431_v33 = vld [vmem:[%s14322_s5 + $0xa38] sm:$0xff]  ;;  %v9225_v57 = vpack.c.bf16 %v3449_v40, %v3448_v61  ;;  %v3974_v43 = vld [vmem:[%s14322_s5 + $0x1b30] sm:$0xff] }
 0x3fe   :  { %9714 = vmatprep.subr.bf16.mxu1 %v9713_v45  ;;  %9176 = vmatpush3.bf16.msra.mxu0 %v9175_v59  ;;  %v3990_v45 = vld [vmem:[%s14322_s5 + $0x1bb0] sm:$0xff]  ;;  %v9223_v54 = vpack.c.bf16 %v3431_v33, %v3430_v30  ;;  %v3505_v30 = vld [vmem:[%s14322_s5 + $0xc88] sm:$0xff] }
 0x3ff   :  { %9210 = vmatprep.subr.bf16.mxu0 %v9209_v5  ;;  %v9765_v59 = vpack.c.bf16 %v3991_v53, %v3990_v45  ;;  %v3451_v5 = vld [vmem:[%s14322_s5 + $0xad8] sm:$0xff]  ;;  %v3102_v61 = vld [vmem:[#allocation3 + $0x70] sm:$0xff] }
 0x400   :  { %v4389_v55 = vcombine.high %v3102_v61, %v3102_v61 }
 0x401   :  { %9716 = vmatpush3.bf16.msra.mxu1 %v9715_v1  ;;  %5112 = vmatmul.mubr.f32.vlgmr.msra.gmra.mrb[32].mxu0 %v12621_v32  ;;  %v9755_v32 = vpack.c.bf16 %v3969_v6, %v3968_v2  ;;  %v3450_v1 = vld [vmem:[%s14322_s5 + $0xad0] sm:$0xff]  ;;  %v3436_v2 = vld [vmem:[%s14322_s5 + $0xa60] sm:$0xff]  ;;  %v3437_v6 = vld [vmem:[%s14322_s5 + $0xa68] sm:$0xff] }
 0x402   :  { %9718 = vmatprep.subr.bf16.mxu1 %v9717_v18  ;;  %9212 = vmatpush3.bf16.msra.mxu0 %v9211_v29  ;;  %v9767_v18 = vpack.c.bf16 %v3975_v42, %v3974_v43  ;;  %v9229_v60 = vpack.c.bf16 %v3451_v5, %v3450_v1  ;;  %v3452_v29 = vld [vmem:[%s14322_s5 + $0xae0] sm:$0xff]  ;;  %v3983_v43 = vld [vmem:[%s14322_s5 + $0x1b78] sm:$0xff]  ;;  %v4049_v5 = vld [vmem:[%s14322_s5 + $0x1d88] sm:$0xff] }
 0x403   :  { %5251 = vmatprep.mubr.f32.mxu0 %v4251_v38  ;;  %9214 = vmatprep.subr.bf16.mxu0 %v9213_v35  ;;  %v3994_v35 = vld [vmem:[%s14322_s5 + $0x1bd0] sm:$0xff]  ;;  %v9771_v38 = vpack.c.bf16 %v3977_v46, %v3976_v21  ;;  %v3507_v42 = vld [vmem:[%s14322_s5 + $0xc98] sm:$0xff]  ;;  %v4048_v1 = vld [vmem:[%s14322_s5 + $0x1d80] sm:$0xff] }
 0x404   :  { %v9773_v16 = vpack.c.bf16 %v3995_v0, %v3994_v35  ;;  %v9817_v21 = vpack.c.bf16 %v4049_v5, %v4048_v1  ;;  %v4033_v46 = vld [vmem:[%s14322_s5 + $0x1d08] sm:$0xff]  ;;  %v4050_v0 = vld [vmem:[%s14322_s5 + $0x1d90] sm:$0xff]  ;;  %v3499_v1 = vld [vmem:[%s14322_s5 + $0xc58] sm:$0xff] }
 0x405   :  { %9720 = vmatpush3.bf16.msra.mxu1 %v9719_v31  ;;  %v3453_v31 = vld [vmem:[%s14322_s5 + $0xae8] sm:$0xff]  ;;  %v4040_v5 = vld [vmem:[%s14322_s5 + $0x1d40] sm:$0xff] }
 0x406   :  { %9754 = vmatprep.subr.bf16.mxu1 %v9753_v41  ;;  %9216 = vmatpush3.bf16.msra.mxu0 %v9215_v17  ;;  %v9233_v41 = vpack.c.bf16 %v3453_v31, %v3452_v29  ;;  %v3454_v17 = vld [vmem:[%s14322_s5 + $0xaf0] sm:$0xff]  ;;  %v3508_v29 = vld [vmem:[%s14322_s5 + $0xca0] sm:$0xff]  ;;  %v13076_v31 = vrot.slane %v4389_v55, %v11104_v63  ;;  %v3509_v35 = vld [vmem:[%s14322_s5 + $0xca8] sm:$0xff] }
 0x407   :  { %9218 = vmatprep.subr.bf16.mxu0 %v9217_v4  ;;  %v9281_v9 = vpack.c.bf16 %v3509_v35, %v3508_v29  ;;  %v3501_v29 = vld [vmem:[%s14322_s5 + $0xc68] sm:$0xff]  ;;  %v4042_v35 = vld [vmem:[%s14322_s5 + $0x1d50] sm:$0xff] }
 0x408   :  { %6302 = vmatmul.mubr.f32.vlgmr.msra.gmra.mrb[32].mxu1 %v12657_v15  ;;  %v9761_v15 = vpack.c.bf16 %v3989_v39, %v3988_v47  ;;  %v3980_v47 = vld [vmem:[%s14322_s5 + $0x1b60] sm:$0xff] }
 0x409   :  { %9756 = vmatpush3.bf16.msra.mxu1 %v9755_v32  ;;  %6441 = vmatprep.mubr.f32.mxu1 %v4388_v23  ;;  %v3455_v32 = vld [vmem:[%s14322_s5 + $0xaf8] sm:$0xff] }
 0x40a   :  { %9758 = vmatprep.subr.bf16.mxu1 %v9757_v22  ;;  %9220 = vmatpush3.bf16.msra.mxu0 %v9219_v48  ;;  %v9235_v22 = vpack.c.bf16 %v3437_v6, %v3436_v2  ;;  %v9237_v34 = vpack.c.bf16 %v3455_v32, %v3454_v17  ;;  %v3439_v23 = vld [vmem:[%s14322_s5 + $0xa78] sm:$0xff]  ;;  %v9777_v48 = vpack.c.bf16 %v3997_v11, %v3996_v19  ;;  %v3493_v2 = vld [vmem:[%s14322_s5 + $0xc28] sm:$0xff]  ;;  %v4034_v6 = vld [vmem:[%s14322_s5 + $0x1d10] sm:$0xff] }
 0x40b   :  { %9222 = vmatprep.subr.bf16.mxu0 %v9221_v28  ;;  %v3504_v28 = vld [vmem:[%s14322_s5 + $0xc80] sm:$0xff]  ;;  %v9239_v3 = vpack.c.bf16 %v3439_v23, %v3438_v44  ;;  %v3511_v17 = vld [vmem:[%s14322_s5 + $0xcb8] sm:$0xff]  ;;  %v4405_v32 = vcombine.high %v13076_v31, %v13076_v31  ;;  %v4053_v19 = vld [vmem:[%s14322_s5 + $0x1da8] sm:$0xff] }
 0x40c   :  { %v9273_v53 = vpack.c.bf16 %v3505_v30, %v3504_v28  ;;  %v4036_v44 = vld [vmem:[%s14322_s5 + $0x1d20] sm:$0xff]  ;;  %v4037_v23 = vld [vmem:[%s14322_s5 + $0x1d28] sm:$0xff]  ;;  %v4055_v28 = vld [vmem:[%s14322_s5 + $0x1db8] sm:$0xff] }
 0x40d   :  { %9760 = vmatpush3.bf16.msra.mxu1 %v9759_v51  ;;  %v3981_v51 = vld [vmem:[%s14322_s5 + $0x1b68] sm:$0xff] }
 0x40e   :  { %9762 = vmatprep.subr.bf16.mxu1 %v9761_v15  ;;  %9224 = vmatpush3.bf16.msra.mxu0 %v9223_v54  ;;  %v9779_v45 = vpack.c.bf16 %v3981_v51, %v3980_v47  ;;  %v3488_v54 = vld [vmem:[%s14322_s5 + $0xc00] sm:$0xff]  ;;  %v4054_v51 = vld [vmem:[%s14322_s5 + $0x1db0] sm:$0xff] }
 0x40f   :  { %9226 = vmatprep.subr.bf16.mxu0 %v9225_v57  ;;  %v3982_v57 = vld [vmem:[%s14322_s5 + $0x1b70] sm:$0xff]  ;;  %v3512_v47 = vld [vmem:[%s14322_s5 + $0xcc0] sm:$0xff]  ;;  %v9829_v61 = vpack.c.bf16 %v4055_v28, %v4054_v51 }
 0x411   :  { %9764 = vmatpush3.bf16.msra.mxu1 %v9763_v52  ;;  %v3489_v52 = vld [vmem:[%s14322_s5 + $0xc08] sm:$0xff] }
 0x412   :  { %9766 = vmatprep.subr.bf16.mxu1 %v9765_v59  ;;  %9228 = vmatpush3.bf16.msra.mxu0 %v9227_v7  ;;  %v3506_v59 = vld [vmem:[%s14322_s5 + $0xc90] sm:$0xff]  ;;  %v9275_v58 = vpack.c.bf16 %v3489_v52, %v3488_v54  ;;  %v9783_v7 = vpack.c.bf16 %v3983_v43, %v3982_v57  ;;  %v3515_v54 = vld [vmem:[%s14322_s5 + $0xcd8] sm:$0xff]  ;;  %v4056_v52 = vld [vmem:[%s14322_s5 + $0x1dc0] sm:$0xff] }
 0x413   :  { %9230 = vmatprep.subr.bf16.mxu0 %v9229_v60  ;;  %v3490_v60 = vld [vmem:[%s14322_s5 + $0xc10] sm:$0xff]  ;;  %v4057_v57 = vld [vmem:[%s14322_s5 + $0x1dc8] sm:$0xff] }
 0x414   :  { %v7325_v14 = vpop.f32.mrb[20].mxu0  ;;  %v9833_v55 = vpack.c.bf16 %v4057_v57, %v4056_v52  ;;  %v4113_v52 = vld [vmem:[%s14322_s5 + $0x1f88] sm:$0xff] }
 0x415   :  { %9768 = vmatpush3.bf16.msra.mxu1 %v9767_v18  ;;  %v7326_v49 = vpop.f32.mrb[21].mxu0  ;;  %v9277_v18 = vpack.c.bf16 %v3507_v42, %v3506_v59  ;;  %v3498_v42 = vld [vmem:[%s14322_s5 + $0xc50] sm:$0xff] }
 0x416   :  { %9770 = vmatprep.subr.bf16.mxu1 %v9769_v25  ;;  %v7327_v4 = vadd.f32 %v7326_v49, %v7325_v14  ;;  %9232 = vmatpush3.bf16.msra.mxu0 %v9231_v37  ;;  %v4032_v25 = vld [vmem:[%s14322_s5 + $0x1d00] sm:$0xff]  ;;  %v4051_v37 = vld [vmem:[%s14322_s5 + $0x1d98] sm:$0xff] }
 0x417   :  { %9234 = vmatprep.subr.bf16.mxu0 %v9233_v41  ;;  %v3492_v41 = vld [vmem:[%s14322_s5 + $0xc20] sm:$0xff]  ;;  %v9821_v14 = vpack.c.bf16 %v4051_v37, %v4050_v0 }
 0x418   :  { %v13012_v39 = vadd.f32 %v7327_v4, %v12804_v56  ;;  %v3998_v56 = vld [vmem:[%s14322_s5 + $0x1bf0] sm:$0xff]  ;;  %v4052_v49 = vld [vmem:[%s14322_s5 + $0x1da0] sm:$0xff]  ;;  %v9283_v11 = vpack.c.bf16 %v3493_v2, %v3492_v41  ;;  %v3519_v41 = vld [vmem:[%s14322_s5 + $0xcf8] sm:$0xff] }
 0x419   :  { %9772 = vmatpush3.bf16.msra.mxu1 %v9771_v38  ;;  %v9781_v50 = vpack.c.bf16 %v3999_v36, %v3998_v56  ;;  %v9279_v38 = vpack.c.bf16 %v3491_v27, %v3490_v60  ;;  %v3496_v36 = vld [vmem:[%s14322_s5 + $0xc40] sm:$0xff]  ;;  %v4058_v60 = vld [vmem:[%s14322_s5 + $0x1dd0] sm:$0xff]  ;;  %v4059_v27 = vld [vmem:[%s14322_s5 + $0x1dd8] sm:$0xff] }
 0x41a   :  { %9774 = vmatprep.subr.bf16.mxu1 %v9773_v16  ;;  %9236 = vmatpush3.bf16.msra.mxu0 %v9235_v22  ;;  %v4035_v16 = vld [vmem:[%s14322_s5 + $0x1d18] sm:$0xff]  ;;  %v9285_v22 = vpack.c.bf16 %v3511_v17, %v3510_v13  ;;  %v9837_v37 = vpack.c.bf16 %v4059_v27, %v4058_v60  ;;  %v3573_v27 = vld [vmem:[%s14322_s5 + $0xea8] sm:$0xff] }
 0x41b   :  { %v7710_v33 = vpop.f32.mrb[20].mxu1  ;;  %9238 = vmatprep.subr.bf16.mxu0 %v9237_v34  ;;  %v9823_v4 = vpack.c.bf16 %v4035_v16, %v4034_v6  ;;  %v3495_v34 = vld [vmem:[%s14322_s5 + $0xc38] sm:$0xff]  ;;  %v4060_v6 = vld [vmem:[%s14322_s5 + $0x1de0] sm:$0xff] }
 0x41c   :  { %v7711_v15 = vpop.f32.mrb[21].mxu1 }
 0x41d   :  { %v13029_v40 = vadd.f32 %v7711_v15, %v7710_v33  ;;  %9776 = vmatpush3.bf16.msra.mxu1 %v9775_v26  ;;  %v3494_v26 = vld [vmem:[%s14322_s5 + $0xc30] sm:$0xff]  ;;  %v9827_v33 = vpack.c.bf16 %v4037_v23, %v4036_v44  ;;  %v3497_v15 = vld [vmem:[%s14322_s5 + $0xc48] sm:$0xff] }
 0x41e   :  { %9778 = vmatprep.subr.bf16.mxu1 %v9777_v48  ;;  %9240 = vmatpush3.bf16.msra.mxu0 %v9239_v3  ;;  %v3513_v48 = vld [vmem:[%s14322_s5 + $0xcc8] sm:$0xff]  ;;  %v9287_v30 = vpack.c.bf16 %v3495_v34, %v3494_v26  ;;  %v4038_v3 = vld [vmem:[%s14322_s5 + $0x1d30] sm:$0xff]  ;;  %v3568_v26 = vld [vmem:[%s14322_s5 + $0xe80] sm:$0xff] }
 0x41f   :  { %9274 = vmatprep.subr.bf16.mxu0 %v9273_v53  ;;  %v9289_v56 = vpack.c.bf16 %v3513_v48, %v3512_v47  ;;  %v3514_v53 = vld [vmem:[%s14322_s5 + $0xcd0] sm:$0xff]  ;;  %v3569_v34 = vld [vmem:[%s14322_s5 + $0xe88] sm:$0xff]  ;;  %v3103_v48 = vld [vmem:[#allocation3 + $0x78] sm:$0xff] }
 0x420   :  { %v9293_v59 = vpack.c.bf16 %v3515_v54, %v3514_v53  ;;  %v3571_v53 = vld [vmem:[%s14322_s5 + $0xe98] sm:$0xff]  ;;  %v4112_v54 = vld [vmem:[%s14322_s5 + $0x1f80] sm:$0xff]  ;;  %v4406_v57 = vcombine.high %v3103_v48, %v3103_v48 }
 0x421   :  { %9780 = vmatpush3.bf16.msra.mxu1 %v9779_v45  ;;  %5252 = vmatmul.mubr.f32.vlgmr.msra.gmra.mrb[34].mxu0 %v12832_v24  ;;  %v9819_v24 = vpack.c.bf16 %v4033_v46, %v4032_v25  ;;  %v4039_v45 = vld [vmem:[%s14322_s5 + $0x1d38] sm:$0xff]  ;;  %v3500_v46 = vld [vmem:[%s14322_s5 + $0xc60] sm:$0xff] }
 0x422   :  { %9782 = vmatprep.subr.bf16.mxu1 %v9781_v50  ;;  %9276 = vmatpush3.bf16.msra.mxu0 %v9275_v58  ;;  %v9291_v50 = vpack.c.bf16 %v3497_v15, %v3496_v36  ;;  %v9831_v43 = vpack.c.bf16 %v4039_v45, %v4038_v3  ;;  %v4041_v58 = vld [vmem:[%s14322_s5 + $0x1d48] sm:$0xff]  ;;  %v9299_v16 = vpack.c.bf16 %v3501_v29, %v3500_v46  ;;  %v4046_v36 = vld [vmem:[%s14322_s5 + $0x1d70] sm:$0xff]  ;;  %v13248_v15 = vld.sshfl [vmem:[#allocation3 + $0x38] sm:$0xff pattern:$0x76325410] }
 0x423   :  { %5391 = vmatprep.mubr.f32.mxu0 %v4268_v20  ;;  %9278 = vmatprep.subr.bf16.mxu0 %v9277_v18  ;;  %v3517_v18 = vld [vmem:[%s14322_s5 + $0xce8] sm:$0xff]  ;;  %v9295_v20 = vpack.c.bf16 %v3499_v1, %v3498_v42  ;;  %v3570_v45 = vld [vmem:[%s14322_s5 + $0xe90] sm:$0xff]  ;;  %v3555_v1 = vld [vmem:[%s14322_s5 + $0xe18] sm:$0xff]  ;;  %v13284_v60 = vrot.slane %v4406_v57, %v11104_v63 }
 0x424   :  { %v3554_v42 = vld [vmem:[%s14322_s5 + $0xe10] sm:$0xff]  ;;  %v3556_v63 = vld [vmem:[%s14322_s5 + $0xe20] sm:$0xff]  ;;  %v3557_v46 = vld [vmem:[%s14322_s5 + $0xe28] sm:$0xff] }
 0x425   :  { %9784 = vmatpush3.bf16.msra.mxu1 %v9783_v7  ;;  %v3516_v7 = vld [vmem:[%s14322_s5 + $0xce0] sm:$0xff]  ;;  %v4098_v29 = vld [vmem:[%s14322_s5 + $0x1f10] sm:$0xff] }
 0x426   :  { %9818 = vmatprep.subr.bf16.mxu1 %v9817_v21  ;;  %9280 = vmatpush3.bf16.msra.mxu0 %v9279_v38  ;;  %v9835_v21 = vpack.c.bf16 %v4041_v58, %v4040_v5  ;;  %v9297_v25 = vpack.c.bf16 %v3517_v18, %v3516_v7  ;;  %v4043_v38 = vld [vmem:[%s14322_s5 + $0x1d58] sm:$0xff]  ;;  %v4285_v5 = vcombine.high %v13248_v15, %v13248_v15  ;;  %v4096_v58 = vld [vmem:[%s14322_s5 + $0x1f00] sm:$0xff]  ;;  %v4097_v7 = vld [vmem:[%s14322_s5 + $0x1f08] sm:$0xff] }
 0x427   :  { %9282 = vmatprep.subr.bf16.mxu0 %v9281_v9  ;;  %v4061_v9 = vld [vmem:[%s14322_s5 + $0x1de8] sm:$0xff]  ;;  %v9839_v13 = vpack.c.bf16 %v4043_v38, %v4042_v35  ;;  %v3572_v18 = vld [vmem:[%s14322_s5 + $0xea0] sm:$0xff]  ;;  %v3574_v38 = vld [vmem:[%s14322_s5 + $0xeb0] sm:$0xff] }
 0x428   :  { %6442 = vmatmul.mubr.f32.vlgmr.msra.gmra.mrb[34].mxu1 %v12868_v12  ;;  %v9825_v12 = vpack.c.bf16 %v4053_v19, %v4052_v49  ;;  %v3503_v49 = vld [vmem:[%s14322_s5 + $0xc78] sm:$0xff]  ;;  %v4044_v19 = vld [vmem:[%s14322_s5 + $0x1d60] sm:$0xff]  ;;  %v9345_v35 = vpack.c.bf16 %v3573_v27, %v3572_v18  ;;  %v3565_v18 = vld [vmem:[%s14322_s5 + $0xe68] sm:$0xff] }
 0x429   :  { %9820 = vmatpush3.bf16.msra.mxu1 %v9819_v24  ;;  %6581 = vmatprep.mubr.f32.mxu1 %v4405_v32  ;;  %v3518_v24 = vld [vmem:[%s14322_s5 + $0xcf0] sm:$0xff] }
 0x42a   :  { %9822 = vmatprep.subr.bf16.mxu1 %v9821_v14  ;;  %9284 = vmatpush3.bf16.msra.mxu0 %v9283_v11  ;;  %v9301_v17 = vpack.c.bf16 %v3519_v41, %v3518_v24  ;;  %v3502_v32 = vld [vmem:[%s14322_s5 + $0xc70] sm:$0xff]  ;;  %v3575_v24 = vld [vmem:[%s14322_s5 + $0xeb8] sm:$0xff]  ;;  %v4422_v41 = vcombine.high %v13284_v60, %v13284_v60 }
 0x42b   :  { %9286 = vmatprep.subr.bf16.mxu0 %v9285_v22  ;;  %v4045_v22 = vld [vmem:[%s14322_s5 + $0x1d68] sm:$0xff]  ;;  %v9303_v47 = vpack.c.bf16 %v3503_v49, %v3502_v32  ;;  %v4100_v32 = vld [vmem:[%s14322_s5 + $0x1f20] sm:$0xff]  ;;  %v4106_v27 = vld [vmem:[%s14322_s5 + $0x1f50] sm:$0xff] }
 0x42c   :  { %v9843_v28 = vpack.c.bf16 %v4045_v22, %v4044_v19  ;;  %v4101_v49 = vld [vmem:[%s14322_s5 + $0x1f28] sm:$0xff]  ;;  %v3576_v19 = vld [vmem:[%s14322_s5 + $0xec0] sm:$0xff]  ;;  %v4118_v22 = vld [vmem:[%s14322_s5 + $0x1fb0] sm:$0xff] }
 0x42d   :  { %9824 = vmatpush3.bf16.msra.mxu1 %v9823_v4  ;;  %v9841_v4 = vpack.c.bf16 %v4061_v9, %v4060_v6  ;;  %v4117_v6 = vld [vmem:[%s14322_s5 + $0x1fa8] sm:$0xff]  ;;  %v9347_v9 = vpack.c.bf16 %v3557_v46, %v3556_v63  ;;  %v3583_v63 = vld [vmem:[%s14322_s5 + $0xef8] sm:$0xff] }
 0x42e   :  { %9826 = vmatprep.subr.bf16.mxu1 %v9825_v12  ;;  %9288 = vmatpush3.bf16.msra.mxu0 %v9287_v30  ;;  %v4063_v12 = vld [vmem:[%s14322_s5 + $0x1df8] sm:$0xff]  ;;  %v9337_v30 = vpack.c.bf16 %v3569_v34, %v3568_v26 }
 0x42f   :  { %9290 = vmatprep.subr.bf16.mxu0 %v9289_v56  ;;  %v3553_v56 = vld [vmem:[%s14322_s5 + $0xe08] sm:$0xff]  ;;  %v4119_v26 = vld [vmem:[%s14322_s5 + $0x1fb8] sm:$0xff] }
 0x430   :  { %v9893_v48 = vpack.c.bf16 %v4119_v26, %v4118_v22 }
 0x431   :  { %9828 = vmatpush3.bf16.msra.mxu1 %v9827_v33  ;;  %v3552_v33 = vld [vmem:[%s14322_s5 + $0xe00] sm:$0xff] }
 0x432   :  { %9830 = vmatprep.subr.bf16.mxu1 %v9829_v61  ;;  %9292 = vmatpush3.bf16.msra.mxu0 %v9291_v50  ;;  %v4047_v61 = vld [vmem:[%s14322_s5 + $0x1d78] sm:$0xff]  ;;  %v9339_v50 = vpack.c.bf16 %v3553_v56, %v3552_v33  ;;  %v4120_v56 = vld [vmem:[%s14322_s5 + $0x1fc0] sm:$0xff] }
 0x433   :  { %9294 = vmatprep.subr.bf16.mxu0 %v9293_v59  ;;  %v9341_v59 = vpack.c.bf16 %v3571_v53, %v3570_v45  ;;  %v3579_v33 = vld [vmem:[%s14322_s5 + $0xed8] sm:$0xff]  ;;  %v3562_v53 = vld [vmem:[%s14322_s5 + $0xe50] sm:$0xff] }
 0x434   :  { %v7360_v0 = vpop.f32.mrb[22].mxu0 }
 0x435   :  { %9832 = vmatpush3.bf16.msra.mxu1 %v9831_v43  ;;  %v7361_v2 = vpop.f32.mrb[23].mxu0  ;;  %v9847_v43 = vpack.c.bf16 %v4047_v61, %v4046_v36  ;;  %v4121_v36 = vld [vmem:[%s14322_s5 + $0x1fc8] sm:$0xff] }
 0x436   :  { %9834 = vmatprep.subr.bf16.mxu1 %v9833_v55  ;;  %v7362_v14 = vadd.f32 %v7361_v2, %v7360_v0  ;;  %9296 = vmatpush3.bf16.msra.mxu0 %v9295_v20  ;;  %v9881_v55 = vpack.c.bf16 %v4113_v52, %v4112_v54  ;;  %v4114_v20 = vld [vmem:[%s14322_s5 + $0x1f90] sm:$0xff]  ;;  %v4116_v2 = vld [vmem:[%s14322_s5 + $0x1fa0] sm:$0xff]  ;;  %v3563_v54 = vld [vmem:[%s14322_s5 + $0xe58] sm:$0xff]  ;;  %v9897_v57 = vpack.c.bf16 %v4121_v36, %v4120_v56 }
 0x437   :  { %9298 = vmatprep.subr.bf16.mxu0 %v9297_v25  ;;  %v9343_v25 = vpack.c.bf16 %v3555_v1, %v3554_v42  ;;  %v4104_v52 = vld [vmem:[%s14322_s5 + $0x1f40] sm:$0xff]  ;;  %v4122_v42 = vld [vmem:[%s14322_s5 + $0x1fd0] sm:$0xff]  ;;  %v4123_v1 = vld [vmem:[%s14322_s5 + $0x1fd8] sm:$0xff] }
 0x438   :  { %v13220_v11 = vadd.f32 %v7362_v14, %v13012_v39  ;;  %v4062_v39 = vld [vmem:[%s14322_s5 + $0x1df0] sm:$0xff] }
 0x439   :  { %9836 = vmatpush3.bf16.msra.mxu1 %v9835_v21  ;;  %v9845_v3 = vpack.c.bf16 %v4063_v12, %v4062_v39  ;;  %v4115_v21 = vld [vmem:[%s14322_s5 + $0x1f98] sm:$0xff]  ;;  %v3560_v12 = vld [vmem:[%s14322_s5 + $0xe40] sm:$0xff]  ;;  %v3618_v36 = vld [vmem:[%s14322_s5 + $0x1010] sm:$0xff] }
 0x43a   :  { %9838 = vmatprep.subr.bf16.mxu1 %v9837_v37  ;;  %9300 = vmatpush3.bf16.msra.mxu0 %v9299_v16  ;;  %v9885_v0 = vpack.c.bf16 %v4115_v21, %v4114_v20  ;;  %v4099_v37 = vld [vmem:[%s14322_s5 + $0x1f18] sm:$0xff]  ;;  %v9349_v16 = vpack.c.bf16 %v3575_v24, %v3574_v38  ;;  %v9901_v21 = vpack.c.bf16 %v4123_v1, %v4122_v42  ;;  %v3622_v1 = vld [vmem:[%s14322_s5 + $0x1030] sm:$0xff] }
 0x43b   :  { %v7780_v44 = vpop.f32.mrb[22].mxu1  ;;  %9302 = vmatprep.subr.bf16.mxu0 %v9301_v17  ;;  %v9887_v14 = vpack.c.bf16 %v4099_v37, %v4098_v29  ;;  %v3559_v17 = vld [vmem:[%s14322_s5 + $0xe38] sm:$0xff]  ;;  %v4124_v29 = vld [vmem:[%s14322_s5 + $0x1fe0] sm:$0xff] }
 0x43c   :  { %v7781_v23 = vpop.f32.mrb[23].mxu1 }
 0x43d   :  { %v13237_v51 = vadd.f32 %v7781_v23, %v7780_v44  ;;  %9840 = vmatpush3.bf16.msra.mxu1 %v9839_v13  ;;  %v3558_v13 = vld [vmem:[%s14322_s5 + $0xe30] sm:$0xff]  ;;  %v9891_v44 = vpack.c.bf16 %v4101_v49, %v4100_v32  ;;  %v3561_v23 = vld [vmem:[%s14322_s5 + $0xe48] sm:$0xff] }
 0x43e   :  { %9842 = vmatprep.subr.bf16.mxu1 %v9841_v4  ;;  %9304 = vmatpush3.bf16.msra.mxu0 %v9303_v47  ;;  %v3577_v4 = vld [vmem:[%s14322_s5 + $0xec8] sm:$0xff]  ;;  %v9351_v34 = vpack.c.bf16 %v3559_v17, %v3558_v13  ;;  %v4102_v47 = vld [vmem:[%s14322_s5 + $0x1f30] sm:$0xff]  ;;  %v3632_v13 = vld [vmem:[%s14322_s5 + $0x1080] sm:$0xff] }
 0x43f   :  { %9338 = vmatprep.subr.bf16.mxu0 %v9337_v30  ;;  %v9353_v39 = vpack.c.bf16 %v3577_v4, %v3576_v19  ;;  %v3578_v30 = vld [vmem:[%s14322_s5 + $0xed0] sm:$0xff]  ;;  %v3633_v17 = vld [vmem:[%s14322_s5 + $0x1088] sm:$0xff] }
 0x440   :  { %v9357_v45 = vpack.c.bf16 %v3579_v33, %v3578_v30  ;;  %v9401_v26 = vpack.c.bf16 %v3633_v17, %v3632_v13 }
 0x441   :  { %9844 = vmatpush3.bf16.msra.mxu1 %v9843_v28  ;;  %5392 = vmatmul.mubr.f32.vlgmr.msra.gmra.mrb[36].mxu0 %v13040_v10  ;;  %v9883_v10 = vpack.c.bf16 %v4097_v7, %v4096_v58  ;;  %v4103_v28 = vld [vmem:[%s14322_s5 + $0x1f38] sm:$0xff]  ;;  %v3564_v7 = vld [vmem:[%s14322_s5 + $0xe60] sm:$0xff] }
 0x442   :  { %9846 = vmatprep.subr.bf16.mxu1 %v9845_v3  ;;  %9340 = vmatpush3.bf16.msra.mxu0 %v9339_v50  ;;  %v9355_v3 = vpack.c.bf16 %v3561_v23, %v3560_v12  ;;  %v9895_v61 = vpack.c.bf16 %v4103_v28, %v4102_v47  ;;  %v4105_v50 = vld [vmem:[%s14322_s5 + $0x1f48] sm:$0xff]  ;;  %v9363_v37 = vpack.c.bf16 %v3565_v18, %v3564_v7  ;;  %v13456_v12 = vld.sshfl [vmem:[#allocation3 + $0x40] sm:$0xff pattern:$0x76325410]  ;;  %v4111_v47 = vld [vmem:[%s14322_s5 + $0x1f78] sm:$0xff] }
 0x443   :  { %5531 = vmatprep.mubr.f32.mxu0 %v4285_v5  ;;  %9342 = vmatprep.subr.bf16.mxu0 %v9341_v59  ;;  %v3581_v59 = vld [vmem:[%s14322_s5 + $0xee8] sm:$0xff]  ;;  %v9359_v5 = vpack.c.bf16 %v3563_v54, %v3562_v53  ;;  %v3635_v28 = vld [vmem:[%s14322_s5 + $0x1098] sm:$0xff]  ;;  %v3624_v18 = vld [vmem:[%s14322_s5 + $0x1040] sm:$0xff] }
 0x444   :  { %v3637_v53 = vld [vmem:[%s14322_s5 + $0x10a8] sm:$0xff] }
 0x445   :  { %9848 = vmatpush3.bf16.msra.mxu1 %v9847_v43  ;;  %v3580_v43 = vld [vmem:[%s14322_s5 + $0xee0] sm:$0xff] }
 0x446   :  { %9882 = vmatprep.subr.bf16.mxu1 %v9881_v55  ;;  %9344 = vmatpush3.bf16.msra.mxu0 %v9343_v25  ;;  %v9899_v55 = vpack.c.bf16 %v4105_v50, %v4104_v52  ;;  %v9361_v58 = vpack.c.bf16 %v3581_v59, %v3580_v43  ;;  %v4107_v25 = vld [vmem:[%s14322_s5 + $0x1f58] sm:$0xff]  ;;  %v3621_v50 = vld [vmem:[%s14322_s5 + $0x1028] sm:$0xff]  ;;  %v3638_v43 = vld [vmem:[%s14322_s5 + $0x10b0] sm:$0xff] }
 0x447   :  { %9346 = vmatprep.subr.bf16.mxu0 %v9345_v35  ;;  %v4125_v35 = vld [vmem:[%s14322_s5 + $0x1fe8] sm:$0xff]  ;;  %v9903_v38 = vpack.c.bf16 %v4107_v25, %v4106_v27 }
 0x448   :  { %6582 = vmatmul.mubr.f32.vlgmr.msra.gmra.mrb[36].mxu1 %v13076_v31  ;;  %v9889_v31 = vpack.c.bf16 %v4117_v6, %v4116_v2  ;;  %v3567_v2 = vld [vmem:[%s14322_s5 + $0xe78] sm:$0xff]  ;;  %v4108_v6 = vld [vmem:[%s14322_s5 + $0x1f60] sm:$0xff]  ;;  %v3625_v27 = vld [vmem:[%s14322_s5 + $0x1048] sm:$0xff] }
 0x449   :  { %9884 = vmatpush3.bf16.msra.mxu1 %v9883_v10  ;;  %6721 = vmatprep.mubr.f32.mxu1 %v4422_v41  ;;  %v3582_v10 = vld [vmem:[%s14322_s5 + $0xef0] sm:$0xff]  ;;  %v9419_v25 = vpack.c.bf16 %v3625_v27, %v3624_v18  ;;  %v3707_v27 = vld [vmem:[%s14322_s5 + $0x12d8] sm:$0xff] }
 0x44a   :  { %9886 = vmatprep.subr.bf16.mxu1 %v9885_v0  ;;  %9348 = vmatpush3.bf16.msra.mxu0 %v9347_v9  ;;  %v9365_v24 = vpack.c.bf16 %v3583_v63, %v3582_v10  ;;  %v3566_v41 = vld [vmem:[%s14322_s5 + $0xe70] sm:$0xff] }
 0x44b   :  { %9350 = vmatprep.subr.bf16.mxu0 %v9349_v16  ;;  %v4109_v16 = vld [vmem:[%s14322_s5 + $0x1f68] sm:$0xff]  ;;  %v9367_v19 = vpack.c.bf16 %v3567_v2, %v3566_v41  ;;  %v3626_v63 = vld [vmem:[%s14322_s5 + $0x1050] sm:$0xff] }
 0x44c   :  { %v9907_v22 = vpack.c.bf16 %v4109_v16, %v4108_v6  ;;  %v3646_v2 = vld [vmem:[%s14322_s5 + $0x10f0] sm:$0xff]  ;;  %v3647_v6 = vld [vmem:[%s14322_s5 + $0x10f8] sm:$0xff] }
 0x44d   :  { %9888 = vmatpush3.bf16.msra.mxu1 %v9887_v14  ;;  %v9905_v14 = vpack.c.bf16 %v4125_v35, %v4124_v29  ;;  %v3644_v29 = vld [vmem:[%s14322_s5 + $0x10e0] sm:$0xff]  ;;  %v3645_v35 = vld [vmem:[%s14322_s5 + $0x10e8] sm:$0xff]  ;;  %v9429_v17 = vpack.c.bf16 %v3647_v6, %v3646_v2  ;;  %v3706_v18 = vld [vmem:[%s14322_s5 + $0x12d0] sm:$0xff] }
 0x44e   :  { %9890 = vmatprep.subr.bf16.mxu1 %v9889_v31  ;;  %9352 = vmatpush3.bf16.msra.mxu0 %v9351_v34  ;;  %v4127_v31 = vld [vmem:[%s14322_s5 + $0x1ff8] sm:$0xff]  ;;  %v3616_v34 = vld [vmem:[%s14322_s5 + $0x1000] sm:$0xff] }
 0x44f   :  { %9354 = vmatprep.subr.bf16.mxu0 %v9353_v39  ;;  %v4110_v39 = vld [vmem:[%s14322_s5 + $0x1f70] sm:$0xff] }
 0x450   :  { %v9911_v33 = vpack.c.bf16 %v4111_v47, %v4110_v39  ;;  %v13566_v47 = vld.sshfl [vmem:[#allocation3 + $0x48] sm:$0xff pattern:$0x76325410] }
 0x451   :  { %9892 = vmatpush3.bf16.msra.mxu1 %v9891_v44  ;;  %v3617_v44 = vld [vmem:[%s14322_s5 + $0x1008] sm:$0xff] }
 0x452   :  { %9894 = vmatprep.subr.bf16.mxu1 %v9893_v48  ;;  %9356 = vmatpush3.bf16.msra.mxu0 %v9355_v3  ;;  %v3634_v48 = vld [vmem:[%s14322_s5 + $0x1090] sm:$0xff]  ;;  %v9403_v30 = vpack.c.bf16 %v3617_v44, %v3616_v34  ;;  %v3619_v3 = vld [vmem:[%s14322_s5 + $0x1018] sm:$0xff] }
 0x453   :  { %9358 = vmatprep.subr.bf16.mxu0 %v9357_v45  ;;  %v9405_v56 = vpack.c.bf16 %v3635_v28, %v3634_v48  ;;  %v3636_v45 = vld [vmem:[%s14322_s5 + $0x10a0] sm:$0xff]  ;;  %v9407_v54 = vpack.c.bf16 %v3619_v3, %v3618_v36  ;;  %v3698_v48 = vld [vmem:[%s14322_s5 + $0x1290] sm:$0xff]  ;;  %v3699_v28 = vld [vmem:[%s14322_s5 + $0x1298] sm:$0xff]  ;;  %v4319_v3 = vcombine.high %v13566_v47, %v13566_v47 }
 0x454   :  { %v7395_v20 = vpop.f32.mrb[24].mxu0  ;;  %v9409_v52 = vpack.c.bf16 %v3637_v53, %v3636_v45  ;;  %v3683_v36 = vld [vmem:[%s14322_s5 + $0x1218] sm:$0xff]  ;;  %v3701_v45 = vld [vmem:[%s14322_s5 + $0x12a8] sm:$0xff] }
 0x455   :  { %9896 = vmatpush3.bf16.msra.mxu1 %v9895_v61  ;;  %v7396_v46 = vpop.f32.mrb[25].mxu0  ;;  %v4302_v61 = vcombine.high %v13456_v12, %v13456_v12 }
 0x456   :  { %9898 = vmatprep.subr.bf16.mxu1 %v9897_v57  ;;  %v7397_v0 = vadd.f32 %v7396_v46, %v7395_v20  ;;  %9360 = vmatpush3.bf16.msra.mxu0 %v9359_v5  ;;  %v3620_v57 = vld [vmem:[%s14322_s5 + $0x1020] sm:$0xff]  ;;  %v3623_v5 = vld [vmem:[%s14322_s5 + $0x1038] sm:$0xff]  ;;  %v3642_v20 = vld [vmem:[%s14322_s5 + $0x10d0] sm:$0xff] }
 0x457   :  { %9362 = vmatprep.subr.bf16.mxu0 %v9361_v58  ;;  %v9411_v59 = vpack.c.bf16 %v3621_v50, %v3620_v57  ;;  %v3641_v58 = vld [vmem:[%s14322_s5 + $0x10c8] sm:$0xff]  ;;  %v3627_v46 = vld [vmem:[%s14322_s5 + $0x1058] sm:$0xff]  ;;  %v3702_v50 = vld [vmem:[%s14322_s5 + $0x12b0] sm:$0xff] }
 0x458   :  { %v13428_v9 = vadd.f32 %v7397_v0, %v13220_v11  ;;  %v4126_v11 = vld [vmem:[%s14322_s5 + $0x1ff0] sm:$0xff]  ;;  %v9423_v0 = vpack.c.bf16 %v3627_v46, %v3626_v63  ;;  %v3685_v57 = vld [vmem:[%s14322_s5 + $0x1228] sm:$0xff]  ;;  %v3708_v63 = vld [vmem:[%s14322_s5 + $0x12e0] sm:$0xff] }
 0x459   :  { %9900 = vmatpush3.bf16.msra.mxu1 %v9899_v55  ;;  %v9909_v23 = vpack.c.bf16 %v4127_v31, %v4126_v11  ;;  %v3640_v55 = vld [vmem:[%s14322_s5 + $0x10c0] sm:$0xff]  ;;  %v3631_v11 = vld [vmem:[%s14322_s5 + $0x1078] sm:$0xff]  ;;  %v3709_v46 = vld [vmem:[%s14322_s5 + $0x12e8] sm:$0xff] }
 0x45a   :  { %9902 = vmatprep.subr.bf16.mxu1 %v9901_v21  ;;  %9364 = vmatpush3.bf16.msra.mxu0 %v9363_v37  ;;  %v9417_v7 = vpack.c.bf16 %v3641_v58, %v3640_v55  ;;  %v3643_v21 = vld [vmem:[%s14322_s5 + $0x10d8] sm:$0xff]  ;;  %v9425_v37 = vpack.c.bf16 %v3645_v35, %v3644_v29  ;;  %v9489_v35 = vpack.c.bf16 %v3709_v46, %v3708_v63  ;;  %v3773_v63 = vld [vmem:[%s14322_s5 + $0x14e8] sm:$0xff] }
 0x45b   :  { %v7850_v32 = vpop.f32.mrb[24].mxu1  ;;  %9366 = vmatprep.subr.bf16.mxu0 %v9365_v24  ;;  %v9421_v10 = vpack.c.bf16 %v3643_v21, %v3642_v20  ;;  %v3629_v24 = vld [vmem:[%s14322_s5 + $0x1068] sm:$0xff]  ;;  %v9485_v21 = vpack.c.bf16 %v3707_v27, %v3706_v18  ;;  %v3771_v18 = vld [vmem:[%s14322_s5 + $0x14d8] sm:$0xff] }
 0x45c   :  { %v7851_v49 = vpop.f32.mrb[25].mxu1 }
 0x45d   :  { %v13445_v4 = vadd.f32 %v7851_v49, %v7850_v32  ;;  %9904 = vmatpush3.bf16.msra.mxu1 %v9903_v38  ;;  %v3628_v38 = vld [vmem:[%s14322_s5 + $0x1060] sm:$0xff]  ;;  %v3630_v32 = vld [vmem:[%s14322_s5 + $0x1070] sm:$0xff] }
 0x45e   :  { %9906 = vmatprep.subr.bf16.mxu1 %v9905_v14  ;;  %9368 = vmatpush3.bf16.msra.mxu0 %v9367_v19  ;;  %v9427_v13 = vpack.c.bf16 %v3629_v24, %v3628_v38  ;;  %v3696_v49 = vld [vmem:[%s14322_s5 + $0x1280] sm:$0xff]  ;;  %v3697_v19 = vld [vmem:[%s14322_s5 + $0x1288] sm:$0xff]  ;;  %v9431_v34 = vpack.c.bf16 %v3631_v11, %v3630_v32  ;;  %v3710_v24 = vld [vmem:[%s14322_s5 + $0x12f0] sm:$0xff] }
 0x45f   :  { %9402 = vmatprep.subr.bf16.mxu0 %v9401_v26  ;;  %v9465_v39 = vpack.c.bf16 %v3697_v19, %v3696_v49  ;;  %v3760_v11 = vld [vmem:[%s14322_s5 + $0x1480] sm:$0xff]  ;;  %v3761_v49 = vld [vmem:[%s14322_s5 + $0x1488] sm:$0xff] }
 0x461   :  { %9908 = vmatpush3.bf16.msra.mxu1 %v9907_v22  ;;  %5532 = vmatmul.mubr.f32.vlgmr.msra.gmra.mrb[38].mxu0 %v13248_v15  ;;  %v3639_v15 = vld [vmem:[%s14322_s5 + $0x10b8] sm:$0xff] }
 0x462   :  { %9910 = vmatprep.subr.bf16.mxu1 %v9909_v23  ;;  %9404 = vmatpush3.bf16.msra.mxu0 %v9403_v30  ;;  %v9413_v42 = vpack.c.bf16 %v3639_v15, %v3638_v43  ;;  %v3681_v23 = vld [vmem:[%s14322_s5 + $0x1208] sm:$0xff] }
 0x463   :  { %5671 = vmatprep.mubr.f32.mxu0 %v4302_v61  ;;  %9406 = vmatprep.subr.bf16.mxu0 %v9405_v56  ;;  %v3682_v56 = vld [vmem:[%s14322_s5 + $0x1210] sm:$0xff]  ;;  %v3700_v61 = vld [vmem:[%s14322_s5 + $0x12a0] sm:$0xff] }
 0x464   :  { %v9471_v53 = vpack.c.bf16 %v3683_v36, %v3682_v56  ;;  %v3746_v56 = vld [vmem:[%s14322_s5 + $0x1410] sm:$0xff]  ;;  %v3747_v36 = vld [vmem:[%s14322_s5 + $0x1418] sm:$0xff] }
 0x465   :  { %9912 = vmatpush3.bf16.msra.mxu1 %v9911_v33  ;;  %v9469_v33 = vpack.c.bf16 %v3699_v28, %v3698_v48  ;;  %v3762_v48 = vld [vmem:[%s14322_s5 + $0x1490] sm:$0xff]  ;;  %v3763_v28 = vld [vmem:[%s14322_s5 + $0x1498] sm:$0xff] }
 0x466   :  { %9408 = vmatpush3.bf16.msra.mxu0 %v9407_v54  ;;  %v9473_v54 = vpack.c.bf16 %v3701_v45, %v3700_v61  ;;  %v3764_v61 = vld [vmem:[%s14322_s5 + $0x14a0] sm:$0xff]  ;;  %v3765_v45 = vld [vmem:[%s14322_s5 + $0x14a8] sm:$0xff] }
 0x467   :  { %9410 = vmatprep.subr.bf16.mxu0 %v9409_v52  ;;  %v3684_v52 = vld [vmem:[%s14322_s5 + $0x1220] sm:$0xff] }
 0x468   :  { %6722 = vmatmul.mubr.f32.vlgmr.msra.gmra.mrb[38].mxu1 %v13284_v60  ;;  %v9415_v60 = vpack.c.bf16 %v3623_v5, %v3622_v1  ;;  %v9475_v43 = vpack.c.bf16 %v3685_v57, %v3684_v52  ;;  %v3704_v1 = vld [vmem:[%s14322_s5 + $0x12c0] sm:$0xff]  ;;  %v3705_v5 = vld [vmem:[%s14322_s5 + $0x12c8] sm:$0xff] }
 0x469   :  { %v9481_v58 = vpack.c.bf16 %v3705_v5, %v3704_v1  ;;  %v3748_v52 = vld [vmem:[%s14322_s5 + $0x1420] sm:$0xff]  ;;  %v3749_v57 = vld [vmem:[%s14322_s5 + $0x1428] sm:$0xff] }
 0x46a   :  { %9412 = vmatpush3.bf16.msra.mxu0 %v9411_v59  ;;  %v3686_v59 = vld [vmem:[%s14322_s5 + $0x1230] sm:$0xff]  ;;  %v3769_v1 = vld [vmem:[%s14322_s5 + $0x14c8] sm:$0xff] }
 0x46b   :  { %9414 = vmatprep.subr.bf16.mxu0 %v9413_v42  ;;  %v3687_v42 = vld [vmem:[%s14322_s5 + $0x1238] sm:$0xff] }
 0x46c   :  { %v9479_v55 = vpack.c.bf16 %v3687_v42, %v3686_v59  ;;  %v3751_v59 = vld [vmem:[%s14322_s5 + $0x1438] sm:$0xff]  ;;  %v3768_v42 = vld [vmem:[%s14322_s5 + $0x14c0] sm:$0xff] }
 0x46e   :  { %9416 = vmatpush3.bf16.msra.mxu0 %v9415_v60  ;;  %v3688_v60 = vld [vmem:[%s14322_s5 + $0x1240] sm:$0xff] }
 0x46f   :  { %9418 = vmatprep.subr.bf16.mxu0 %v9417_v7  ;;  %v3689_v7 = vld [vmem:[%s14322_s5 + $0x1248] sm:$0xff] }
 0x470   :  { %v9483_v20 = vpack.c.bf16 %v3689_v7, %v3688_v60  ;;  %v3753_v60 = vld [vmem:[%s14322_s5 + $0x1448] sm:$0xff]  ;;  %v3770_v7 = vld [vmem:[%s14322_s5 + $0x14d0] sm:$0xff] }
 0x472   :  { %9420 = vmatpush3.bf16.msra.mxu0 %v9419_v25  ;;  %v3690_v25 = vld [vmem:[%s14322_s5 + $0x1250] sm:$0xff] }
 0x473   :  { %9422 = vmatprep.subr.bf16.mxu0 %v9421_v10  ;;  %v3691_v10 = vld [vmem:[%s14322_s5 + $0x1258] sm:$0xff] }
 0x474   :  { %v7430_v41 = vpop.f32.mrb[26].mxu0  ;;  %v9487_v29 = vpack.c.bf16 %v3691_v10, %v3690_v25  ;;  %v3755_v25 = vld [vmem:[%s14322_s5 + $0x1458] sm:$0xff]  ;;  %v3772_v10 = vld [vmem:[%s14322_s5 + $0x14e0] sm:$0xff] }
 0x475   :  { %v7431_v14 = vpop.f32.mrb[27].mxu0 }
 0x476   :  { %v7432_v16 = vadd.f32 %v7431_v14, %v7430_v41  ;;  %9424 = vmatpush3.bf16.msra.mxu0 %v9423_v0  ;;  %v3692_v0 = vld [vmem:[%s14322_s5 + $0x1260] sm:$0xff]  ;;  %v3711_v41 = vld [vmem:[%s14322_s5 + $0x12f8] sm:$0xff] }
 0x477   :  { %9426 = vmatprep.subr.bf16.mxu0 %v9425_v37  ;;  %v3693_v37 = vld [vmem:[%s14322_s5 + $0x1268] sm:$0xff] }
 0x478   :  { %v13550_v31 = vadd.f32 %v7432_v16, %v13428_v9  ;;  %v3680_v9 = vld [vmem:[%s14322_s5 + $0x1200] sm:$0xff]  ;;  %v9491_v14 = vpack.c.bf16 %v3693_v37, %v3692_v0  ;;  %v9493_v16 = vpack.c.bf16 %v3711_v41, %v3710_v24  ;;  %v3757_v0 = vld [vmem:[%s14322_s5 + $0x1468] sm:$0xff]  ;;  %v3775_v24 = vld [vmem:[%s14322_s5 + $0x14f8] sm:$0xff] }
 0x479   :  { %v9467_v30 = vpack.c.bf16 %v3681_v23, %v3680_v9  ;;  %v3745_v9 = vld [vmem:[%s14322_s5 + $0x1408] sm:$0xff]  ;;  %v13672_v23 = vld.sshfl [vmem:[#allocation3 + $0x50] sm:$0xff pattern:$0x76325410] }
 0x47a   :  { %9428 = vmatpush3.bf16.msra.mxu0 %v9427_v13  ;;  %v3694_v13 = vld [vmem:[%s14322_s5 + $0x1270] sm:$0xff] }
 0x47b   :  { %v7920_v22 = vpop.f32.mrb[26].mxu1  ;;  %9430 = vmatprep.subr.bf16.mxu0 %v9429_v17  ;;  %v3695_v17 = vld [vmem:[%s14322_s5 + $0x1278] sm:$0xff] }
 0x47c   :  { %v7921_v26 = vpop.f32.mrb[27].mxu1 }
 0x47d   :  { %v13558_v44 = vadd.f32 %v7921_v26, %v7920_v22  ;;  %v9495_v26 = vpack.c.bf16 %v3695_v17, %v3694_v13  ;;  %v3759_v13 = vld [vmem:[%s14322_s5 + $0x1478] sm:$0xff] }
 0x47e   :  { %9432 = vmatpush3.bf16.msra.mxu0 %v9431_v34 }
 0x47f   :  { %9466 = vmatprep.subr.bf16.mxu0 %v9465_v39  ;;  %v9529_v39 = vpack.c.bf16 %v3761_v49, %v3760_v11  ;;  %v3824_v11 = vld [vmem:[%s14322_s5 + $0x1680] sm:$0xff]  ;;  %v3825_v49 = vld [vmem:[%s14322_s5 + $0x1688] sm:$0xff] }
 0x481   :  { %5672 = vmatmul.mubr.f32.vlgmr.msra.gmra.mrb[40].mxu0 %v13456_v12  ;;  %v3703_v12 = vld [vmem:[%s14322_s5 + $0x12b8] sm:$0xff] }
 0x482   :  { %9468 = vmatpush3.bf16.msra.mxu0 %v9467_v30  ;;  %5811 = vmatprep.mubr.f32.mxu0 %v4319_v3  ;;  %v9477_v15 = vpack.c.bf16 %v3703_v12, %v3702_v50  ;;  %v4336_v3 = vcombine.high %v13672_v23, %v13672_v23  ;;  %v3766_v50 = vld [vmem:[%s14322_s5 + $0x14b0] sm:$0xff]  ;;  %v9539_v12 = vpack.c.bf16 %v3749_v57, %v3748_v52  ;;  %v3812_v57 = vld [vmem:[%s14322_s5 + $0x1620] sm:$0xff] }
 0x483   :  { %9470 = vmatprep.subr.bf16.mxu0 %v9469_v33  ;;  %v9533_v33 = vpack.c.bf16 %v3763_v28, %v3762_v48  ;;  %v13778_v48 = vld.sshfl [vmem:[#allocation3 + $0x58] sm:$0xff pattern:$0x76325410]  ;;  %v3826_v28 = vld [vmem:[%s14322_s5 + $0x1690] sm:$0xff] }
 0x486   :  { %9472 = vmatpush3.bf16.msra.mxu0 %v9471_v53  ;;  %v9535_v53 = vpack.c.bf16 %v3747_v36, %v3746_v56  ;;  %v3810_v36 = vld [vmem:[%s14322_s5 + $0x1610] sm:$0xff] }
 0x487   :  { %9474 = vmatprep.subr.bf16.mxu0 %v9473_v54  ;;  %v9537_v54 = vpack.c.bf16 %v3765_v45, %v3764_v61  ;;  %v4353_v61 = vcombine.high %v13778_v48, %v13778_v48  ;;  %v3828_v45 = vld [vmem:[%s14322_s5 + $0x16a0] sm:$0xff] }
 0x48a   :  { %9476 = vmatpush3.bf16.msra.mxu0 %v9475_v43 }
 0x48b   :  { %9478 = vmatprep.subr.bf16.mxu0 %v9477_v15  ;;  %v3750_v15 = vld [vmem:[%s14322_s5 + $0x1430] sm:$0xff] }
 0x48c   :  { %v9543_v5 = vpack.c.bf16 %v3751_v59, %v3750_v15  ;;  %v3814_v15 = vld [vmem:[%s14322_s5 + $0x1630] sm:$0xff]  ;;  %v3815_v59 = vld [vmem:[%s14322_s5 + $0x1638] sm:$0xff] }
 0x48e   :  { %9480 = vmatpush3.bf16.msra.mxu0 %v9479_v55  ;;  %v9545_v55 = vpack.c.bf16 %v3769_v1, %v3768_v42  ;;  %v3832_v42 = vld [vmem:[%s14322_s5 + $0x16c0] sm:$0xff]  ;;  %v3833_v1 = vld [vmem:[%s14322_s5 + $0x16c8] sm:$0xff] }
 0x48f   :  { %9482 = vmatprep.subr.bf16.mxu0 %v9481_v58  ;;  %v3752_v58 = vld [vmem:[%s14322_s5 + $0x1440] sm:$0xff] }
 0x490   :  { %v9547_v27 = vpack.c.bf16 %v3753_v60, %v3752_v58  ;;  %v3816_v58 = vld [vmem:[%s14322_s5 + $0x1640] sm:$0xff]  ;;  %v3817_v60 = vld [vmem:[%s14322_s5 + $0x1648] sm:$0xff] }
 0x492   :  { %9484 = vmatpush3.bf16.msra.mxu0 %v9483_v20  ;;  %v9549_v20 = vpack.c.bf16 %v3771_v18, %v3770_v7  ;;  %v3834_v7 = vld [vmem:[%s14322_s5 + $0x16d0] sm:$0xff]  ;;  %v3835_v18 = vld [vmem:[%s14322_s5 + $0x16d8] sm:$0xff] }
 0x493   :  { %9486 = vmatprep.subr.bf16.mxu0 %v9485_v21  ;;  %v3754_v21 = vld [vmem:[%s14322_s5 + $0x1450] sm:$0xff] }
 0x494   :  { %v7465_v38 = vpop.f32.mrb[28].mxu0  ;;  %v9551_v46 = vpack.c.bf16 %v3755_v25, %v3754_v21  ;;  %v3818_v21 = vld [vmem:[%s14322_s5 + $0x1650] sm:$0xff]  ;;  %v3819_v25 = vld [vmem:[%s14322_s5 + $0x1658] sm:$0xff] }
 0x495   :  { %v7466_v2 = vpop.f32.mrb[29].mxu0 }
 0x496   :  { %v7467_v6 = vadd.f32 %v7466_v2, %v7465_v38  ;;  %9488 = vmatpush3.bf16.msra.mxu0 %v9487_v29  ;;  %v9553_v29 = vpack.c.bf16 %v3773_v63, %v3772_v10  ;;  %v3774_v38 = vld [vmem:[%s14322_s5 + $0x14f0] sm:$0xff]  ;;  %v3836_v10 = vld [vmem:[%s14322_s5 + $0x16e0] sm:$0xff]  ;;  %v3837_v63 = vld [vmem:[%s14322_s5 + $0x16e8] sm:$0xff] }
 0x497   :  { %9490 = vmatprep.subr.bf16.mxu0 %v9489_v35  ;;  %v3756_v35 = vld [vmem:[%s14322_s5 + $0x1460] sm:$0xff] }
 0x498   :  { %v13656_v32 = vadd.f32 %v7467_v6, %v13550_v31  ;;  %v3744_v31 = vld [vmem:[%s14322_s5 + $0x1400] sm:$0xff]  ;;  %v9555_v6 = vpack.c.bf16 %v3757_v0, %v3756_v35  ;;  %v3821_v0 = vld [vmem:[%s14322_s5 + $0x1668] sm:$0xff] }
 0x499   :  { %v9531_v30 = vpack.c.bf16 %v3745_v9, %v3744_v31  ;;  %v9593_v31 = vpack.c.bf16 %v3825_v49, %v3824_v11  ;;  %v3809_v9 = vld [vmem:[%s14322_s5 + $0x1608] sm:$0xff]  ;;  %v3820_v35 = vld [vmem:[%s14322_s5 + $0x1660] sm:$0xff] }
 0x49a   :  { %9492 = vmatpush3.bf16.msra.mxu0 %v9491_v14  ;;  %v9557_v14 = vpack.c.bf16 %v3775_v24, %v3774_v38  ;;  %v3838_v38 = vld [vmem:[%s14322_s5 + $0x16f0] sm:$0xff]  ;;  %v3839_v24 = vld [vmem:[%s14322_s5 + $0x16f8] sm:$0xff]  ;;  %v3888_v49 = vld [vmem:[%s14322_s5 + $0x1880] sm:$0xff] }
 0x49b   :  { %v7990_v19 = vpop.f32.mrb[28].mxu1  ;;  %9494 = vmatprep.subr.bf16.mxu0 %v9493_v16  ;;  %v3758_v16 = vld [vmem:[%s14322_s5 + $0x1470] sm:$0xff] }
 0x49c   :  { %v7991_v22 = vpop.f32.mrb[29].mxu1 }
 0x49d   :  { %v13664_v34 = vadd.f32 %v7991_v22, %v7990_v19 }
 0x49e   :  { %9496 = vmatpush3.bf16.msra.mxu0 %v9495_v26  ;;  %v9559_v26 = vpack.c.bf16 %v3759_v13, %v3758_v16  ;;  %v3822_v16 = vld [vmem:[%s14322_s5 + $0x1670] sm:$0xff]  ;;  %v3823_v13 = vld [vmem:[%s14322_s5 + $0x1678] sm:$0xff] }
 0x49f   :  { %9530 = vmatprep.subr.bf16.mxu0 %v9529_v39 }
 0x4a1   :  { %5812 = vmatmul.mubr.f32.vlgmr.msra.gmra.mrb[42].mxu0 %v13566_v47  ;;  %v3767_v47 = vld [vmem:[%s14322_s5 + $0x14b8] sm:$0xff] }
 0x4a2   :  { %9532 = vmatpush3.bf16.msra.mxu0 %v9531_v30  ;;  %5951 = vmatprep.mubr.f32.mxu0 %v4336_v3  ;;  %v9541_v43 = vpack.c.bf16 %v3767_v47, %v3766_v50  ;;  %v3827_v30 = vld [vmem:[%s14322_s5 + $0x1698] sm:$0xff]  ;;  %v3813_v50 = vld [vmem:[%s14322_s5 + $0x1628] sm:$0xff]  ;;  %v3830_v47 = vld [vmem:[%s14322_s5 + $0x16b0] sm:$0xff] }
 0x4a3   :  { %9534 = vmatprep.subr.bf16.mxu0 %v9533_v33  ;;  %v9597_v56 = vpack.c.bf16 %v3827_v30, %v3826_v28  ;;  %v3811_v3 = vld [vmem:[%s14322_s5 + $0x1618] sm:$0xff]  ;;  %v3873_v30 = vld [vmem:[%s14322_s5 + $0x1808] sm:$0xff] }
 0x4a6   :  { %9536 = vmatpush3.bf16.msra.mxu0 %v9535_v53  ;;  %v3829_v53 = vld [vmem:[%s14322_s5 + $0x16a8] sm:$0xff] }
 0x4a7   :  { %9538 = vmatprep.subr.bf16.mxu0 %v9537_v54  ;;  %v9599_v54 = vpack.c.bf16 %v3811_v3, %v3810_v36  ;;  %v9601_v52 = vpack.c.bf16 %v3829_v53, %v3828_v45  ;;  %v3875_v45 = vld [vmem:[%s14322_s5 + $0x1818] sm:$0xff] }
 0x4aa   :  { %9540 = vmatpush3.bf16.msra.mxu0 %v9539_v12  ;;  %v9603_v12 = vpack.c.bf16 %v3813_v50, %v3812_v57 }
 0x4ab   :  { %9542 = vmatprep.subr.bf16.mxu0 %v9541_v43 }
 0x4ae   :  { %9544 = vmatpush3.bf16.msra.mxu0 %v9543_v5  ;;  %v9607_v5 = vpack.c.bf16 %v3815_v59, %v3814_v15  ;;  %v3878_v59 = vld [vmem:[%s14322_s5 + $0x1830] sm:$0xff] }
 0x4af   :  { %9546 = vmatprep.subr.bf16.mxu0 %v9545_v55  ;;  %v9609_v55 = vpack.c.bf16 %v3833_v1, %v3832_v42  ;;  %v3879_v42 = vld [vmem:[%s14322_s5 + $0x1838] sm:$0xff]  ;;  %v3896_v1 = vld [vmem:[%s14322_s5 + $0x18c0] sm:$0xff] }
 0x4b2   :  { %9548 = vmatpush3.bf16.msra.mxu0 %v9547_v27  ;;  %v9611_v27 = vpack.c.bf16 %v3817_v60, %v3816_v58  ;;  %v3880_v60 = vld [vmem:[%s14322_s5 + $0x1840] sm:$0xff] }
 0x4b3   :  { %9550 = vmatprep.subr.bf16.mxu0 %v9549_v20  ;;  %v9613_v20 = vpack.c.bf16 %v3835_v18, %v3834_v7  ;;  %v3881_v7 = vld [vmem:[%s14322_s5 + $0x1848] sm:$0xff]  ;;  %v3898_v18 = vld [vmem:[%s14322_s5 + $0x18d0] sm:$0xff] }
 0x4b4   :  { %v7500_v37 = vpop.f32.mrb[30].mxu0 }
 0x4b5   :  { %v7501_v41 = vpop.f32.mrb[31].mxu0 }
 0x4b6   :  { %v7502_v2 = vadd.f32 %v7501_v41, %v7500_v37  ;;  %9552 = vmatpush3.bf16.msra.mxu0 %v9551_v46  ;;  %v9615_v46 = vpack.c.bf16 %v3819_v25, %v3818_v21  ;;  %v3882_v25 = vld [vmem:[%s14322_s5 + $0x1850] sm:$0xff] }
 0x4b7   :  { %9554 = vmatprep.subr.bf16.mxu0 %v9553_v29  ;;  %v9617_v29 = vpack.c.bf16 %v3837_v63, %v3836_v10  ;;  %v3883_v10 = vld [vmem:[%s14322_s5 + $0x1858] sm:$0xff]  ;;  %v3900_v63 = vld [vmem:[%s14322_s5 + $0x18e0] sm:$0xff] }
 0x4b8   :  { %v13762_v17 = vadd.f32 %v7502_v2, %v13656_v32  ;;  %v3808_v32 = vld [vmem:[%s14322_s5 + $0x1600] sm:$0xff] }
 0x4b9   :  { %v9595_v33 = vpack.c.bf16 %v3809_v9, %v3808_v32 }
 0x4ba   :  { %9556 = vmatpush3.bf16.msra.mxu0 %v9555_v6  ;;  %v9619_v6 = vpack.c.bf16 %v3821_v0, %v3820_v35  ;;  %v3884_v0 = vld [vmem:[%s14322_s5 + $0x1860] sm:$0xff] }
 0x4bb   :  { %v8060_v19 = vpop.f32.mrb[30].mxu1  ;;  %9558 = vmatprep.subr.bf16.mxu0 %v9557_v14  ;;  %v9621_v14 = vpack.c.bf16 %v3839_v24, %v3838_v38  ;;  %v3902_v24 = vld [vmem:[%s14322_s5 + $0x18f0] sm:$0xff] }
 0x4bc   :  { %v8061_v22 = vpop.f32.mrb[31].mxu1 }
 0x4bd   :  { %v13770_v39 = vadd.f32 %v8061_v22, %v8060_v19  ;;  %v3889_v19 = vld [vmem:[%s14322_s5 + $0x1888] sm:$0xff] }
 0x4be   :  { %9560 = vmatpush3.bf16.msra.mxu0 %v9559_v26  ;;  %v9657_v28 = vpack.c.bf16 %v3889_v19, %v3888_v49  ;;  %v3952_v19 = vld [vmem:[%s14322_s5 + $0x1a80] sm:$0xff] }
 0x4bf   :  { %9594 = vmatprep.subr.bf16.mxu0 %v9593_v31  ;;  %v9623_v31 = vpack.c.bf16 %v3823_v13, %v3822_v16  ;;  %v3886_v13 = vld [vmem:[%s14322_s5 + $0x1870] sm:$0xff] }
 0x4c1   :  { %5952 = vmatmul.mubr.f32.vlgmr.msra.gmra.mrb[44].mxu0 %v13672_v23  ;;  %v3831_v23 = vld [vmem:[%s14322_s5 + $0x16b8] sm:$0xff] }
 0x4c2   :  { %9596 = vmatpush3.bf16.msra.mxu0 %v9595_v33  ;;  %6091 = vmatprep.mubr.f32.mxu0 %v4353_v61  ;;  %v9605_v43 = vpack.c.bf16 %v3831_v23, %v3830_v47  ;;  %v13885_v33 = vld.sshfl [vmem:[#allocation3 + $0x60] sm:$0xff pattern:$0x76325410]  ;;  %v3874_v61 = vld [vmem:[%s14322_s5 + $0x1810] sm:$0xff]  ;;  %v3877_v23 = vld [vmem:[%s14322_s5 + $0x1828] sm:$0xff] }
 0x4c3   :  { %9598 = vmatprep.subr.bf16.mxu0 %v9597_v56  ;;  %v3890_v56 = vld [vmem:[%s14322_s5 + $0x1890] sm:$0xff]  ;;  %v4370_v53 = vcombine.high %v13885_v33, %v13885_v33  ;;  %v9663_v57 = vpack.c.bf16 %v3875_v45, %v3874_v61  ;;  %v3876_v47 = vld [vmem:[%s14322_s5 + $0x1820] sm:$0xff] }
 0x4c6   :  { %9600 = vmatpush3.bf16.msra.mxu0 %v9599_v54  ;;  %v3892_v54 = vld [vmem:[%s14322_s5 + $0x18a0] sm:$0xff] }
 0x4c7   :  { %9602 = vmatprep.subr.bf16.mxu0 %v9601_v52  ;;  %v3893_v52 = vld [vmem:[%s14322_s5 + $0x18a8] sm:$0xff] }
 0x4c8   :  { %v9665_v50 = vpack.c.bf16 %v3893_v52, %v3892_v54  ;;  %v3939_v54 = vld [vmem:[%s14322_s5 + $0x1a18] sm:$0xff] }
 0x4ca   :  { %9604 = vmatpush3.bf16.msra.mxu0 %v9603_v12  ;;  %v3894_v12 = vld [vmem:[%s14322_s5 + $0x18b0] sm:$0xff] }
 0x4cb   :  { %9606 = vmatprep.subr.bf16.mxu0 %v9605_v43  ;;  %v9667_v43 = vpack.c.bf16 %v3877_v23, %v3876_v47 }
 0x4ce   :  { %9608 = vmatpush3.bf16.msra.mxu0 %v9607_v5  ;;  %v3897_v5 = vld [vmem:[%s14322_s5 + $0x18c8] sm:$0xff] }
 0x4cf   :  { %9610 = vmatprep.subr.bf16.mxu0 %v9609_v55  ;;  %v9671_v55 = vpack.c.bf16 %v3879_v42, %v3878_v59  ;;  %v9673_v58 = vpack.c.bf16 %v3897_v5, %v3896_v1  ;;  %v3942_v42 = vld [vmem:[%s14322_s5 + $0x1a30] sm:$0xff]  ;;  %v3943_v1 = vld [vmem:[%s14322_s5 + $0x1a38] sm:$0xff]  ;;  %v3960_v5 = vld [vmem:[%s14322_s5 + $0x1ac0] sm:$0xff] }
 0x4d2   :  { %9612 = vmatpush3.bf16.msra.mxu0 %v9611_v27  ;;  %v3899_v27 = vld [vmem:[%s14322_s5 + $0x18d8] sm:$0xff] }
 0x4d3   :  { %9614 = vmatprep.subr.bf16.mxu0 %v9613_v20  ;;  %v9675_v20 = vpack.c.bf16 %v3881_v7, %v3880_v60  ;;  %v9677_v21 = vpack.c.bf16 %v3899_v27, %v3898_v18  ;;  %v3944_v7 = vld [vmem:[%s14322_s5 + $0x1a40] sm:$0xff]  ;;  %v3945_v18 = vld [vmem:[%s14322_s5 + $0x1a48] sm:$0xff]  ;;  %v3962_v27 = vld [vmem:[%s14322_s5 + $0x1ad0] sm:$0xff] }
 0x4d4   :  { %v7535_v37 = vpop.f32.mrb[32].mxu0 }
 0x4d5   :  { %v7536_v41 = vpop.f32.mrb[33].mxu0 }
 0x4d6   :  { %v7537_v2 = vadd.f32 %v7536_v41, %v7535_v37  ;;  %9616 = vmatpush3.bf16.msra.mxu0 %v9615_v46  ;;  %v3901_v46 = vld [vmem:[%s14322_s5 + $0x18e8] sm:$0xff]  ;;  %v3903_v41 = vld [vmem:[%s14322_s5 + $0x18f8] sm:$0xff] }
 0x4d7   :  { %9618 = vmatprep.subr.bf16.mxu0 %v9617_v29  ;;  %v9679_v29 = vpack.c.bf16 %v3883_v10, %v3882_v25  ;;  %v9681_v35 = vpack.c.bf16 %v3901_v46, %v3900_v63  ;;  %v3885_v37 = vld [vmem:[%s14322_s5 + $0x1868] sm:$0xff]  ;;  %v9685_v16 = vpack.c.bf16 %v3903_v41, %v3902_v24  ;;  %v3946_v10 = vld [vmem:[%s14322_s5 + $0x1a50] sm:$0xff]  ;;  %v3947_v63 = vld [vmem:[%s14322_s5 + $0x1a58] sm:$0xff] }
 0x4d8   :  { %v5114_v11 = vadd.f32 %v7537_v2, %v13762_v17  ;;  %v3872_v17 = vld [vmem:[%s14322_s5 + $0x1800] sm:$0xff]  ;;  %v3966_v41 = vld [vmem:[%s14322_s5 + $0x1af0] sm:$0xff] }
 0x4d9   :  { %v9659_v36 = vpack.c.bf16 %v3873_v30, %v3872_v17  ;;  %v3964_v46 = vld [vmem:[%s14322_s5 + $0x1ae0] sm:$0xff] }
 0x4da   :  { %9620 = vmatpush3.bf16.msra.mxu0 %v9619_v6  ;;  %v13875_v32 = vadd.f32 %v12610_v8, %v5114_v11  ;;  %v3891_v8 = vld [vmem:[%s14322_s5 + $0x1898] sm:$0xff] }
 0x4db   :  { %v8130_v22 = vpop.f32.mrb[32].mxu1  ;;  %9622 = vmatprep.subr.bf16.mxu0 %v9621_v14  ;;  %v9661_v3 = vpack.c.bf16 %v3891_v8, %v3890_v56  ;;  %v9683_v14 = vpack.c.bf16 %v3885_v37, %v3884_v0  ;;  %v3887_v11 = vld [vmem:[%s14322_s5 + $0x1878] sm:$0xff]  ;;  %v3937_v8 = vld [vmem:[%s14322_s5 + $0x1a08] sm:$0xff]  ;;  %v3948_v37 = vld [vmem:[%s14322_s5 + $0x1a60] sm:$0xff] }
 0x4dc   :  { %v8131_v26 = vpop.f32.mrb[33].mxu1 }
 0x4dd   :  { %v13877_v9 = vadd.f32 %v8131_v26, %v8130_v22  ;;  %v3953_v22 = vld [vmem:[%s14322_s5 + $0x1a88] sm:$0xff] }
 0x4de   :  { %9624 = vmatpush3.bf16.msra.mxu0 %v9623_v31  ;;  %v9721_v56 = vpack.c.bf16 %v3953_v22, %v3952_v19  ;;  %v4016_v22 = vld [vmem:[%s14322_s5 + $0x1c80] sm:$0xff] }
 0x4df   :  { %9658 = vmatprep.subr.bf16.mxu0 %v9657_v28  ;;  %v9687_v28 = vpack.c.bf16 %v3887_v11, %v3886_v13  ;;  %v3950_v11 = vld [vmem:[%s14322_s5 + $0x1a70] sm:$0xff] }
 0x4e1   :  { %6092 = vmatmul.mubr.f32.vlgmr.msra.gmra.mrb[46].mxu0 %v13778_v48  ;;  %v3895_v48 = vld [vmem:[%s14322_s5 + $0x18b8] sm:$0xff] }
 0x4e2   :  { %9660 = vmatpush3.bf16.msra.mxu0 %v9659_v36  ;;  %6231 = vmatprep.mubr.f32.mxu0 %v4370_v53  ;;  %v9669_v15 = vpack.c.bf16 %v3895_v48, %v3894_v12  ;;  %v13992_v36 = vld.sshfl [vmem:[#allocation3 + $0x68] sm:$0xff pattern:$0x76325410]  ;;  %v3938_v53 = vld [vmem:[%s14322_s5 + $0x1a10] sm:$0xff]  ;;  %v3940_v12 = vld [vmem:[%s14322_s5 + $0x1a20] sm:$0xff] }
 0x4e3   :  { %9662 = vmatprep.subr.bf16.mxu0 %v9661_v3  ;;  %v3954_v3 = vld [vmem:[%s14322_s5 + $0x1a90] sm:$0xff]  ;;  %v4387_v52 = vcombine.high %v13992_v36, %v13992_v36  ;;  %v9727_v47 = vpack.c.bf16 %v3939_v54, %v3938_v53  ;;  %v3941_v48 = vld [vmem:[%s14322_s5 + $0x1a28] sm:$0xff] }
 0x4e6   :  { %9664 = vmatpush3.bf16.msra.mxu0 %v9663_v57  ;;  %v3956_v57 = vld [vmem:[%s14322_s5 + $0x1aa0] sm:$0xff] }
 0x4e7   :  { %9666 = vmatprep.subr.bf16.mxu0 %v9665_v50  ;;  %v3957_v50 = vld [vmem:[%s14322_s5 + $0x1aa8] sm:$0xff] }
 0x4e8   :  { %v9729_v23 = vpack.c.bf16 %v3957_v50, %v3956_v57  ;;  %v4003_v57 = vld [vmem:[%s14322_s5 + $0x1c18] sm:$0xff] }
 0x4ea   :  { %9668 = vmatpush3.bf16.msra.mxu0 %v9667_v43  ;;  %v3958_v43 = vld [vmem:[%s14322_s5 + $0x1ab0] sm:$0xff] }
 0x4eb   :  { %9670 = vmatprep.subr.bf16.mxu0 %v9669_v15  ;;  %v9731_v15 = vpack.c.bf16 %v3941_v48, %v3940_v12 }
 0x4ee   :  { %9672 = vmatpush3.bf16.msra.mxu0 %v9671_v55  ;;  %v3961_v55 = vld [vmem:[%s14322_s5 + $0x1ac8] sm:$0xff] }
 0x4ef   :  { %9674 = vmatprep.subr.bf16.mxu0 %v9673_v58  ;;  %v9735_v58 = vpack.c.bf16 %v3943_v1, %v3942_v42  ;;  %v9737_v60 = vpack.c.bf16 %v3961_v55, %v3960_v5  ;;  %v4006_v1 = vld [vmem:[%s14322_s5 + $0x1c30] sm:$0xff]  ;;  %v4007_v5 = vld [vmem:[%s14322_s5 + $0x1c38] sm:$0xff]  ;;  %v4024_v55 = vld [vmem:[%s14322_s5 + $0x1cc0] sm:$0xff] }
 0x4f2   :  { %9676 = vmatpush3.bf16.msra.mxu0 %v9675_v20  ;;  %v3963_v20 = vld [vmem:[%s14322_s5 + $0x1ad8] sm:$0xff] }
 0x4f3   :  { %9678 = vmatprep.subr.bf16.mxu0 %v9677_v21  ;;  %v9739_v21 = vpack.c.bf16 %v3945_v18, %v3944_v7  ;;  %v9741_v25 = vpack.c.bf16 %v3963_v20, %v3962_v27  ;;  %v4008_v18 = vld [vmem:[%s14322_s5 + $0x1c40] sm:$0xff]  ;;  %v4009_v27 = vld [vmem:[%s14322_s5 + $0x1c48] sm:$0xff]  ;;  %v4026_v20 = vld [vmem:[%s14322_s5 + $0x1cd0] sm:$0xff] }
 0x4f4   :  { %v7605_v38 = vpop.f32.mrb[34].mxu0 }
 0x4f5   :  { %v7606_v2 = vpop.f32.mrb[35].mxu0 }
 0x4f6   :  { %v7607_v6 = vadd.f32 %v7606_v2, %v7605_v38  ;;  %9680 = vmatpush3.bf16.msra.mxu0 %v9679_v29  ;;  %v3965_v29 = vld [vmem:[%s14322_s5 + $0x1ae8] sm:$0xff]  ;;  %v3967_v2 = vld [vmem:[%s14322_s5 + $0x1af8] sm:$0xff] }
 0x4f7   :  { %9682 = vmatprep.subr.bf16.mxu0 %v9681_v35  ;;  %v9743_v35 = vpack.c.bf16 %v3947_v63, %v3946_v10  ;;  %v9745_v0 = vpack.c.bf16 %v3965_v29, %v3964_v46  ;;  %v3949_v38 = vld [vmem:[%s14322_s5 + $0x1a68] sm:$0xff]  ;;  %v9749_v13 = vpack.c.bf16 %v3967_v2, %v3966_v41  ;;  %v4010_v63 = vld [vmem:[%s14322_s5 + $0x1c50] sm:$0xff]  ;;  %v4011_v46 = vld [vmem:[%s14322_s5 + $0x1c58] sm:$0xff] }
 0x4f8   :  { %v5254_v49 = vadd.f32 %v7607_v6, %v13875_v32  ;;  %v3936_v32 = vld [vmem:[%s14322_s5 + $0x1a00] sm:$0xff]  ;;  %v4030_v2 = vld [vmem:[%s14322_s5 + $0x1cf0] sm:$0xff] }
 0x4f9   :  { %v9723_v61 = vpack.c.bf16 %v3937_v8, %v3936_v32  ;;  %v4028_v29 = vld [vmem:[%s14322_s5 + $0x1ce0] sm:$0xff] }
 0x4fa   :  { %9684 = vmatpush3.bf16.msra.mxu0 %v9683_v14  ;;  %v13982_v17 = vadd.f32 %v12821_v62, %v5254_v49  ;;  %v3955_v62 = vld [vmem:[%s14322_s5 + $0x1a98] sm:$0xff] }
 0x4fb   :  { %v8200_v26 = vpop.f32.mrb[34].mxu1  ;;  %9686 = vmatprep.subr.bf16.mxu0 %v9685_v16  ;;  %v9725_v45 = vpack.c.bf16 %v3955_v62, %v3954_v3  ;;  %v9747_v16 = vpack.c.bf16 %v3949_v38, %v3948_v37  ;;  %v3951_v49 = vld [vmem:[%s14322_s5 + $0x1a78] sm:$0xff]  ;;  %v4001_v62 = vld [vmem:[%s14322_s5 + $0x1c08] sm:$0xff]  ;;  %v4012_v38 = vld [vmem:[%s14322_s5 + $0x1c60] sm:$0xff] }
 0x4fc   :  { %v8201_v31 = vpop.f32.mrb[35].mxu1 }
 0x4fd   :  { %v13984_v30 = vadd.f32 %v8201_v31, %v8200_v26  ;;  %v4017_v26 = vld [vmem:[%s14322_s5 + $0x1c88] sm:$0xff] }
 0x4fe   :  { %9688 = vmatpush3.bf16.msra.mxu0 %v9687_v28  ;;  %v9785_v3 = vpack.c.bf16 %v4017_v26, %v4016_v22  ;;  %v4080_v26 = vld [vmem:[%s14322_s5 + $0x1e80] sm:$0xff] }
 0x4ff   :  { %9722 = vmatprep.subr.bf16.mxu0 %v9721_v56  ;;  %v9751_v56 = vpack.c.bf16 %v3951_v49, %v3950_v11  ;;  %v4014_v49 = vld [vmem:[%s14322_s5 + $0x1c70] sm:$0xff] }
 0x501   :  { %6232 = vmatmul.mubr.f32.vlgmr.msra.gmra.mrb[48].mxu0 %v13885_v33  ;;  %v3959_v33 = vld [vmem:[%s14322_s5 + $0x1ab8] sm:$0xff] }
 0x502   :  { %9724 = vmatpush3.bf16.msra.mxu0 %v9723_v61  ;;  %6371 = vmatprep.mubr.f32.mxu0 %v4387_v52  ;;  %v9733_v59 = vpack.c.bf16 %v3959_v33, %v3958_v43  ;;  %v14099_v61 = vld.sshfl [vmem:[#allocation3 + $0x70] sm:$0xff pattern:$0x76325410]  ;;  %v4004_v43 = vld [vmem:[%s14322_s5 + $0x1c20] sm:$0xff]  ;;  %v4005_v33 = vld [vmem:[%s14322_s5 + $0x1c28] sm:$0xff] }
 0x503   :  { %9726 = vmatprep.subr.bf16.mxu0 %v9725_v45  ;;  %v4018_v45 = vld [vmem:[%s14322_s5 + $0x1c90] sm:$0xff]  ;;  %v4404_v50 = vcombine.high %v14099_v61, %v14099_v61 }
 0x504   :  { %v4002_v52 = vld [vmem:[%s14322_s5 + $0x1c10] sm:$0xff] }
 0x505   :  { %v9791_v12 = vpack.c.bf16 %v4003_v57, %v4002_v52 }
 0x506   :  { %9728 = vmatpush3.bf16.msra.mxu0 %v9727_v47  ;;  %v4020_v47 = vld [vmem:[%s14322_s5 + $0x1ca0] sm:$0xff] }
 0x507   :  { %9730 = vmatprep.subr.bf16.mxu0 %v9729_v23  ;;  %v4021_v23 = vld [vmem:[%s14322_s5 + $0x1ca8] sm:$0xff] }
 0x508   :  { %v9793_v48 = vpack.c.bf16 %v4021_v23, %v4020_v47  ;;  %v4067_v47 = vld [vmem:[%s14322_s5 + $0x1e18] sm:$0xff] }
 0x50a   :  { %9732 = vmatpush3.bf16.msra.mxu0 %v9731_v15  ;;  %v4022_v15 = vld [vmem:[%s14322_s5 + $0x1cb0] sm:$0xff] }
 0x50b   :  { %9734 = vmatprep.subr.bf16.mxu0 %v9733_v59  ;;  %v9795_v59 = vpack.c.bf16 %v4005_v33, %v4004_v43 }
 0x50e   :  { %9736 = vmatpush3.bf16.msra.mxu0 %v9735_v58  ;;  %v4025_v58 = vld [vmem:[%s14322_s5 + $0x1cc8] sm:$0xff] }
 0x50f   :  { %9738 = vmatprep.subr.bf16.mxu0 %v9737_v60  ;;  %v9799_v60 = vpack.c.bf16 %v4007_v5, %v4006_v1  ;;  %v9801_v7 = vpack.c.bf16 %v4025_v58, %v4024_v55  ;;  %v4070_v5 = vld [vmem:[%s14322_s5 + $0x1e30] sm:$0xff]  ;;  %v4071_v55 = vld [vmem:[%s14322_s5 + $0x1e38] sm:$0xff]  ;;  %v4088_v58 = vld [vmem:[%s14322_s5 + $0x1ec0] sm:$0xff] }
 0x512   :  { %9740 = vmatpush3.bf16.msra.mxu0 %v9739_v21  ;;  %v4027_v21 = vld [vmem:[%s14322_s5 + $0x1cd8] sm:$0xff] }
 0x513   :  { %9742 = vmatprep.subr.bf16.mxu0 %v9741_v25  ;;  %v9803_v25 = vpack.c.bf16 %v4009_v27, %v4008_v18  ;;  %v9805_v10 = vpack.c.bf16 %v4027_v21, %v4026_v20  ;;  %v4072_v27 = vld [vmem:[%s14322_s5 + $0x1e40] sm:$0xff]  ;;  %v4073_v20 = vld [vmem:[%s14322_s5 + $0x1e48] sm:$0xff]  ;;  %v4090_v21 = vld [vmem:[%s14322_s5 + $0x1ed0] sm:$0xff] }
 0x514   :  { %v7675_v24 = vpop.f32.mrb[36].mxu0 }
 0x515   :  { %v7676_v6 = vpop.f32.mrb[37].mxu0 }
 0x516   :  { %v7677_v14 = vadd.f32 %v7676_v6, %v7675_v24  ;;  %9744 = vmatpush3.bf16.msra.mxu0 %v9743_v35  ;;  %v4029_v35 = vld [vmem:[%s14322_s5 + $0x1ce8] sm:$0xff]  ;;  %v4031_v6 = vld [vmem:[%s14322_s5 + $0x1cf8] sm:$0xff] }
 0x517   :  { %9746 = vmatprep.subr.bf16.mxu0 %v9745_v0  ;;  %v9807_v0 = vpack.c.bf16 %v4011_v46, %v4010_v63  ;;  %v9809_v37 = vpack.c.bf16 %v4029_v35, %v4028_v29  ;;  %v4013_v24 = vld [vmem:[%s14322_s5 + $0x1c68] sm:$0xff]  ;;  %v9813_v11 = vpack.c.bf16 %v4031_v6, %v4030_v2  ;;  %v4074_v46 = vld [vmem:[%s14322_s5 + $0x1e50] sm:$0xff]  ;;  %v4075_v29 = vld [vmem:[%s14322_s5 + $0x1e58] sm:$0xff] }
 0x518   :  { %v5394_v19 = vadd.f32 %v7677_v14, %v13982_v17  ;;  %v4000_v17 = vld [vmem:[%s14322_s5 + $0x1c00] sm:$0xff]  ;;  %v4094_v6 = vld [vmem:[%s14322_s5 + $0x1ef0] sm:$0xff] }
 0x519   :  { %v9787_v53 = vpack.c.bf16 %v4001_v62, %v4000_v17  ;;  %v4092_v35 = vld [vmem:[%s14322_s5 + $0x1ee0] sm:$0xff] }
 0x51a   :  { %9748 = vmatpush3.bf16.msra.mxu0 %v9747_v16  ;;  %v14089_v32 = vadd.f32 %v13029_v40, %v5394_v19  ;;  %v4019_v40 = vld [vmem:[%s14322_s5 + $0x1c98] sm:$0xff] }
 0x51b   :  { %v8270_v31 = vpop.f32.mrb[36].mxu1  ;;  %9750 = vmatprep.subr.bf16.mxu0 %v9749_v13  ;;  %v9789_v54 = vpack.c.bf16 %v4019_v40, %v4018_v45  ;;  %v9811_v13 = vpack.c.bf16 %v4013_v24, %v4012_v38  ;;  %v4015_v19 = vld [vmem:[%s14322_s5 + $0x1c78] sm:$0xff]  ;;  %v4065_v40 = vld [vmem:[%s14322_s5 + $0x1e08] sm:$0xff]  ;;  %v4076_v24 = vld [vmem:[%s14322_s5 + $0x1e60] sm:$0xff] }
 0x51c   :  { %v8271_v28 = vpop.f32.mrb[37].mxu1 }
 0x51d   :  { %v14091_v8 = vadd.f32 %v8271_v28, %v8270_v31  ;;  %v4081_v31 = vld [vmem:[%s14322_s5 + $0x1e88] sm:$0xff] }
 0x51e   :  { %9752 = vmatpush3.bf16.msra.mxu0 %v9751_v56  ;;  %v9849_v45 = vpack.c.bf16 %v4081_v31, %v4080_v26 }
 0x51f   :  { %9786 = vmatprep.subr.bf16.mxu0 %v9785_v3  ;;  %v9815_v3 = vpack.c.bf16 %v4015_v19, %v4014_v49  ;;  %v4078_v19 = vld [vmem:[%s14322_s5 + $0x1e70] sm:$0xff] }
 0x521   :  { %6372 = vmatmul.mubr.f32.vlgmr.msra.gmra.mrb[50].mxu0 %v13992_v36  ;;  %v4023_v36 = vld [vmem:[%s14322_s5 + $0x1cb8] sm:$0xff] }
 0x522   :  { %9788 = vmatpush3.bf16.msra.mxu0 %v9787_v53  ;;  %6511 = vmatprep.mubr.f32.mxu0 %v4404_v50  ;;  %v9797_v42 = vpack.c.bf16 %v4023_v36, %v4022_v15  ;;  %v14206_v53 = vld.sshfl [vmem:[#allocation3 + $0x78] sm:$0xff pattern:$0x76325410]  ;;  %v4066_v50 = vld [vmem:[%s14322_s5 + $0x1e10] sm:$0xff]  ;;  %v4068_v15 = vld [vmem:[%s14322_s5 + $0x1e20] sm:$0xff] }
 0x523   :  { %9790 = vmatprep.subr.bf16.mxu0 %v9789_v54  ;;  %v4082_v54 = vld [vmem:[%s14322_s5 + $0x1e90] sm:$0xff]  ;;  %v4421_v23 = vcombine.high %v14206_v53, %v14206_v53  ;;  %v9855_v43 = vpack.c.bf16 %v4067_v47, %v4066_v50  ;;  %v4069_v36 = vld [vmem:[%s14322_s5 + $0x1e28] sm:$0xff] }
 0x526   :  { %9792 = vmatpush3.bf16.msra.mxu0 %v9791_v12  ;;  %v4084_v12 = vld [vmem:[%s14322_s5 + $0x1ea0] sm:$0xff] }
 0x527   :  { %9794 = vmatprep.subr.bf16.mxu0 %v9793_v48  ;;  %v4085_v48 = vld [vmem:[%s14322_s5 + $0x1ea8] sm:$0xff] }
 0x528   :  { %v9857_v33 = vpack.c.bf16 %v4085_v48, %v4084_v12 }
 0x52a   :  { %9796 = vmatpush3.bf16.msra.mxu0 %v9795_v59  ;;  %v4086_v59 = vld [vmem:[%s14322_s5 + $0x1eb0] sm:$0xff] }
 0x52b   :  { %9798 = vmatprep.subr.bf16.mxu0 %v9797_v42  ;;  %v9859_v42 = vpack.c.bf16 %v4069_v36, %v4068_v15 }
 0x52e   :  { %9800 = vmatpush3.bf16.msra.mxu0 %v9799_v60  ;;  %v4089_v60 = vld [vmem:[%s14322_s5 + $0x1ec8] sm:$0xff] }
 0x52f   :  { %9802 = vmatprep.subr.bf16.mxu0 %v9801_v7  ;;  %v9863_v7 = vpack.c.bf16 %v4071_v55, %v4070_v5  ;;  %v9865_v18 = vpack.c.bf16 %v4089_v60, %v4088_v58 }
 0x532   :  { %9804 = vmatpush3.bf16.msra.mxu0 %v9803_v25  ;;  %v4091_v25 = vld [vmem:[%s14322_s5 + $0x1ed8] sm:$0xff] }
 0x533   :  { %9806 = vmatprep.subr.bf16.mxu0 %v9805_v10  ;;  %v9867_v10 = vpack.c.bf16 %v4073_v20, %v4072_v27  ;;  %v9869_v63 = vpack.c.bf16 %v4091_v25, %v4090_v21 }
 0x534   :  { %v7745_v41 = vpop.f32.mrb[38].mxu0 }
 0x535   :  { %v7746_v14 = vpop.f32.mrb[39].mxu0 }
 0x536   :  { %v7747_v16 = vadd.f32 %v7746_v14, %v7745_v41  ;;  %9808 = vmatpush3.bf16.msra.mxu0 %v9807_v0  ;;  %v4093_v0 = vld [vmem:[%s14322_s5 + $0x1ee8] sm:$0xff]  ;;  %v4095_v14 = vld [vmem:[%s14322_s5 + $0x1ef8] sm:$0xff] }
 0x537   :  { %9810 = vmatprep.subr.bf16.mxu0 %v9809_v37  ;;  %v9871_v37 = vpack.c.bf16 %v4075_v29, %v4074_v46  ;;  %v9873_v38 = vpack.c.bf16 %v4093_v0, %v4092_v35  ;;  %v4077_v41 = vld [vmem:[%s14322_s5 + $0x1e68] sm:$0xff]  ;;  %v9877_v49 = vpack.c.bf16 %v4095_v14, %v4094_v6 }
 0x538   :  { %v5534_v22 = vadd.f32 %v7747_v16, %v14089_v32  ;;  %v4064_v32 = vld [vmem:[%s14322_s5 + $0x1e00] sm:$0xff] }
 0x539   :  { %v9851_v52 = vpack.c.bf16 %v4065_v40, %v4064_v32 }
 0x53a   :  { %9812 = vmatpush3.bf16.msra.mxu0 %v9811_v13  ;;  %v14196_v17 = vadd.f32 %v13237_v51, %v5534_v22  ;;  %v4083_v51 = vld [vmem:[%s14322_s5 + $0x1e98] sm:$0xff] }
 0x53b   :  { %v8340_v28 = vpop.f32.mrb[38].mxu1  ;;  %9814 = vmatprep.subr.bf16.mxu0 %v9813_v11  ;;  %v9853_v57 = vpack.c.bf16 %v4083_v51, %v4082_v54  ;;  %v9875_v11 = vpack.c.bf16 %v4077_v41, %v4076_v24  ;;  %v4079_v22 = vld [vmem:[%s14322_s5 + $0x1e78] sm:$0xff] }
 0x53c   :  { %v8341_v56 = vpop.f32.mrb[39].mxu1  ;;  %v9879_v31 = vpack.c.bf16 %v4079_v22, %v4078_v19 }
 0x53d   :  { %v14198_v62 = vadd.f32 %v8341_v56, %v8340_v28 }
 0x53e   :  { %9816 = vmatpush3.bf16.msra.mxu0 %v9815_v3 }
 0x53f   :  { %9850 = vmatprep.subr.bf16.mxu0 %v9849_v45 }
 0x541   :  { %6512 = vmatmul.mubr.f32.vlgmr.msra.gmra.mrb[52].mxu0 %v14099_v61  ;;  %v4087_v61 = vld [vmem:[%s14322_s5 + $0x1eb8] sm:$0xff]  ;;  %s10112_s5 = smov [#allocation4]  }
 0x542   :  { %9852 = vmatpush3.bf16.msra.mxu0 %v9851_v52  ;;  %6651 = vmatprep.mubr.f32.mxu0 %v4421_v23  ;;  %v9861_v1 = vpack.c.bf16 %v4087_v61, %v4086_v59  ;;  %s6735_s14 = sshll.u32 %s10112_s5, 4  ;;  %s6736_s14 = int_to_ptr.vmem [resolvable:$true] %s6735_s14 }
 0x543   :  { %9854 = vmatprep.subr.bf16.mxu0 %v9853_v57  ;;  %s10085_s1 = scalar_lea.vmem %s6736_s14, 32  ;;  %p10090_p1 = scmp.lt.s32.totalorder %s6736_s14, %s6736_s14 }
 0x544   :  { %p10086_p0 = scmp.ne.s32.totalorder %s6736_s14, %s10085_s1  ;;  %p10091_p2 = scmp.lt.s32.totalorder %s10085_s1, %s10085_s1 }
 0x546   :  { %9856 = vmatpush3.bf16.msra.mxu0 %v9855_v43  ;;  %p10092_p3 = por %p10091_p2, %p10090_p1 }
 0x547   :  { %9858 = vmatprep.subr.bf16.mxu0 %v9857_v33 }
 0x548   :  { %p10093_p4 = pnand %p10092_p3, %p10086_p0 }
 0x54a   :  { %9860 = vmatpush3.bf16.msra.mxu0 %v9859_v42 }
 0x54b   :  { %9862 = vmatprep.subr.bf16.mxu0 %v9861_v1 }
 0x54e   :  { %9864 = vmatpush3.bf16.msra.mxu0 %v9863_v7 }
 0x54f   :  { %9866 = vmatprep.subr.bf16.mxu0 %v9865_v18 }
 0x552   :  { %9868 = vmatpush3.bf16.msra.mxu0 %v9867_v10 }
 0x553   :  { %9870 = vmatprep.subr.bf16.mxu0 %v9869_v63 }
 0x554   :  { %v7815_v2 = vpop.f32.mrb[40].mxu0 }
 0x555   :  { %v7816_v16 = vpop.f32.mrb[41].mxu0 }
 0x556   :  { %v7817_v13 = vadd.f32 %v7816_v16, %v7815_v2  ;;  %9872 = vmatpush3.bf16.msra.mxu0 %v9871_v37 }
 0x557   :  { %9874 = vmatprep.subr.bf16.mxu0 %v9873_v38 }
 0x558   :  { %v5674_v26 = vadd.f32 %v7817_v13, %v14196_v17 }
 0x55a   :  { %9876 = vmatpush3.bf16.msra.mxu0 %v9875_v11  ;;  %v5744_v28 = vadd.f32 %v13445_v4, %v5674_v26 }
 0x55b   :  { %9878 = vmatprep.subr.bf16.mxu0 %v9877_v49 }
 0x55e   :  { %9880 = vmatpush3.bf16.msra.mxu0 %v9879_v31 }
 0x561   :  { %6652 = vmatmul.mubr.f32.vlgmr.msra.gmra.mrb[54].mxu0 %v14206_v53 }
 0x574   :  { %v7885_v56 = vpop.f32.mrb[42].mxu0 }
 0x575   :  { %v7886_v3 = vpop.f32.mrb[43].mxu0 }
 0x576   :  { %v7887_v45 = vadd.f32 %v7886_v3, %v7885_v56 }
 0x578   :  { %v5814_v32 = vadd.f32 %v7887_v45, %v5744_v28 }
 0x57a   :  { %v5884_v40 = vadd.f32 %v13558_v44, %v5814_v32 }
 0x594   :  { %v7955_v54 = vpop.f32.mrb[44].mxu0 }
 0x595   :  { %v7956_v51 = vpop.f32.mrb[45].mxu0 }
 0x596   :  { %v7957_v52 = vadd.f32 %v7956_v51, %v7955_v54 }
 0x598   :  { %v5954_v57 = vadd.f32 %v7957_v52, %v5884_v40 }
 0x59a   :  { %v6024_v17 = vadd.f32 %v13664_v34, %v5954_v57 }
 0x5b4   :  { %v8025_v50 = vpop.f32.mrb[46].mxu0 }
 0x5b5   :  { %v8026_v47 = vpop.f32.mrb[47].mxu0 }
 0x5b6   :  { %v8027_v23 = vadd.f32 %v8026_v47, %v8025_v50 }
 0x5b8   :  { %v6094_v4 = vadd.f32 %v8027_v23, %v6024_v17 }
 0x5ba   :  { %v6164_v12 = vadd.f32 %v13770_v39, %v6094_v4 }
 0x5d4   :  { %v8095_v48 = vpop.f32.mrb[48].mxu0 }
 0x5d5   :  { %v8096_v53 = vpop.f32.mrb[49].mxu0 }
 0x5d6   :  { %v8097_v43 = vadd.f32 %v8096_v53, %v8095_v48 }
 0x5d8   :  { %v6234_v33 = vadd.f32 %v8097_v43, %v6164_v12 }
 0x5da   :  { %v6304_v15 = vadd.f32 %v13877_v9, %v6234_v33 }
 0x5f4   :  { %v8165_v36 = vpop.f32.mrb[50].mxu0 }
 0x5f5   :  { %v8166_v44 = vpop.f32.mrb[51].mxu0 }
 0x5f6   :  { %v8167_v59 = vadd.f32 %v8166_v44, %v8165_v36 }
 0x5f8   :  { %v6374_v61 = vadd.f32 %v8167_v59, %v6304_v15 }
 0x5fa   :  { %v6444_v42 = vadd.f32 %v13984_v30, %v6374_v61 }
 0x614   :  { %v8235_v1 = vpop.f32.mrb[52].mxu0 }
 0x615   :  { %v8236_v34 = vpop.f32.mrb[53].mxu0 }
 0x616   :  { %v8237_v5 = vadd.f32 %v8236_v34, %v8235_v1 }
 0x618   :  { %v6514_v55 = vadd.f32 %v8237_v5, %v6444_v42 }
 0x61a   :  { %v6584_v58 = vadd.f32 %v14091_v8, %v6514_v55 }
 0x634   :  { %v8305_v60 = vpop.f32.mrb[54].mxu0 }
 0x635   :  { %v8306_v39 = vpop.f32.mrb[55].mxu0 }
 0x636   :  { %v8307_v7 = vadd.f32 %v8306_v39, %v8305_v60 }
 0x638   :  { %v6654_v18 = vadd.f32 %v8307_v7, %v6584_v58 }
 0x63a   :  { %v6724_v9 = vadd.f32 %v14198_v62, %v6654_v18 }
 0x63c   :  { %6728 = vst.msk [vmem:[#allocation4] sm:$0x3] %vm6727_vm6, %v6724_v9 }
 0x63d   :  { %10096 = shalt.err (!%p10093_p4)
}
 0x63e   :  { %s10097_s17 = scalar_lea.hbm %s14324_s7, 32 }
 0x63f   :  { %p10098_p5 = scmp.ne.s32.totalorder %s14324_s7, %s10097_s17  ;;  %p10101_p6 = scmp.lt.u32.totalorder %s10097_s17, %s14324_s7 }
 0x641   :  { %p10103_p7 = pnand %p10101_p6, %p10098_p5 }
 0x643   :  { %10106 = shalt.err (!%p10103_p7)
}
 0x644   :  { %6738 = dma.vmem_to_hbm [thread:$0]  %s6736_s14, 32, %s14324_s7, [#allocation5]  }
 0x645   :  { %10107 = dma.done.wait [#allocation5], 32  }
 0x646   :  { %10108 = vsyncadd [#allocation5], 4294967264 }
 0x647   :  { %6742 = vsyncpa [#allocation5], 1 }

</bundles_post_ra>
